<compile_context>
chip_gen: v7x
topology: tpu7x:2x2x1
jax: 0.10.0
libtpu: 0.0.40
codegen_flags: <defaults>
</compile_context>

<pallas_src>
import functools
import math

import jax
import jax.numpy as jnp
from jax import lax
from jax.experimental import pallas as pl
from jax.experimental.pallas import tpu as pltpu

_ROW_TILE = 256                   # row tile for all (B*T, D) kernels
_LANE = 128                       # lane padding multiple
_EPS = 1e-5                       # torch.nn.LayerNorm default
_VMEM_LIMIT = 48 * 1024 * 1024    # fits v7x (64 MiB/TC); v5e/v6e have headroom


def _round_up(v, m):
    return ((v + m - 1) // m) * m


def _largest_divisor_leq(n, cap):
    c = min(n, cap)
    while n % c:
        c -= 1
    return c


def _pick_channel_groups(g, bsz):
    # smallest divisor cg of g such that cg*bsz rows fill whole sublane groups
    for cg in range(1, g + 1):
        if g % cg == 0 and (cg * bsz) % 8 == 0:
            return cg
    return g


# ----------------------------------------------------------------------------
# In-kernel helpers
# ----------------------------------------------------------------------------
def _ln_rows(x, gamma, beta, d_true, eps):
    # Two-pass LayerNorm over the *true* feature width.  Padded lanes of x are
    # exactly zero, so the mean over the padded width equals the true mean; the
    # centered signal is lane-masked so the variance only sees true lanes and
    # the padded output lanes stay exactly zero (gamma/beta padded lanes are 0).
    dp = x.shape[-1]
    inv_d = 1.0 / float(d_true)
    mean = jnp.sum(x, axis=-1, keepdims=True) * inv_d
    c = x - mean
    if d_true != dp:
        lane = lax.broadcasted_iota(jnp.int32, (1, dp), 1)
        c = jnp.where(lane < d_true, c, 0.0)
    var = jnp.sum(c * c, axis=-1, keepdims=True) * inv_d
    return c * lax.rsqrt(var + eps) * gamma + beta


def _shifted_ln(h, prev_ref, batch):
    # hp[row] = h_global[row - batch] (zero for the very first `batch` rows).
    # prev_ref carries roll(h_prev_tile, batch) so its head rows are exactly the
    # previous tile's tail rows; requires the row grid axis to be sequential
    # ("arbitrary").  Tile 0 sees zeros (scratch is zero-initialized).
    tm = h.shape[0]
    rows = lax.broadcasted_iota(jnp.int32, (tm, 1), 0)
    h_roll = pltpu.roll(h, batch, axis=0)
    hp = jnp.where(rows < batch, prev_ref[...], h_roll)
    prev_ref[...] = h_roll
    return hp


# ----------------------------------------------------------------------------
# Pallas kernels
# ----------------------------------------------------------------------------
def _ln_kernel(x_ref, p_ref, o_ref, *, d_true, eps):
    p = p_ref[...]
    o_ref[...] = _ln_rows(x_ref[...], p[0:1, :], p[1:2, :], d_true, eps)


def _att_kvr_kernel(x_ref, ln_ref, mu_ref, w_ref, k_ref, v_ref, r_ref, prev_ref,
                    *, d_true, batch, eps):
    @pl.when(pl.program_id(0) == 0)
    def _():
        prev_ref[...] = jnp.zeros_like(prev_ref)
    lnp = ln_ref[...]
    h = _ln_rows(x_ref[...], lnp[0:1, :], lnp[1:2, :], d_true, eps)
    hp = _shifted_ln(h, prev_ref, batch)
    mus = mu_ref[...]
    mu_k, mu_v, mu_r = mus[0:1, :], mus[1:2, :], mus[2:3, :]
    xk = h * mu_k + hp * (1.0 - mu_k)
    xv = h * mu_v + hp * (1.0 - mu_v)
    xr = h * mu_r + hp * (1.0 - mu_r)
    wt = w_ref.dtype
    k_ref[...] = jnp.dot(xk.astype(wt), w_ref[0], preferred_element_type=jnp.float32)
    v_ref[...] = jnp.dot(xv.astype(wt), w_ref[1], preferred_element_type=jnp.float32)
    r_ref[...] = jax.nn.sigmoid(
        jnp.dot(xr.astype(wt), w_ref[2], preferred_element_type=jnp.float32)
    ).astype(r_ref.dtype)


def _att_out_kernel(r_ref, wkv_ref, x_ref, w_ref, o_ref):
    # gate prologue (r * wkv, both bf16) + output projection + residual, fused
    gated = (r_ref[...] * wkv_ref[...]).astype(w_ref.dtype)
    o_ref[...] = x_ref[...] + jnp.dot(gated, w_ref[...],
                                      preferred_element_type=jnp.float32)


def _ffn_kr_kernel(x_ref, ln_ref, mu_ref, wk_ref, wr_ref, k_ref, r_ref, prev_ref,
                   *, d_true, batch, eps):
    @pl.when(pl.program_id(0) == 0)
    def _():
        prev_ref[...] = jnp.zeros_like(prev_ref)
    lnp = ln_ref[...]
    h = _ln_rows(x_ref[...], lnp[0:1, :], lnp[1:2, :], d_true, eps)
    hp = _shifted_ln(h, prev_ref, batch)
    mus = mu_ref[...]
    mu_k, mu_r = mus[0:1, :], mus[1:2, :]
    xk = h * mu_k + hp * (1.0 - mu_k)
    xr = h * mu_r + hp * (1.0 - mu_r)
    wt = wk_ref.dtype
    kk = jnp.dot(xk.astype(wt), wk_ref[...], preferred_element_type=jnp.float32)
    k_ref[...] = jnp.square(jnp.maximum(kk, 0.0)).astype(k_ref.dtype)   # relu^2
    r_ref[...] = jax.nn.sigmoid(
        jnp.dot(xr.astype(wt), wr_ref[...], preferred_element_type=jnp.float32)
    ).astype(r_ref.dtype)


def _ffn_out_kernel(k_ref, r_ref, x_ref, w_ref, o_ref):
    # value projection + sigmoid gate epilogue + residual add, fused
    vv = jnp.dot(k_ref[...], w_ref[...], preferred_element_type=jnp.float32)
    o_ref[...] = x_ref[...] + r_ref[...].astype(jnp.float32) * vv


def _wkv_kernel(k_ref, v_ref, w_ref, u_ref, o_ref, aa_ref, bb_ref, pp_ref):
    # grid = (channel_chunks, time_chunks); time-major blocks (tc, rows, 128)
    # where rows = channel_group * B + b (sublane-dense).  The (aa, bb, pp)
    # carry lives in VMEM scratch and is reset at the first time chunk.
    @pl.when(pl.program_id(1) == 0)
    def _():
        aa_ref[...] = jnp.zeros_like(aa_ref)
        bb_ref[...] = jnp.zeros_like(bb_ref)
        pp_ref[...] = jnp.full_like(pp_ref, -1e30)

    t_len = k_ref.shape[0]
    w = w_ref[...]            # (rows, 128)  negative decay (= -exp(time_decay))
    u = u_ref[...]            # (rows, 128)  time_first bonus

    def step(t, carry):
        aa, bb, pp = carry
        kt = k_ref[t]
        vt = v_ref[t]
        # out_t = (e1*aa + e2*vt) / (e1*bb + e2) with p = max(pp, u+kt);
        # one of (e1, e2) is exp(0)=1, so compute a single exp + two selects.
        ww = u + kt
        d = pp - ww
        e = jnp.exp(-jnp.abs(d))
        pos = d >= 0.0
        e1 = jnp.where(pos, 1.0, e)
        e2 = jnp.where(pos, e, 1.0)
        num = e1 * aa + e2 * vt
        den = e1 * bb + e2
        o_ref[t] = (num * pl.reciprocal(den, approx=True)).astype(o_ref.dtype)
        # state update with the same single-exp trick
        ww2 = pp + w
        d2 = ww2 - kt
        f = jnp.exp(-jnp.abs(d2))
        pos2 = d2 >= 0.0
        f1 = jnp.where(pos2, 1.0, f)
        f2 = jnp.where(pos2, f, 1.0)
        return (f1 * aa + f2 * vt, f1 * bb + f2, jnp.maximum(ww2, kt))

    # Unroll the serial recurrence so adjacent timesteps' EUP exp() pushes
    # overlap the VALU select/mul/add work.
    uf = 8 if t_len % 8 == 0 else (4 if t_len % 4 == 0 else 1)

    def body(i, carry):
        for j in range(uf):
            carry = step(i * uf + j, carry)
        return carry

    carry = (aa_ref[...], bb_ref[...], pp_ref[...])
    aa, bb, pp = lax.fori_loop(0, t_len // uf, body, carry)
    aa_ref[...] = aa
    bb_ref[...] = bb
    pp_ref[...] = pp


def _matmul_kernel(x_ref, w_ref, b_ref, o_ref, *, act):
    acc = jnp.dot(x_ref[...], w_ref[...], preferred_element_type=jnp.float32)
    acc = acc + b_ref[...]
    if act == "relu":
        acc = jnp.maximum(acc, 0.0)
    o_ref[...] = acc.astype(o_ref.dtype)


# ----------------------------------------------------------------------------
# pallas_call wrappers
# ----------------------------------------------------------------------------
def _row_spec(d):
    return pl.BlockSpec((_ROW_TILE, d), lambda i: (i, 0))


def _fixed_spec(shape):
    nd = len(shape)
    return pl.BlockSpec(shape, lambda i: (0,) * nd)


def _cparams(*sems):
    return pltpu.CompilerParams(dimension_semantics=sems,
                                vmem_limit_bytes=_VMEM_LIMIT)


def layer_norm(x, ln_params, *, d_true, eps=_EPS):
    mp, dp = x.shape
    return pl.pallas_call(
        functools.partial(_ln_kernel, d_true=d_true, eps=eps),
        out_shape=jax.ShapeDtypeStruct((mp, dp), jnp.float32),
        grid=(mp // _ROW_TILE,),
        in_specs=[_row_spec(dp), _fixed_spec((2, dp))],
        out_specs=_row_spec(dp),
        compiler_params=_cparams("parallel"),
    )(x, ln_params)


def att_kvr(x, ln, mu, w3, *, batch, d_true):
    mp, dp = x.shape
    ap = w3.shape[-1]
    f32 = jax.ShapeDtypeStruct((mp, ap), jnp.float32)
    bf16 = jax.ShapeDtypeStruct((mp, ap), jnp.bfloat16)
    return pl.pallas_call(
        functools.partial(_att_kvr_kernel, d_true=d_true, batch=batch, eps=_EPS),
        out_shape=(f32, f32, bf16),
        grid=(mp // _ROW_TILE,),
        in_specs=[_row_spec(dp), _fixed_spec((2, dp)), _fixed_spec((3, dp)),
                  _fixed_spec((3, dp, ap))],
        out_specs=(_row_spec(ap), _row_spec(ap), _row_spec(ap)),
        scratch_shapes=[pltpu.VMEM((_ROW_TILE, dp), jnp.float32)],
        # "arbitrary": the halo scratch must be carried across tiles in order
        compiler_params=_cparams("arbitrary"),
    )(x, ln, mu, w3)


def att_out(r, wkv_flat, x, wo):
    mp, ap = r.shape
    dp = x.shape[1]
    return pl.pallas_call(
        _att_out_kernel,
        out_shape=jax.ShapeDtypeStruct((mp, dp), jnp.float32),
        grid=(mp // _ROW_TILE,),
        in_specs=[_row_spec(ap), _row_spec(ap), _row_spec(dp),
                  _fixed_spec((ap, dp))],
        out_specs=_row_spec(dp),
        compiler_params=_cparams("parallel"),
    )(r, wkv_flat, x, wo)


def ffn_kr(x, ln, mu, wk, wr, *, batch, d_true):
    mp, dp = x.shape
    lp = wk.shape[1]
    return pl.pallas_call(
        functools.partial(_ffn_kr_kernel, d_true=d_true, batch=batch, eps=_EPS),
        out_shape=(jax.ShapeDtypeStruct((mp, lp), jnp.bfloat16),
                   jax.ShapeDtypeStruct((mp, dp), jnp.bfloat16)),
        grid=(mp // _ROW_TILE,),
        in_specs=[_row_spec(dp), _fixed_spec((2, dp)), _fixed_spec((2, dp)),
                  _fixed_spec((dp, lp)), _fixed_spec((dp, dp))],
        out_specs=(_row_spec(lp), _row_spec(dp)),
        scratch_shapes=[pltpu.VMEM((_ROW_TILE, dp), jnp.float32)],
        compiler_params=_cparams("arbitrary"),
    )(x, ln, mu, wk, wr)


def ffn_out(kk, rr, x, wv):
    mp, lp = kk.shape
    dp = x.shape[1]
    return pl.pallas_call(
        _ffn_out_kernel,
        out_shape=jax.ShapeDtypeStruct((mp, dp), jnp.float32),
        grid=(mp // _ROW_TILE,),
        in_specs=[_row_spec(lp), _row_spec(dp), _row_spec(dp),
                  _fixed_spec((lp, dp))],
        out_specs=_row_spec(dp),
        compiler_params=_cparams("parallel"),
    )(kk, rr, x, wv)


def wkv(k, v, w_neg, u, *, tp, bsz):
    # k, v: (tp*bsz, ap) f32 with rows ordered (t, b).  Re-layout to g-major
    # rows so contiguous channel-group chunks (8+ sublanes) feed the serial
    # recurrence; returns bf16 in the original (tp*bsz, ap) layout.
    mp, ap = k.shape
    g = ap // _LANE
    k3 = k.reshape(tp, bsz, g, _LANE).transpose(0, 2, 1, 3).reshape(tp, g * bsz, _LANE)
    v3 = v.reshape(tp, bsz, g, _LANE).transpose(0, 2, 1, 3).reshape(tp, g * bsz, _LANE)
    w_rows = jnp.repeat(w_neg.reshape(g, _LANE), bsz, axis=0)
    u_rows = jnp.repeat(u.reshape(g, _LANE), bsz, axis=0)

    cg = _pick_channel_groups(g, bsz)
    rows = cg * bsz
    tc = _largest_divisor_leq(tp, 256)

    blk3 = lambda c, t: (t, c, 0)
    blk2 = lambda c, t: (c, 0)
    out = pl.pallas_call(
        _wkv_kernel,
        out_shape=jax.ShapeDtypeStruct((tp, g * bsz, _LANE), jnp.bfloat16),
        grid=(g // cg, tp // tc),
        in_specs=[pl.BlockSpec((tc, rows, _LANE), blk3),
                  pl.BlockSpec((tc, rows, _LANE), blk3),
                  pl.BlockSpec((rows, _LANE), blk2),
                  pl.BlockSpec((rows, _LANE), blk2)],
        out_specs=pl.BlockSpec((tc, rows, _LANE), blk3),
        scratch_shapes=[pltpu.VMEM((rows, _LANE), jnp.float32),
                        pltpu.VMEM((rows, _LANE), jnp.float32),
                        pltpu.VMEM((rows, _LANE), jnp.float32)],
        compiler_params=_cparams("parallel", "arbitrary"),
    )(k3, v3, w_rows, u_rows)
    return out.reshape(tp, g, bsz, _LANE).transpose(0, 2, 1, 3).reshape(mp, ap)


def matmul_bias_act(x, w, b=None, act="none"):
    m, k = x.shape
    n = w.shape[1]
    if b is None:
        b = jnp.zeros((n,), jnp.float32)
    tm = min(_ROW_TILE, _round_up(m, 8))
    mp = _round_up(m, tm)
    if mp != m:
        x = jnp.pad(x, ((0, mp - m), (0, 0)))
    # TODO(synk): for very large embed projections (k*n bf16 > ~16 MiB) tile the
    # N dimension instead of one resident weight block.
    out = pl.pallas_call(
        functools.partial(_matmul_kernel, act=act),
        out_shape=jax.ShapeDtypeStruct((mp, n), jnp.float32),
        grid=(mp // tm,),
        in_specs=[pl.BlockSpec((tm, k), lambda i: (i, 0)),
                  _fixed_spec((k, n)),
                  _fixed_spec((1, n))],
        out_specs=pl.BlockSpec((tm, n), lambda i: (i, 0)),
        compiler_params=_cparams("parallel"),
    )(x.astype(jnp.bfloat16), w.astype(jnp.bfloat16),
      b.reshape(1, n).astype(jnp.float32))
    return out[:m]


# ----------------------------------------------------------------------------
# Conv subsampling (RWKVConvInput): XLA-native conv (per perf review) + Pallas
# bf16 matmul for the output projection.
# ----------------------------------------------------------------------------
def conv2d_relu(x, w, b, stride):
    # x: (B, Cin, H, W); w: (Cout, Cin, kh, kw) (PyTorch layout), pad = (k-1)//2
    kh, kw = w.shape[2], w.shape[3]
    ph, pw = (kh - 1) // 2, (kw - 1) // 2
    y = lax.conv_general_dilated(
        x, w, window_strides=stride, padding=((ph, ph), (pw, pw)),
        dimension_numbers=("NCHW", "OIHW", "NCHW"))
    y = y + b.reshape(1, -1, 1, 1)
    return jnp.maximum(y, 0.0)


def embed_forward(x, p, output_size):
    # x: (B, L, F) -> (B, T, D) with T = ceil(ceil(L/2)/2)
    b = x.shape[0]
    h = x[:, None, :, :]                         # (B, 1, L, F)  NCHW
    h = conv2d_relu(h, p["w1"], p["b1"], (2, 2))
    h = conv2d_relu(h, p["w2"], p["b2"], (2, 2))
    h = conv2d_relu(h, p["w3"], p["b3"], (1, 1))
    _, c, tc, fc = h.shape
    h = h.transpose(0, 2, 1, 3).reshape(b * tc, c * fc)
    h = matmul_bias_act(h.astype(jnp.bfloat16), p["wo"], p["bo"])
    return h.reshape(b, tc, output_size)


# ----------------------------------------------------------------------------
# RWKV block (time-mix attention + channel-mix FFN), eval semantics
# ----------------------------------------------------------------------------
def rwkv_block(x2, p, *, batch, d_true, tp):
    # ---- SelfAttention (time mix): LN + in-kernel shift-mix + K/V/R proj ----
    k, v, r = att_kvr(x2, p["att_ln"], p["att_mu"], p["att_w_kvr"],
                      batch=batch, d_true=d_true)
    wkv_o = wkv(k, v, p["att_w_decay"], p["att_u"], tp=tp, bsz=batch)
    # output projection fused with r*wkv gate and the residual add
    x2 = att_out(r, wkv_o, x2, p["att_wo"])
    # ---- FeedForward (channel mix): LN + shift-mix + relu^2 / sigmoid -------
    kk, rr = ffn_kr(x2, p["ffn_ln"], p["ffn_mu"], p["ffn_wk"], p["ffn_wr"],
                    batch=batch, d_true=d_true)
    x2 = ffn_out(kk, rr, x2, p["ffn_wv"])
    return x2


# ----------------------------------------------------------------------------
# Full encoder forward
# ----------------------------------------------------------------------------
def rwkv_encoder_forward(params, x, x_len, *, output_size, context_size,
                         subsampling_factor=4, time_reduction_factor=1):
    bsz, length, _ = x.shape
    assert length <= context_size * subsampling_factor, (
        "Context size is too short for current length: %d versus %d"
        % (length, context_size * subsampling_factor))
    h = embed_forward(x, params["embed"], output_size)        # (B, T, D)
    t_true = h.shape[1]
    d_true = output_size
    dp = params["embed_norm"].shape[1]
    # olens = number of valid frames after the 2x stride-2 subsampling
    l1 = (x_len - 1) // 2 + 1
    olens = (l1 - 1) // 2 + 1
    # --- pad once: lane-dense feature dim + time padded so B*Tp % tile == 0 ---
    step = max(1, _ROW_TILE // math.gcd(bsz, _ROW_TILE))
    tp = _round_up(max(t_true, 1), step)
    h = jnp.pad(h, ((0, 0), (0, tp - t_true), (0, dp - d_true)))
    # time-major layout: rows ordered (t, b) so the time shift is a `bsz`-row
    # shift and the WKV recurrence needs no per-step transposes
    h2 = h.transpose(1, 0, 2).reshape(tp * bsz, dp)
    h2 = layer_norm(h2, params["embed_norm"], d_true=d_true)
    for blk in params["blocks"]:
        h2 = rwkv_block(h2, blk, batch=bsz, d_true=d_true, tp=tp)
    h2 = layer_norm(h2, params["final_norm"], d_true=d_true)
    out = h2.reshape(tp, bsz, dp).transpose(1, 0, 2)[:, :t_true, :d_true]
    if time_reduction_factor > 1:
        out = out[:, ::time_reduction_factor, :]
        olens = (olens - 1) // time_reduction_factor + 1
    return out, olens.astype(jnp.int32), None


# ----------------------------------------------------------------------------
# Parameter init (synthetic, torch-like layout) + packing into padded tensors
# ----------------------------------------------------------------------------
def _normal(key, shape, scale=0.02):
    return scale * jax.random.normal(key, shape, dtype=jnp.float32)


def init_params(key, input_size, output_size, linear_size, attention_size,
                num_blocks, kernel=3):
    d = output_size
    c1, c2, c3 = d // 4, d // 2, d
    f1 = (input_size + 1) // 2
    f2 = (f1 + 1) // 2
    keys = jax.random.split(key, 8 + num_blocks)
    embed = {
        "w1": _normal(keys[0], (c1, 1, kernel, kernel)),
        "b1": jnp.zeros((c1,), jnp.float32),
        "w2": _normal(keys[1], (c2, c1, kernel, kernel)),
        "b2": jnp.zeros((c2,), jnp.float32),
        "w3": _normal(keys[2], (c3, c2, kernel, kernel)),
        "b3": jnp.zeros((c3,), jnp.float32),
        "wo": _normal(keys[3], (c3 * f2, d)),
        "bo": jnp.zeros((d,), jnp.float32),
    }
    blocks = []
    for bi in range(num_blocks):
        bk = jax.random.split(keys[4 + bi], 8)
        blocks.append({
            "ln_att_g": jnp.ones((d,), jnp.float32),
            "ln_att_b": jnp.zeros((d,), jnp.float32),
            "ln_ffn_g": jnp.ones((d,), jnp.float32),
            "ln_ffn_b": jnp.zeros((d,), jnp.float32),
            "att_time_decay": jnp.linspace(-5.0 + bi, 1.0 + bi, attention_size,
                                           dtype=jnp.float32),
            "att_time_first": 0.5 * jnp.ones((attention_size,), jnp.float32),
            "att_mu_k": jnp.linspace(0.1, 0.9, d, dtype=jnp.float32),
            "att_mu_v": jnp.linspace(0.2, 0.8, d, dtype=jnp.float32),
            "att_mu_r": jnp.linspace(0.3, 0.7, d, dtype=jnp.float32),
            "att_wk": _normal(bk[0], (d, attention_size)),
            "att_wv": _normal(bk[1], (d, attention_size)),
            "att_wr": _normal(bk[2], (d, attention_size)),
            "att_wo": _normal(bk[3], (attention_size, d)),
            "ffn_mu_k": jnp.linspace(0.15, 0.85, d, dtype=jnp.float32),
            "ffn_mu_r": jnp.linspace(0.25, 0.75, d, dtype=jnp.float32),
            "ffn_wk": _normal(bk[4], (d, linear_size)),
            "ffn_wv": _normal(bk[5], (linear_size, d)),
            "ffn_wr": _normal(bk[6], (d, d)),
        })
    return {
        "embed": embed,
        "blocks": blocks,
        "embed_norm_g": jnp.ones((d,), jnp.float32),
        "embed_norm_b": jnp.zeros((d,), jnp.float32),
        "final_norm_g": jnp.ones((d,), jnp.float32),
        "final_norm_b": jnp.zeros((d,), jnp.float32),
    }


def prepare_params(raw):
    # Pad every feature dim to a multiple of 128 (zero padding keeps padded
    # lanes exactly zero through the whole network) and pack weights as bf16.
    d = raw["embed_norm_g"].shape[0]
    a = raw["blocks"][0]["att_wk"].shape[1]
    lsz = raw["blocks"][0]["ffn_wk"].shape[1]
    dp = _round_up(d, _LANE)
    ap = _round_up(a, _LANE)
    lp = _round_up(lsz, _LANE)

    def pw(w, rp, cp):
        r, c = w.shape
        return jnp.pad(w, ((0, rp - r), (0, cp - c))).astype(jnp.bfloat16)

    def pv(v, n):
        return jnp.pad(v, (0, n - v.shape[0])).astype(jnp.float32)

    blocks = []
    for blk in raw["blocks"]:
        blocks.append({
            "att_ln": jnp.stack([pv(blk["ln_att_g"], dp), pv(blk["ln_att_b"], dp)]),
            "att_mu": jnp.stack([pv(blk["att_mu_k"], dp), pv(blk["att_mu_v"], dp),
                                 pv(blk["att_mu_r"], dp)]),
            "att_w_kvr": jnp.stack([pw(blk["att_wk"], dp, ap),
                                    pw(blk["att_wv"], dp, ap),
                                    pw(blk["att_wr"], dp, ap)]),
            "att_wo": pw(blk["att_wo"], ap, dp),
            "att_w_decay": (-jnp.exp(pv(blk["att_time_decay"], ap))).reshape(1, ap),
            "att_u": pv(blk["att_time_first"], ap).reshape(1, ap),
            "ffn_ln": jnp.stack([pv(blk["ln_ffn_g"], dp), pv(blk["ln_ffn_b"], dp)]),
            "ffn_mu": jnp.stack([pv(blk["ffn_mu_k"], dp), pv(blk["ffn_mu_r"], dp)]),
            "ffn_wk": pw(blk["ffn_wk"], dp, lp),
            "ffn_wr": pw(blk["ffn_wr"], dp, dp),
            "ffn_wv": pw(blk["ffn_wv"], lp, dp),
        })
    return {
        "embed": raw["embed"],
        "blocks": blocks,
        "embed_norm": jnp.stack([pv(raw["embed_norm_g"], dp),
                                 pv(raw["embed_norm_b"], dp)]),
        "final_norm": jnp.stack([pv(raw["final_norm_g"], dp),
                                 pv(raw["final_norm_b"], dp)]),
    }


if __name__ == "__main__":
    B, L, F = 2, 16, 16          # batch, frames, input feature size
    D = 32                       # output_size
    num_blocks = 2
    linear_size = 4 * D
    attention_size = D
    context_size = 64

    key = jax.random.PRNGKey(0)
    pkey, xkey = jax.random.split(key)
    raw_params = init_params(pkey, F, D, linear_size, attention_size, num_blocks)
    params = prepare_params(raw_params)
    x = jax.random.normal(xkey, (B, L, F), dtype=jnp.float32)
    x_len = jnp.array([L, L - 4], dtype=jnp.int32)

    fwd = jax.jit(functools.partial(
        rwkv_encoder_forward, output_size=D, context_size=context_size,
        subsampling_factor=4, time_reduction_factor=1))
    out, olens, _ = fwd(params, x, x_len)
    jax.block_until_ready(out)

    assert out.shape == (B, L // 4, D), out.shape
    assert olens.shape == (B,)
    assert bool(jnp.all(jnp.isfinite(out)))
    print("KERNEL_OK")
</pallas_src>

<mosaic_0001>
module attributes {stable_mosaic.version = 11 : i64} {
  func.func @_matmul_kernel(%arg0: i32, %arg1: memref<8x128xbf16, #tpu.memory_space<vmem>>, %arg2: memref<128x32xbf16, #tpu.memory_space<vmem>>, %arg3: memref<1x32xf32, #tpu.memory_space<vmem>>, %arg4: memref<8x32xf32, #tpu.memory_space<vmem>>) attributes {dimension_semantics = [#tpu.dimension_semantics<parallel>], iteration_bounds = array<i64: 1>, scalar_prefetch = 0 : i64, scratch_operands = 0 : i64, tpu.core_type = #tpu.core_type<tc>, window_params = [{transform_indices = @transform_0, window_bounds = array<i64: 8, 128>}, {pipeline_mode = #tpu.pipeline_mode<synchronous>, transform_indices = @transform_1, window_bounds = array<i64: 128, 32>}, {pipeline_mode = #tpu.pipeline_mode<synchronous>, transform_indices = @transform_2, window_bounds = array<i64: 1, 32>}, {transform_indices = @transform_3, window_bounds = array<i64: 8, 32>}]} {
    %c0 = arith.constant 0 : index
    %c0_0 = arith.constant 0 : index
    %0 = vector.load %arg1[%c0, %c0_0] : memref<8x128xbf16, #tpu.memory_space<vmem>>, vector<8x128xbf16>
    %c0_1 = arith.constant 0 : index
    %c0_2 = arith.constant 0 : index
    %1 = vector.load %arg2[%c0_1, %c0_2] : memref<128x32xbf16, #tpu.memory_space<vmem>>, vector<128x32xbf16>
    %cst = arith.constant dense<0.000000e+00> : vector<8x32xf32>
    %2 = tpu.matmul %0, %1, %cst {dimension_numbers = #tpu.dot_dimension_numbers<[1], [0], [0], [1], [0, 0, 1, 1], [], []>} : vector<8x128xbf16>, vector<128x32xbf16>, vector<8x32xf32> -> vector<8x32xf32>
    %c0_3 = arith.constant 0 : index
    %c0_4 = arith.constant 0 : index
    %3 = vector.load %arg3[%c0_3, %c0_4] : memref<1x32xf32, #tpu.memory_space<vmem>>, vector<1x32xf32>
    %4 = vector.broadcast %3 : vector<1x32xf32> to vector<8x32xf32>
    %5 = arith.addf %2, %4 : vector<8x32xf32>
    %c0_5 = arith.constant 0 : index
    %c0_6 = arith.constant 0 : index
    %6 = vector.load %arg4[%c0_5, %c0_6] : memref<8x32xf32, #tpu.memory_space<vmem>>, vector<8x32xf32>
    tpu.vector_store %arg4[%c0_5, %c0_6], %5 {strides = array<i32>} : memref<8x32xf32, #tpu.memory_space<vmem>>, vector<8x32xf32>,
    return
  }
  func.func @transform_0(%arg0: i32) -> (i32, i32) {
    %c0_i32 = arith.constant 0 : i32
    %c0_i32_0 = arith.constant 0 : i32
    return %arg0, %c0_i32 : i32, i32
  }
  func.func @transform_1(%arg0: i32) -> (i32, i32) {
    %c0_i32 = arith.constant 0 : i32
    %c0_i32_0 = arith.constant 0 : i32
    %c0_i32_1 = arith.constant 0 : i32
    return %c0_i32, %c0_i32_0 : i32, i32
  }
  func.func @transform_2(%arg0: i32) -> (i32, i32) {
    %c0_i32 = arith.constant 0 : i32
    %c0_i32_0 = arith.constant 0 : i32
    %c0_i32_1 = arith.constant 0 : i32
    return %c0_i32, %c0_i32_0 : i32, i32
  }
  func.func @transform_3(%arg0: i32) -> (i32, i32) {
    %c0_i32 = arith.constant 0 : i32
    %c0_i32_0 = arith.constant 0 : i32
    return %arg0, %c0_i32 : i32, i32
  }
}

module attributes {stable_mosaic.version = 11 : i64} {
  func.func @_ln_kernel(%arg0: i32, %arg1: memref<256x128xf32, #tpu.memory_space<vmem>>, %arg2: memref<2x128xf32, #tpu.memory_space<vmem>>, %arg3: memref<256x128xf32, #tpu.memory_space<vmem>>) attributes {dimension_semantics = [#tpu.dimension_semantics<parallel>], iteration_bounds = array<i64: 1>, scalar_prefetch = 0 : i64, scratch_operands = 0 : i64, tpu.core_type = #tpu.core_type<tc>, window_params = [{transform_indices = @transform_0, window_bounds = array<i64: 256, 128>}, {pipeline_mode = #tpu.pipeline_mode<synchronous>, transform_indices = @transform_1, window_bounds = array<i64: 2, 128>}, {transform_indices = @transform_2, window_bounds = array<i64: 256, 128>}]} {
    %c0 = arith.constant 0 : index
    %c0_0 = arith.constant 0 : index
    %0 = vector.load %arg2[%c0, %c0_0] : memref<2x128xf32, #tpu.memory_space<vmem>>, vector<2x128xf32>
    %c0_1 = arith.constant 0 : index
    %c0_2 = arith.constant 0 : index
    %1 = vector.load %arg1[%c0_1, %c0_2] : memref<256x128xf32, #tpu.memory_space<vmem>>, vector<256x128xf32>
    %2 = vector.extract_strided_slice %0 {offsets = [0, 0], sizes = [1, 128], strides = [1, 1]} : vector<2x128xf32> to vector<1x128xf32>
    %3 = vector.extract_strided_slice %0 {offsets = [1, 0], sizes = [1, 128], strides = [1, 1]} : vector<2x128xf32> to vector<1x128xf32>
    %cst = arith.constant dense<0.000000e+00> : vector<256xf32>
    %4 = vector.multi_reduction <add>, %1, %cst [1] : vector<256x128xf32> to vector<256xf32>
    %5 = vector.shape_cast %4 : vector<256xf32> to vector<256x1xf32>
    %cst_3 = arith.constant 3.125000e-02 : f32
    %6 = vector.broadcast %cst_3 : f32 to vector<256x1xf32>
    %7 = arith.mulf %5, %6 : vector<256x1xf32>
    %8 = vector.broadcast %7 : vector<256x1xf32> to vector<256x128xf32>
    %9 = arith.subf %1, %8 : vector<256x128xf32>
    %10 = tpu.iota {dimensions = array<i32: 1>} : vector<1x128xi32>
    %c32_i32 = arith.constant 32 : i32
    %11 = vector.broadcast %c32_i32 : i32 to vector<1x128xi32>
    %12 = arith.cmpi slt, %10, %11 : vector<1x128xi32>
    %cst_4 = arith.constant 0.000000e+00 : f32
    %13 = vector.shape_cast %12 : vector<1x128xi1> to vector<1x128xi1>
    %14 = vector.broadcast %13 : vector<1x128xi1> to vector<256x128xi1>
    %15 = vector.broadcast %cst_4 : f32 to vector<256x128xf32>
    %16 = arith.select %14, %9, %15 : vector<256x128xi1>, vector<256x128xf32>
    %17 = arith.mulf %16, %16 : vector<256x128xf32>
    %cst_5 = arith.constant dense<0.000000e+00> : vector<256xf32>
    %18 = vector.multi_reduction <add>, %17, %cst_5 [1] : vector<256x128xf32> to vector<256xf32>
    %19 = vector.shape_cast %18 : vector<256xf32> to vector<256x1xf32>
    %cst_6 = arith.constant 3.125000e-02 : f32
    %20 = vector.broadcast %cst_6 : f32 to vector<256x1xf32>
    %21 = arith.mulf %19, %20 : vector<256x1xf32>
    %cst_7 = arith.constant 9.99999974E-6 : f32
    %22 = vector.broadcast %cst_7 : f32 to vector<256x1xf32>
    %23 = arith.addf %21, %22 : vector<256x1xf32>
    %24 = math.rsqrt %23 : vector<256x1xf32>
    %25 = vector.broadcast %24 : vector<256x1xf32> to vector<256x128xf32>
    %26 = arith.mulf %16, %25 : vector<256x128xf32>
    %27 = vector.broadcast %2 : vector<1x128xf32> to vector<256x128xf32>
    %28 = arith.mulf %26, %27 : vector<256x128xf32>
    %29 = vector.broadcast %3 : vector<1x128xf32> to vector<256x128xf32>
    %30 = arith.addf %28, %29 : vector<256x128xf32>
    %c0_8 = arith.constant 0 : index
    %c0_9 = arith.constant 0 : index
    %31 = vector.load %arg3[%c0_8, %c0_9] : memref<256x128xf32, #tpu.memory_space<vmem>>, vector<256x128xf32>
    tpu.vector_store %arg3[%c0_8, %c0_9], %30 {strides = array<i32>} : memref<256x128xf32, #tpu.memory_space<vmem>>, vector<256x128xf32>,
    return
  }
  func.func @transform_0(%arg0: i32) -> (i32, i32) {
    %c0_i32 = arith.constant 0 : i32
    %c0_i32_0 = arith.constant 0 : i32
    return %arg0, %c0_i32 : i32, i32
  }
  func.func @transform_1(%arg0: i32) -> (i32, i32) {
    %c0_i32 = arith.constant 0 : i32
    %c0_i32_0 = arith.constant 0 : i32
    %c0_i32_1 = arith.constant 0 : i32
    return %c0_i32, %c0_i32_0 : i32, i32
  }
  func.func @transform_2(%arg0: i32) -> (i32, i32) {
    %c0_i32 = arith.constant 0 : i32
    %c0_i32_0 = arith.constant 0 : i32
    return %arg0, %c0_i32 : i32, i32
  }
}

module attributes {stable_mosaic.version = 11 : i64} {
  func.func @_att_kvr_kernel(%arg0: i32, %arg1: memref<256x128xf32, #tpu.memory_space<vmem>>, %arg2: memref<2x128xf32, #tpu.memory_space<vmem>>, %arg3: memref<3x128xf32, #tpu.memory_space<vmem>>, %arg4: memref<3x128x128xbf16, #tpu.memory_space<vmem>>, %arg5: memref<256x128xf32, #tpu.memory_space<vmem>>, %arg6: memref<256x128xf32, #tpu.memory_space<vmem>>, %arg7: memref<256x128xbf16, #tpu.memory_space<vmem>>, %arg8: memref<256x128xf32, #tpu.memory_space<vmem>>) attributes {dimension_semantics = [#tpu.dimension_semantics<arbitrary>], iteration_bounds = array<i64: 1>, scalar_prefetch = 0 : i64, scratch_operands = 1 : i64, tpu.core_type = #tpu.core_type<tc>, window_params = [{transform_indices = @transform_0, window_bounds = array<i64: 256, 128>}, {pipeline_mode = #tpu.pipeline_mode<synchronous>, transform_indices = @transform_1, window_bounds = array<i64: 2, 128>}, {pipeline_mode = #tpu.pipeline_mode<synchronous>, transform_indices = @transform_2, window_bounds = array<i64: 3, 128>}, {pipeline_mode = #tpu.pipeline_mode<synchronous>, transform_indices = @transform_3, window_bounds = array<i64: 3, 128, 128>}, {transform_indices = @transform_4, window_bounds = array<i64: 256, 128>}, {transform_indices = @transform_5, window_bounds = array<i64: 256, 128>}, {transform_indices = @transform_6, window_bounds = array<i64: 256, 128>}]} {
    %c0_i32 = arith.constant 0 : i32
    %0 = arith.cmpi eq, %arg0, %c0_i32 : i32
    %1 = arith.extui %0 : i1 to i32
    %c0_i32_0 = arith.constant 0 : i32
    %2 = arith.cmpi ne, %1, %c0_i32_0 : i32
    scf.if %2 {
      %cst_36 = arith.constant 0.000000e+00 : f32
      %89 = vector.broadcast %cst_36 : f32 to vector<256x128xf32>
      %c0_37 = arith.constant 0 : index
      %c0_38 = arith.constant 0 : index
      %90 = vector.load %arg8[%c0_37, %c0_38] : memref<256x128xf32, #tpu.memory_space<vmem>>, vector<256x128xf32>
      tpu.vector_store %arg8[%c0_37, %c0_38], %89 {strides = array<i32>} : memref<256x128xf32, #tpu.memory_space<vmem>>, vector<256x128xf32>,
    } else {
    }
    %c0 = arith.constant 0 : index
    %c0_1 = arith.constant 0 : index
    %3 = vector.load %arg2[%c0, %c0_1] : memref<2x128xf32, #tpu.memory_space<vmem>>, vector<2x128xf32>
    %c0_2 = arith.constant 0 : index
    %c0_3 = arith.constant 0 : index
    %4 = vector.load %arg1[%c0_2, %c0_3] : memref<256x128xf32, #tpu.memory_space<vmem>>, vector<256x128xf32>
    %5 = vector.extract_strided_slice %3 {offsets = [0, 0], sizes = [1, 128], strides = [1, 1]} : vector<2x128xf32> to vector<1x128xf32>
    %6 = vector.extract_strided_slice %3 {offsets = [1, 0], sizes = [1, 128], strides = [1, 1]} : vector<2x128xf32> to vector<1x128xf32>
    %cst = arith.constant dense<0.000000e+00> : vector<256xf32>
    %7 = vector.multi_reduction <add>, %4, %cst [1] : vector<256x128xf32> to vector<256xf32>
    %8 = vector.shape_cast %7 : vector<256xf32> to vector<256x1xf32>
    %cst_4 = arith.constant 3.125000e-02 : f32
    %9 = vector.broadcast %cst_4 : f32 to vector<256x1xf32>
    %10 = arith.mulf %8, %9 : vector<256x1xf32>
    %11 = vector.broadcast %10 : vector<256x1xf32> to vector<256x128xf32>
    %12 = arith.subf %4, %11 : vector<256x128xf32>
    %13 = tpu.iota {dimensions = array<i32: 1>} : vector<1x128xi32>
    %c32_i32 = arith.constant 32 : i32
    %14 = vector.broadcast %c32_i32 : i32 to vector<1x128xi32>
    %15 = arith.cmpi slt, %13, %14 : vector<1x128xi32>
    %cst_5 = arith.constant 0.000000e+00 : f32
    %16 = vector.shape_cast %15 : vector<1x128xi1> to vector<1x128xi1>
    %17 = vector.broadcast %16 : vector<1x128xi1> to vector<256x128xi1>
    %18 = vector.broadcast %cst_5 : f32 to vector<256x128xf32>
    %19 = arith.select %17, %12, %18 : vector<256x128xi1>, vector<256x128xf32>
    %20 = arith.mulf %19, %19 : vector<256x128xf32>
    %cst_6 = arith.constant dense<0.000000e+00> : vector<256xf32>
    %21 = vector.multi_reduction <add>, %20, %cst_6 [1] : vector<256x128xf32> to vector<256xf32>
    %22 = vector.shape_cast %21 : vector<256xf32> to vector<256x1xf32>
    %cst_7 = arith.constant 3.125000e-02 : f32
    %23 = vector.broadcast %cst_7 : f32 to vector<256x1xf32>
    %24 = arith.mulf %22, %23 : vector<256x1xf32>
    %cst_8 = arith.constant 9.99999974E-6 : f32
    %25 = vector.broadcast %cst_8 : f32 to vector<256x1xf32>
    %26 = arith.addf %24, %25 : vector<256x1xf32>
    %27 = math.rsqrt %26 : vector<256x1xf32>
    %28 = vector.broadcast %27 : vector<256x1xf32> to vector<256x128xf32>
    %29 = arith.mulf %19, %28 : vector<256x128xf32>
    %30 = vector.broadcast %5 : vector<1x128xf32> to vector<256x128xf32>
    %31 = arith.mulf %29, %30 : vector<256x128xf32>
    %32 = vector.broadcast %6 : vector<1x128xf32> to vector<256x128xf32>
    %33 = arith.addf %31, %32 : vector<256x128xf32>
    %34 = tpu.iota {dimensions = array<i32: 0>} : vector<256x1xi32>
    %c2_i32 = arith.constant 2 : i32
    %35 = tpu.dynamic_rotate %33 by %c2_i32 dim 0 : vector<256x128xf32>, i32 -> vector<256x128xf32>
    %c2_i32_9 = arith.constant 2 : i32
    %36 = vector.broadcast %c2_i32_9 : i32 to vector<256x1xi32>
    %37 = arith.cmpi slt, %34, %36 : vector<256x1xi32>
    %c0_10 = arith.constant 0 : index
    %c0_11 = arith.constant 0 : index
    %38 = vector.load %arg8[%c0_10, %c0_11] : memref<256x128xf32, #tpu.memory_space<vmem>>, vector<256x128xf32>
    %39 = vector.shape_cast %37 : vector<256x1xi1> to vector<256x1xi1>
    %40 = vector.broadcast %39 : vector<256x1xi1> to vector<256x128xi1>
    %41 = arith.select %40, %38, %35 : vector<256x128xi1>, vector<256x128xf32>
    %c0_12 = arith.constant 0 : index
    %c0_13 = arith.constant 0 : index
    %42 = vector.load %arg8[%c0_12, %c0_13] : memref<256x128xf32, #tpu.memory_space<vmem>>, vector<256x128xf32>
    tpu.vector_store %arg8[%c0_12, %c0_13], %35 {strides = array<i32>} : memref<256x128xf32, #tpu.memory_space<vmem>>, vector<256x128xf32>,
    %c0_14 = arith.constant 0 : index
    %c0_15 = arith.constant 0 : index
    %43 = vector.load %arg3[%c0_14, %c0_15] : memref<3x128xf32, #tpu.memory_space<vmem>>, vector<3x128xf32>
    %44 = vector.extract_strided_slice %43 {offsets = [0, 0], sizes = [1, 128], strides = [1, 1]} : vector<3x128xf32> to vector<1x128xf32>
    %45 = vector.extract_strided_slice %43 {offsets = [1, 0], sizes = [1, 128], strides = [1, 1]} : vector<3x128xf32> to vector<1x128xf32>
    %46 = vector.extract_strided_slice %43 {offsets = [2, 0], sizes = [1, 128], strides = [1, 1]} : vector<3x128xf32> to vector<1x128xf32>
    %47 = vector.broadcast %44 : vector<1x128xf32> to vector<256x128xf32>
    %48 = arith.mulf %33, %47 : vector<256x128xf32>
    %cst_16 = arith.constant 1.000000e+00 : f32
    %49 = vector.broadcast %cst_16 : f32 to vector<1x128xf32>
    %50 = arith.subf %49, %44 : vector<1x128xf32>
    %51 = vector.broadcast %50 : vector<1x128xf32> to vector<256x128xf32>
    %52 = arith.mulf %41, %51 : vector<256x128xf32>
    %53 = arith.addf %48, %52 : vector<256x128xf32>
    %54 = vector.broadcast %45 : vector<1x128xf32> to vector<256x128xf32>
    %55 = arith.mulf %33, %54 : vector<256x128xf32>
    %cst_17 = arith.constant 1.000000e+00 : f32
    %56 = vector.broadcast %cst_17 : f32 to vector<1x128xf32>
    %57 = arith.subf %56, %45 : vector<1x128xf32>
    %58 = vector.broadcast %57 : vector<1x128xf32> to vector<256x128xf32>
    %59 = arith.mulf %41, %58 : vector<256x128xf32>
    %60 = arith.addf %55, %59 : vector<256x128xf32>
    %61 = vector.broadcast %46 : vector<1x128xf32> to vector<256x128xf32>
    %62 = arith.mulf %33, %61 : vector<256x128xf32>
    %cst_18 = arith.constant 1.000000e+00 : f32
    %63 = vector.broadcast %cst_18 : f32 to vector<1x128xf32>
    %64 = arith.subf %63, %46 : vector<1x128xf32>
    %65 = vector.broadcast %64 : vector<1x128xf32> to vector<256x128xf32>
    %66 = arith.mulf %41, %65 : vector<256x128xf32>
    %67 = arith.addf %62, %66 : vector<256x128xf32>
    %68 = arith.truncf %53 : vector<256x128xf32> to vector<256x128xbf16>
    %c0_19 = arith.constant 0 : index
    %c0_20 = arith.constant 0 : index
    %c0_21 = arith.constant 0 : index
    %69 = vector.load %arg4[%c0_19, %c0_20, %c0_21] : memref<3x128x128xbf16, #tpu.memory_space<vmem>>, vector<1x128x128xbf16>
    %70 = vector.shape_cast %69 : vector<1x128x128xbf16> to vector<128x128xbf16>
    %cst_22 = arith.constant dense<0.000000e+00> : vector<256x128xf32>
    %71 = tpu.matmul %68, %70, %cst_22 {dimension_numbers = #tpu.dot_dimension_numbers<[1], [0], [0], [1], [0, 0, 1, 1], [], []>} : vector<256x128xbf16>, vector<128x128xbf16>, vector<256x128xf32> -> vector<256x128xf32>
    %c0_23 = arith.constant 0 : index
    %c0_24 = arith.constant 0 : index
    %72 = vector.load %arg5[%c0_23, %c0_24] : memref<256x128xf32, #tpu.memory_space<vmem>>, vector<256x128xf32>
    tpu.vector_store %arg5[%c0_23, %c0_24], %71 {strides = array<i32>} : memref<256x128xf32, #tpu.memory_space<vmem>>, vector<256x128xf32>,
    %73 = arith.truncf %60 : vector<256x128xf32> to vector<256x128xbf16>
    %c1 = arith.constant 1 : index
    %c0_25 = arith.constant 0 : index
    %c0_26 = arith.constant 0 : index
    %74 = vector.load %arg4[%c1, %c0_25, %c0_26] : memref<3x128x128xbf16, #tpu.memory_space<vmem>>, vector<1x128x128xbf16>
    %75 = vector.shape_cast %74 : vector<1x128x128xbf16> to vector<128x128xbf16>
    %cst_27 = arith.constant dense<0.000000e+00> : vector<256x128xf32>
    %76 = tpu.matmul %73, %75, %cst_27 {dimension_numbers = #tpu.dot_dimension_numbers<[1], [0], [0], [1], [0, 0, 1, 1], [], []>} : vector<256x128xbf16>, vector<128x128xbf16>, vector<256x128xf32> -> vector<256x128xf32>
    %c0_28 = arith.constant 0 : index
    %c0_29 = arith.constant 0 : index
    %77 = vector.load %arg6[%c0_28, %c0_29] : memref<256x128xf32, #tpu.memory_space<vmem>>, vector<256x128xf32>
    tpu.vector_store %arg6[%c0_28, %c0_29], %76 {strides = array<i32>} : memref<256x128xf32, #tpu.memory_space<vmem>>, vector<256x128xf32>,
    %78 = arith.truncf %67 : vector<256x128xf32> to vector<256x128xbf16>
    %c2 = arith.constant 2 : index
    %c0_30 = arith.constant 0 : index
    %c0_31 = arith.constant 0 : index
    %79 = vector.load %arg4[%c2, %c0_30, %c0_31] : memref<3x128x128xbf16, #tpu.memory_space<vmem>>, vector<1x128x128xbf16>
    %80 = vector.shape_cast %79 : vector<1x128x128xbf16> to vector<128x128xbf16>
    %cst_32 = arith.constant dense<0.000000e+00> : vector<256x128xf32>
    %81 = tpu.matmul %78, %80, %cst_32 {dimension_numbers = #tpu.dot_dimension_numbers<[1], [0], [0], [1], [0, 0, 1, 1], [], []>} : vector<256x128xbf16>, vector<128x128xbf16>, vector<256x128xf32> -> vector<256x128xf32>
    %82 = arith.negf %81 : vector<256x128xf32>
    %83 = math.exp %82 : vector<256x128xf32>
    %cst_33 = arith.constant 1.000000e+00 : f32
    %84 = vector.broadcast %cst_33 : f32 to vector<256x128xf32>
    %85 = arith.addf %84, %83 : vector<256x128xf32>
    %86 = arith.divf %84, %85 : vector<256x128xf32>
    %87 = arith.truncf %86 : vector<256x128xf32> to vector<256x128xbf16>
    %c0_34 = arith.constant 0 : index
    %c0_35 = arith.constant 0 : index
    %88 = vector.load %arg7[%c0_34, %c0_35] : memref<256x128xbf16, #tpu.memory_space<vmem>>, vector<256x128xbf16>
    tpu.vector_store %arg7[%c0_34, %c0_35], %87 {strides = array<i32>} : memref<256x128xbf16, #tpu.memory_space<vmem>>, vector<256x128xbf16>,
    return
  }
  func.func @transform_0(%arg0: i32) -> (i32, i32) {
    %c0_i32 = arith.constant 0 : i32
    %c0_i32_0 = arith.constant 0 : i32
    return %arg0, %c0_i32 : i32, i32
  }
  func.func @transform_1(%arg0: i32) -> (i32, i32) {
    %c0_i32 = arith.constant 0 : i32
    %c0_i32_0 = arith.constant 0 : i32
    %c0_i32_1 = arith.constant 0 : i32
    return %c0_i32, %c0_i32_0 : i32, i32
  }
  func.func @transform_2(%arg0: i32) -> (i32, i32) {
    %c0_i32 = arith.constant 0 : i32
    %c0_i32_0 = arith.constant 0 : i32
    %c0_i32_1 = arith.constant 0 : i32
    return %c0_i32, %c0_i32_0 : i32, i32
  }
  func.func @transform_3(%arg0: i32) -> (i32, i32, i32) {
    %c0_i32 = arith.constant 0 : i32
    %c0_i32_0 = arith.constant 0 : i32
    %c0_i32_1 = arith.constant 0 : i32
    %c0_i32_2 = arith.constant 0 : i32
    return %c0_i32, %c0_i32_0, %c0_i32_1 : i32, i32, i32
  }
  func.func @transform_4(%arg0: i32) -> (i32, i32) {
    %c0_i32 = arith.constant 0 : i32
    %c0_i32_0 = arith.constant 0 : i32
    return %arg0, %c0_i32 : i32, i32
  }
  func.func @transform_5(%arg0: i32) -> (i32, i32) {
    %c0_i32 = arith.constant 0 : i32
    %c0_i32_0 = arith.constant 0 : i32
    return %arg0, %c0_i32 : i32, i32
  }
  func.func @transform_6(%arg0: i32) -> (i32, i32) {
    %c0_i32 = arith.constant 0 : i32
    %c0_i32_0 = arith.constant 0 : i32
    return %arg0, %c0_i32 : i32, i32
  }
}

module attributes {stable_mosaic.version = 11 : i64} {
  func.func @_att_out_kernel(%arg0: i32, %arg1: memref<256x128xbf16, #tpu.memory_space<vmem>>, %arg2: memref<256x128xbf16, #tpu.memory_space<vmem>>, %arg3: memref<256x128xf32, #tpu.memory_space<vmem>>, %arg4: memref<128x128xbf16, #tpu.memory_space<vmem>>, %arg5: memref<256x128xf32, #tpu.memory_space<vmem>>) attributes {dimension_semantics = [#tpu.dimension_semantics<parallel>], iteration_bounds = array<i64: 1>, scalar_prefetch = 0 : i64, scratch_operands = 0 : i64, tpu.core_type = #tpu.core_type<tc>, window_params = [{transform_indices = @transform_0, window_bounds = array<i64: 256, 128>}, {transform_indices = @transform_1, window_bounds = array<i64: 256, 128>}, {transform_indices = @transform_2, window_bounds = array<i64: 256, 128>}, {pipeline_mode = #tpu.pipeline_mode<synchronous>, transform_indices = @transform_3, window_bounds = array<i64: 128, 128>}, {transform_indices = @transform_4, window_bounds = array<i64: 256, 128>}]} {
    %c0 = arith.constant 0 : index
    %c0_0 = arith.constant 0 : index
    %0 = vector.load %arg1[%c0, %c0_0] : memref<256x128xbf16, #tpu.memory_space<vmem>>, vector<256x128xbf16>
    %c0_1 = arith.constant 0 : index
    %c0_2 = arith.constant 0 : index
    %1 = vector.load %arg2[%c0_1, %c0_2] : memref<256x128xbf16, #tpu.memory_space<vmem>>, vector<256x128xbf16>
    %2 = arith.mulf %0, %1 : vector<256x128xbf16>
    %c0_3 = arith.constant 0 : index
    %c0_4 = arith.constant 0 : index
    %3 = vector.load %arg3[%c0_3, %c0_4] : memref<256x128xf32, #tpu.memory_space<vmem>>, vector<256x128xf32>
    %c0_5 = arith.constant 0 : index
    %c0_6 = arith.constant 0 : index
    %4 = vector.load %arg4[%c0_5, %c0_6] : memref<128x128xbf16, #tpu.memory_space<vmem>>, vector<128x128xbf16>
    %cst = arith.constant dense<0.000000e+00> : vector<256x128xf32>
    %5 = tpu.matmul %2, %4, %cst {dimension_numbers = #tpu.dot_dimension_numbers<[1], [0], [0], [1], [0, 0, 1, 1], [], []>} : vector<256x128xbf16>, vector<128x128xbf16>, vector<256x128xf32> -> vector<256x128xf32>
    %6 = arith.addf %3, %5 : vector<256x128xf32>
    %c0_7 = arith.constant 0 : index
    %c0_8 = arith.constant 0 : index
    %7 = vector.load %arg5[%c0_7, %c0_8] : memref<256x128xf32, #tpu.memory_space<vmem>>, vector<256x128xf32>
    tpu.vector_store %arg5[%c0_7, %c0_8], %6 {strides = array<i32>} : memref<256x128xf32, #tpu.memory_space<vmem>>, vector<256x128xf32>,
    return
  }
  func.func @transform_0(%arg0: i32) -> (i32, i32) {
    %c0_i32 = arith.constant 0 : i32
    %c0_i32_0 = arith.constant 0 : i32
    return %arg0, %c0_i32 : i32, i32
  }
  func.func @transform_1(%arg0: i32) -> (i32, i32) {
    %c0_i32 = arith.constant 0 : i32
    %c0_i32_0 = arith.constant 0 : i32
    return %arg0, %c0_i32 : i32, i32
  }
  func.func @transform_2(%arg0: i32) -> (i32, i32) {
    %c0_i32 = arith.constant 0 : i32
    %c0_i32_0 = arith.constant 0 : i32
    return %arg0, %c0_i32 : i32, i32
  }
  func.func @transform_3(%arg0: i32) -> (i32, i32) {
    %c0_i32 = arith.constant 0 : i32
    %c0_i32_0 = arith.constant 0 : i32
    %c0_i32_1 = arith.constant 0 : i32
    return %c0_i32, %c0_i32_0 : i32, i32
  }
  func.func @transform_4(%arg0: i32) -> (i32, i32) {
    %c0_i32 = arith.constant 0 : i32
    %c0_i32_0 = arith.constant 0 : i32
    return %arg0, %c0_i32 : i32, i32
  }
}

module attributes {stable_mosaic.version = 11 : i64} {
  func.func @_wkv_kernel(%arg0: i32, %arg1: i32, %arg2: memref<128x2x128xf32, #tpu.memory_space<vmem>>, %arg3: memref<128x2x128xf32, #tpu.memory_space<vmem>>, %arg4: memref<2x128xf32, #tpu.memory_space<vmem>>, %arg5: memref<2x128xf32, #tpu.memory_space<vmem>>, %arg6: memref<128x2x128xbf16, #tpu.memory_space<vmem>>, %arg7: memref<2x128xf32, #tpu.memory_space<vmem>>, %arg8: memref<2x128xf32, #tpu.memory_space<vmem>>, %arg9: memref<2x128xf32, #tpu.memory_space<vmem>>) attributes {dimension_semantics = [#tpu.dimension_semantics<parallel>, #tpu.dimension_semantics<arbitrary>], iteration_bounds = array<i64: 1, 1>, scalar_prefetch = 0 : i64, scratch_operands = 3 : i64, tpu.core_type = #tpu.core_type<tc>, window_params = [{transform_indices = @transform_0, window_bounds = array<i64: 128, 2, 128>}, {transform_indices = @transform_1, window_bounds = array<i64: 128, 2, 128>}, {transform_indices = @transform_2, window_bounds = array<i64: 2, 128>}, {transform_indices = @transform_3, window_bounds = array<i64: 2, 128>}, {transform_indices = @transform_4, window_bounds = array<i64: 128, 2, 128>}]} {
    %c0_i32 = arith.constant 0 : i32
    %0 = arith.cmpi eq, %arg1, %c0_i32 : i32
    %1 = arith.extui %0 : i1 to i32
    %c0_i32_0 = arith.constant 0 : i32
    %2 = arith.cmpi ne, %1, %c0_i32_0 : i32
    scf.if %2 {
      %cst = arith.constant 0.000000e+00 : f32
      %13 = vector.broadcast %cst : f32 to vector<2x128xf32>
      %c0_18 = arith.constant 0 : index
      %c0_19 = arith.constant 0 : index
      %14 = vector.load %arg7[%c0_18, %c0_19] : memref<2x128xf32, #tpu.memory_space<vmem>>, vector<2x128xf32>
      tpu.vector_store %arg7[%c0_18, %c0_19], %13 {strides = array<i32>} : memref<2x128xf32, #tpu.memory_space<vmem>>, vector<2x128xf32>,
      %cst_20 = arith.constant 0.000000e+00 : f32
      %15 = vector.broadcast %cst_20 : f32 to vector<2x128xf32>
      %c0_21 = arith.constant 0 : index
      %c0_22 = arith.constant 0 : index
      %16 = vector.load %arg8[%c0_21, %c0_22] : memref<2x128xf32, #tpu.memory_space<vmem>>, vector<2x128xf32>
      tpu.vector_store %arg8[%c0_21, %c0_22], %15 {strides = array<i32>} : memref<2x128xf32, #tpu.memory_space<vmem>>, vector<2x128xf32>,
      %cst_23 = arith.constant -1.000000e+30 : f32
      %17 = vector.broadcast %cst_23 : f32 to vector<2x128xf32>
      %c0_24 = arith.constant 0 : index
      %c0_25 = arith.constant 0 : index
      %18 = vector.load %arg9[%c0_24, %c0_25] : memref<2x128xf32, #tpu.memory_space<vmem>>, vector<2x128xf32>
      tpu.vector_store %arg9[%c0_24, %c0_25], %17 {strides = array<i32>} : memref<2x128xf32, #tpu.memory_space<vmem>>, vector<2x128xf32>,
    } else {
    }
    %c0 = arith.constant 0 : index
    %c0_1 = arith.constant 0 : index
    %3 = vector.load %arg4[%c0, %c0_1] : memref<2x128xf32, #tpu.memory_space<vmem>>, vector<2x128xf32>
    %c0_2 = arith.constant 0 : index
    %c0_3 = arith.constant 0 : index
    %4 = vector.load %arg5[%c0_2, %c0_3] : memref<2x128xf32, #tpu.memory_space<vmem>>, vector<2x128xf32>
    %c0_4 = arith.constant 0 : index
    %c0_5 = arith.constant 0 : index
    %5 = vector.load %arg7[%c0_4, %c0_5] : memref<2x128xf32, #tpu.memory_space<vmem>>, vector<2x128xf32>
    %c0_6 = arith.constant 0 : index
    %c0_7 = arith.constant 0 : index
    %6 = vector.load %arg8[%c0_6, %c0_7] : memref<2x128xf32, #tpu.memory_space<vmem>>, vector<2x128xf32>
    %c0_8 = arith.constant 0 : index
    %c0_9 = arith.constant 0 : index
    %7 = vector.load %arg9[%c0_8, %c0_9] : memref<2x128xf32, #tpu.memory_space<vmem>>, vector<2x128xf32>
    %c0_i32_10 = arith.constant 0 : i32
    %c16_i32 = arith.constant 16 : i32
    %8 = arith.addi %c0_i32_10, %c16_i32 : i32
    %c1_i32 = arith.constant 1 : i32
    %9:3 = scf.for %arg10 = %c0_i32_10 to %8 step %c1_i32 iter_args(%arg11 = %5, %arg12 = %6, %arg13 = %7) -> (vector<2x128xf32>, vector<2x128xf32>, vector<2x128xf32>)  : i32 {
      %c8_i32 = arith.constant 8 : i32
      %13 = arith.muli %arg10, %c8_i32 : i32
      %c0_i32_18 = arith.constant 0 : i32
      %14 = arith.addi %13, %c0_i32_18 : i32
      %15 = arith.index_cast %14 : i32 to index
      %c0_19 = arith.constant 0 : index
      %c0_20 = arith.constant 0 : index
      %16 = vector.load %arg2[%15, %c0_19, %c0_20] : memref<128x2x128xf32, #tpu.memory_space<vmem>>, vector<1x2x128xf32>
      %17 = vector.shape_cast %16 : vector<1x2x128xf32> to vector<2x128xf32>
      %18 = arith.index_cast %14 : i32 to index
      %c0_21 = arith.constant 0 : index
      %c0_22 = arith.constant 0 : index
      %19 = vector.load %arg3[%18, %c0_21, %c0_22] : memref<128x2x128xf32, #tpu.memory_space<vmem>>, vector<1x2x128xf32>
      %20 = vector.shape_cast %19 : vector<1x2x128xf32> to vector<2x128xf32>
      %21 = arith.addf %4, %17 : vector<2x128xf32>
      %22 = arith.subf %arg13, %21 : vector<2x128xf32>
      %23 = math.absf %22 : vector<2x128xf32>
      %cst = arith.constant 0.000000e+00 : f32
      %24 = vector.broadcast %cst : f32 to vector<2x128xf32>
      %25 = arith.subf %24, %23 : vector<2x128xf32>
      %26 = math.exp %25 : vector<2x128xf32>
      %cst_23 = arith.constant 0.000000e+00 : f32
      %27 = vector.broadcast %cst_23 : f32 to vector<2x128xf32>
      %28 = arith.cmpf oge, %22, %27 : vector<2x128xf32>
      %cst_24 = arith.constant 1.000000e+00 : f32
      %29 = vector.broadcast %cst_24 : f32 to vector<2x128xf32>
      %30 = arith.select %28, %29, %26 : vector<2x128xi1>, vector<2x128xf32>
      %cst_25 = arith.constant 1.000000e+00 : f32
      %31 = vector.broadcast %cst_25 : f32 to vector<2x128xf32>
      %32 = arith.select %28, %26, %31 : vector<2x128xi1>, vector<2x128xf32>
      %33 = arith.mulf %30, %arg11 : vector<2x128xf32>
      %34 = arith.mulf %32, %20 : vector<2x128xf32>
      %35 = arith.addf %33, %34 : vector<2x128xf32>
      %36 = arith.mulf %30, %arg12 : vector<2x128xf32>
      %37 = arith.addf %36, %32 : vector<2x128xf32>
      %38 = tpu.reciprocal %37 {approx = true} : vector<2x128xf32> -> vector<2x128xf32>
      %39 = arith.mulf %35, %38 : vector<2x128xf32>
      %40 = arith.truncf %39 : vector<2x128xf32> to vector<2x128xbf16>
      %41 = arith.index_cast %14 : i32 to index
      %c0_26 = arith.constant 0 : index
      %c0_27 = arith.constant 0 : index
      %42 = vector.load %arg6[%41, %c0_26, %c0_27] : memref<128x2x128xbf16, #tpu.memory_space<vmem>>, vector<1x2x128xbf16>
      %43 = vector.shape_cast %42 : vector<1x2x128xbf16> to vector<2x128xbf16>
      %44 = vector.shape_cast %40 : vector<2x128xbf16> to vector<1x2x128xbf16>
      tpu.vector_store %arg6[%41, %c0_26, %c0_27], %44 {strides = array<i32>} : memref<128x2x128xbf16, #tpu.memory_space<vmem>>, vector<1x2x128xbf16>,
      %45 = arith.addf %arg13, %3 : vector<2x128xf32>
      %46 = arith.subf %45, %17 : vector<2x128xf32>
      %47 = math.absf %46 : vector<2x128xf32>
      %cst_28 = arith.constant 0.000000e+00 : f32
      %48 = vector.broadcast %cst_28 : f32 to vector<2x128xf32>
      %49 = arith.subf %48, %47 : vector<2x128xf32>
      %50 = math.exp %49 : vector<2x128xf32>
      %cst_29 = arith.constant 0.000000e+00 : f32
      %51 = vector.broadcast %cst_29 : f32 to vector<2x128xf32>
      %52 = arith.cmpf oge, %46, %51 : vector<2x128xf32>
      %cst_30 = arith.constant 1.000000e+00 : f32
      %53 = vector.broadcast %cst_30 : f32 to vector<2x128xf32>
      %54 = arith.select %52, %53, %50 : vector<2x128xi1>, vector<2x128xf32>
      %cst_31 = arith.constant 1.000000e+00 : f32
      %55 = vector.broadcast %cst_31 : f32 to vector<2x128xf32>
      %56 = arith.select %52, %50, %55 : vector<2x128xi1>, vector<2x128xf32>
      %57 = arith.mulf %54, %arg11 : vector<2x128xf32>
      %58 = arith.mulf %56, %20 : vector<2x128xf32>
      %59 = arith.addf %57, %58 : vector<2x128xf32>
      %60 = arith.mulf %54, %arg12 : vector<2x128xf32>
      %61 = arith.addf %60, %56 : vector<2x128xf32>
      %62 = arith.maximumf %45, %17 : vector<2x128xf32>
      %c8_i32_32 = arith.constant 8 : i32
      %63 = arith.muli %arg10, %c8_i32_32 : i32
      %c1_i32_33 = arith.constant 1 : i32
      %64 = arith.addi %63, %c1_i32_33 : i32
      %65 = arith.index_cast %64 : i32 to index
      %c0_34 = arith.constant 0 : index
      %c0_35 = arith.constant 0 : index
      %66 = vector.load %arg2[%65, %c0_34, %c0_35] : memref<128x2x128xf32, #tpu.memory_space<vmem>>, vector<1x2x128xf32>
      %67 = vector.shape_cast %66 : vector<1x2x128xf32> to vector<2x128xf32>
      %68 = arith.index_cast %64 : i32 to index
      %c0_36 = arith.constant 0 : index
      %c0_37 = arith.constant 0 : index
      %69 = vector.load %arg3[%68, %c0_36, %c0_37] : memref<128x2x128xf32, #tpu.memory_space<vmem>>, vector<1x2x128xf32>
      %70 = vector.shape_cast %69 : vector<1x2x128xf32> to vector<2x128xf32>
      %71 = arith.addf %4, %67 : vector<2x128xf32>
      %72 = arith.subf %62, %71 : vector<2x128xf32>
      %73 = math.absf %72 : vector<2x128xf32>
      %cst_38 = arith.constant 0.000000e+00 : f32
      %74 = vector.broadcast %cst_38 : f32 to vector<2x128xf32>
      %75 = arith.subf %74, %73 : vector<2x128xf32>
      %76 = math.exp %75 : vector<2x128xf32>
      %cst_39 = arith.constant 0.000000e+00 : f32
      %77 = vector.broadcast %cst_39 : f32 to vector<2x128xf32>
      %78 = arith.cmpf oge, %72, %77 : vector<2x128xf32>
      %cst_40 = arith.constant 1.000000e+00 : f32
      %79 = vector.broadcast %cst_40 : f32 to vector<2x128xf32>
      %80 = arith.select %78, %79, %76 : vector<2x128xi1>, vector<2x128xf32>
      %cst_41 = arith.constant 1.000000e+00 : f32
      %81 = vector.broadcast %cst_41 : f32 to vector<2x128xf32>
      %82 = arith.select %78, %76, %81 : vector<2x128xi1>, vector<2x128xf32>
      %83 = arith.mulf %80, %59 : vector<2x128xf32>
      %84 = arith.mulf %82, %70 : vector<2x128xf32>
      %85 = arith.addf %83, %84 : vector<2x128xf32>
      %86 = arith.mulf %80, %61 : vector<2x128xf32>
      %87 = arith.addf %86, %82 : vector<2x128xf32>
      %88 = tpu.reciprocal %87 {approx = true} : vector<2x128xf32> -> vector<2x128xf32>
      %89 = arith.mulf %85, %88 : vector<2x128xf32>
      %90 = arith.truncf %89 : vector<2x128xf32> to vector<2x128xbf16>
      %91 = arith.index_cast %64 : i32 to index
      %c0_42 = arith.constant 0 : index
      %c0_43 = arith.constant 0 : index
      %92 = vector.load %arg6[%91, %c0_42, %c0_43] : memref<128x2x128xbf16, #tpu.memory_space<vmem>>, vector<1x2x128xbf16>
      %93 = vector.shape_cast %92 : vector<1x2x128xbf16> to vector<2x128xbf16>
      %94 = vector.shape_cast %90 : vector<2x128xbf16> to vector<1x2x128xbf16>
      tpu.vector_store %arg6[%91, %c0_42, %c0_43], %94 {strides = array<i32>} : memref<128x2x128xbf16, #tpu.memory_space<vmem>>, vector<1x2x128xbf16>,
      %95 = arith.addf %62, %3 : vector<2x128xf32>
      %96 = arith.subf %95, %67 : vector<2x128xf32>
      %97 = math.absf %96 : vector<2x128xf32>
      %cst_44 = arith.constant 0.000000e+00 : f32
      %98 = vector.broadcast %cst_44 : f32 to vector<2x128xf32>
      %99 = arith.subf %98, %97 : vector<2x128xf32>
      %100 = math.exp %99 : vector<2x128xf32>
      %cst_45 = arith.constant 0.000000e+00 : f32
      %101 = vector.broadcast %cst_45 : f32 to vector<2x128xf32>
      %102 = arith.cmpf oge, %96, %101 : vector<2x128xf32>
      %cst_46 = arith.constant 1.000000e+00 : f32
      %103 = vector.broadcast %cst_46 : f32 to vector<2x128xf32>
      %104 = arith.select %102, %103, %100 : vector<2x128xi1>, vector<2x128xf32>
      %cst_47 = arith.constant 1.000000e+00 : f32
      %105 = vector.broadcast %cst_47 : f32 to vector<2x128xf32>
      %106 = arith.select %102, %100, %105 : vector<2x128xi1>, vector<2x128xf32>
      %107 = arith.mulf %104, %59 : vector<2x128xf32>
      %108 = arith.mulf %106, %70 : vector<2x128xf32>
      %109 = arith.addf %107, %108 : vector<2x128xf32>
      %110 = arith.mulf %104, %61 : vector<2x128xf32>
      %111 = arith.addf %110, %106 : vector<2x128xf32>
      %112 = arith.maximumf %95, %67 : vector<2x128xf32>
      %c8_i32_48 = arith.constant 8 : i32
      %113 = arith.muli %arg10, %c8_i32_48 : i32
      %c2_i32 = arith.constant 2 : i32
      %114 = arith.addi %113, %c2_i32 : i32
      %115 = arith.index_cast %114 : i32 to index
      %c0_49 = arith.constant 0 : index
      %c0_50 = arith.constant 0 : index
      %116 = vector.load %arg2[%115, %c0_49, %c0_50] : memref<128x2x128xf32, #tpu.memory_space<vmem>>, vector<1x2x128xf32>
      %117 = vector.shape_cast %116 : vector<1x2x128xf32> to vector<2x128xf32>
      %118 = arith.index_cast %114 : i32 to index
      %c0_51 = arith.constant 0 : index
      %c0_52 = arith.constant 0 : index
      %119 = vector.load %arg3[%118, %c0_51, %c0_52] : memref<128x2x128xf32, #tpu.memory_space<vmem>>, vector<1x2x128xf32>
      %120 = vector.shape_cast %119 : vector<1x2x128xf32> to vector<2x128xf32>
      %121 = arith.addf %4, %117 : vector<2x128xf32>
      %122 = arith.subf %112, %121 : vector<2x128xf32>
      %123 = math.absf %122 : vector<2x128xf32>
      %cst_53 = arith.constant 0.000000e+00 : f32
      %124 = vector.broadcast %cst_53 : f32 to vector<2x128xf32>
      %125 = arith.subf %124, %123 : vector<2x128xf32>
      %126 = math.exp %125 : vector<2x128xf32>
      %cst_54 = arith.constant 0.000000e+00 : f32
      %127 = vector.broadcast %cst_54 : f32 to vector<2x128xf32>
      %128 = arith.cmpf oge, %122, %127 : vector<2x128xf32>
      %cst_55 = arith.constant 1.000000e+00 : f32
      %129 = vector.broadcast %cst_55 : f32 to vector<2x128xf32>
      %130 = arith.select %128, %129, %126 : vector<2x128xi1>, vector<2x128xf32>
      %cst_56 = arith.constant 1.000000e+00 : f32
      %131 = vector.broadcast %cst_56 : f32 to vector<2x128xf32>
      %132 = arith.select %128, %126, %131 : vector<2x128xi1>, vector<2x128xf32>
      %133 = arith.mulf %130, %109 : vector<2x128xf32>
      %134 = arith.mulf %132, %120 : vector<2x128xf32>
      %135 = arith.addf %133, %134 : vector<2x128xf32>
      %136 = arith.mulf %130, %111 : vector<2x128xf32>
      %137 = arith.addf %136, %132 : vector<2x128xf32>
      %138 = tpu.reciprocal %137 {approx = true} : vector<2x128xf32> -> vector<2x128xf32>
      %139 = arith.mulf %135, %138 : vector<2x128xf32>
      %140 = arith.truncf %139 : vector<2x128xf32> to vector<2x128xbf16>
      %141 = arith.index_cast %114 : i32 to index
      %c0_57 = arith.constant 0 : index
      %c0_58 = arith.constant 0 : index
      %142 = vector.load %arg6[%141, %c0_57, %c0_58] : memref<128x2x128xbf16, #tpu.memory_space<vmem>>, vector<1x2x128xbf16>
      %143 = vector.shape_cast %142 : vector<1x2x128xbf16> to vector<2x128xbf16>
      %144 = vector.shape_cast %140 : vector<2x128xbf16> to vector<1x2x128xbf16>
      tpu.vector_store %arg6[%141, %c0_57, %c0_58], %144 {strides = array<i32>} : memref<128x2x128xbf16, #tpu.memory_space<vmem>>, vector<1x2x128xbf16>,
      %145 = arith.addf %112, %3 : vector<2x128xf32>
      %146 = arith.subf %145, %117 : vector<2x128xf32>
      %147 = math.absf %146 : vector<2x128xf32>
      %cst_59 = arith.constant 0.000000e+00 : f32
      %148 = vector.broadcast %cst_59 : f32 to vector<2x128xf32>
      %149 = arith.subf %148, %147 : vector<2x128xf32>
      %150 = math.exp %149 : vector<2x128xf32>
      %cst_60 = arith.constant 0.000000e+00 : f32
      %151 = vector.broadcast %cst_60 : f32 to vector<2x128xf32>
      %152 = arith.cmpf oge, %146, %151 : vector<2x128xf32>
      %cst_61 = arith.constant 1.000000e+00 : f32
      %153 = vector.broadcast %cst_61 : f32 to vector<2x128xf32>
      %154 = arith.select %152, %153, %150 : vector<2x128xi1>, vector<2x128xf32>
      %cst_62 = arith.constant 1.000000e+00 : f32
      %155 = vector.broadcast %cst_62 : f32 to vector<2x128xf32>
      %156 = arith.select %152, %150, %155 : vector<2x128xi1>, vector<2x128xf32>
      %157 = arith.mulf %154, %109 : vector<2x128xf32>
      %158 = arith.mulf %156, %120 : vector<2x128xf32>
      %159 = arith.addf %157, %158 : vector<2x128xf32>
      %160 = arith.mulf %154, %111 : vector<2x128xf32>
      %161 = arith.addf %160, %156 : vector<2x128xf32>
      %162 = arith.maximumf %145, %117 : vector<2x128xf32>
      %c8_i32_63 = arith.constant 8 : i32
      %163 = arith.muli %arg10, %c8_i32_63 : i32
      %c3_i32 = arith.constant 3 : i32
      %164 = arith.addi %163, %c3_i32 : i32
      %165 = arith.index_cast %164 : i32 to index
      %c0_64 = arith.constant 0 : index
      %c0_65 = arith.constant 0 : index
      %166 = vector.load %arg2[%165, %c0_64, %c0_65] : memref<128x2x128xf32, #tpu.memory_space<vmem>>, vector<1x2x128xf32>
      %167 = vector.shape_cast %166 : vector<1x2x128xf32> to vector<2x128xf32>
      %168 = arith.index_cast %164 : i32 to index
      %c0_66 = arith.constant 0 : index
      %c0_67 = arith.constant 0 : index
      %169 = vector.load %arg3[%168, %c0_66, %c0_67] : memref<128x2x128xf32, #tpu.memory_space<vmem>>, vector<1x2x128xf32>
      %170 = vector.shape_cast %169 : vector<1x2x128xf32> to vector<2x128xf32>
      %171 = arith.addf %4, %167 : vector<2x128xf32>
      %172 = arith.subf %162, %171 : vector<2x128xf32>
      %173 = math.absf %172 : vector<2x128xf32>
      %cst_68 = arith.constant 0.000000e+00 : f32
      %174 = vector.broadcast %cst_68 : f32 to vector<2x128xf32>
      %175 = arith.subf %174, %173 : vector<2x128xf32>
      %176 = math.exp %175 : vector<2x128xf32>
      %cst_69 = arith.constant 0.000000e+00 : f32
      %177 = vector.broadcast %cst_69 : f32 to vector<2x128xf32>
      %178 = arith.cmpf oge, %172, %177 : vector<2x128xf32>
      %cst_70 = arith.constant 1.000000e+00 : f32
      %179 = vector.broadcast %cst_70 : f32 to vector<2x128xf32>
      %180 = arith.select %178, %179, %176 : vector<2x128xi1>, vector<2x128xf32>
      %cst_71 = arith.constant 1.000000e+00 : f32
      %181 = vector.broadcast %cst_71 : f32 to vector<2x128xf32>
      %182 = arith.select %178, %176, %181 : vector<2x128xi1>, vector<2x128xf32>
      %183 = arith.mulf %180, %159 : vector<2x128xf32>
      %184 = arith.mulf %182, %170 : vector<2x128xf32>
      %185 = arith.addf %183, %184 : vector<2x128xf32>
      %186 = arith.mulf %180, %161 : vector<2x128xf32>
      %187 = arith.addf %186, %182 : vector<2x128xf32>
      %188 = tpu.reciprocal %187 {approx = true} : vector<2x128xf32> -> vector<2x128xf32>
      %189 = arith.mulf %185, %188 : vector<2x128xf32>
      %190 = arith.truncf %189 : vector<2x128xf32> to vector<2x128xbf16>
      %191 = arith.index_cast %164 : i32 to index
      %c0_72 = arith.constant 0 : index
      %c0_73 = arith.constant 0 : index
      %192 = vector.load %arg6[%191, %c0_72, %c0_73] : memref<128x2x128xbf16, #tpu.memory_space<vmem>>, vector<1x2x128xbf16>
      %193 = vector.shape_cast %192 : vector<1x2x128xbf16> to vector<2x128xbf16>
      %194 = vector.shape_cast %190 : vector<2x128xbf16> to vector<1x2x128xbf16>
      tpu.vector_store %arg6[%191, %c0_72, %c0_73], %194 {strides = array<i32>} : memref<128x2x128xbf16, #tpu.memory_space<vmem>>, vector<1x2x128xbf16>,
      %195 = arith.addf %162, %3 : vector<2x128xf32>
      %196 = arith.subf %195, %167 : vector<2x128xf32>
      %197 = math.absf %196 : vector<2x128xf32>
      %cst_74 = arith.constant 0.000000e+00 : f32
      %198 = vector.broadcast %cst_74 : f32 to vector<2x128xf32>
      %199 = arith.subf %198, %197 : vector<2x128xf32>
      %200 = math.exp %199 : vector<2x128xf32>
      %cst_75 = arith.constant 0.000000e+00 : f32
      %201 = vector.broadcast %cst_75 : f32 to vector<2x128xf32>
      %202 = arith.cmpf oge, %196, %201 : vector<2x128xf32>
      %cst_76 = arith.constant 1.000000e+00 : f32
      %203 = vector.broadcast %cst_76 : f32 to vector<2x128xf32>
      %204 = arith.select %202, %203, %200 : vector<2x128xi1>, vector<2x128xf32>
      %cst_77 = arith.constant 1.000000e+00 : f32
      %205 = vector.broadcast %cst_77 : f32 to vector<2x128xf32>
      %206 = arith.select %202, %200, %205 : vector<2x128xi1>, vector<2x128xf32>
      %207 = arith.mulf %204, %159 : vector<2x128xf32>
      %208 = arith.mulf %206, %170 : vector<2x128xf32>
      %209 = arith.addf %207, %208 : vector<2x128xf32>
      %210 = arith.mulf %204, %161 : vector<2x128xf32>
      %211 = arith.addf %210, %206 : vector<2x128xf32>
      %212 = arith.maximumf %195, %167 : vector<2x128xf32>
      %c8_i32_78 = arith.constant 8 : i32
      %213 = arith.muli %arg10, %c8_i32_78 : i32
      %c4_i32 = arith.constant 4 : i32
      %214 = arith.addi %213, %c4_i32 : i32
      %215 = arith.index_cast %214 : i32 to index
      %c0_79 = arith.constant 0 : index
      %c0_80 = arith.constant 0 : index
      %216 = vector.load %arg2[%215, %c0_79, %c0_80] : memref<128x2x128xf32, #tpu.memory_space<vmem>>, vector<1x2x128xf32>
      %217 = vector.shape_cast %216 : vector<1x2x128xf32> to vector<2x128xf32>
      %218 = arith.index_cast %214 : i32 to index
      %c0_81 = arith.constant 0 : index
      %c0_82 = arith.constant 0 : index
      %219 = vector.load %arg3[%218, %c0_81, %c0_82] : memref<128x2x128xf32, #tpu.memory_space<vmem>>, vector<1x2x128xf32>
      %220 = vector.shape_cast %219 : vector<1x2x128xf32> to vector<2x128xf32>
      %221 = arith.addf %4, %217 : vector<2x128xf32>
      %222 = arith.subf %212, %221 : vector<2x128xf32>
      %223 = math.absf %222 : vector<2x128xf32>
      %cst_83 = arith.constant 0.000000e+00 : f32
      %224 = vector.broadcast %cst_83 : f32 to vector<2x128xf32>
      %225 = arith.subf %224, %223 : vector<2x128xf32>
      %226 = math.exp %225 : vector<2x128xf32>
      %cst_84 = arith.constant 0.000000e+00 : f32
      %227 = vector.broadcast %cst_84 : f32 to vector<2x128xf32>
      %228 = arith.cmpf oge, %222, %227 : vector<2x128xf32>
      %cst_85 = arith.constant 1.000000e+00 : f32
      %229 = vector.broadcast %cst_85 : f32 to vector<2x128xf32>
      %230 = arith.select %228, %229, %226 : vector<2x128xi1>, vector<2x128xf32>
      %cst_86 = arith.constant 1.000000e+00 : f32
      %231 = vector.broadcast %cst_86 : f32 to vector<2x128xf32>
      %232 = arith.select %228, %226, %231 : vector<2x128xi1>, vector<2x128xf32>
      %233 = arith.mulf %230, %209 : vector<2x128xf32>
      %234 = arith.mulf %232, %220 : vector<2x128xf32>
      %235 = arith.addf %233, %234 : vector<2x128xf32>
      %236 = arith.mulf %230, %211 : vector<2x128xf32>
      %237 = arith.addf %236, %232 : vector<2x128xf32>
      %238 = tpu.reciprocal %237 {approx = true} : vector<2x128xf32> -> vector<2x128xf32>
      %239 = arith.mulf %235, %238 : vector<2x128xf32>
      %240 = arith.truncf %239 : vector<2x128xf32> to vector<2x128xbf16>
      %241 = arith.index_cast %214 : i32 to index
      %c0_87 = arith.constant 0 : index
      %c0_88 = arith.constant 0 : index
      %242 = vector.load %arg6[%241, %c0_87, %c0_88] : memref<128x2x128xbf16, #tpu.memory_space<vmem>>, vector<1x2x128xbf16>
      %243 = vector.shape_cast %242 : vector<1x2x128xbf16> to vector<2x128xbf16>
      %244 = vector.shape_cast %240 : vector<2x128xbf16> to vector<1x2x128xbf16>
      tpu.vector_store %arg6[%241, %c0_87, %c0_88], %244 {strides = array<i32>} : memref<128x2x128xbf16, #tpu.memory_space<vmem>>, vector<1x2x128xbf16>,
      %245 = arith.addf %212, %3 : vector<2x128xf32>
      %246 = arith.subf %245, %217 : vector<2x128xf32>
      %247 = math.absf %246 : vector<2x128xf32>
      %cst_89 = arith.constant 0.000000e+00 : f32
      %248 = vector.broadcast %cst_89 : f32 to vector<2x128xf32>
      %249 = arith.subf %248, %247 : vector<2x128xf32>
      %250 = math.exp %249 : vector<2x128xf32>
      %cst_90 = arith.constant 0.000000e+00 : f32
      %251 = vector.broadcast %cst_90 : f32 to vector<2x128xf32>
      %252 = arith.cmpf oge, %246, %251 : vector<2x128xf32>
      %cst_91 = arith.constant 1.000000e+00 : f32
      %253 = vector.broadcast %cst_91 : f32 to vector<2x128xf32>
      %254 = arith.select %252, %253, %250 : vector<2x128xi1>, vector<2x128xf32>
      %cst_92 = arith.constant 1.000000e+00 : f32
      %255 = vector.broadcast %cst_92 : f32 to vector<2x128xf32>
      %256 = arith.select %252, %250, %255 : vector<2x128xi1>, vector<2x128xf32>
      %257 = arith.mulf %254, %209 : vector<2x128xf32>
      %258 = arith.mulf %256, %220 : vector<2x128xf32>
      %259 = arith.addf %257, %258 : vector<2x128xf32>
      %260 = arith.mulf %254, %211 : vector<2x128xf32>
      %261 = arith.addf %260, %256 : vector<2x128xf32>
      %262 = arith.maximumf %245, %217 : vector<2x128xf32>
      %c8_i32_93 = arith.constant 8 : i32
      %263 = arith.muli %arg10, %c8_i32_93 : i32
      %c5_i32 = arith.constant 5 : i32
      %264 = arith.addi %263, %c5_i32 : i32
      %265 = arith.index_cast %264 : i32 to index
      %c0_94 = arith.constant 0 : index
      %c0_95 = arith.constant 0 : index
      %266 = vector.load %arg2[%265, %c0_94, %c0_95] : memref<128x2x128xf32, #tpu.memory_space<vmem>>, vector<1x2x128xf32>
      %267 = vector.shape_cast %266 : vector<1x2x128xf32> to vector<2x128xf32>
      %268 = arith.index_cast %264 : i32 to index
      %c0_96 = arith.constant 0 : index
      %c0_97 = arith.constant 0 : index
      %269 = vector.load %arg3[%268, %c0_96, %c0_97] : memref<128x2x128xf32, #tpu.memory_space<vmem>>, vector<1x2x128xf32>
      %270 = vector.shape_cast %269 : vector<1x2x128xf32> to vector<2x128xf32>
      %271 = arith.addf %4, %267 : vector<2x128xf32>
      %272 = arith.subf %262, %271 : vector<2x128xf32>
      %273 = math.absf %272 : vector<2x128xf32>
      %cst_98 = arith.constant 0.000000e+00 : f32
      %274 = vector.broadcast %cst_98 : f32 to vector<2x128xf32>
      %275 = arith.subf %274, %273 : vector<2x128xf32>
      %276 = math.exp %275 : vector<2x128xf32>
      %cst_99 = arith.constant 0.000000e+00 : f32
      %277 = vector.broadcast %cst_99 : f32 to vector<2x128xf32>
      %278 = arith.cmpf oge, %272, %277 : vector<2x128xf32>
      %cst_100 = arith.constant 1.000000e+00 : f32
      %279 = vector.broadcast %cst_100 : f32 to vector<2x128xf32>
      %280 = arith.select %278, %279, %276 : vector<2x128xi1>, vector<2x128xf32>
      %cst_101 = arith.constant 1.000000e+00 : f32
      %281 = vector.broadcast %cst_101 : f32 to vector<2x128xf32>
      %282 = arith.select %278, %276, %281 : vector<2x128xi1>, vector<2x128xf32>
      %283 = arith.mulf %280, %259 : vector<2x128xf32>
      %284 = arith.mulf %282, %270 : vector<2x128xf32>
      %285 = arith.addf %283, %284 : vector<2x128xf32>
      %286 = arith.mulf %280, %261 : vector<2x128xf32>
      %287 = arith.addf %286, %282 : vector<2x128xf32>
      %288 = tpu.reciprocal %287 {approx = true} : vector<2x128xf32> -> vector<2x128xf32>
      %289 = arith.mulf %285, %288 : vector<2x128xf32>
      %290 = arith.truncf %289 : vector<2x128xf32> to vector<2x128xbf16>
      %291 = arith.index_cast %264 : i32 to index
      %c0_102 = arith.constant 0 : index
      %c0_103 = arith.constant 0 : index
      %292 = vector.load %arg6[%291, %c0_102, %c0_103] : memref<128x2x128xbf16, #tpu.memory_space<vmem>>, vector<1x2x128xbf16>
      %293 = vector.shape_cast %292 : vector<1x2x128xbf16> to vector<2x128xbf16>
      %294 = vector.shape_cast %290 : vector<2x128xbf16> to vector<1x2x128xbf16>
      tpu.vector_store %arg6[%291, %c0_102, %c0_103], %294 {strides = array<i32>} : memref<128x2x128xbf16, #tpu.memory_space<vmem>>, vector<1x2x128xbf16>,
      %295 = arith.addf %262, %3 : vector<2x128xf32>
      %296 = arith.subf %295, %267 : vector<2x128xf32>
      %297 = math.absf %296 : vector<2x128xf32>
      %cst_104 = arith.constant 0.000000e+00 : f32
      %298 = vector.broadcast %cst_104 : f32 to vector<2x128xf32>
      %299 = arith.subf %298, %297 : vector<2x128xf32>
      %300 = math.exp %299 : vector<2x128xf32>
      %cst_105 = arith.constant 0.000000e+00 : f32
      %301 = vector.broadcast %cst_105 : f32 to vector<2x128xf32>
      %302 = arith.cmpf oge, %296, %301 : vector<2x128xf32>
      %cst_106 = arith.constant 1.000000e+00 : f32
      %303 = vector.broadcast %cst_106 : f32 to vector<2x128xf32>
      %304 = arith.select %302, %303, %300 : vector<2x128xi1>, vector<2x128xf32>
      %cst_107 = arith.constant 1.000000e+00 : f32
      %305 = vector.broadcast %cst_107 : f32 to vector<2x128xf32>
      %306 = arith.select %302, %300, %305 : vector<2x128xi1>, vector<2x128xf32>
      %307 = arith.mulf %304, %259 : vector<2x128xf32>
      %308 = arith.mulf %306, %270 : vector<2x128xf32>
      %309 = arith.addf %307, %308 : vector<2x128xf32>
      %310 = arith.mulf %304, %261 : vector<2x128xf32>
      %311 = arith.addf %310, %306 : vector<2x128xf32>
      %312 = arith.maximumf %295, %267 : vector<2x128xf32>
      %c8_i32_108 = arith.constant 8 : i32
      %313 = arith.muli %arg10, %c8_i32_108 : i32
      %c6_i32 = arith.constant 6 : i32
      %314 = arith.addi %313, %c6_i32 : i32
      %315 = arith.index_cast %314 : i32 to index
      %c0_109 = arith.constant 0 : index
      %c0_110 = arith.constant 0 : index
      %316 = vector.load %arg2[%315, %c0_109, %c0_110] : memref<128x2x128xf32, #tpu.memory_space<vmem>>, vector<1x2x128xf32>
      %317 = vector.shape_cast %316 : vector<1x2x128xf32> to vector<2x128xf32>
      %318 = arith.index_cast %314 : i32 to index
      %c0_111 = arith.constant 0 : index
      %c0_112 = arith.constant 0 : index
      %319 = vector.load %arg3[%318, %c0_111, %c0_112] : memref<128x2x128xf32, #tpu.memory_space<vmem>>, vector<1x2x128xf32>
      %320 = vector.shape_cast %319 : vector<1x2x128xf32> to vector<2x128xf32>
      %321 = arith.addf %4, %317 : vector<2x128xf32>
      %322 = arith.subf %312, %321 : vector<2x128xf32>
      %323 = math.absf %322 : vector<2x128xf32>
      %cst_113 = arith.constant 0.000000e+00 : f32
      %324 = vector.broadcast %cst_113 : f32 to vector<2x128xf32>
      %325 = arith.subf %324, %323 : vector<2x128xf32>
      %326 = math.exp %325 : vector<2x128xf32>
      %cst_114 = arith.constant 0.000000e+00 : f32
      %327 = vector.broadcast %cst_114 : f32 to vector<2x128xf32>
      %328 = arith.cmpf oge, %322, %327 : vector<2x128xf32>
      %cst_115 = arith.constant 1.000000e+00 : f32
      %329 = vector.broadcast %cst_115 : f32 to vector<2x128xf32>
      %330 = arith.select %328, %329, %326 : vector<2x128xi1>, vector<2x128xf32>
      %cst_116 = arith.constant 1.000000e+00 : f32
      %331 = vector.broadcast %cst_116 : f32 to vector<2x128xf32>
      %332 = arith.select %328, %326, %331 : vector<2x128xi1>, vector<2x128xf32>
      %333 = arith.mulf %330, %309 : vector<2x128xf32>
      %334 = arith.mulf %332, %320 : vector<2x128xf32>
      %335 = arith.addf %333, %334 : vector<2x128xf32>
      %336 = arith.mulf %330, %311 : vector<2x128xf32>
      %337 = arith.addf %336, %332 : vector<2x128xf32>
      %338 = tpu.reciprocal %337 {approx = true} : vector<2x128xf32> -> vector<2x128xf32>
      %339 = arith.mulf %335, %338 : vector<2x128xf32>
      %340 = arith.truncf %339 : vector<2x128xf32> to vector<2x128xbf16>
      %341 = arith.index_cast %314 : i32 to index
      %c0_117 = arith.constant 0 : index
      %c0_118 = arith.constant 0 : index
      %342 = vector.load %arg6[%341, %c0_117, %c0_118] : memref<128x2x128xbf16, #tpu.memory_space<vmem>>, vector<1x2x128xbf16>
      %343 = vector.shape_cast %342 : vector<1x2x128xbf16> to vector<2x128xbf16>
      %344 = vector.shape_cast %340 : vector<2x128xbf16> to vector<1x2x128xbf16>
      tpu.vector_store %arg6[%341, %c0_117, %c0_118], %344 {strides = array<i32>} : memref<128x2x128xbf16, #tpu.memory_space<vmem>>, vector<1x2x128xbf16>,
      %345 = arith.addf %312, %3 : vector<2x128xf32>
      %346 = arith.subf %345, %317 : vector<2x128xf32>
      %347 = math.absf %346 : vector<2x128xf32>
      %cst_119 = arith.constant 0.000000e+00 : f32
      %348 = vector.broadcast %cst_119 : f32 to vector<2x128xf32>
      %349 = arith.subf %348, %347 : vector<2x128xf32>
      %350 = math.exp %349 : vector<2x128xf32>
      %cst_120 = arith.constant 0.000000e+00 : f32
      %351 = vector.broadcast %cst_120 : f32 to vector<2x128xf32>
      %352 = arith.cmpf oge, %346, %351 : vector<2x128xf32>
      %cst_121 = arith.constant 1.000000e+00 : f32
      %353 = vector.broadcast %cst_121 : f32 to vector<2x128xf32>
      %354 = arith.select %352, %353, %350 : vector<2x128xi1>, vector<2x128xf32>
      %cst_122 = arith.constant 1.000000e+00 : f32
      %355 = vector.broadcast %cst_122 : f32 to vector<2x128xf32>
      %356 = arith.select %352, %350, %355 : vector<2x128xi1>, vector<2x128xf32>
      %357 = arith.mulf %354, %309 : vector<2x128xf32>
      %358 = arith.mulf %356, %320 : vector<2x128xf32>
      %359 = arith.addf %357, %358 : vector<2x128xf32>
      %360 = arith.mulf %354, %311 : vector<2x128xf32>
      %361 = arith.addf %360, %356 : vector<2x128xf32>
      %362 = arith.maximumf %345, %317 : vector<2x128xf32>
      %c8_i32_123 = arith.constant 8 : i32
      %363 = arith.muli %arg10, %c8_i32_123 : i32
      %c7_i32 = arith.constant 7 : i32
      %364 = arith.addi %363, %c7_i32 : i32
      %365 = arith.index_cast %364 : i32 to index
      %c0_124 = arith.constant 0 : index
      %c0_125 = arith.constant 0 : index
      %366 = vector.load %arg2[%365, %c0_124, %c0_125] : memref<128x2x128xf32, #tpu.memory_space<vmem>>, vector<1x2x128xf32>
      %367 = vector.shape_cast %366 : vector<1x2x128xf32> to vector<2x128xf32>
      %368 = arith.index_cast %364 : i32 to index
      %c0_126 = arith.constant 0 : index
      %c0_127 = arith.constant 0 : index
      %369 = vector.load %arg3[%368, %c0_126, %c0_127] : memref<128x2x128xf32, #tpu.memory_space<vmem>>, vector<1x2x128xf32>
      %370 = vector.shape_cast %369 : vector<1x2x128xf32> to vector<2x128xf32>
      %371 = arith.addf %4, %367 : vector<2x128xf32>
      %372 = arith.subf %362, %371 : vector<2x128xf32>
      %373 = math.absf %372 : vector<2x128xf32>
      %cst_128 = arith.constant 0.000000e+00 : f32
      %374 = vector.broadcast %cst_128 : f32 to vector<2x128xf32>
      %375 = arith.subf %374, %373 : vector<2x128xf32>
      %376 = math.exp %375 : vector<2x128xf32>
      %cst_129 = arith.constant 0.000000e+00 : f32
      %377 = vector.broadcast %cst_129 : f32 to vector<2x128xf32>
      %378 = arith.cmpf oge, %372, %377 : vector<2x128xf32>
      %cst_130 = arith.constant 1.000000e+00 : f32
      %379 = vector.broadcast %cst_130 : f32 to vector<2x128xf32>
      %380 = arith.select %378, %379, %376 : vector<2x128xi1>, vector<2x128xf32>
      %cst_131 = arith.constant 1.000000e+00 : f32
      %381 = vector.broadcast %cst_131 : f32 to vector<2x128xf32>
      %382 = arith.select %378, %376, %381 : vector<2x128xi1>, vector<2x128xf32>
      %383 = arith.mulf %380, %359 : vector<2x128xf32>
      %384 = arith.mulf %382, %370 : vector<2x128xf32>
      %385 = arith.addf %383, %384 : vector<2x128xf32>
      %386 = arith.mulf %380, %361 : vector<2x128xf32>
      %387 = arith.addf %386, %382 : vector<2x128xf32>
      %388 = tpu.reciprocal %387 {approx = true} : vector<2x128xf32> -> vector<2x128xf32>
      %389 = arith.mulf %385, %388 : vector<2x128xf32>
      %390 = arith.truncf %389 : vector<2x128xf32> to vector<2x128xbf16>
      %391 = arith.index_cast %364 : i32 to index
      %c0_132 = arith.constant 0 : index
      %c0_133 = arith.constant 0 : index
      %392 = vector.load %arg6[%391, %c0_132, %c0_133] : memref<128x2x128xbf16, #tpu.memory_space<vmem>>, vector<1x2x128xbf16>
      %393 = vector.shape_cast %392 : vector<1x2x128xbf16> to vector<2x128xbf16>
      %394 = vector.shape_cast %390 : vector<2x128xbf16> to vector<1x2x128xbf16>
      tpu.vector_store %arg6[%391, %c0_132, %c0_133], %394 {strides = array<i32>} : memref<128x2x128xbf16, #tpu.memory_space<vmem>>, vector<1x2x128xbf16>,
      %395 = arith.addf %362, %3 : vector<2x128xf32>
      %396 = arith.subf %395, %367 : vector<2x128xf32>
      %397 = math.absf %396 : vector<2x128xf32>
      %cst_134 = arith.constant 0.000000e+00 : f32
      %398 = vector.broadcast %cst_134 : f32 to vector<2x128xf32>
      %399 = arith.subf %398, %397 : vector<2x128xf32>
      %400 = math.exp %399 : vector<2x128xf32>
      %cst_135 = arith.constant 0.000000e+00 : f32
      %401 = vector.broadcast %cst_135 : f32 to vector<2x128xf32>
      %402 = arith.cmpf oge, %396, %401 : vector<2x128xf32>
      %cst_136 = arith.constant 1.000000e+00 : f32
      %403 = vector.broadcast %cst_136 : f32 to vector<2x128xf32>
      %404 = arith.select %402, %403, %400 : vector<2x128xi1>, vector<2x128xf32>
      %cst_137 = arith.constant 1.000000e+00 : f32
      %405 = vector.broadcast %cst_137 : f32 to vector<2x128xf32>
      %406 = arith.select %402, %400, %405 : vector<2x128xi1>, vector<2x128xf32>
      %407 = arith.mulf %404, %359 : vector<2x128xf32>
      %408 = arith.mulf %406, %370 : vector<2x128xf32>
      %409 = arith.addf %407, %408 : vector<2x128xf32>
      %410 = arith.mulf %404, %361 : vector<2x128xf32>
      %411 = arith.addf %410, %406 : vector<2x128xf32>
      %412 = arith.maximumf %395, %367 : vector<2x128xf32>
      scf.yield %409, %411, %412 : vector<2x128xf32>, vector<2x128xf32>, vector<2x128xf32>
    }
    %c16_i32_11 = arith.constant 16 : i32
    %c0_12 = arith.constant 0 : index
    %c0_13 = arith.constant 0 : index
    %10 = vector.load %arg7[%c0_12, %c0_13] : memref<2x128xf32, #tpu.memory_space<vmem>>, vector<2x128xf32>
    tpu.vector_store %arg7[%c0_12, %c0_13], %9#0 {strides = array<i32>} : memref<2x128xf32, #tpu.memory_space<vmem>>, vector<2x128xf32>,
    %c0_14 = arith.constant 0 : index
    %c0_15 = arith.constant 0 : index
    %11 = vector.load %arg8[%c0_14, %c0_15] : memref<2x128xf32, #tpu.memory_space<vmem>>, vector<2x128xf32>
    tpu.vector_store %arg8[%c0_14, %c0_15], %9#1 {strides = array<i32>} : memref<2x128xf32, #tpu.memory_space<vmem>>, vector<2x128xf32>,
    %c0_16 = arith.constant 0 : index
    %c0_17 = arith.constant 0 : index
    %12 = vector.load %arg9[%c0_16, %c0_17] : memref<2x128xf32, #tpu.memory_space<vmem>>, vector<2x128xf32>
    tpu.vector_store %arg9[%c0_16, %c0_17], %9#2 {strides = array<i32>} : memref<2x128xf32, #tpu.memory_space<vmem>>, vector<2x128xf32>,
    return
  }
  func.func @transform_0(%arg0: i32, %arg1: i32) -> (i32, i32, i32) {
    %c0_i32 = arith.constant 0 : i32
    %c0_i32_0 = arith.constant 0 : i32
    return %arg1, %arg0, %c0_i32 : i32, i32, i32
  }
  func.func @transform_1(%arg0: i32, %arg1: i32) -> (i32, i32, i32) {
    %c0_i32 = arith.constant 0 : i32
    %c0_i32_0 = arith.constant 0 : i32
    return %arg1, %arg0, %c0_i32 : i32, i32, i32
  }
  func.func @transform_2(%arg0: i32, %arg1: i32) -> (i32, i32) {
    %c0_i32 = arith.constant 0 : i32
    %c0_i32_0 = arith.constant 0 : i32
    return %arg0, %c0_i32 : i32, i32
  }
  func.func @transform_3(%arg0: i32, %arg1: i32) -> (i32, i32) {
    %c0_i32 = arith.constant 0 : i32
    %c0_i32_0 = arith.constant 0 : i32
    return %arg0, %c0_i32 : i32, i32
  }
  func.func @transform_4(%arg0: i32, %arg1: i32) -> (i32, i32, i32) {
    %c0_i32 = arith.constant 0 : i32
    %c0_i32_0 = arith.constant 0 : i32
    return %arg1, %arg0, %c0_i32 : i32, i32, i32
  }
}

module attributes {stable_mosaic.version = 11 : i64} {
  func.func @_ffn_kr_kernel(%arg0: i32, %arg1: memref<256x128xf32, #tpu.memory_space<vmem>>, %arg2: memref<2x128xf32, #tpu.memory_space<vmem>>, %arg3: memref<2x128xf32, #tpu.memory_space<vmem>>, %arg4: memref<128x128xbf16, #tpu.memory_space<vmem>>, %arg5: memref<128x128xbf16, #tpu.memory_space<vmem>>, %arg6: memref<256x128xbf16, #tpu.memory_space<vmem>>, %arg7: memref<256x128xbf16, #tpu.memory_space<vmem>>, %arg8: memref<256x128xf32, #tpu.memory_space<vmem>>) attributes {dimension_semantics = [#tpu.dimension_semantics<arbitrary>], iteration_bounds = array<i64: 1>, scalar_prefetch = 0 : i64, scratch_operands = 1 : i64, tpu.core_type = #tpu.core_type<tc>, window_params = [{transform_indices = @transform_0, window_bounds = array<i64: 256, 128>}, {pipeline_mode = #tpu.pipeline_mode<synchronous>, transform_indices = @transform_1, window_bounds = array<i64: 2, 128>}, {pipeline_mode = #tpu.pipeline_mode<synchronous>, transform_indices = @transform_2, window_bounds = array<i64: 2, 128>}, {pipeline_mode = #tpu.pipeline_mode<synchronous>, transform_indices = @transform_3, window_bounds = array<i64: 128, 128>}, {pipeline_mode = #tpu.pipeline_mode<synchronous>, transform_indices = @transform_4, window_bounds = array<i64: 128, 128>}, {transform_indices = @transform_5, window_bounds = array<i64: 256, 128>}, {transform_indices = @transform_6, window_bounds = array<i64: 256, 128>}]} {
    %c0_i32 = arith.constant 0 : i32
    %0 = arith.cmpi eq, %arg0, %c0_i32 : i32
    %1 = arith.extui %0 : i1 to i32
    %c0_i32_0 = arith.constant 0 : i32
    %2 = arith.cmpi ne, %1, %c0_i32_0 : i32
    scf.if %2 {
      %cst_30 = arith.constant 0.000000e+00 : f32
      %78 = vector.broadcast %cst_30 : f32 to vector<256x128xf32>
      %c0_31 = arith.constant 0 : index
      %c0_32 = arith.constant 0 : index
      %79 = vector.load %arg8[%c0_31, %c0_32] : memref<256x128xf32, #tpu.memory_space<vmem>>, vector<256x128xf32>
      tpu.vector_store %arg8[%c0_31, %c0_32], %78 {strides = array<i32>} : memref<256x128xf32, #tpu.memory_space<vmem>>, vector<256x128xf32>,
    } else {
    }
    %c0 = arith.constant 0 : index
    %c0_1 = arith.constant 0 : index
    %3 = vector.load %arg2[%c0, %c0_1] : memref<2x128xf32, #tpu.memory_space<vmem>>, vector<2x128xf32>
    %c0_2 = arith.constant 0 : index
    %c0_3 = arith.constant 0 : index
    %4 = vector.load %arg1[%c0_2, %c0_3] : memref<256x128xf32, #tpu.memory_space<vmem>>, vector<256x128xf32>
    %5 = vector.extract_strided_slice %3 {offsets = [0, 0], sizes = [1, 128], strides = [1, 1]} : vector<2x128xf32> to vector<1x128xf32>
    %6 = vector.extract_strided_slice %3 {offsets = [1, 0], sizes = [1, 128], strides = [1, 1]} : vector<2x128xf32> to vector<1x128xf32>
    %cst = arith.constant dense<0.000000e+00> : vector<256xf32>
    %7 = vector.multi_reduction <add>, %4, %cst [1] : vector<256x128xf32> to vector<256xf32>
    %8 = vector.shape_cast %7 : vector<256xf32> to vector<256x1xf32>
    %cst_4 = arith.constant 3.125000e-02 : f32
    %9 = vector.broadcast %cst_4 : f32 to vector<256x1xf32>
    %10 = arith.mulf %8, %9 : vector<256x1xf32>
    %11 = vector.broadcast %10 : vector<256x1xf32> to vector<256x128xf32>
    %12 = arith.subf %4, %11 : vector<256x128xf32>
    %13 = tpu.iota {dimensions = array<i32: 1>} : vector<1x128xi32>
    %c32_i32 = arith.constant 32 : i32
    %14 = vector.broadcast %c32_i32 : i32 to vector<1x128xi32>
    %15 = arith.cmpi slt, %13, %14 : vector<1x128xi32>
    %cst_5 = arith.constant 0.000000e+00 : f32
    %16 = vector.shape_cast %15 : vector<1x128xi1> to vector<1x128xi1>
    %17 = vector.broadcast %16 : vector<1x128xi1> to vector<256x128xi1>
    %18 = vector.broadcast %cst_5 : f32 to vector<256x128xf32>
    %19 = arith.select %17, %12, %18 : vector<256x128xi1>, vector<256x128xf32>
    %20 = arith.mulf %19, %19 : vector<256x128xf32>
    %cst_6 = arith.constant dense<0.000000e+00> : vector<256xf32>
    %21 = vector.multi_reduction <add>, %20, %cst_6 [1] : vector<256x128xf32> to vector<256xf32>
    %22 = vector.shape_cast %21 : vector<256xf32> to vector<256x1xf32>
    %cst_7 = arith.constant 3.125000e-02 : f32
    %23 = vector.broadcast %cst_7 : f32 to vector<256x1xf32>
    %24 = arith.mulf %22, %23 : vector<256x1xf32>
    %cst_8 = arith.constant 9.99999974E-6 : f32
    %25 = vector.broadcast %cst_8 : f32 to vector<256x1xf32>
    %26 = arith.addf %24, %25 : vector<256x1xf32>
    %27 = math.rsqrt %26 : vector<256x1xf32>
    %28 = vector.broadcast %27 : vector<256x1xf32> to vector<256x128xf32>
    %29 = arith.mulf %19, %28 : vector<256x128xf32>
    %30 = vector.broadcast %5 : vector<1x128xf32> to vector<256x128xf32>
    %31 = arith.mulf %29, %30 : vector<256x128xf32>
    %32 = vector.broadcast %6 : vector<1x128xf32> to vector<256x128xf32>
    %33 = arith.addf %31, %32 : vector<256x128xf32>
    %34 = tpu.iota {dimensions = array<i32: 0>} : vector<256x1xi32>
    %c2_i32 = arith.constant 2 : i32
    %35 = tpu.dynamic_rotate %33 by %c2_i32 dim 0 : vector<256x128xf32>, i32 -> vector<256x128xf32>
    %c2_i32_9 = arith.constant 2 : i32
    %36 = vector.broadcast %c2_i32_9 : i32 to vector<256x1xi32>
    %37 = arith.cmpi slt, %34, %36 : vector<256x1xi32>
    %c0_10 = arith.constant 0 : index
    %c0_11 = arith.constant 0 : index
    %38 = vector.load %arg8[%c0_10, %c0_11] : memref<256x128xf32, #tpu.memory_space<vmem>>, vector<256x128xf32>
    %39 = vector.shape_cast %37 : vector<256x1xi1> to vector<256x1xi1>
    %40 = vector.broadcast %39 : vector<256x1xi1> to vector<256x128xi1>
    %41 = arith.select %40, %38, %35 : vector<256x128xi1>, vector<256x128xf32>
    %c0_12 = arith.constant 0 : index
    %c0_13 = arith.constant 0 : index
    %42 = vector.load %arg8[%c0_12, %c0_13] : memref<256x128xf32, #tpu.memory_space<vmem>>, vector<256x128xf32>
    tpu.vector_store %arg8[%c0_12, %c0_13], %35 {strides = array<i32>} : memref<256x128xf32, #tpu.memory_space<vmem>>, vector<256x128xf32>,
    %c0_14 = arith.constant 0 : index
    %c0_15 = arith.constant 0 : index
    %43 = vector.load %arg3[%c0_14, %c0_15] : memref<2x128xf32, #tpu.memory_space<vmem>>, vector<2x128xf32>
    %44 = vector.extract_strided_slice %43 {offsets = [0, 0], sizes = [1, 128], strides = [1, 1]} : vector<2x128xf32> to vector<1x128xf32>
    %45 = vector.extract_strided_slice %43 {offsets = [1, 0], sizes = [1, 128], strides = [1, 1]} : vector<2x128xf32> to vector<1x128xf32>
    %46 = vector.broadcast %44 : vector<1x128xf32> to vector<256x128xf32>
    %47 = arith.mulf %33, %46 : vector<256x128xf32>
    %cst_16 = arith.constant 1.000000e+00 : f32
    %48 = vector.broadcast %cst_16 : f32 to vector<1x128xf32>
    %49 = arith.subf %48, %44 : vector<1x128xf32>
    %50 = vector.broadcast %49 : vector<1x128xf32> to vector<256x128xf32>
    %51 = arith.mulf %41, %50 : vector<256x128xf32>
    %52 = arith.addf %47, %51 : vector<256x128xf32>
    %53 = vector.broadcast %45 : vector<1x128xf32> to vector<256x128xf32>
    %54 = arith.mulf %33, %53 : vector<256x128xf32>
    %cst_17 = arith.constant 1.000000e+00 : f32
    %55 = vector.broadcast %cst_17 : f32 to vector<1x128xf32>
    %56 = arith.subf %55, %45 : vector<1x128xf32>
    %57 = vector.broadcast %56 : vector<1x128xf32> to vector<256x128xf32>
    %58 = arith.mulf %41, %57 : vector<256x128xf32>
    %59 = arith.addf %54, %58 : vector<256x128xf32>
    %60 = arith.truncf %52 : vector<256x128xf32> to vector<256x128xbf16>
    %c0_18 = arith.constant 0 : index
    %c0_19 = arith.constant 0 : index
    %61 = vector.load %arg4[%c0_18, %c0_19] : memref<128x128xbf16, #tpu.memory_space<vmem>>, vector<128x128xbf16>
    %cst_20 = arith.constant dense<0.000000e+00> : vector<256x128xf32>
    %62 = tpu.matmul %60, %61, %cst_20 {dimension_numbers = #tpu.dot_dimension_numbers<[1], [0], [0], [1], [0, 0, 1, 1], [], []>} : vector<256x128xbf16>, vector<128x128xbf16>, vector<256x128xf32> -> vector<256x128xf32>
    %cst_21 = arith.constant 0.000000e+00 : f32
    %63 = vector.broadcast %cst_21 : f32 to vector<256x128xf32>
    %64 = arith.maximumf %62, %63 : vector<256x128xf32>
    %65 = arith.mulf %64, %64 : vector<256x128xf32>
    %66 = arith.truncf %65 : vector<256x128xf32> to vector<256x128xbf16>
    %c0_22 = arith.constant 0 : index
    %c0_23 = arith.constant 0 : index
    %67 = vector.load %arg6[%c0_22, %c0_23] : memref<256x128xbf16, #tpu.memory_space<vmem>>, vector<256x128xbf16>
    tpu.vector_store %arg6[%c0_22, %c0_23], %66 {strides = array<i32>} : memref<256x128xbf16, #tpu.memory_space<vmem>>, vector<256x128xbf16>,
    %68 = arith.truncf %59 : vector<256x128xf32> to vector<256x128xbf16>
    %c0_24 = arith.constant 0 : index
    %c0_25 = arith.constant 0 : index
    %69 = vector.load %arg5[%c0_24, %c0_25] : memref<128x128xbf16, #tpu.memory_space<vmem>>, vector<128x128xbf16>
    %cst_26 = arith.constant dense<0.000000e+00> : vector<256x128xf32>
    %70 = tpu.matmul %68, %69, %cst_26 {dimension_numbers = #tpu.dot_dimension_numbers<[1], [0], [0], [1], [0, 0, 1, 1], [], []>} : vector<256x128xbf16>, vector<128x128xbf16>, vector<256x128xf32> -> vector<256x128xf32>
    %71 = arith.negf %70 : vector<256x128xf32>
    %72 = math.exp %71 : vector<256x128xf32>
    %cst_27 = arith.constant 1.000000e+00 : f32
    %73 = vector.broadcast %cst_27 : f32 to vector<256x128xf32>
    %74 = arith.addf %73, %72 : vector<256x128xf32>
    %75 = arith.divf %73, %74 : vector<256x128xf32>
    %76 = arith.truncf %75 : vector<256x128xf32> to vector<256x128xbf16>
    %c0_28 = arith.constant 0 : index
    %c0_29 = arith.constant 0 : index
    %77 = vector.load %arg7[%c0_28, %c0_29] : memref<256x128xbf16, #tpu.memory_space<vmem>>, vector<256x128xbf16>
    tpu.vector_store %arg7[%c0_28, %c0_29], %76 {strides = array<i32>} : memref<256x128xbf16, #tpu.memory_space<vmem>>, vector<256x128xbf16>,
    return
  }
  func.func @transform_0(%arg0: i32) -> (i32, i32) {
    %c0_i32 = arith.constant 0 : i32
    %c0_i32_0 = arith.constant 0 : i32
    return %arg0, %c0_i32 : i32, i32
  }
  func.func @transform_1(%arg0: i32) -> (i32, i32) {
    %c0_i32 = arith.constant 0 : i32
    %c0_i32_0 = arith.constant 0 : i32
    %c0_i32_1 = arith.constant 0 : i32
    return %c0_i32, %c0_i32_0 : i32, i32
  }
  func.func @transform_2(%arg0: i32) -> (i32, i32) {
    %c0_i32 = arith.constant 0 : i32
    %c0_i32_0 = arith.constant 0 : i32
    %c0_i32_1 = arith.constant 0 : i32
    return %c0_i32, %c0_i32_0 : i32, i32
  }
  func.func @transform_3(%arg0: i32) -> (i32, i32) {
    %c0_i32 = arith.constant 0 : i32
    %c0_i32_0 = arith.constant 0 : i32
    %c0_i32_1 = arith.constant 0 : i32
    return %c0_i32, %c0_i32_0 : i32, i32
  }
  func.func @transform_4(%arg0: i32) -> (i32, i32) {
    %c0_i32 = arith.constant 0 : i32
    %c0_i32_0 = arith.constant 0 : i32
    %c0_i32_1 = arith.constant 0 : i32
    return %c0_i32, %c0_i32_0 : i32, i32
  }
  func.func @transform_5(%arg0: i32) -> (i32, i32) {
    %c0_i32 = arith.constant 0 : i32
    %c0_i32_0 = arith.constant 0 : i32
    return %arg0, %c0_i32 : i32, i32
  }
  func.func @transform_6(%arg0: i32) -> (i32, i32) {
    %c0_i32 = arith.constant 0 : i32
    %c0_i32_0 = arith.constant 0 : i32
    return %arg0, %c0_i32 : i32, i32
  }
}

module attributes {stable_mosaic.version = 11 : i64} {
  func.func @_ffn_out_kernel(%arg0: i32, %arg1: memref<256x128xbf16, #tpu.memory_space<vmem>>, %arg2: memref<256x128xbf16, #tpu.memory_space<vmem>>, %arg3: memref<256x128xf32, #tpu.memory_space<vmem>>, %arg4: memref<128x128xbf16, #tpu.memory_space<vmem>>, %arg5: memref<256x128xf32, #tpu.memory_space<vmem>>) attributes {dimension_semantics = [#tpu.dimension_semantics<parallel>], iteration_bounds = array<i64: 1>, scalar_prefetch = 0 : i64, scratch_operands = 0 : i64, tpu.core_type = #tpu.core_type<tc>, window_params = [{transform_indices = @transform_0, window_bounds = array<i64: 256, 128>}, {transform_indices = @transform_1, window_bounds = array<i64: 256, 128>}, {transform_indices = @transform_2, window_bounds = array<i64: 256, 128>}, {pipeline_mode = #tpu.pipeline_mode<synchronous>, transform_indices = @transform_3, window_bounds = array<i64: 128, 128>}, {transform_indices = @transform_4, window_bounds = array<i64: 256, 128>}]} {
    %c0 = arith.constant 0 : index
    %c0_0 = arith.constant 0 : index
    %0 = vector.load %arg1[%c0, %c0_0] : memref<256x128xbf16, #tpu.memory_space<vmem>>, vector<256x128xbf16>
    %c0_1 = arith.constant 0 : index
    %c0_2 = arith.constant 0 : index
    %1 = vector.load %arg4[%c0_1, %c0_2] : memref<128x128xbf16, #tpu.memory_space<vmem>>, vector<128x128xbf16>
    %cst = arith.constant dense<0.000000e+00> : vector<256x128xf32>
    %2 = tpu.matmul %0, %1, %cst {dimension_numbers = #tpu.dot_dimension_numbers<[1], [0], [0], [1], [0, 0, 1, 1], [], []>} : vector<256x128xbf16>, vector<128x128xbf16>, vector<256x128xf32> -> vector<256x128xf32>
    %c0_3 = arith.constant 0 : index
    %c0_4 = arith.constant 0 : index
    %3 = vector.load %arg3[%c0_3, %c0_4] : memref<256x128xf32, #tpu.memory_space<vmem>>, vector<256x128xf32>
    %c0_5 = arith.constant 0 : index
    %c0_6 = arith.constant 0 : index
    %4 = vector.load %arg2[%c0_5, %c0_6] : memref<256x128xbf16, #tpu.memory_space<vmem>>, vector<256x128xbf16>
    %5 = arith.extf %4 : vector<256x128xbf16> to vector<256x128xf32>
    %6 = arith.mulf %5, %2 : vector<256x128xf32>
    %7 = arith.addf %3, %6 : vector<256x128xf32>
    %c0_7 = arith.constant 0 : index
    %c0_8 = arith.constant 0 : index
    %8 = vector.load %arg5[%c0_7, %c0_8] : memref<256x128xf32, #tpu.memory_space<vmem>>, vector<256x128xf32>
    tpu.vector_store %arg5[%c0_7, %c0_8], %7 {strides = array<i32>} : memref<256x128xf32, #tpu.memory_space<vmem>>, vector<256x128xf32>,
    return
  }
  func.func @transform_0(%arg0: i32) -> (i32, i32) {
    %c0_i32 = arith.constant 0 : i32
    %c0_i32_0 = arith.constant 0 : i32
    return %arg0, %c0_i32 : i32, i32
  }
  func.func @transform_1(%arg0: i32) -> (i32, i32) {
    %c0_i32 = arith.constant 0 : i32
    %c0_i32_0 = arith.constant 0 : i32
    return %arg0, %c0_i32 : i32, i32
  }
  func.func @transform_2(%arg0: i32) -> (i32, i32) {
    %c0_i32 = arith.constant 0 : i32
    %c0_i32_0 = arith.constant 0 : i32
    return %arg0, %c0_i32 : i32, i32
  }
  func.func @transform_3(%arg0: i32) -> (i32, i32) {
    %c0_i32 = arith.constant 0 : i32
    %c0_i32_0 = arith.constant 0 : i32
    %c0_i32_1 = arith.constant 0 : i32
    return %c0_i32, %c0_i32_0 : i32, i32
  }
  func.func @transform_4(%arg0: i32) -> (i32, i32) {
    %c0_i32 = arith.constant 0 : i32
    %c0_i32_0 = arith.constant 0 : i32
    return %arg0, %c0_i32 : i32, i32
  }
}

</mosaic_0001>

<bundles_post_ra>
// kernel: rwkv_encoder_forward.13
= control target key start
LH: loop header
LB: loop body
LE: loop exit
PB: predicated region body
PF: predicated region fallthrough
CT: control target
= control target key end

     0   :  { %v181_v0 = vmov 0.0   ;;  %vm182_vm0 = vmmov 0   ;;  %vm127_vm1 = vcmask 261120   ;;  %s236_s1 = inlined_call_operand.vmem [shape: bf16[128,32], index: 1, kind: input, shape index: {}]   ;;  %s237_s0 = inlined_call_operand.vmem [shape: bf16[8,128], index: 0, kind: input, shape index: {}]   ;;  %s238_s2 = inlined_call_operand.vmem [shape: f32[1,32], index: 2, kind: input, shape index: {}]   ;;  %s239_s3 = inlined_call_operand.vmem [shape: f32[8,32], index: 3, kind: output, shape index: {}]  }
   0x1   :  { %151 = vmatprep.subr.bf16.mxu0 %v181_v0  ;;  %v173_v1 = vld [vmem:[%s236_s1] sm:$0xff]   ;;  %167 = vmatprep.mubr.msk.bf16.mxu0 %vm182_vm0, %v181_v0  ;;  %v174_v2 = vld [vmem:[%s236_s1 + $0x8] sm:$0xff]   ;;  %v175_v3 = vld [vmem:[%s236_s1 + $0x10] sm:$0xff]  }
   0x2   :  { %152 = vmatpush3.bf16.msra.mxu0 %v173_v1  ;;  %v176_v4 = vld [vmem:[%s236_s1 + $0x18] sm:$0xff]   ;;  %v177_v5 = vld [vmem:[%s236_s1 + $0x20] sm:$0xff]   ;;  %v178_v6 = vld [vmem:[%s236_s1 + $0x28] sm:$0xff]  }
   0x3   :  { %153 = vmatprep.subr.bf16.mxu0 %v181_v0  ;;  %v179_v7 = vld [vmem:[%s236_s1 + $0x30] sm:$0xff]   ;;  %v180_v8 = vld [vmem:[%s236_s1 + $0x38] sm:$0xff]   ;;  %v15_v9 = vld [vmem:[%s237_s0] sm:$0xf] }
   0x4   :  { %v133_v10 = vld [vmem:[%s238_s2] ss:$0 sm:$0xff] }
   0x6   :  { %154 = vmatpush3.bf16.msra.mxu0 %v174_v2 }
   0x7   :  { %155 = vmatprep.subr.bf16.mxu0 %v181_v0 }
   0xa   :  { %156 = vmatpush3.bf16.msra.mxu0 %v175_v3 }
   0xb   :  { %157 = vmatprep.subr.bf16.mxu0 %v181_v0 }
   0xe   :  { %158 = vmatpush3.bf16.msra.mxu0 %v176_v4 }
   0xf   :  { %159 = vmatprep.subr.bf16.mxu0 %v181_v0 }
  0x12   :  { %160 = vmatpush3.bf16.msra.mxu0 %v177_v5 }
  0x13   :  { %161 = vmatprep.subr.bf16.mxu0 %v181_v0 }
  0x16   :  { %162 = vmatpush3.bf16.msra.mxu0 %v178_v6 }
  0x17   :  { %163 = vmatprep.subr.bf16.mxu0 %v181_v0 }
  0x1a   :  { %164 = vmatpush3.bf16.msra.mxu0 %v179_v7 }
  0x1b   :  { %165 = vmatprep.subr.bf16.mxu0 %v181_v0 }
  0x1e   :  { %166 = vmatpush3.bf16.msra.mxu0 %v180_v8 }
  0x21   :  { %168 = vmatmul.mubr.bf16.vlgmr.msra.gmra.mrb[0].mxu0 %v15_v9 }
  0xf4   :  { %v121_v11 = vpop.f32.mrb[0].mxu0 }
  0xf5   :  { %v122_v12 = vadd.f32 %v133_v10, %v121_v11  ;;  %v169_v13 = vpop.f32.mrb[1].mxu0 }
  0xf6   :  { %v124_v14 = vpop.f32.mrb[2].mxu0 }
  0xf7   :  { %128 = vst.msk [vmem:[%s239_s3] sm:$0xff] %vm127_vm1, %v122_v12  ;;  %v170_v15 = vpop.f32.mrb[3].mxu0 }

// kernel: rwkv_encoder_forward.14
= control target key start
LH: loop header
LB: loop body
LE: loop exit
PB: predicated region body
PF: predicated region fallthrough
CT: control target
= control target key end

     0   :  { %v172_v32 = vlaneseq  ;;  %s1240_s0 = inlined_call_operand.vmem [shape: f32[256,128], index: 0, kind: input, shape index: {}]   ;;  %s1241_s1 = inlined_call_operand.vmem [shape: f32[2,128], index: 1, kind: input, shape index: {}]   ;;  %s1242_s2 = inlined_call_operand.vmem [shape: f32[256,128], index: 2, kind: output, shape index: {}]  }
   0x1   :  { %v623_v0 = vld [vmem:[%s1240_s0] sm:$0xff]  ;;  %v628_v1 = vld [vmem:[%s1240_s0 + $0x10] sm:$0xff]  ;;  %v635_v2 = vld [vmem:[%s1240_s0 + $0x8] sm:$0xff] }
   0x2   :  { %44 = vadd.xlane.f32.xlu0 %v623_v0  ;;  %48 = vadd.xlane.f32.xlu1 %v628_v1  ;;  %v640_v3 = vld [vmem:[%s1240_s0 + $0x18] sm:$0xff]  ;;  %v647_v4 = vld [vmem:[%s1240_s0 + $0x20] sm:$0xff]  ;;  %v652_v5 = vld [vmem:[%s1240_s0 + $0x28] sm:$0xff]  ;;  %v813_v33 = vand.u32 127, %v172_v32 }
   0x3   :  { %v659_v6 = vld [vmem:[%s1240_s0 + $0x30] sm:$0xff]  ;;  %v664_v7 = vld [vmem:[%s1240_s0 + $0x38] sm:$0xff]  ;;  %v671_v8 = vld [vmem:[%s1240_s0 + $0x40] sm:$0xff] }
   0x4   :  { %v676_v9 = vld [vmem:[%s1240_s0 + $0x48] sm:$0xff]  ;;  %v683_v10 = vld [vmem:[%s1240_s0 + $0x50] sm:$0xff]  ;;  %v688_v11 = vld [vmem:[%s1240_s0 + $0x58] sm:$0xff]  ;;  %vm174_vm0 = vcmp.lt.s32.totalorder %v813_v33, 32  ;;  %v434_v33 = vshrl.u32 %v172_v32, 7 }
   0x5   :  { %v695_v12 = vld [vmem:[%s1240_s0 + $0x60] sm:$0xff]  ;;  %v700_v13 = vld [vmem:[%s1240_s0 + $0x68] sm:$0xff]  ;;  %v707_v14 = vld [vmem:[%s1240_s0 + $0x70] sm:$0xff] }
   0x6   :  { %46 = vadd.xlane.f32.xlu0 %v635_v2  ;;  %50 = vadd.xlane.f32.xlu1 %v640_v3  ;;  %v712_v15 = vld [vmem:[%s1240_s0 + $0x78] sm:$0xff]  ;;  %v719_v16 = vld [vmem:[%s1240_s0 + $0x80] sm:$0xff]  ;;  %v724_v17 = vld [vmem:[%s1240_s0 + $0x88] sm:$0xff] }
   0x7   :  { %v731_v18 = vld [vmem:[%s1240_s0 + $0x90] sm:$0xff]  ;;  %v736_v19 = vld [vmem:[%s1240_s0 + $0x98] sm:$0xff]  ;;  %v743_v20 = vld [vmem:[%s1240_s0 + $0xa0] sm:$0xff] }
   0x8   :  { %v748_v21 = vld [vmem:[%s1240_s0 + $0xa8] sm:$0xff]  ;;  %v755_v22 = vld [vmem:[%s1240_s0 + $0xb0] sm:$0xff]  ;;  %v760_v23 = vld [vmem:[%s1240_s0 + $0xb8] sm:$0xff] }
   0x9   :  { %v767_v24 = vld [vmem:[%s1240_s0 + $0xc0] sm:$0xff]  ;;  %v772_v25 = vld [vmem:[%s1240_s0 + $0xc8] sm:$0xff]  ;;  %v779_v26 = vld [vmem:[%s1240_s0 + $0xd0] sm:$0xff] }
   0xa   :  { %52 = vadd.xlane.f32.xlu0 %v647_v4  ;;  %54 = vadd.xlane.f32.xlu1 %v652_v5  ;;  %v784_v27 = vld [vmem:[%s1240_s0 + $0xd8] sm:$0xff]  ;;  %v791_v28 = vld [vmem:[%s1240_s0 + $0xe0] sm:$0xff]  ;;  %v796_v29 = vld [vmem:[%s1240_s0 + $0xe8] sm:$0xff] }
   0xb   :  { %v803_v30 = vld [vmem:[%s1240_s0 + $0xf0] sm:$0xff]  ;;  %v808_v31 = vld [vmem:[%s1240_s0 + $0xf8] sm:$0xff] }
   0xe   :  { %56 = vadd.xlane.f32.xlu0 %v659_v6  ;;  %58 = vadd.xlane.f32.xlu1 %v664_v7 }
  0x12   :  { %60 = vadd.xlane.f32.xlu0 %v671_v8  ;;  %62 = vadd.xlane.f32.xlu1 %v676_v9 }
  0x16   :  { %64 = vadd.xlane.f32.xlu0 %v683_v10  ;;  %66 = vadd.xlane.f32.xlu1 %v688_v11 }
  0x1a   :  { %68 = vadd.xlane.f32.xlu0 %v695_v12  ;;  %70 = vadd.xlane.f32.xlu1 %v700_v13 }
  0x1e   :  { %72 = vadd.xlane.f32.xlu0 %v707_v14  ;;  %74 = vadd.xlane.f32.xlu1 %v712_v15 }
  0x22   :  { %76 = vadd.xlane.f32.xlu0 %v719_v16  ;;  %78 = vadd.xlane.f32.xlu1 %v724_v17 }
  0x26   :  { %80 = vadd.xlane.f32.xlu0 %v731_v18  ;;  %82 = vadd.xlane.f32.xlu1 %v736_v19 }
  0x2a   :  { %84 = vadd.xlane.f32.xlu0 %v743_v20  ;;  %86 = vadd.xlane.f32.xlu1 %v748_v21 }
  0x2e   :  { %88 = vadd.xlane.f32.xlu0 %v755_v22  ;;  %90 = vadd.xlane.f32.xlu1 %v760_v23 }
  0x32   :  { %92 = vadd.xlane.f32.xlu0 %v767_v24  ;;  %94 = vadd.xlane.f32.xlu1 %v772_v25 }
  0x36   :  { %96 = vadd.xlane.f32.xlu0 %v779_v26  ;;  %98 = vadd.xlane.f32.xlu1 %v784_v27 }
  0x3a   :  { %100 = vadd.xlane.f32.xlu0 %v791_v28  ;;  %102 = vadd.xlane.f32.xlu1 %v796_v29 }
  0x3e   :  { %104 = vadd.xlane.f32.xlu0 %v803_v30  ;;  %106 = vadd.xlane.f32.xlu1 %v808_v31 }
  0x8f   :  { %v45_v34 = vpop.xlane.xlu0 %44  ;;  %v49_v35 = vpop.xlane.xlu1 %48 }
  0x90   :  { %v108_v36 = vmul.f32 0.03125, %v45_v34  ;;  %v110_v37 = vmul.f32 0.03125, %v49_v35 }
  0x92   :  { %v140_v38 = vsub.f32 %v623_v0, %v108_v36  ;;  %v142_v39 = vsub.f32 %v628_v1, %v110_v37 }
  0x93   :  { %v47_v40 = vpop.xlane.xlu0 %46  ;;  %v51_v41 = vpop.xlane.xlu1 %50 }
  0x94   :  { %v109_v42 = vmul.f32 0.03125, %v47_v40  ;;  %v111_v43 = vmul.f32 0.03125, %v51_v41  ;;  %v820_v44 = vsel %vm174_vm0, %v140_v38, 0.0  ;;  %v824_v45 = vsel %vm174_vm0, %v142_v39, 0.0 }
  0x95   :  { %v209_v46 = vmul.f32 %v820_v44, %v820_v44  ;;  %v211_v51 = vmul.f32 %v824_v45, %v824_v45 }
  0x96   :  { %v141_v47 = vsub.f32 %v635_v2, %v109_v42  ;;  %v143_v48 = vsub.f32 %v640_v3, %v111_v43 }
  0x97   :  { %241 = vadd.xlane.f32.xlu0 %v209_v46  ;;  %v53_v49 = vpop.xlane.xlu0 %52  ;;  %v55_v50 = vpop.xlane.xlu1 %54 }
  0x98   :  { %v112_v52 = vmul.f32 0.03125, %v53_v49  ;;  %v113_v53 = vmul.f32 0.03125, %v55_v50  ;;  %v834_v54 = vsel %vm174_vm0, %v141_v47, 0.0  ;;  %v838_v55 = vsel %vm174_vm0, %v143_v48, 0.0 }
  0x99   :  { %v210_v56 = vmul.f32 %v834_v54, %v834_v54  ;;  %v212_v61 = vmul.f32 %v838_v55, %v838_v55 }
  0x9a   :  { %v144_v57 = vsub.f32 %v647_v4, %v112_v52  ;;  %v145_v58 = vsub.f32 %v652_v5, %v113_v53 }
  0x9b   :  { %245 = vadd.xlane.f32.xlu0 %v211_v51  ;;  %243 = vadd.xlane.f32.xlu1 %v210_v56  ;;  %v57_v59 = vpop.xlane.xlu0 %56  ;;  %v59_v60 = vpop.xlane.xlu1 %58 }
  0x9c   :  { %v114_v62 = vmul.f32 0.03125, %v57_v59  ;;  %v115_v63 = vmul.f32 0.03125, %v59_v60  ;;  %v848_v0 = vsel %vm174_vm0, %v144_v57, 0.0  ;;  %v852_v1 = vsel %vm174_vm0, %v145_v58, 0.0 }
  0x9d   :  { %v213_v2 = vmul.f32 %v848_v0, %v848_v0  ;;  %v214_v35 = vmul.f32 %v852_v1, %v852_v1 }
  0x9e   :  { %v146_v3 = vsub.f32 %v659_v6, %v114_v62  ;;  %v147_v4 = vsub.f32 %v664_v7, %v115_v63 }
  0x9f   :  { %247 = vadd.xlane.f32.xlu1 %v212_v61  ;;  %249 = vadd.xlane.f32.xlu0 %v213_v2  ;;  %v61_v5 = vpop.xlane.xlu0 %60  ;;  %v63_v34 = vpop.xlane.xlu1 %62 }
  0xa0   :  { %v116_v36 = vmul.f32 0.03125, %v61_v5  ;;  %v117_v37 = vmul.f32 0.03125, %v63_v34  ;;  %v862_v38 = vsel %vm174_vm0, %v146_v3, 0.0  ;;  %v866_v39 = vsel %vm174_vm0, %v147_v4, 0.0 }
  0xa1   :  { %v215_v6 = vmul.f32 %v862_v38, %v862_v38  ;;  %v216_v43 = vmul.f32 %v866_v39, %v866_v39 }
  0xa2   :  { %v148_v7 = vsub.f32 %v671_v8, %v116_v36  ;;  %v149_v40 = vsub.f32 %v676_v9, %v117_v37 }
  0xa3   :  { %251 = vadd.xlane.f32.xlu1 %v214_v35  ;;  %253 = vadd.xlane.f32.xlu0 %v215_v6  ;;  %v65_v41 = vpop.xlane.xlu0 %64  ;;  %v67_v42 = vpop.xlane.xlu1 %66 }
  0xa4   :  { %v118_v46 = vmul.f32 0.03125, %v65_v41  ;;  %v119_v47 = vmul.f32 0.03125, %v67_v42  ;;  %v876_v48 = vsel %vm174_vm0, %v148_v7, 0.0  ;;  %v880_v49 = vsel %vm174_vm0, %v149_v40, 0.0 }
  0xa5   :  { %v217_v8 = vmul.f32 %v876_v48, %v876_v48  ;;  %v218_v53 = vmul.f32 %v880_v49, %v880_v49 }
  0xa6   :  { %v150_v9 = vsub.f32 %v683_v10, %v118_v46  ;;  %v151_v50 = vsub.f32 %v688_v11, %v119_v47 }
  0xa7   :  { %255 = vadd.xlane.f32.xlu1 %v216_v43  ;;  %257 = vadd.xlane.f32.xlu0 %v217_v8  ;;  %v69_v51 = vpop.xlane.xlu0 %68  ;;  %v71_v52 = vpop.xlane.xlu1 %70 }
  0xa8   :  { %v120_v56 = vmul.f32 0.03125, %v69_v51  ;;  %v121_v57 = vmul.f32 0.03125, %v71_v52  ;;  %v890_v58 = vsel %vm174_vm0, %v150_v9, 0.0  ;;  %v894_v59 = vsel %vm174_vm0, %v151_v50, 0.0 }
  0xa9   :  { %v219_v10 = vmul.f32 %v890_v58, %v890_v58  ;;  %v220_v63 = vmul.f32 %v894_v59, %v894_v59 }
  0xaa   :  { %v152_v11 = vsub.f32 %v695_v12, %v120_v56  ;;  %v153_v60 = vsub.f32 %v700_v13, %v121_v57 }
  0xab   :  { %259 = vadd.xlane.f32.xlu1 %v218_v53  ;;  %261 = vadd.xlane.f32.xlu0 %v219_v10  ;;  %v73_v61 = vpop.xlane.xlu0 %72  ;;  %v75_v62 = vpop.xlane.xlu1 %74 }
  0xac   :  { %v122_v2 = vmul.f32 0.03125, %v73_v61  ;;  %v123_v3 = vmul.f32 0.03125, %v75_v62  ;;  %v904_v4 = vsel %vm174_vm0, %v152_v11, 0.0  ;;  %v908_v5 = vsel %vm174_vm0, %v153_v60, 0.0 }
  0xad   :  { %v221_v12 = vmul.f32 %v904_v4, %v904_v4  ;;  %v222_v37 = vmul.f32 %v908_v5, %v908_v5 }
  0xae   :  { %v154_v13 = vsub.f32 %v707_v14, %v122_v2  ;;  %v155_v34 = vsub.f32 %v712_v15, %v123_v3 }
  0xaf   :  { %263 = vadd.xlane.f32.xlu1 %v220_v63  ;;  %265 = vadd.xlane.f32.xlu0 %v221_v12  ;;  %v77_v35 = vpop.xlane.xlu0 %76  ;;  %v79_v36 = vpop.xlane.xlu1 %78 }
  0xb0   :  { %v124_v6 = vmul.f32 0.03125, %v77_v35  ;;  %v125_v7 = vmul.f32 0.03125, %v79_v36  ;;  %v918_v40 = vsel %vm174_vm0, %v154_v13, 0.0  ;;  %v922_v41 = vsel %vm174_vm0, %v155_v34, 0.0 }
  0xb1   :  { %v223_v14 = vmul.f32 %v918_v40, %v918_v40  ;;  %v224_v47 = vmul.f32 %v922_v41, %v922_v41 }
  0xb2   :  { %v156_v15 = vsub.f32 %v719_v16, %v124_v6  ;;  %v157_v42 = vsub.f32 %v724_v17, %v125_v7 }
  0xb3   :  { %267 = vadd.xlane.f32.xlu1 %v222_v37  ;;  %269 = vadd.xlane.f32.xlu0 %v223_v14  ;;  %v81_v43 = vpop.xlane.xlu0 %80  ;;  %v83_v46 = vpop.xlane.xlu1 %82 }
  0xb4   :  { %v126_v8 = vmul.f32 0.03125, %v81_v43  ;;  %v127_v9 = vmul.f32 0.03125, %v83_v46  ;;  %v932_v50 = vsel %vm174_vm0, %v156_v15, 0.0  ;;  %v936_v51 = vsel %vm174_vm0, %v157_v42, 0.0 }
  0xb5   :  { %v225_v16 = vmul.f32 %v932_v50, %v932_v50  ;;  %v226_v57 = vmul.f32 %v936_v51, %v936_v51 }
  0xb6   :  { %v158_v17 = vsub.f32 %v731_v18, %v126_v8  ;;  %v159_v52 = vsub.f32 %v736_v19, %v127_v9 }
  0xb7   :  { %271 = vadd.xlane.f32.xlu1 %v224_v47  ;;  %273 = vadd.xlane.f32.xlu0 %v225_v16  ;;  %v85_v53 = vpop.xlane.xlu0 %84  ;;  %v87_v56 = vpop.xlane.xlu1 %86 }
  0xb8   :  { %v128_v10 = vmul.f32 0.03125, %v85_v53  ;;  %v129_v11 = vmul.f32 0.03125, %v87_v56  ;;  %v946_v60 = vsel %vm174_vm0, %v158_v17, 0.0  ;;  %v950_v61 = vsel %vm174_vm0, %v159_v52, 0.0 }
  0xb9   :  { %v227_v18 = vmul.f32 %v946_v60, %v946_v60  ;;  %v228_v3 = vmul.f32 %v950_v61, %v950_v61 }
  0xba   :  { %v160_v19 = vsub.f32 %v743_v20, %v128_v10  ;;  %v161_v62 = vsub.f32 %v748_v21, %v129_v11 }
  0xbb   :  { %275 = vadd.xlane.f32.xlu1 %v226_v57  ;;  %277 = vadd.xlane.f32.xlu0 %v227_v18  ;;  %v89_v63 = vpop.xlane.xlu0 %88  ;;  %v91_v2 = vpop.xlane.xlu1 %90 }
  0xbc   :  { %v130_v12 = vmul.f32 0.03125, %v89_v63  ;;  %v131_v13 = vmul.f32 0.03125, %v91_v2  ;;  %v960_v34 = vsel %vm174_vm0, %v160_v19, 0.0  ;;  %v964_v35 = vsel %vm174_vm0, %v161_v62, 0.0 }
  0xbd   :  { %v229_v20 = vmul.f32 %v960_v34, %v960_v34  ;;  %v230_v7 = vmul.f32 %v964_v35, %v964_v35 }
  0xbe   :  { %v162_v21 = vsub.f32 %v755_v22, %v130_v12  ;;  %v163_v36 = vsub.f32 %v760_v23, %v131_v13 }
  0xbf   :  { %279 = vadd.xlane.f32.xlu1 %v228_v3  ;;  %281 = vadd.xlane.f32.xlu0 %v229_v20  ;;  %v93_v37 = vpop.xlane.xlu0 %92  ;;  %v95_v6 = vpop.xlane.xlu1 %94 }
  0xc0   :  { %v132_v14 = vmul.f32 0.03125, %v93_v37  ;;  %v133_v15 = vmul.f32 0.03125, %v95_v6  ;;  %v974_v42 = vsel %vm174_vm0, %v162_v21, 0.0  ;;  %v978_v43 = vsel %vm174_vm0, %v163_v36, 0.0 }
  0xc1   :  { %v231_v22 = vmul.f32 %v974_v42, %v974_v42  ;;  %v232_v9 = vmul.f32 %v978_v43, %v978_v43 }
  0xc2   :  { %v164_v23 = vsub.f32 %v767_v24, %v132_v14  ;;  %v165_v46 = vsub.f32 %v772_v25, %v133_v15 }
  0xc3   :  { %283 = vadd.xlane.f32.xlu1 %v230_v7  ;;  %285 = vadd.xlane.f32.xlu0 %v231_v22  ;;  %v97_v47 = vpop.xlane.xlu0 %96  ;;  %v99_v8 = vpop.xlane.xlu1 %98 }
  0xc4   :  { %v134_v16 = vmul.f32 0.03125, %v97_v47  ;;  %v135_v17 = vmul.f32 0.03125, %v99_v8  ;;  %v988_v52 = vsel %vm174_vm0, %v164_v23, 0.0  ;;  %v992_v53 = vsel %vm174_vm0, %v165_v46, 0.0 }
  0xc5   :  { %v233_v24 = vmul.f32 %v988_v52, %v988_v52  ;;  %v234_v11 = vmul.f32 %v992_v53, %v992_v53 }
  0xc6   :  { %v166_v25 = vsub.f32 %v779_v26, %v134_v16  ;;  %v167_v56 = vsub.f32 %v784_v27, %v135_v17 }
  0xc7   :  { %287 = vadd.xlane.f32.xlu1 %v232_v9  ;;  %289 = vadd.xlane.f32.xlu0 %v233_v24  ;;  %v101_v57 = vpop.xlane.xlu0 %100  ;;  %v103_v10 = vpop.xlane.xlu1 %102 }
  0xc8   :  { %v136_v18 = vmul.f32 0.03125, %v101_v57  ;;  %v137_v19 = vmul.f32 0.03125, %v103_v10  ;;  %v1002_v62 = vsel %vm174_vm0, %v166_v25, 0.0  ;;  %v1006_v63 = vsel %vm174_vm0, %v167_v56, 0.0 }
  0xc9   :  { %v235_v26 = vmul.f32 %v1002_v62, %v1002_v62  ;;  %v236_v13 = vmul.f32 %v1006_v63, %v1006_v63 }
  0xca   :  { %v168_v27 = vsub.f32 %v791_v28, %v136_v18  ;;  %v169_v2 = vsub.f32 %v796_v29, %v137_v19  ;;  %v11_v18 = vld [vmem:[%s1241_s1] sm:$0x3] }
  0xcb   :  { %291 = vadd.xlane.f32.xlu1 %v234_v11  ;;  %293 = vadd.xlane.f32.xlu0 %v235_v26  ;;  %v105_v3 = vpop.xlane.xlu0 %104  ;;  %v107_v12 = vpop.xlane.xlu1 %106  ;;  %v435_v11 = vsub.s32 0, %v434_v33 }
  0xcc   :  { %v138_v20 = vmul.f32 0.03125, %v105_v3  ;;  %v139_v21 = vmul.f32 0.03125, %v107_v12  ;;  %v1016_v36 = vsel %vm174_vm0, %v168_v27, 0.0  ;;  %v1020_v37 = vsel %vm174_vm0, %v169_v2, 0.0 }
  0xcd   :  { %v237_v28 = vmul.f32 %v1016_v36, %v1016_v36  ;;  %v238_v7 = vmul.f32 %v1020_v37, %v1020_v37  ;;  %v471_v27 = vsub.s32 1, %v434_v33 }
  0xce   :  { %v170_v29 = vsub.f32 %v803_v30, %v138_v20  ;;  %v171_v6 = vsub.f32 %v808_v31, %v139_v21 }
  0xcf   :  { %295 = vadd.xlane.f32.xlu1 %v236_v13  ;;  %297 = vadd.xlane.f32.xlu0 %v237_v28  ;;  %v1044_v13 = vrot.slane %v11_v18, %v435_v11 }
  0xd0   :  { %v1030_v14 = vsel %vm174_vm0, %v170_v29, 0.0  ;;  %v1034_v15 = vsel %vm174_vm0, %v171_v6, 0.0  ;;  %v1046_v29 = vrot.slane %v11_v18, %v471_v27 }
  0xd1   :  { %v239_v22 = vmul.f32 %v1030_v14, %v1030_v14  ;;  %v240_v30 = vmul.f32 %v1034_v15, %v1034_v15 }
  0xd3   :  { %299 = vadd.xlane.f32.xlu1 %v238_v7  ;;  %301 = vadd.xlane.f32.xlu0 %v239_v22 }
  0xd7   :  { %303 = vadd.xlane.f32.xlu1 %v240_v30 }
 0x124   :  { %v242_v31 = vpop.xlane.xlu0 %241 }
 0x125   :  { %v305_v23 = vmul.f32 0.03125, %v242_v31 }
 0x127   :  { %v337_v46 = vadd.f32 1e-05, %v305_v23 }
 0x128   :  { %v244_v47 = vpop.xlane.xlu1 %243  ;;  %v246_v8 = vpop.xlane.xlu0 %245 }
 0x129   :  { %541 = vrsqrt.f32 %v337_v46  ;;  %v306_v9 = vmul.f32 0.03125, %v244_v47  ;;  %v307_v16 = vmul.f32 0.03125, %v246_v8 }
 0x12b   :  { %v338_v17 = vadd.f32 1e-05, %v306_v9  ;;  %v339_v24 = vadd.f32 1e-05, %v307_v16 }
 0x12c   :  { %v248_v25 = vpop.xlane.xlu1 %247  ;;  %v250_v56 = vpop.xlane.xlu0 %249 }
 0x12d   :  { %543 = vrsqrt.f32 %v338_v17  ;;  %v308_v57 = vmul.f32 0.03125, %v248_v25  ;;  %v309_v10 = vmul.f32 0.03125, %v250_v56 }
 0x12e   :  { %545 = vrsqrt.f32 %v339_v24 }
 0x12f   :  { %v340_v19 = vadd.f32 1e-05, %v308_v57  ;;  %v341_v26 = vadd.f32 1e-05, %v309_v10 }
 0x130   :  { %v252_v2 = vpop.xlane.xlu1 %251  ;;  %v254_v3 = vpop.xlane.xlu0 %253 }
 0x131   :  { %547 = vrsqrt.f32 %v340_v19  ;;  %v310_v32 = vmul.f32 0.03125, %v252_v2  ;;  %v311_v12 = vmul.f32 0.03125, %v254_v3 }
 0x132   :  { %549 = vrsqrt.f32 %v341_v26 }
 0x133   :  { %v542_v20 = vpop.eup %541  ;;  %v342_v21 = vadd.f32 1e-05, %v310_v32  ;;  %v343_v28 = vadd.f32 1e-05, %v311_v12 }
 0x134   :  { %v401_v6 = vmul.f32 %v542_v20, %v820_v44  ;;  %v256_v7 = vpop.xlane.xlu1 %255  ;;  %v258_v22 = vpop.xlane.xlu0 %257 }
 0x135   :  { %551 = vrsqrt.f32 %v342_v21  ;;  %v312_v30 = vmul.f32 0.03125, %v256_v7  ;;  %v313_v31 = vmul.f32 0.03125, %v258_v22 }
 0x136   :  { %v437_v23 = vmul.f32 %v1044_v13, %v401_v6  ;;  %553 = vrsqrt.f32 %v343_v28 }
 0x137   :  { %v544_v46 = vpop.eup %543  ;;  %v344_v47 = vadd.f32 1e-05, %v312_v30  ;;  %v345_v8 = vadd.f32 1e-05, %v313_v31 }
 0x138   :  { %v546_v9 = vpop.eup %545  ;;  %v473_v16 = vadd.f32 %v1046_v29, %v437_v23  ;;  %v402_v33 = vmul.f32 %v544_v46, %v834_v54  ;;  %v260_v17 = vpop.xlane.xlu1 %259 }
 0x139   :  { %v262_v24 = vpop.xlane.xlu0 %261  ;;  %v403_v44 = vmul.f32 %v546_v9, %v824_v45  ;;  %555 = vrsqrt.f32 %v344_v47  ;;  %v314_v25 = vmul.f32 0.03125, %v260_v17 }
 0x13a   :  { %v315_v56 = vmul.f32 0.03125, %v262_v24  ;;  %505 = vst [vmem:[%s1242_s2] sm:$0xff] %v473_v16  ;;  %v438_v57 = vmul.f32 %v1044_v13, %v402_v33  ;;  %557 = vrsqrt.f32 %v345_v8 }
 0x13b   :  { %v548_v10 = vpop.eup %547  ;;  %v439_v11 = vmul.f32 %v1044_v13, %v403_v44  ;;  %v346_v18 = vadd.f32 1e-05, %v314_v25 }
 0x13c   :  { %v347_v19 = vadd.f32 1e-05, %v315_v56  ;;  %v550_v54 = vpop.eup %549  ;;  %v474_v26 = vadd.f32 %v1046_v29, %v438_v57  ;;  %v404_v45 = vmul.f32 %v548_v10, %v838_v55  ;;  %v264_v27 = vpop.xlane.xlu1 %263 }
 0x13d   :  { %v266_v2 = vpop.xlane.xlu0 %265  ;;  %v475_v3 = vadd.f32 %v1046_v29, %v439_v11  ;;  %v405_v32 = vmul.f32 %v550_v54, %v848_v0  ;;  %559 = vrsqrt.f32 %v346_v18  ;;  %v316_v12 = vmul.f32 0.03125, %v264_v27 }
 0x13e   :  { %506 = vst [vmem:[%s1242_s2 + $0x8] sm:$0xff] %v474_v26  ;;  %v440_v20 = vmul.f32 %v1044_v13, %v404_v45  ;;  %561 = vrsqrt.f32 %v347_v19  ;;  %v317_v21 = vmul.f32 0.03125, %v266_v2 }
 0x13f   :  { %v552_v28 = vpop.eup %551  ;;  %507 = vst [vmem:[%s1242_s2 + $0x10] sm:$0xff] %v475_v3  ;;  %v441_v55 = vmul.f32 %v1044_v13, %v405_v32  ;;  %v348_v6 = vadd.f32 1e-05, %v316_v12 }
 0x140   :  { %v554_v7 = vpop.eup %553  ;;  %v476_v0 = vadd.f32 %v1046_v29, %v440_v20  ;;  %v406_v22 = vmul.f32 %v552_v28, %v852_v1  ;;  %v349_v30 = vadd.f32 1e-05, %v317_v21  ;;  %v268_v31 = vpop.xlane.xlu1 %267 }
 0x141   :  { %v270_v23 = vpop.xlane.xlu0 %269  ;;  %v477_v46 = vadd.f32 %v1046_v29, %v441_v55  ;;  %v407_v47 = vmul.f32 %v554_v7, %v862_v38  ;;  %563 = vrsqrt.f32 %v348_v6  ;;  %v318_v8 = vmul.f32 0.03125, %v268_v31 }
 0x142   :  { %508 = vst [vmem:[%s1242_s2 + $0x18] sm:$0xff] %v476_v0  ;;  %v442_v9 = vmul.f32 %v1044_v13, %v406_v22  ;;  %565 = vrsqrt.f32 %v349_v30  ;;  %v319_v16 = vmul.f32 0.03125, %v270_v23 }
 0x143   :  { %v556_v33 = vpop.eup %555  ;;  %509 = vst [vmem:[%s1242_s2 + $0x20] sm:$0xff] %v477_v46  ;;  %v443_v1 = vmul.f32 %v1044_v13, %v407_v47  ;;  %v350_v17 = vadd.f32 1e-05, %v318_v8 }
 0x144   :  { %v558_v24 = vpop.eup %557  ;;  %v478_v38 = vadd.f32 %v1046_v29, %v442_v9  ;;  %v408_v44 = vmul.f32 %v556_v33, %v866_v39  ;;  %v351_v25 = vadd.f32 1e-05, %v319_v16  ;;  %v272_v56 = vpop.xlane.xlu1 %271 }
 0x145   :  { %v274_v57 = vpop.xlane.xlu0 %273  ;;  %v479_v10 = vadd.f32 %v1046_v29, %v443_v1  ;;  %v409_v11 = vmul.f32 %v558_v24, %v876_v48  ;;  %567 = vrsqrt.f32 %v350_v17  ;;  %v320_v18 = vmul.f32 0.03125, %v272_v56 }
 0x146   :  { %510 = vst [vmem:[%s1242_s2 + $0x28] sm:$0xff] %v478_v38  ;;  %v444_v19 = vmul.f32 %v1044_v13, %v408_v44  ;;  %569 = vrsqrt.f32 %v351_v25  ;;  %v321_v54 = vmul.f32 0.03125, %v274_v57 }
 0x147   :  { %v560_v26 = vpop.eup %559  ;;  %511 = vst [vmem:[%s1242_s2 + $0x30] sm:$0xff] %v479_v10  ;;  %v445_v39 = vmul.f32 %v1044_v13, %v409_v11  ;;  %v352_v45 = vadd.f32 1e-05, %v320_v18 }
 0x148   :  { %v562_v27 = vpop.eup %561  ;;  %v480_v48 = vadd.f32 %v1046_v29, %v444_v19  ;;  %v410_v2 = vmul.f32 %v560_v26, %v880_v49  ;;  %v353_v3 = vadd.f32 1e-05, %v321_v54  ;;  %v276_v32 = vpop.xlane.xlu1 %275 }
 0x149   :  { %v278_v12 = vpop.xlane.xlu0 %277  ;;  %v481_v20 = vadd.f32 %v1046_v29, %v445_v39  ;;  %v411_v21 = vmul.f32 %v562_v27, %v890_v58  ;;  %571 = vrsqrt.f32 %v352_v45  ;;  %v322_v28 = vmul.f32 0.03125, %v276_v32 }
 0x14a   :  { %512 = vst [vmem:[%s1242_s2 + $0x38] sm:$0xff] %v480_v48  ;;  %v446_v55 = vmul.f32 %v1044_v13, %v410_v2  ;;  %573 = vrsqrt.f32 %v353_v3  ;;  %v323_v6 = vmul.f32 0.03125, %v278_v12 }
 0x14b   :  { %v564_v7 = vpop.eup %563  ;;  %513 = vst [vmem:[%s1242_s2 + $0x40] sm:$0xff] %v481_v20  ;;  %v447_v49 = vmul.f32 %v1044_v13, %v411_v21  ;;  %v354_v0 = vadd.f32 1e-05, %v322_v28 }
 0x14c   :  { %v566_v22 = vpop.eup %565  ;;  %v482_v58 = vadd.f32 %v1046_v29, %v446_v55  ;;  %v412_v30 = vmul.f32 %v564_v7, %v894_v59  ;;  %v355_v31 = vadd.f32 1e-05, %v323_v6  ;;  %v280_v23 = vpop.xlane.xlu1 %279 }
 0x14d   :  { %v282_v46 = vpop.xlane.xlu0 %281  ;;  %v483_v47 = vadd.f32 %v1046_v29, %v447_v49  ;;  %v413_v8 = vmul.f32 %v566_v22, %v904_v4  ;;  %575 = vrsqrt.f32 %v354_v0  ;;  %v324_v9 = vmul.f32 0.03125, %v280_v23 }
 0x14e   :  { %514 = vst [vmem:[%s1242_s2 + $0x48] sm:$0xff] %v482_v58  ;;  %v448_v16 = vmul.f32 %v1044_v13, %v412_v30  ;;  %577 = vrsqrt.f32 %v355_v31  ;;  %v325_v33 = vmul.f32 0.03125, %v282_v46 }
 0x14f   :  { %v568_v1 = vpop.eup %567  ;;  %515 = vst [vmem:[%s1242_s2 + $0x50] sm:$0xff] %v483_v47  ;;  %v449_v59 = vmul.f32 %v1044_v13, %v413_v8  ;;  %v356_v17 = vadd.f32 1e-05, %v324_v9 }
 0x150   :  { %v570_v24 = vpop.eup %569  ;;  %v484_v4 = vadd.f32 %v1046_v29, %v448_v16  ;;  %v414_v38 = vmul.f32 %v568_v1, %v908_v5  ;;  %v357_v44 = vadd.f32 1e-05, %v325_v33  ;;  %v284_v25 = vpop.xlane.xlu1 %283 }
 0x151   :  { %v286_v56 = vpop.xlane.xlu0 %285  ;;  %v485_v57 = vadd.f32 %v1046_v29, %v449_v59  ;;  %v415_v10 = vmul.f32 %v570_v24, %v918_v40  ;;  %579 = vrsqrt.f32 %v356_v17  ;;  %v326_v11 = vmul.f32 0.03125, %v284_v25 }
 0x152   :  { %516 = vst [vmem:[%s1242_s2 + $0x58] sm:$0xff] %v484_v4  ;;  %v450_v18 = vmul.f32 %v1044_v13, %v414_v38  ;;  %581 = vrsqrt.f32 %v357_v44  ;;  %v327_v19 = vmul.f32 0.03125, %v286_v56 }
 0x153   :  { %v572_v54 = vpop.eup %571  ;;  %517 = vst [vmem:[%s1242_s2 + $0x60] sm:$0xff] %v485_v57  ;;  %v451_v5 = vmul.f32 %v1044_v13, %v415_v10  ;;  %v358_v26 = vadd.f32 1e-05, %v326_v11 }
 0x154   :  { %v574_v39 = vpop.eup %573  ;;  %v486_v40 = vadd.f32 %v1046_v29, %v450_v18  ;;  %v416_v45 = vmul.f32 %v572_v54, %v922_v41  ;;  %v359_v27 = vadd.f32 1e-05, %v327_v19  ;;  %v288_v48 = vpop.xlane.xlu1 %287 }
 0x155   :  { %v290_v2 = vpop.xlane.xlu0 %289  ;;  %v487_v3 = vadd.f32 %v1046_v29, %v451_v5  ;;  %v417_v32 = vmul.f32 %v574_v39, %v932_v50  ;;  %583 = vrsqrt.f32 %v358_v26  ;;  %v328_v12 = vmul.f32 0.03125, %v288_v48 }
 0x156   :  { %518 = vst [vmem:[%s1242_s2 + $0x68] sm:$0xff] %v486_v40  ;;  %v452_v20 = vmul.f32 %v1044_v13, %v416_v45  ;;  %585 = vrsqrt.f32 %v359_v27  ;;  %v329_v21 = vmul.f32 0.03125, %v290_v2 }
 0x157   :  { %v576_v28 = vpop.eup %575  ;;  %519 = vst [vmem:[%s1242_s2 + $0x70] sm:$0xff] %v487_v3  ;;  %v453_v41 = vmul.f32 %v1044_v13, %v417_v32  ;;  %v360_v55 = vadd.f32 1e-05, %v328_v12 }
 0x158   :  { %v578_v6 = vpop.eup %577  ;;  %v488_v50 = vadd.f32 %v1046_v29, %v452_v20  ;;  %v418_v7 = vmul.f32 %v576_v28, %v936_v51  ;;  %v361_v49 = vadd.f32 1e-05, %v329_v21  ;;  %v292_v0 = vpop.xlane.xlu1 %291 }
 0x159   :  { %v294_v22 = vpop.xlane.xlu0 %293  ;;  %v489_v58 = vadd.f32 %v1046_v29, %v453_v41  ;;  %v419_v30 = vmul.f32 %v578_v6, %v946_v60  ;;  %587 = vrsqrt.f32 %v360_v55  ;;  %v330_v31 = vmul.f32 0.03125, %v292_v0 }
 0x15a   :  { %520 = vst [vmem:[%s1242_s2 + $0x78] sm:$0xff] %v488_v50  ;;  %v454_v23 = vmul.f32 %v1044_v13, %v418_v7  ;;  %589 = vrsqrt.f32 %v361_v49  ;;  %v331_v46 = vmul.f32 0.03125, %v294_v22 }
 0x15b   :  { %v580_v47 = vpop.eup %579  ;;  %521 = vst [vmem:[%s1242_s2 + $0x80] sm:$0xff] %v489_v58  ;;  %v455_v51 = vmul.f32 %v1044_v13, %v419_v30  ;;  %v362_v8 = vadd.f32 1e-05, %v330_v31 }
 0x15c   :  { %v582_v9 = vpop.eup %581  ;;  %v490_v60 = vadd.f32 %v1046_v29, %v454_v23  ;;  %v420_v16 = vmul.f32 %v580_v47, %v950_v61  ;;  %v363_v33 = vadd.f32 1e-05, %v331_v46  ;;  %v296_v1 = vpop.xlane.xlu1 %295 }
 0x15d   :  { %v298_v59 = vpop.xlane.xlu0 %297  ;;  %v491_v17 = vadd.f32 %v1046_v29, %v455_v51  ;;  %v421_v24 = vmul.f32 %v582_v9, %v960_v34  ;;  %591 = vrsqrt.f32 %v362_v8  ;;  %v332_v4 = vmul.f32 0.03125, %v296_v1 }
 0x15e   :  { %522 = vst [vmem:[%s1242_s2 + $0x88] sm:$0xff] %v490_v60  ;;  %v456_v38 = vmul.f32 %v1044_v13, %v420_v16  ;;  %593 = vrsqrt.f32 %v363_v33  ;;  %v333_v44 = vmul.f32 0.03125, %v298_v59 }
 0x15f   :  { %v584_v25 = vpop.eup %583  ;;  %523 = vst [vmem:[%s1242_s2 + $0x90] sm:$0xff] %v491_v17  ;;  %v457_v61 = vmul.f32 %v1044_v13, %v421_v24  ;;  %v364_v56 = vadd.f32 1e-05, %v332_v4 }
 0x160   :  { %v586_v57 = vpop.eup %585  ;;  %v492_v34 = vadd.f32 %v1046_v29, %v456_v38  ;;  %v422_v10 = vmul.f32 %v584_v25, %v964_v35  ;;  %v365_v11 = vadd.f32 1e-05, %v333_v44  ;;  %v300_v18 = vpop.xlane.xlu1 %299 }
 0x161   :  { %v302_v19 = vpop.xlane.xlu0 %301  ;;  %v493_v54 = vadd.f32 %v1046_v29, %v457_v61  ;;  %v423_v5 = vmul.f32 %v586_v57, %v974_v42  ;;  %595 = vrsqrt.f32 %v364_v56  ;;  %v334_v26 = vmul.f32 0.03125, %v300_v18 }
 0x162   :  { %524 = vst [vmem:[%s1242_s2 + $0x98] sm:$0xff] %v492_v34  ;;  %v458_v39 = vmul.f32 %v1044_v13, %v422_v10  ;;  %597 = vrsqrt.f32 %v365_v11  ;;  %v335_v40 = vmul.f32 0.03125, %v302_v19 }
 0x163   :  { %v588_v45 = vpop.eup %587  ;;  %525 = vst [vmem:[%s1242_s2 + $0xa0] sm:$0xff] %v493_v54  ;;  %v459_v35 = vmul.f32 %v1044_v13, %v423_v5  ;;  %v366_v27 = vadd.f32 1e-05, %v334_v26 }
 0x164   :  { %v590_v48 = vpop.eup %589  ;;  %v494_v42 = vadd.f32 %v1046_v29, %v458_v39  ;;  %v424_v2 = vmul.f32 %v588_v45, %v978_v43  ;;  %v367_v3 = vadd.f32 1e-05, %v335_v40  ;;  %v304_v32 = vpop.xlane.xlu1 %303 }
 0x165   :  { %v495_v12 = vadd.f32 %v1046_v29, %v459_v35  ;;  %v425_v20 = vmul.f32 %v590_v48, %v988_v52  ;;  %599 = vrsqrt.f32 %v366_v27  ;;  %v336_v21 = vmul.f32 0.03125, %v304_v32 }
 0x166   :  { %526 = vst [vmem:[%s1242_s2 + $0xa8] sm:$0xff] %v494_v42  ;;  %v460_v28 = vmul.f32 %v1044_v13, %v424_v2  ;;  %601 = vrsqrt.f32 %v367_v3 }
 0x167   :  { %v592_v41 = vpop.eup %591  ;;  %527 = vst [vmem:[%s1242_s2 + $0xb0] sm:$0xff] %v495_v12  ;;  %v461_v43 = vmul.f32 %v1044_v13, %v425_v20  ;;  %v368_v55 = vadd.f32 1e-05, %v336_v21 }
 0x168   :  { %v594_v6 = vpop.eup %593  ;;  %v496_v52 = vadd.f32 %v1046_v29, %v460_v28  ;;  %v426_v50 = vmul.f32 %v592_v41, %v992_v53 }
 0x169   :  { %v497_v7 = vadd.f32 %v1046_v29, %v461_v43  ;;  %v427_v49 = vmul.f32 %v594_v6, %v1002_v62  ;;  %603 = vrsqrt.f32 %v368_v55 }
 0x16a   :  { %528 = vst [vmem:[%s1242_s2 + $0xb8] sm:$0xff] %v496_v52  ;;  %v462_v0 = vmul.f32 %v1044_v13, %v426_v50 }
 0x16b   :  { %v596_v22 = vpop.eup %595  ;;  %529 = vst [vmem:[%s1242_s2 + $0xc0] sm:$0xff] %v497_v7  ;;  %v463_v58 = vmul.f32 %v1044_v13, %v427_v49 }
 0x16c   :  { %v598_v30 = vpop.eup %597  ;;  %v498_v53 = vadd.f32 %v1046_v29, %v462_v0  ;;  %v428_v31 = vmul.f32 %v596_v22, %v1006_v63 }
 0x16d   :  { %v499_v62 = vadd.f32 %v1046_v29, %v463_v58  ;;  %v429_v23 = vmul.f32 %v598_v30, %v1016_v36 }
 0x16e   :  { %530 = vst [vmem:[%s1242_s2 + $0xc8] sm:$0xff] %v498_v53  ;;  %v464_v46 = vmul.f32 %v1044_v13, %v428_v31 }
 0x16f   :  { %v600_v47 = vpop.eup %599  ;;  %531 = vst [vmem:[%s1242_s2 + $0xd0] sm:$0xff] %v499_v62  ;;  %v465_v51 = vmul.f32 %v1044_v13, %v429_v23 }
 0x170   :  { %v602_v8 = vpop.eup %601  ;;  %v500_v63 = vadd.f32 %v1046_v29, %v464_v46  ;;  %v430_v9 = vmul.f32 %v600_v47, %v1020_v37 }
 0x171   :  { %v501_v36 = vadd.f32 %v1046_v29, %v465_v51  ;;  %v431_v60 = vmul.f32 %v602_v8, %v1030_v14 }
 0x172   :  { %532 = vst [vmem:[%s1242_s2 + $0xd8] sm:$0xff] %v500_v63  ;;  %v466_v16 = vmul.f32 %v1044_v13, %v430_v9 }
 0x173   :  { %v604_v33 = vpop.eup %603  ;;  %533 = vst [vmem:[%s1242_s2 + $0xe0] sm:$0xff] %v501_v36  ;;  %v467_v1 = vmul.f32 %v1044_v13, %v431_v60 }
 0x174   :  { %v502_v59 = vadd.f32 %v1046_v29, %v466_v16  ;;  %v432_v37 = vmul.f32 %v604_v33, %v1034_v15 }
 0x175   :  { %v503_v17 = vadd.f32 %v1046_v29, %v467_v1 }
 0x176   :  { %534 = vst [vmem:[%s1242_s2 + $0xe8] sm:$0xff] %v502_v59  ;;  %v468_v14 = vmul.f32 %v1044_v13, %v432_v37 }
 0x177   :  { %535 = vst [vmem:[%s1242_s2 + $0xf0] sm:$0xff] %v503_v17 }
 0x178   :  { %v504_v24 = vadd.f32 %v1046_v29, %v468_v14 }
 0x17a   :  { %536 = vst [vmem:[%s1242_s2 + $0xf8] sm:$0xff] %v504_v24 }

// kernel: rwkv_encoder_forward.17
= control target key start
LH: loop header
LB: loop body
LE: loop exit
PB: predicated region body
PF: predicated region fallthrough
CT: control target
= control target key end

     0   :  { %s1088_s3 = inlined_call_operand.vmem [shape: bf16[128,128], index: 3, kind: input, shape index: {}]   ;;  %s1089_s0 = inlined_call_operand.vmem [shape: bf16[256,128], index: 0, kind: input, shape index: {}]   ;;  %s1090_s1 = inlined_call_operand.vmem [shape: bf16[256,128], index: 1, kind: input, shape index: {}]   ;;  %s1091_s2 = inlined_call_operand.vmem [shape: f32[256,128], index: 2, kind: input, shape index: {}]   ;;  %s1092_s4 = inlined_call_operand.vmem [shape: f32[256,128], index: 4, kind: output, shape index: {}]  }
   0x1   :  { %v647_v0 = vld [vmem:[%s1088_s3] sm:$0xff]   ;;  %v648_v1 = vld [vmem:[%s1088_s3 + $0x8] sm:$0xff]   ;;  %v649_v2 = vld [vmem:[%s1088_s3 + $0x10] sm:$0xff]  }
   0x2   :  { %583 = vmatprep.subr.bf16.mxu0 %v647_v0  ;;  %631 = vmatprep.subr.bf16.mxu1 %v647_v0  ;;  %v650_v3 = vld [vmem:[%s1088_s3 + $0x18] sm:$0xff]   ;;  %v18_v4 = vld [vmem:[%s1089_s0] sm:$0xf]  ;;  %v19_v5 = vld [vmem:[%s1089_s0 + $0x4] sm:$0xf] }
   0x3   :  { %584 = vmatpush3.bf16.msra.mxu0 %v647_v0  ;;  %639 = vmatpush3.bf16.msra.mxu1 %v647_v0  ;;  %v50_v6 = vld [vmem:[%s1090_s1] sm:$0xf]  ;;  %v51_v7 = vld [vmem:[%s1090_s1 + $0x4] sm:$0xf]  ;;  %v652_v19 = vld [vmem:[%s1088_s3 + $0x28] sm:$0xff]  }
   0x4   :  { %585 = vmatprep.subr.bf16.mxu0 %v648_v1  ;;  %632 = vmatprep.subr.bf16.mxu1 %v648_v1  ;;  %v82_v8 = vmul.bf16 %v50_v6, %v18_v4  ;;  %v34_v9 = vld [vmem:[%s1089_s0 + $0x40] sm:$0xf]  ;;  %v35_v10 = vld [vmem:[%s1089_s0 + $0x44] sm:$0xf]  ;;  %v83_v11 = vmul.bf16 %v51_v7, %v19_v5  ;;  %v653_v20 = vld [vmem:[%s1088_s3 + $0x30] sm:$0xff]  }
   0x5   :  { %v66_v12 = vld [vmem:[%s1090_s1 + $0x40] sm:$0xf]  ;;  %v67_v13 = vld [vmem:[%s1090_s1 + $0x44] sm:$0xf]  ;;  %v20_v21 = vld [vmem:[%s1089_s0 + $0x8] sm:$0xf] }
   0x6   :  { %v98_v14 = vmul.bf16 %v66_v12, %v34_v9  ;;  %v99_v15 = vmul.bf16 %v67_v13, %v35_v10  ;;  %v651_v16 = vld [vmem:[%s1088_s3 + $0x20] sm:$0xff]   ;;  %v535_v17 = vcombine.low %v82_v8, %v83_v11  ;;  %v52_v22 = vld [vmem:[%s1090_s1 + $0x8] sm:$0xf]  ;;  %v21_v23 = vld [vmem:[%s1089_s0 + $0xc] sm:$0xf] }
   0x7   :  { %586 = vmatpush3.bf16.msra.mxu0 %v648_v1  ;;  %640 = vmatpush3.bf16.msra.mxu1 %v648_v1  ;;  %v53_v24 = vld [vmem:[%s1090_s1 + $0xc] sm:$0xf]  ;;  %v36_v25 = vld [vmem:[%s1089_s0 + $0x48] sm:$0xf]  ;;  %v654_v28 = vld [vmem:[%s1088_s3 + $0x38] sm:$0xff]   ;;  %v84_v38 = vmul.bf16 %v52_v22, %v20_v21 }
   0x8   :  { %587 = vmatprep.subr.bf16.mxu0 %v649_v2  ;;  %633 = vmatprep.subr.bf16.mxu1 %v649_v2  ;;  %v543_v18 = vcombine.low %v98_v14, %v99_v15  ;;  %v37_v26 = vld [vmem:[%s1089_s0 + $0x4c] sm:$0xf]  ;;  %v68_v27 = vld [vmem:[%s1090_s1 + $0x48] sm:$0xf]  ;;  %v22_v30 = vld [vmem:[%s1089_s0 + $0x10] sm:$0xf]  ;;  %v85_v39 = vmul.bf16 %v53_v24, %v21_v23 }
   0x9   :  { %599 = vmatprep.mubr.bf16.mxu0 %v535_v17  ;;  %v69_v29 = vld [vmem:[%s1090_s1 + $0x4c] sm:$0xf]  ;;  %v23_v31 = vld [vmem:[%s1089_s0 + $0x14] sm:$0xf]  ;;  %v54_v32 = vld [vmem:[%s1090_s1 + $0x10] sm:$0xf]  ;;  %v100_v40 = vmul.bf16 %v68_v27, %v36_v25 }
   0xa   :  { %615 = vmatprep.mubr.bf16.mxu1 %v543_v18  ;;  %v55_v33 = vld [vmem:[%s1090_s1 + $0x14] sm:$0xf]  ;;  %v38_v34 = vld [vmem:[%s1089_s0 + $0x50] sm:$0xf]  ;;  %v101_v41 = vmul.bf16 %v69_v29, %v37_v26  ;;  %v86_v42 = vmul.bf16 %v54_v32, %v22_v30  ;;  %v24_v46 = vld [vmem:[%s1089_s0 + $0x18] sm:$0xf]  ;;  %v536_v53 = vcombine.low %v84_v38, %v85_v39 }
   0xb   :  { %588 = vmatpush3.bf16.msra.mxu0 %v649_v2  ;;  %641 = vmatpush3.bf16.msra.mxu1 %v649_v2  ;;  %v39_v35 = vld [vmem:[%s1089_s0 + $0x54] sm:$0xf]  ;;  %v70_v36 = vld [vmem:[%s1090_s1 + $0x50] sm:$0xf]  ;;  %v87_v43 = vmul.bf16 %v55_v33, %v23_v31  ;;  %v25_v47 = vld [vmem:[%s1089_s0 + $0x1c] sm:$0xf] }
   0xc   :  { %589 = vmatprep.subr.bf16.mxu0 %v650_v3  ;;  %634 = vmatprep.subr.bf16.mxu1 %v650_v3  ;;  %v71_v37 = vld [vmem:[%s1090_s1 + $0x54] sm:$0xf]  ;;  %v102_v44 = vmul.bf16 %v70_v36, %v38_v34  ;;  %v56_v48 = vld [vmem:[%s1090_s1 + $0x18] sm:$0xf]  ;;  %v57_v49 = vld [vmem:[%s1090_s1 + $0x1c] sm:$0xf]  ;;  %v544_v54 = vcombine.low %v100_v40, %v101_v41 }
   0xd   :  { %v103_v45 = vmul.bf16 %v71_v37, %v39_v35  ;;  %v40_v50 = vld [vmem:[%s1089_s0 + $0x58] sm:$0xf]  ;;  %v41_v51 = vld [vmem:[%s1089_s0 + $0x5c] sm:$0xf]  ;;  %v26_v56 = vld [vmem:[%s1089_s0 + $0x20] sm:$0xf]  ;;  %v537_v58 = vcombine.low %v86_v42, %v87_v43  ;;  %v88_v2 = vmul.bf16 %v56_v48, %v24_v46 }
   0xe   :  { %v72_v52 = vld [vmem:[%s1090_s1 + $0x58] sm:$0xf]  ;;  %v73_v55 = vld [vmem:[%s1090_s1 + $0x5c] sm:$0xf]  ;;  %v27_v57 = vld [vmem:[%s1089_s0 + $0x24] sm:$0xf] }
   0xf   :  { %590 = vmatpush3.bf16.msra.mxu0 %v650_v3  ;;  %642 = vmatpush3.bf16.msra.mxu1 %v650_v3  ;;  %v545_v59 = vcombine.low %v102_v44, %v103_v45  ;;  %v58_v60 = vld [vmem:[%s1090_s1 + $0x20] sm:$0xf]  ;;  %v59_v61 = vld [vmem:[%s1090_s1 + $0x24] sm:$0xf]  ;;  %v89_v3 = vmul.bf16 %v57_v49, %v25_v47  ;;  %v104_v4 = vmul.bf16 %v72_v52, %v40_v50  ;;  %v28_v10 = vld [vmem:[%s1089_s0 + $0x28] sm:$0xf] }
  0x10   :  { %591 = vmatprep.subr.bf16.mxu0 %v651_v16  ;;  %635 = vmatprep.subr.bf16.mxu1 %v651_v16  ;;  %v42_v62 = vld [vmem:[%s1089_s0 + $0x60] sm:$0xf]  ;;  %v43_v63 = vld [vmem:[%s1089_s0 + $0x64] sm:$0xf]  ;;  %v105_v5 = vmul.bf16 %v73_v55, %v41_v51  ;;  %v90_v6 = vmul.bf16 %v58_v60, %v26_v56  ;;  %v91_v7 = vmul.bf16 %v59_v61, %v27_v57  ;;  %v29_v11 = vld [vmem:[%s1089_s0 + $0x2c] sm:$0xf] }
  0x11   :  { %v74_v0 = vld [vmem:[%s1090_s1 + $0x60] sm:$0xf]  ;;  %v75_v1 = vld [vmem:[%s1090_s1 + $0x64] sm:$0xf]  ;;  %v60_v12 = vld [vmem:[%s1090_s1 + $0x28] sm:$0xf]  ;;  %v538_v17 = vcombine.low %v88_v2, %v89_v3 }
  0x12   :  { %v106_v8 = vmul.bf16 %v74_v0, %v42_v62  ;;  %v107_v9 = vmul.bf16 %v75_v1, %v43_v63  ;;  %v61_v13 = vld [vmem:[%s1090_s1 + $0x2c] sm:$0xf]  ;;  %v44_v14 = vld [vmem:[%s1089_s0 + $0x68] sm:$0xf]  ;;  %v546_v18 = vcombine.low %v104_v4, %v105_v5  ;;  %v31_v21 = vld [vmem:[%s1089_s0 + $0x34] sm:$0xf]  ;;  %v539_v22 = vcombine.low %v90_v6, %v91_v7 }
  0x13   :  { %592 = vmatpush3.bf16.msra.mxu0 %v651_v16  ;;  %643 = vmatpush3.bf16.msra.mxu1 %v651_v16  ;;  %v45_v15 = vld [vmem:[%s1089_s0 + $0x6c] sm:$0xf]  ;;  %v76_v16 = vld [vmem:[%s1090_s1 + $0x68] sm:$0xf]  ;;  %v62_v24 = vld [vmem:[%s1090_s1 + $0x30] sm:$0xf]  ;;  %v92_v30 = vmul.bf16 %v60_v12, %v28_v10  ;;  %v93_v31 = vmul.bf16 %v61_v13, %v29_v11 }
  0x14   :  { %593 = vmatprep.subr.bf16.mxu0 %v652_v19  ;;  %636 = vmatprep.subr.bf16.mxu1 %v652_v19  ;;  %v547_v23 = vcombine.low %v106_v8, %v107_v9  ;;  %v63_v25 = vld [vmem:[%s1090_s1 + $0x34] sm:$0xf]  ;;  %v46_v26 = vld [vmem:[%s1089_s0 + $0x70] sm:$0xf]  ;;  %v108_v32 = vmul.bf16 %v76_v16, %v44_v14  ;;  %v32_v38 = vld [vmem:[%s1089_s0 + $0x38] sm:$0xf] }
  0x15   :  { %v47_v27 = vld [vmem:[%s1089_s0 + $0x74] sm:$0xf]  ;;  %v95_v35 = vmul.bf16 %v63_v25, %v31_v21  ;;  %v33_v39 = vld [vmem:[%s1089_s0 + $0x3c] sm:$0xf]  ;;  %v540_v40 = vcombine.low %v92_v30, %v93_v31  ;;  %v64_v42 = vld [vmem:[%s1090_s1 + $0x38] sm:$0xf] }
  0x16   :  { %v79_v29 = vld [vmem:[%s1090_s1 + $0x74] sm:$0xf]  ;;  %v65_v43 = vld [vmem:[%s1090_s1 + $0x3c] sm:$0xf]  ;;  %v48_v44 = vld [vmem:[%s1089_s0 + $0x78] sm:$0xf]  ;;  %v96_v50 = vmul.bf16 %v64_v42, %v32_v38 }
  0x17   :  { %594 = vmatpush3.bf16.msra.mxu0 %v652_v19  ;;  %644 = vmatpush3.bf16.msra.mxu1 %v652_v19  ;;  %v77_v19 = vld [vmem:[%s1090_s1 + $0x6c] sm:$0xf]  ;;  %v111_v37 = vmul.bf16 %v79_v29, %v47_v27  ;;  %v49_v47 = vld [vmem:[%s1089_s0 + $0x7c] sm:$0xf]  ;;  %v80_v48 = vld [vmem:[%s1090_s1 + $0x78] sm:$0xf]  ;;  %v97_v51 = vmul.bf16 %v65_v43, %v33_v39 }
  0x18   :  { %595 = vmatprep.subr.bf16.mxu0 %v653_v20  ;;  %637 = vmatprep.subr.bf16.mxu1 %v653_v20  ;;  %v109_v33 = vmul.bf16 %v77_v19, %v45_v15  ;;  %v81_v49 = vld [vmem:[%s1090_s1 + $0x7c] sm:$0xf]  ;;  %v112_v52 = vmul.bf16 %v80_v48, %v48_v44  ;;  %v116_v56 = vld [vmem:[%s1091_s2 + $0x10] sm:$0xff]  ;;  %v115_v4 = vld [vmem:[%s1091_s2 + $0x8] sm:$0xff] }
  0x19   :  { %v132_v57 = vld [vmem:[%s1091_s2 + $0x90] sm:$0xff]  ;;  %v117_v62 = vld [vmem:[%s1091_s2 + $0x18] sm:$0xff]  ;;  %v131_v5 = vld [vmem:[%s1091_s2 + $0x88] sm:$0xff] }
  0x1a   :  { %v548_v41 = vcombine.low %v108_v32, %v109_v33  ;;  %v133_v63 = vld [vmem:[%s1091_s2 + $0x98] sm:$0xff]  ;;  %v120_v16 = vld [vmem:[%s1091_s2 + $0x30] sm:$0xff]  ;;  %v134_v19 = vld [vmem:[%s1091_s2 + $0xa0] sm:$0xff] }
  0x1b   :  { %596 = vmatpush3.bf16.msra.mxu0 %v653_v20  ;;  %645 = vmatpush3.bf16.msra.mxu1 %v653_v20  ;;  %v30_v20 = vld [vmem:[%s1089_s0 + $0x30] sm:$0xf]  ;;  %v135_v29 = vld [vmem:[%s1091_s2 + $0xa8] sm:$0xff]  ;;  %v122_v42 = vld [vmem:[%s1091_s2 + $0x40] sm:$0xff] }
  0x1c   :  { %597 = vmatprep.subr.bf16.mxu0 %v654_v28  ;;  %638 = vmatprep.subr.bf16.mxu1 %v654_v28  ;;  %v94_v34 = vmul.bf16 %v62_v24, %v30_v20  ;;  %v138_v43 = vld [vmem:[%s1091_s2 + $0xc0] sm:$0xff] }
  0x1e   :  { %v541_v45 = vcombine.low %v94_v34, %v95_v35 }
  0x1f   :  { %598 = vmatpush3.bf16.msra.mxu0 %v654_v28  ;;  %646 = vmatpush3.bf16.msra.mxu1 %v654_v28  ;;  %v78_v28 = vld [vmem:[%s1090_s1 + $0x70] sm:$0xf] }
  0x20   :  { %v110_v36 = vmul.bf16 %v78_v28, %v46_v26  ;;  %v119_v28 = vld [vmem:[%s1091_s2 + $0x28] sm:$0xff] }
  0x22   :  { %600 = vmatmul.mubr.bf16.vlgmr.msra.gmra.mrb[0].mxu0 %v536_v53  ;;  %616 = vmatmul.mubr.bf16.vlgmr.msra.gmra.mrb[0].mxu1 %v544_v54  ;;  %v549_v46 = vcombine.low %v110_v36, %v111_v37  ;;  %v113_v53 = vmul.bf16 %v81_v49, %v49_v47  ;;  %v542_v54 = vcombine.low %v96_v50, %v97_v51  ;;  %v141_v47 = vld [vmem:[%s1091_s2 + $0xd8] sm:$0xff] }
  0x23   :  { %603 = vmatprep.mubr.bf16.mxu0 %v537_v58  ;;  %619 = vmatprep.mubr.bf16.mxu1 %v545_v59  ;;  %v114_v58 = vld [vmem:[%s1091_s2] sm:$0xff] }
  0x24   :  { %v550_v55 = vcombine.low %v112_v52, %v113_v53  ;;  %v130_v59 = vld [vmem:[%s1091_s2 + $0x80] sm:$0xff]  ;;  %v123_v52 = vld [vmem:[%s1091_s2 + $0x48] sm:$0xff] }
  0x25   :  { %v139_v53 = vld [vmem:[%s1091_s2 + $0xc8] sm:$0xff] }
  0x2a   :  { %604 = vmatmul.mubr.bf16.gmra.mrb[4].mxu0 %v538_v17  ;;  %620 = vmatmul.mubr.bf16.gmra.mrb[4].mxu1 %v546_v18  ;;  %v136_v17 = vld [vmem:[%s1091_s2 + $0xb0] sm:$0xff]  ;;  %v118_v18 = vld [vmem:[%s1091_s2 + $0x20] sm:$0xff] }
  0x2b   :  { %607 = vmatprep.mubr.bf16.mxu0 %v539_v22  ;;  %623 = vmatprep.mubr.bf16.mxu1 %v547_v23  ;;  %v121_v22 = vld [vmem:[%s1091_s2 + $0x38] sm:$0xff] }
  0x2c   :  { %v137_v23 = vld [vmem:[%s1091_s2 + $0xb8] sm:$0xff] }
  0x32   :  { %608 = vmatmul.mubr.bf16.gmra.mrb[8].mxu0 %v540_v40  ;;  %624 = vmatmul.mubr.bf16.gmra.mrb[8].mxu1 %v548_v41  ;;  %v124_v40 = vld [vmem:[%s1091_s2 + $0x50] sm:$0xff] }
  0x33   :  { %611 = vmatprep.mubr.bf16.mxu0 %v541_v45  ;;  %627 = vmatprep.mubr.bf16.mxu1 %v549_v46  ;;  %v140_v41 = vld [vmem:[%s1091_s2 + $0xd0] sm:$0xff]  ;;  %v125_v46 = vld [vmem:[%s1091_s2 + $0x58] sm:$0xff] }
  0x3a   :  { %612 = vmatmul.mubr.bf16.gmra.mrb[12].mxu0 %v542_v54  ;;  %628 = vmatmul.mubr.bf16.gmra.mrb[12].mxu1 %v550_v55 }
  0xf5   :  { %v601_v60 = vpop.f32.mrb[0].mxu0  ;;  %v617_v61 = vpop.f32.mrb[0].mxu1 }
  0xf6   :  { %v469_v0 = vadd.f32 %v601_v60, %v116_v56  ;;  %v485_v1 = vadd.f32 %v617_v61, %v132_v57  ;;  %v340_v2 = vpop.f32.mrb[1].mxu0  ;;  %v404_v3 = vpop.f32.mrb[1].mxu1 }
  0xf7   :  { %v467_v6 = vadd.f32 %v340_v2, %v114_v58  ;;  %v483_v7 = vadd.f32 %v404_v3, %v130_v59  ;;  %v602_v8 = vpop.f32.mrb[2].mxu0  ;;  %v618_v9 = vpop.f32.mrb[2].mxu1  ;;  %v126_v2 = vld [vmem:[%s1091_s2 + $0x60] sm:$0xff] }
  0xf8   :  { %501 = vst [vmem:[%s1092_s4 + $0x10] sm:$0xff] %v469_v0  ;;  %517 = vst [vmem:[%s1092_s4 + $0x90] sm:$0xff] %v485_v1  ;;  %v470_v10 = vadd.f32 %v602_v8, %v117_v62  ;;  %v486_v11 = vadd.f32 %v618_v9, %v133_v63  ;;  %v343_v12 = vpop.f32.mrb[3].mxu0  ;;  %v407_v13 = vpop.f32.mrb[3].mxu1  ;;  %v128_v0 = vld [vmem:[%s1091_s2 + $0x70] sm:$0xff]  ;;  %v142_v3 = vld [vmem:[%s1091_s2 + $0xe0] sm:$0xff] }
  0xf9   :  { %499 = vst [vmem:[%s1092_s4] sm:$0xff] %v467_v6  ;;  %515 = vst [vmem:[%s1092_s4 + $0x80] sm:$0xff] %v483_v7  ;;  %v468_v14 = vadd.f32 %v343_v12, %v115_v4  ;;  %v484_v15 = vadd.f32 %v407_v13, %v131_v5  ;;  %v144_v1 = vld [vmem:[%s1091_s2 + $0xf0] sm:$0xff]  ;;  %v129_v6 = vld [vmem:[%s1091_s2 + $0x78] sm:$0xff] }
  0xfa   :  { %502 = vst [vmem:[%s1092_s4 + $0x18] sm:$0xff] %v470_v10  ;;  %518 = vst [vmem:[%s1092_s4 + $0x98] sm:$0xff] %v486_v11  ;;  %v145_v7 = vld [vmem:[%s1091_s2 + $0xf8] sm:$0xff]  ;;  %v127_v12 = vld [vmem:[%s1091_s2 + $0x68] sm:$0xff] }
  0xfb   :  { %500 = vst [vmem:[%s1092_s4 + $0x8] sm:$0xff] %v468_v14  ;;  %516 = vst [vmem:[%s1092_s4 + $0x88] sm:$0xff] %v484_v15  ;;  %v143_v13 = vld [vmem:[%s1091_s2 + $0xe8] sm:$0xff] }
  0xfd   :  { %v605_v20 = vpop.f32.mrb[4].mxu0  ;;  %v621_v21 = vpop.f32.mrb[4].mxu1 }
  0xfe   :  { %v473_v24 = vadd.f32 %v605_v20, %v120_v16  ;;  %v489_v25 = vadd.f32 %v621_v21, %v136_v17  ;;  %v356_v26 = vpop.f32.mrb[5].mxu0  ;;  %v420_v27 = vpop.f32.mrb[5].mxu1 }
  0xff   :  { %v471_v30 = vadd.f32 %v356_v26, %v118_v18  ;;  %v487_v31 = vadd.f32 %v420_v27, %v134_v19  ;;  %v606_v32 = vpop.f32.mrb[6].mxu0  ;;  %v622_v33 = vpop.f32.mrb[6].mxu1 }
 0x100   :  { %505 = vst [vmem:[%s1092_s4 + $0x30] sm:$0xff] %v473_v24  ;;  %521 = vst [vmem:[%s1092_s4 + $0xb0] sm:$0xff] %v489_v25  ;;  %v474_v34 = vadd.f32 %v606_v32, %v121_v22  ;;  %v490_v35 = vadd.f32 %v622_v33, %v137_v23  ;;  %v359_v36 = vpop.f32.mrb[7].mxu0  ;;  %v423_v37 = vpop.f32.mrb[7].mxu1 }
 0x101   :  { %503 = vst [vmem:[%s1092_s4 + $0x20] sm:$0xff] %v471_v30  ;;  %519 = vst [vmem:[%s1092_s4 + $0xa0] sm:$0xff] %v487_v31  ;;  %v472_v38 = vadd.f32 %v359_v36, %v119_v28  ;;  %v488_v39 = vadd.f32 %v423_v37, %v135_v29 }
 0x102   :  { %506 = vst [vmem:[%s1092_s4 + $0x38] sm:$0xff] %v474_v34  ;;  %522 = vst [vmem:[%s1092_s4 + $0xb8] sm:$0xff] %v490_v35 }
 0x103   :  { %504 = vst [vmem:[%s1092_s4 + $0x28] sm:$0xff] %v472_v38  ;;  %520 = vst [vmem:[%s1092_s4 + $0xa8] sm:$0xff] %v488_v39 }
 0x105   :  { %v609_v44 = vpop.f32.mrb[8].mxu0  ;;  %v625_v45 = vpop.f32.mrb[8].mxu1 }
 0x106   :  { %v477_v48 = vadd.f32 %v609_v44, %v124_v40  ;;  %v493_v49 = vadd.f32 %v625_v45, %v140_v41  ;;  %v372_v50 = vpop.f32.mrb[9].mxu0  ;;  %v436_v51 = vpop.f32.mrb[9].mxu1 }
 0x107   :  { %v475_v54 = vadd.f32 %v372_v50, %v122_v42  ;;  %v491_v55 = vadd.f32 %v436_v51, %v138_v43  ;;  %v610_v56 = vpop.f32.mrb[10].mxu0  ;;  %v626_v57 = vpop.f32.mrb[10].mxu1 }
 0x108   :  { %509 = vst [vmem:[%s1092_s4 + $0x50] sm:$0xff] %v477_v48  ;;  %525 = vst [vmem:[%s1092_s4 + $0xd0] sm:$0xff] %v493_v49  ;;  %v478_v58 = vadd.f32 %v610_v56, %v125_v46  ;;  %v494_v59 = vadd.f32 %v626_v57, %v141_v47  ;;  %v375_v60 = vpop.f32.mrb[11].mxu0  ;;  %v439_v61 = vpop.f32.mrb[11].mxu1 }
 0x109   :  { %507 = vst [vmem:[%s1092_s4 + $0x40] sm:$0xff] %v475_v54  ;;  %523 = vst [vmem:[%s1092_s4 + $0xc0] sm:$0xff] %v491_v55  ;;  %v476_v62 = vadd.f32 %v375_v60, %v123_v52  ;;  %v492_v63 = vadd.f32 %v439_v61, %v139_v53 }
 0x10a   :  { %510 = vst [vmem:[%s1092_s4 + $0x58] sm:$0xff] %v478_v58  ;;  %526 = vst [vmem:[%s1092_s4 + $0xd8] sm:$0xff] %v494_v59 }
 0x10b   :  { %508 = vst [vmem:[%s1092_s4 + $0x48] sm:$0xff] %v476_v62  ;;  %524 = vst [vmem:[%s1092_s4 + $0xc8] sm:$0xff] %v492_v63 }
 0x10d   :  { %v613_v4 = vpop.f32.mrb[12].mxu0  ;;  %v629_v5 = vpop.f32.mrb[12].mxu1 }
 0x10e   :  { %v481_v8 = vadd.f32 %v613_v4, %v128_v0  ;;  %v497_v9 = vadd.f32 %v629_v5, %v144_v1  ;;  %v388_v10 = vpop.f32.mrb[13].mxu0  ;;  %v452_v11 = vpop.f32.mrb[13].mxu1 }
 0x10f   :  { %v479_v14 = vadd.f32 %v388_v10, %v126_v2  ;;  %v495_v15 = vadd.f32 %v452_v11, %v142_v3  ;;  %v614_v16 = vpop.f32.mrb[14].mxu0  ;;  %v630_v17 = vpop.f32.mrb[14].mxu1 }
 0x110   :  { %513 = vst [vmem:[%s1092_s4 + $0x70] sm:$0xff] %v481_v8  ;;  %529 = vst [vmem:[%s1092_s4 + $0xf0] sm:$0xff] %v497_v9  ;;  %v482_v18 = vadd.f32 %v614_v16, %v129_v6  ;;  %v498_v19 = vadd.f32 %v630_v17, %v145_v7  ;;  %v391_v20 = vpop.f32.mrb[15].mxu0  ;;  %v455_v21 = vpop.f32.mrb[15].mxu1 }
 0x111   :  { %511 = vst [vmem:[%s1092_s4 + $0x60] sm:$0xff] %v479_v14  ;;  %527 = vst [vmem:[%s1092_s4 + $0xe0] sm:$0xff] %v495_v15  ;;  %v480_v22 = vadd.f32 %v391_v20, %v127_v12  ;;  %v496_v23 = vadd.f32 %v455_v21, %v143_v13 }
 0x112   :  { %514 = vst [vmem:[%s1092_s4 + $0x78] sm:$0xff] %v482_v18  ;;  %530 = vst [vmem:[%s1092_s4 + $0xf8] sm:$0xff] %v498_v19 }
 0x113   :  { %512 = vst [vmem:[%s1092_s4 + $0x68] sm:$0xff] %v480_v22  ;;  %528 = vst [vmem:[%s1092_s4 + $0xe8] sm:$0xff] %v496_v23 }

// kernel: rwkv_encoder_forward.16
= control target key start
LH: loop header
LB: loop body
LE: loop exit
PB: predicated region body
PF: predicated region fallthrough
CT: control target
= control target key end

     0   :  { %v649_v0 = vmov 0.0   ;;  %v650_v3 = vmov -1e+30   ;;  %s692_s19 = smov 0   ;;  %s895_s0 = inlined_call_operand.vmem [shape: f32[128,2,128], index: 0, kind: input, shape index: {}]   ;;  %s896_s1 = inlined_call_operand.vmem [shape: f32[128,2,128], index: 1, kind: input, shape index: {}]   ;;  %s897_s2 = inlined_call_operand.vmem [shape: f32[2,128], index: 2, kind: input, shape index: {}]   ;;  %s898_s3 = inlined_call_operand.vmem [shape: f32[2,128], index: 3, kind: input, shape index: {}]   ;;  %s899_s4 = inlined_call_operand.vmem [shape: bf16[128,2,128], index: 4, kind: output, shape index: {}]  }
   0x1   :  { %21 = vst [vmem:[#allocation2] sm:$0x3] %v649_v0  ;;  %22 = vst [vmem:[#allocation3] sm:$0x3] %v649_v0  ;;  %v679_v1 = vld [vmem:[%s897_s2] sm:$0x3] }
   0x2   :  { %v684_v2 = vld [vmem:[%s898_s3] sm:$0x3]  ;;  %23 = vst [vmem:[#allocation4] sm:$0x3] %v650_v3 }
   0x8   :  { %v26_v4 = vld [vmem:[#allocation2] sm:$0x3]   ;;  %v27_v5 = vld [vmem:[#allocation3] sm:$0x3]  }
   0x9   :  { %v28_v6 = vld [vmem:[#allocation4] sm:$0x3]  }
   0xa LB: > { %s520_s2 = sshll.u32 %s647_s19, 4  ;;  %v63_v7 = vadd.f32 %v635_v6, %v679_v1  ;;  %s462_s25 = sshll.u32 %s647_s19, 3  ;;  %s647_s19 = sphi %s692_s19, %s34_s19   ;;  %v643_v4 = vphi %v26_v4, %v903_v4   ;;  %v639_v5 = vphi %v27_v5, %v902_v5   ;;  %v635_v6 = vphi %v28_v6, %v901_v6  }
   0xb   : > { %s711_s21 = scalar_lea.vmem %s895_s0, %s520_s2  ;;  %s751_s24 = scalar_lea.vmem %s896_s1, %s520_s2 }
   0xc   : > { %v41_v8 = vld [vmem:[%s711_s21] sm:$0x3]  ;;  %v466_v9 = vld [vmem:[%s711_s21 + $0x2] sm:$0x3]  ;;  %v474_v17 = vld [vmem:[%s711_s21 + $0x4] sm:$0x3]  ;;  %s828_s28 = scalar_lea.vmem %s899_s4, %s462_s25 }
   0xd   : > { %v44_v10 = vadd.f32 %v41_v8, %v684_v2  ;;  %v64_v11 = vsub.f32 %v63_v7, %v41_v8  ;;  %v77_v12 = vmax.f32 %v63_v7, %v41_v8  ;;  %v84_v13 = vadd.f32 %v466_v9, %v684_v2  ;;  %v482_v31 = vld [vmem:[%s711_s21 + $0x6] sm:$0x3]  ;;  %v738_v39 = vld [vmem:[%s711_s21 + $0x8] sm:$0x3]  ;;  %v43_v55 = vld [vmem:[%s751_s24] sm:$0x3] }
   0xe   : > { %v124_v19 = vadd.f32 %v474_v17, %v684_v2  ;;  %v164_v34 = vadd.f32 %v482_v31, %v684_v2  ;;  %v204_v45 = vadd.f32 %v738_v39, %v684_v2  ;;  %v762_v56 = vld [vmem:[%s711_s21 + $0xa] sm:$0x3]  ;;  %s34_s19 = sadd.s32 1, %s647_s19  }
   0xf   : > { %v717_v14 = vsub.f32 %v635_v6, %v44_v10  ;;  %v65_v15 = vand.u32 2147483647, %v64_v11  ;;  %v719_v16 = vsub.f32 %v77_v12, %v84_v13  ;;  %v103_v18 = vadd.f32 %v77_v12, %v679_v1  ;;  %p31_p0 = scmp.ge.s32.totalorder %s34_s19, 16  }
  0x10   : > { %vm69_vm0 = vcmp.ge.f32.partialorder %v64_v11, 0.0  ;;  %v769_v0 = vadd.f32 %v762_v56, %v684_v2 }
  0x11   : > { %v46_v20 = vand.u32 2147483647, %v717_v14  ;;  %v66_v21 = vsub.f32 0.0, %v65_v15  ;;  %v86_v22 = vand.u32 2147483647, %v719_v16  ;;  %v726_v23 = vsub.f32 %v103_v18, %v466_v9 }
  0x12   : > { %v117_v24 = vmax.f32 %v103_v18, %v466_v9  ;;  %vm50_vm1 = vcmp.ge.f32.partialorder %v717_v14, 0.0  ;;  %vm90_vm2 = vcmp.ge.f32.partialorder %v719_v16, 0.0 }
  0x13   : > { %v47_v25 = vsub.f32 0.0, %v46_v20  ;;  %v67_v26 = vmul.f32 1.442695, %v66_v21  ;;  %v87_v27 = vsub.f32 0.0, %v86_v22  ;;  %v105_v28 = vand.u32 2147483647, %v726_v23 }
  0x14   : > { %v729_v29 = vsub.f32 %v117_v24, %v124_v19  ;;  %v143_v30 = vadd.f32 %v117_v24, %v679_v1  ;;  %vm109_vm3 = vcmp.ge.f32.partialorder %v726_v23, 0.0  ;;  %v469_v20 = vld [vmem:[%s751_s24 + $0x2] sm:$0x3] }
  0x15   : > { %v48_v32 = vmul.f32 1.442695, %v47_v25  ;;  %569 = vpow2.f32 %v67_v26  ;;  %v88_v33 = vmul.f32 1.442695, %v87_v27  ;;  %v106_v35 = vsub.f32 0.0, %v105_v28 }
  0x16   : > { %v126_v36 = vand.u32 2147483647, %v729_v29  ;;  %v735_v37 = vsub.f32 %v143_v30, %v474_v17  ;;  %v157_v38 = vmax.f32 %v143_v30, %v474_v17  ;;  %vm130_vm4 = vcmp.ge.f32.partialorder %v729_v29, 0.0 }
  0x17   : > { %571 = vpow2.f32 %v48_v32  ;;  %v107_v40 = vmul.f32 1.442695, %v106_v35 }
  0x18   : > { %573 = vpow2.f32 %v88_v33  ;;  %v127_v41 = vsub.f32 0.0, %v126_v36  ;;  %v145_v42 = vand.u32 2147483647, %v735_v37  ;;  %v741_v43 = vsub.f32 %v157_v38, %v164_v34  ;;  %v477_v36 = vld [vmem:[%s751_s24 + $0x4] sm:$0x3] }
  0x19   : > { %v183_v44 = vadd.f32 %v157_v38, %v679_v1  ;;  %575 = vpow2.f32 %v107_v40  ;;  %vm149_vm5 = vcmp.ge.f32.partialorder %v735_v37, 0.0 }
  0x1a   : > { %v128_v46 = vmul.f32 1.442695, %v127_v41  ;;  %v146_v47 = vsub.f32 0.0, %v145_v42  ;;  %v166_v48 = vand.u32 2147483647, %v741_v43  ;;  %vm170_vm6 = vcmp.ge.f32.partialorder %v741_v43, 0.0 }
  0x1b   : > { %v754_v49 = vsub.f32 %v183_v44, %v482_v31  ;;  %v197_v50 = vmax.f32 %v183_v44, %v482_v31 }
  0x1c   : > { %577 = vpow2.f32 %v128_v46  ;;  %v147_v51 = vmul.f32 1.442695, %v146_v47  ;;  %v167_v52 = vsub.f32 0.0, %v166_v48 }
  0x1d   : > { %v185_v53 = vand.u32 2147483647, %v754_v49  ;;  %v757_v54 = vsub.f32 %v197_v50, %v204_v45  ;;  %v223_v63 = vadd.f32 %v197_v50, %v679_v1  ;;  %vm189_vm7 = vcmp.ge.f32.partialorder %v754_v49, 0.0 }
  0x1e   : > { %579 = vpow2.f32 %v147_v51  ;;  %v168_v58 = vmul.f32 1.442695, %v167_v52 }
  0x1f   : > { %v570_v57 = vpop.eup %569  ;;  %v186_v59 = vsub.f32 0.0, %v185_v53  ;;  %v206_v60 = vand.u32 2147483647, %v757_v54  ;;  %v237_v40 = vmax.f32 %v223_v63, %v738_v39  ;;  %vm210_vm8 = vcmp.ge.f32.partialorder %v757_v54, 0.0 }
  0x20   : > { %v70_v61 = vsel %vm69_vm0, 1.0, %v570_v57  ;;  %v71_v62 = vsel %vm69_vm0, %v570_v57, 1.0  ;;  %581 = vpow2.f32 %v168_v58 }
  0x21   : > { %v572_v3 = vpop.eup %571  ;;  %v72_v6 = vmul.f32 %v643_v4, %v70_v61  ;;  %v73_v7 = vmul.f32 %v71_v62, %v43_v55  ;;  %v75_v8 = vmul.f32 %v639_v5, %v70_v61  ;;  %v187_v12 = vmul.f32 1.442695, %v186_v59 }
  0x22   : > { %v574_v9 = vpop.eup %573  ;;  %v51_v10 = vsel %vm50_vm1, 1.0, %v572_v3  ;;  %v52_v11 = vsel %vm50_vm1, %v572_v3, 1.0  ;;  %v207_v17 = vsub.f32 0.0, %v206_v60  ;;  %v810_v37 = vsub.f32 %v237_v40, %v769_v0  ;;  %v485_v0 = vld [vmem:[%s751_s24 + $0x6] sm:$0x3] }
  0x23   : > { %v56_v13 = vmul.f32 %v639_v5, %v51_v10  ;;  %v74_v15 = vadd.f32 %v73_v7, %v72_v6  ;;  %v576_v18 = vpop.eup %575  ;;  %v76_v19 = vadd.f32 %v75_v8, %v71_v62  ;;  %v91_v21 = vsel %vm90_vm2, 1.0, %v574_v9  ;;  %v506_v7 = vld [vmem:[%s711_s21 + $0xc] sm:$0x3] }
  0x24   : > { %583 = vpow2.f32 %v187_v12  ;;  %v53_v14 = vmul.f32 %v643_v4, %v51_v10  ;;  %v92_v24 = vsel %vm90_vm2, %v574_v9, 1.0  ;;  %v788_v5 = vsub.f32 %v223_v63, %v738_v39 }
  0x25   : > { %v57_v22 = vadd.f32 %v56_v13, %v52_v11  ;;  %v54_v26 = vmul.f32 %v52_v11, %v43_v55  ;;  %v96_v27 = vmul.f32 %v91_v21, %v76_v19  ;;  %v111_v28 = vsel %vm109_vm3, %v576_v18, 1.0 }
  0x26   : > { %v578_v25 = vpop.eup %577  ;;  %v110_v30 = vsel %vm109_vm3, 1.0, %v576_v18  ;;  %v113_v31 = vmul.f32 %v469_v20, %v111_v28  ;;  %v208_v32 = vmul.f32 1.442695, %v207_v17  ;;  %v225_v44 = vand.u32 2147483647, %v788_v5 }
  0x27   : > { %585 = vrcp.f32 %v57_v22  ;;  %v112_v4 = vmul.f32 %v110_v30, %v74_v15  ;;  %v97_v16 = vadd.f32 %v96_v27, %v92_v24  ;;  %v115_v34 = vmul.f32 %v110_v30, %v76_v19 }
  0x28   : > { %v580_v33 = vpop.eup %579  ;;  %v131_v38 = vsel %vm130_vm4, 1.0, %v578_v25  ;;  %v55_v41 = vadd.f32 %v54_v26, %v53_v14  ;;  %v93_v46 = vmul.f32 %v91_v21, %v74_v15  ;;  %v132_v47 = vsel %vm130_vm4, %v578_v25, 1.0 }
  0x29   : > { %v114_v35 = vadd.f32 %v113_v31, %v112_v4  ;;  %v150_v23 = vsel %vm149_vm5, 1.0, %v580_v33  ;;  %587 = vrcp.f32 %v97_v16  ;;  %v116_v42 = vadd.f32 %v115_v34, %v111_v28  ;;  %v514_v16 = vld [vmem:[%s711_s21 + $0xe] sm:$0x3] }
  0x2a   : > { %v582_v45 = vpop.eup %581  ;;  %v151_v48 = vsel %vm149_vm5, %v580_v33, 1.0  ;;  %589 = vpow2.f32 %v208_v32  ;;  %v94_v53 = vmul.f32 %v469_v20, %v92_v24  ;;  %v134_v55 = vmul.f32 %v477_v36, %v132_v47 }
  0x2b   : > { %v136_v50 = vmul.f32 %v131_v38, %v116_v42  ;;  %v153_v51 = vmul.f32 %v477_v36, %v151_v48  ;;  %v152_v52 = vmul.f32 %v150_v23, %v114_v35  ;;  %v155_v39 = vmul.f32 %v150_v23, %v116_v42 }
  0x2c   : > { %v171_v57 = vsel %vm170_vm6, 1.0, %v582_v45  ;;  %v226_v58 = vsub.f32 0.0, %v225_v44  ;;  %v133_v60 = vmul.f32 %v131_v38, %v114_v35  ;;  %v172_v62 = vsel %vm170_vm6, %v582_v45, 1.0 }
  0x2d   : > { %v137_v29 = vadd.f32 %v136_v50, %v132_v47  ;;  %v156_v61 = vadd.f32 %v155_v39, %v151_v48  ;;  %v263_v6 = vadd.f32 %v237_v40, %v679_v1  ;;  %v154_v8 = vadd.f32 %v153_v51, %v152_v52 }
  0x2e   : > { %v584_v59 = vpop.eup %583  ;;  %v227_v3 = vmul.f32 1.442695, %v226_v58  ;;  %v284_v10 = vadd.f32 %v506_v7, %v684_v2  ;;  %v95_v12 = vadd.f32 %v94_v53, %v93_v46  ;;  %v246_v43 = vand.u32 2147483647, %v810_v37  ;;  %v493_v53 = vld [vmem:[%s751_s24 + $0x8] sm:$0x3] }
  0x2f   : > { %v190_v63 = vsel %vm189_vm7, 1.0, %v584_v59  ;;  %591 = vrcp.f32 %v137_v29  ;;  %v176_v9 = vmul.f32 %v171_v57, %v156_v61  ;;  %v191_v18 = vsel %vm189_vm7, %v584_v59, 1.0 }
  0x30   : > { %v195_v13 = vmul.f32 %v190_v63, %v156_v61  ;;  %593 = vpow2.f32 %v227_v3  ;;  %v135_v19 = vadd.f32 %v134_v55, %v133_v60  ;;  %v247_v20 = vsub.f32 0.0, %v246_v43 }
  0x31   : > { %v586_v11 = vpop.eup %585  ;;  %v177_v17 = vadd.f32 %v176_v9, %v172_v62  ;;  %v831_v21 = vsub.f32 %v263_v6, %v762_v56  ;;  %v277_v14 = vmax.f32 %v263_v6, %v762_v56  ;;  %v193_v49 = vmul.f32 %v485_v0, %v191_v18 }
  0x32   : > { %v59_v15 = vmul.f32 %v586_v11, %v55_v41  ;;  %v192_v25 = vmul.f32 %v190_v63, %v154_v8  ;;  %v196_v28 = vadd.f32 %v195_v13, %v191_v18  ;;  %v248_v30 = vmul.f32 1.442695, %v247_v20 }
  0x33   : > { %v588_v22 = vpop.eup %587  ;;  %595 = vrcp.f32 %v177_v17  ;;  %v265_v31 = vand.u32 2147483647, %v831_v21  ;;  %v840_v32 = vsub.f32 %v277_v14, %v284_v10  ;;  %v303_v33 = vadd.f32 %v277_v14, %v679_v1 }
  0x34   : > { %v60_v24 = vpack.c.bf16 %v59_v15, %v59_v15  ;;  %v590_v26 = vpop.eup %589  ;;  %v99_v27 = vmul.f32 %v588_v22, %v95_v12  ;;  %v173_v35 = vmul.f32 %v171_v57, %v154_v8  ;;  %v174_v36 = vmul.f32 %v485_v0, %v172_v62 }
  0x35   : > { %v211_v4 = vsel %vm210_vm8, 1.0, %v590_v26  ;;  %v212_v56 = vsel %vm210_vm8, %v590_v26, 1.0  ;;  %597 = vpow2.f32 %v248_v30  ;;  %v266_v23 = vsub.f32 0.0, %v265_v31 }
  0x36   : > { %62 = vst [vmem:[%s828_s28] sm:$0x1] %v60_v24  ;;  %v100_v34 = vpack.c.bf16 %v99_v27, %v99_v27  ;;  %v216_v38 = vmul.f32 %v211_v4, %v196_v28  ;;  %v286_v40 = vand.u32 2147483647, %v840_v32  ;;  %vm229_vm9 = vcmp.ge.f32.partialorder %v788_v5, 0.0 }
  0x37   : > { %v847_v54 = vsub.f32 %v303_v33, %v506_v7  ;;  %v324_v42 = vadd.f32 %v514_v16, %v684_v2  ;;  %v194_v45 = vadd.f32 %v193_v49, %v192_v25  ;;  %v267_v46 = vmul.f32 1.442695, %v266_v23  ;;  %v501_v49 = vld [vmem:[%s751_s24 + $0xa] sm:$0x3] }
  0x38   : > { %471 = vst [vmem:[%s828_s28 + $0x1] sm:$0x1] %v100_v34  ;;  %v217_v41 = vadd.f32 %v216_v38, %v212_v56  ;;  %v287_v47 = vsub.f32 0.0, %v286_v40  ;;  %v317_v48 = vmax.f32 %v303_v33, %v506_v7  ;;  %v175_v52 = vadd.f32 %v174_v36, %v173_v35 }
  0x39   : > { %v592_v44 = vpop.eup %591  ;;  %v305_v39 = vand.u32 2147483647, %v847_v54  ;;  %v213_v55 = vmul.f32 %v211_v4, %v194_v45  ;;  %v214_v60 = vmul.f32 %v493_v53, %v212_v56  ;;  %vm250_vm10 = vcmp.ge.f32.partialorder %v810_v37, 0.0 }
  0x3a   : > { %v594_v50 = vpop.eup %593  ;;  %v139_v51 = vmul.f32 %v592_v44, %v135_v19  ;;  %599 = vrcp.f32 %v217_v41  ;;  %v288_v58 = vmul.f32 1.442695, %v287_v47  ;;  %v856_v3 = vsub.f32 %v317_v48, %v324_v42  ;;  %v509_v42 = vld [vmem:[%s751_s24 + $0xc] sm:$0x3] }
  0x3b   : > { %v230_v57 = vsel %vm229_vm9, 1.0, %v594_v50  ;;  %601 = vpow2.f32 %v267_v46  ;;  %v231_v29 = vsel %vm229_vm9, %v594_v50, 1.0  ;;  %v306_v63 = vsub.f32 0.0, %v305_v39 }
  0x3c   : > { %v140_v59 = vpack.c.bf16 %v139_v51, %v139_v51  ;;  %v235_v61 = vmul.f32 %v230_v57, %v196_v28  ;;  %603 = vpow2.f32 %v288_v58  ;;  %v343_v6 = vadd.f32 %v317_v48, %v679_v1 }
  0x3d   : > { %v596_v62 = vpop.eup %595  ;;  %v233_v8 = vmul.f32 %v493_v53, %v231_v29  ;;  %v232_v9 = vmul.f32 %v230_v57, %v194_v45  ;;  %v307_v10 = vmul.f32 1.442695, %v306_v63  ;;  %v326_v11 = vand.u32 2147483647, %v856_v3  ;;  %v517_v63 = vld [vmem:[%s751_s24 + $0xe] sm:$0x3] }
  0x3e   : > { %479 = vst [vmem:[%s828_s28 + $0x2] sm:$0x1] %v140_v59  ;;  %v179_v7 = vmul.f32 %v596_v62, %v175_v52  ;;  %v862_v5 = vsub.f32 %v343_v6, %v514_v16  ;;  %v215_v0 = vadd.f32 %v214_v60, %v213_v55  ;;  %v864_v6 = vmax.f32 %v343_v6, %v514_v16  }
  0x3f   : > { %v598_v43 = vpop.eup %597  ;;  %v236_v15 = vadd.f32 %v235_v61, %v231_v29  ;;  %605 = vpow2.f32 %v307_v10  ;;  %v327_v17 = vsub.f32 0.0, %v326_v11  ;;  %v234_v20 = vadd.f32 %v233_v8, %v232_v9 }
  0x40   : > { %v180_v12 = vpack.c.bf16 %v179_v7, %v179_v7  ;;  %v900_v13 = vmov %v864_v6  ;;  %v345_v18 = vand.u32 2147483647, %v862_v5  ;;  %v251_v19 = vsel %vm250_vm10, 1.0, %v598_v43 }
  0x41   : > { %v252_v37 = vsel %vm250_vm10, %v598_v43, 1.0  ;;  %v256_v14 = vmul.f32 %v251_v19, %v236_v15  ;;  %vm269_vm11 = vcmp.ge.f32.partialorder %v831_v21, 0.0  ;;  %v328_v22 = vmul.f32 1.442695, %v327_v17  ;;  %360 = vst [vmem:[#allocation4] sm:$0x3] (%p31_p0), %v900_v13 }
  0x42   : > { %487 = vst [vmem:[%s828_s28 + $0x3] sm:$0x1] %v180_v12  ;;  %v346_v25 = vsub.f32 0.0, %v345_v18  ;;  %vm290_vm12 = vcmp.ge.f32.partialorder %v840_v32, 0.0  ;;  %vm309_vm13 = vcmp.ge.f32.partialorder %v847_v54, 0.0  ;;  %v253_v36 = vmul.f32 %v251_v19, %v234_v20 }
  0x43   : > { %v257_v28 = vadd.f32 %v256_v14, %v252_v37  ;;  %607 = vpow2.f32 %v328_v22  ;;  %v254_v38 = vmul.f32 %v501_v49, %v252_v37  ;;  %vm330_vm14 = vcmp.ge.f32.partialorder %v856_v3, 0.0 }
  0x44   : > { %v600_v24 = vpop.eup %599  ;;  %v347_v4 = vmul.f32 1.442695, %v346_v25  ;;  %vm349_vm15 = vcmp.ge.f32.partialorder %v862_v5, 0.0 }
  0x45   : > { %v602_v26 = vpop.eup %601  ;;  %v219_v27 = vmul.f32 %v600_v24, %v215_v0  ;;  %609 = vrcp.f32 %v257_v28  ;;  %v255_v50 = vadd.f32 %v254_v38, %v253_v36 }
  0x46   : > { %v271_v30 = vsel %vm269_vm11, %v602_v26, 1.0  ;;  %v270_v31 = vsel %vm269_vm11, 1.0, %v602_v26  ;;  %v604_v56 = vpop.eup %603  ;;  %611 = vpow2.f32 %v347_v4 }
  0x47   : > { %v220_v33 = vpack.c.bf16 %v219_v27, %v219_v27  ;;  %v273_v16 = vmul.f32 %v501_v49, %v271_v30  ;;  %v272_v21 = vmul.f32 %v270_v31, %v234_v20  ;;  %v275_v34 = vmul.f32 %v270_v31, %v236_v15 }
  0x48   : > { %v291_v35 = vsel %vm290_vm12, 1.0, %v604_v56  ;;  %v292_v44 = vsel %vm290_vm12, %v604_v56, 1.0 }
  0x49   : > { %495 = vst [vmem:[%s828_s28 + $0x4] sm:$0x1] %v220_v33  ;;  %v274_v23 = vadd.f32 %v273_v16, %v272_v21  ;;  %v276_v40 = vadd.f32 %v275_v34, %v271_v30  ;;  %v606_v41 = vpop.eup %605  ;;  %v294_v29 = vmul.f32 %v509_v42, %v292_v44 }
  0x4a   : > { %v311_v46 = vsel %vm309_vm13, %v606_v41, 1.0  ;;  %v310_v47 = vsel %vm309_vm13, 1.0, %v606_v41 }
  0x4b   : > { %v296_v45 = vmul.f32 %v291_v35, %v276_v40  ;;  %v315_v48 = vmul.f32 %v310_v47, %v276_v40  ;;  %v313_v52 = vmul.f32 %v509_v42, %v311_v46  ;;  %v312_v54 = vmul.f32 %v310_v47, %v274_v23 }
  0x4c   : > { %v293_v62 = vmul.f32 %v291_v35, %v274_v23 }
  0x4d   : > { %v297_v51 = vadd.f32 %v296_v45, %v292_v44  ;;  %v608_v39 = vpop.eup %607  ;;  %v316_v53 = vadd.f32 %v315_v48, %v311_v46  ;;  %v314_v61 = vadd.f32 %v313_v52, %v312_v54 }
  0x4e   : > { %v331_v55 = vsel %vm330_vm14, 1.0, %v608_v39  ;;  %v332_v57 = vsel %vm330_vm14, %v608_v39, 1.0  ;;  %v295_v5 = vadd.f32 %v294_v29, %v293_v62 }
  0x4f   : > { %613 = vrcp.f32 %v297_v51  ;;  %v610_v32 = vpop.eup %609  ;;  %v336_v58 = vmul.f32 %v331_v55, %v316_v53  ;;  %v333_v43 = vmul.f32 %v331_v55, %v314_v61  ;;  %v334_v15 = vmul.f32 %v517_v63, %v332_v57 }
  0x50   : > { %v612_v59 = vpop.eup %611  ;;  %v259_v60 = vmul.f32 %v610_v32, %v255_v50 }
  0x51   : > { %v337_v3 = vadd.f32 %v336_v58, %v332_v57  ;;  %v350_v6 = vsel %vm349_vm15, 1.0, %v612_v59  ;;  %v351_v7 = vsel %vm349_vm15, %v612_v59, 1.0  ;;  %v335_v19 = vadd.f32 %v334_v15, %v333_v43 }
  0x52   : > { %v260_v8 = vpack.c.bf16 %v259_v60, %v259_v60  ;;  %v352_v9 = vmul.f32 %v350_v6, %v314_v61  ;;  %v353_v10 = vmul.f32 %v517_v63, %v351_v7  ;;  %v355_v11 = vmul.f32 %v350_v6, %v316_v53 }
  0x53   : > { %615 = vrcp.f32 %v337_v3  ;;  %v901_v6 = vmov %v900_v13 }
  0x54   : > { %503 = vst [vmem:[%s828_s28 + $0x5] sm:$0x1] %v260_v8  ;;  %v354_v12 = vadd.f32 %v353_v10, %v352_v9   ;;  %v356_v0 = vadd.f32 %v355_v11, %v351_v7  }
  0x56   : > { %v903_v4 = vmov %v354_v12  ;;  %358 = vst [vmem:[#allocation2] sm:$0x3] (%p31_p0), %v354_v12  ;;  %359 = vst [vmem:[#allocation3] sm:$0x3] (%p31_p0), %v356_v0 }
  0x59   : > { %v614_v17 = vpop.eup %613 }
  0x5a   : > { %v299_v18 = vmul.f32 %v614_v17, %v295_v5  ;;  %v902_v5 = vmov %v356_v0 }
  0x5c   : > { %v300_v37 = vpack.c.bf16 %v299_v18, %v299_v18  ;;  %33 = sbr.rel (!%p31_p0) target bundleno = 10 (0xa), region = 71 }
  0x5d   : > { %v616_v20 = vpop.eup %615 }
  0x5e   : > { %511 = vst [vmem:[%s828_s28 + $0x6] sm:$0x1] %v300_v37  ;;  %v339_v14 = vmul.f32 %v616_v20, %v335_v19 }
  0x60   : > { %v340_v22 = vpack.c.bf16 %v339_v14, %v339_v14 }
  0x62   : > { %519 = vst [vmem:[%s828_s28 + $0x7] sm:$0x1] %v340_v22 }

// kernel: rwkv_encoder_forward.15
= control target key start
LH: loop header
LB: loop body
LE: loop exit
PB: predicated region body
PF: predicated region fallthrough
CT: control target
= control target key end

     0   :  { %v218_v12 = vlaneseq  ;;  %s4614_s0 = inlined_call_operand.vmem [shape: f32[256,128], index: 0, kind: input, shape index: {}]   ;;  %s4615_s2 = inlined_call_operand.vmem [shape: f32[3,128], index: 2, kind: input, shape index: {}]   ;;  %s4616_s3 = inlined_call_operand.vmem [shape: bf16[3,128,128], index: 3, kind: input, shape index: {}]   ;;  %s4617_s1 = inlined_call_operand.vmem [shape: f32[2,128], index: 1, kind: input, shape index: {}]   ;;  %s4618_s4 = inlined_call_operand.vmem [shape: f32[256,128], index: 4, kind: output, shape index: {0}]   ;;  %s4619_s6 = inlined_call_operand.vmem [shape: bf16[256,128], index: 6, kind: output, shape index: {2}]   ;;  %s4620_s5 = inlined_call_operand.vmem [shape: f32[256,128], index: 5, kind: output, shape index: {1}]  }
   0x1   :  { %v3040_v0 = vld [vmem:[%s4614_s0] sm:$0xff]  ;;  %v3045_v1 = vld [vmem:[%s4614_s0 + $0x8] sm:$0xff]  ;;  %v3052_v2 = vld [vmem:[%s4614_s0 + $0xf8] sm:$0xff] }
   0x2   :  { %90 = vadd.xlane.f32.xlu0 %v3040_v0  ;;  %92 = vadd.xlane.f32.xlu1 %v3045_v1  ;;  %v3057_v3 = vld [vmem:[%s4614_s0 + $0x10] sm:$0xff]  ;;  %v3064_v4 = vld [vmem:[%s4614_s0 + $0x18] sm:$0xff]  ;;  %v3069_v5 = vld [vmem:[%s4614_s0 + $0x20] sm:$0xff]  ;;  %v3119_v15 = vshrl.u32 %v218_v12, 7  ;;  %v3250_v39 = vand.u32 127, %v218_v12 }
   0x3   :  { %v3076_v6 = vld [vmem:[%s4614_s0 + $0x28] sm:$0xff]  ;;  %v3081_v7 = vld [vmem:[%s4614_s0 + $0x30] sm:$0xff]  ;;  %v3088_v8 = vld [vmem:[%s4614_s0 + $0x38] sm:$0xff] }
   0x4   :  { %v3093_v9 = vld [vmem:[%s4614_s0 + $0x40] sm:$0xff]  ;;  %v3100_v10 = vld [vmem:[%s4614_s0 + $0x48] sm:$0xff]  ;;  %v3105_v11 = vld [vmem:[%s4614_s0 + $0x50] sm:$0xff]  ;;  %v3130_v18 = vsub.s32 1, %v3119_v15  ;;  %vm220_vm0 = vcmp.lt.s32.totalorder %v3250_v39, 32  ;;  %vm616_vm1 = vcmp.lt.s32.totalorder %v3119_v15, 2 }
   0x5   :  { %v3112_v13 = vld [vmem:[%s4614_s0 + $0x58] sm:$0xff]  ;;  %v3117_v14 = vld [vmem:[%s4614_s0 + $0x60] sm:$0xff]  ;;  %v3137_v19 = vld [vmem:[%s4614_s0 + $0x68] sm:$0xff] }
   0x6   :  { %152 = vadd.xlane.f32.xlu0 %v3052_v2  ;;  %94 = vadd.xlane.f32.xlu1 %v3057_v3  ;;  %v3124_v16 = vld [vmem:[%s4615_s2] sm:$0x7]  ;;  %v3142_v20 = vld [vmem:[%s4614_s0 + $0x70] sm:$0xff]  ;;  %v3157_v23 = vld [vmem:[%s4614_s0 + $0x78] sm:$0xff] }
   0x7   :  { %v3127_v17 = vsub.f32 1.0, %v3124_v16  ;;  %v3146_v21 = vrot.slane %v3124_v16, %v3130_v18  ;;  %v3162_v24 = vld [vmem:[%s4614_s0 + $0x80] sm:$0xff]  ;;  %v3169_v25 = vld [vmem:[%s4614_s0 + $0x88] sm:$0xff]  ;;  %v3174_v26 = vld [vmem:[%s4614_s0 + $0x90] sm:$0xff] }
   0x8   :  { %v3181_v27 = vld [vmem:[%s4614_s0 + $0x98] sm:$0xff]  ;;  %v3186_v28 = vld [vmem:[%s4614_s0 + $0xa0] sm:$0xff]  ;;  %v3193_v29 = vld [vmem:[%s4614_s0 + $0xa8] sm:$0xff] }
   0x9   :  { %4688 = vst [vmem:[#allocation3_spill] sm:$0xff] %v3146_v21  ;;  %v3150_v22 = vrot.slane %v3127_v17, %v3130_v18  ;;  %v3198_v30 = vld [vmem:[%s4614_s0 + $0xb0] sm:$0xff]  ;;  %v3205_v31 = vld [vmem:[%s4614_s0 + $0xb8] sm:$0xff]  ;;  %v3210_v32 = vld [vmem:[%s4614_s0 + $0xc0] sm:$0xff] }
   0xa   :  { %96 = vadd.xlane.f32.xlu0 %v3064_v4  ;;  %98 = vadd.xlane.f32.xlu1 %v3069_v5  ;;  %v3217_v33 = vld [vmem:[%s4614_s0 + $0xc8] sm:$0xff]  ;;  %v3222_v34 = vld [vmem:[%s4614_s0 + $0xd0] sm:$0xff]  ;;  %v3229_v35 = vld [vmem:[%s4614_s0 + $0xd8] sm:$0xff] }
   0xb   :  { %4689 = vst [vmem:[#allocation4_spill] sm:$0xff] %v3150_v22  ;;  %v3234_v36 = vld [vmem:[%s4614_s0 + $0xe0] sm:$0xff]  ;;  %v3241_v37 = vld [vmem:[%s4614_s0 + $0xe8] sm:$0xff]  ;;  %v3246_v38 = vld [vmem:[%s4614_s0 + $0xf0] sm:$0xff] }
   0xc   :  { %v3510_v39 = vld [vmem:[%s4616_s3 + $0x40] sm:$0xff]  }
   0xd   :  { %4691 = vst [vmem:[#allocation6_spill] sm:$0xff] %v3510_v39 }
   0xe   :  { %100 = vadd.xlane.f32.xlu0 %v3076_v6  ;;  %102 = vadd.xlane.f32.xlu1 %v3081_v7 }
  0x12   :  { %104 = vadd.xlane.f32.xlu0 %v3088_v8  ;;  %106 = vadd.xlane.f32.xlu1 %v3093_v9 }
  0x16   :  { %108 = vadd.xlane.f32.xlu0 %v3100_v10  ;;  %110 = vadd.xlane.f32.xlu1 %v3105_v11 }
  0x1a   :  { %112 = vadd.xlane.f32.xlu0 %v3112_v13  ;;  %114 = vadd.xlane.f32.xlu1 %v3117_v14 }
  0x1e   :  { %116 = vadd.xlane.f32.xlu0 %v3137_v19  ;;  %118 = vadd.xlane.f32.xlu1 %v3142_v20 }
  0x22   :  { %120 = vadd.xlane.f32.xlu0 %v3157_v23  ;;  %122 = vadd.xlane.f32.xlu1 %v3162_v24 }
  0x26   :  { %124 = vadd.xlane.f32.xlu0 %v3169_v25  ;;  %126 = vadd.xlane.f32.xlu1 %v3174_v26 }
  0x2a   :  { %128 = vadd.xlane.f32.xlu0 %v3181_v27  ;;  %130 = vadd.xlane.f32.xlu1 %v3186_v28 }
  0x2e   :  { %132 = vadd.xlane.f32.xlu0 %v3193_v29  ;;  %134 = vadd.xlane.f32.xlu1 %v3198_v30 }
  0x32   :  { %136 = vadd.xlane.f32.xlu0 %v3205_v31  ;;  %138 = vadd.xlane.f32.xlu1 %v3210_v32 }
  0x36   :  { %140 = vadd.xlane.f32.xlu0 %v3217_v33  ;;  %142 = vadd.xlane.f32.xlu1 %v3222_v34 }
  0x3a   :  { %144 = vadd.xlane.f32.xlu0 %v3229_v35  ;;  %146 = vadd.xlane.f32.xlu1 %v3234_v36 }
  0x3e   :  { %148 = vadd.xlane.f32.xlu0 %v3241_v37  ;;  %150 = vadd.xlane.f32.xlu1 %v3246_v38 }
  0x8f   :  { %v91_v40 = vpop.xlane.xlu0 %90  ;;  %v93_v41 = vpop.xlane.xlu1 %92 }
  0x90   :  { %v154_v42 = vmul.f32 0.03125, %v91_v40  ;;  %v155_v43 = vmul.f32 0.03125, %v93_v41 }
  0x92   :  { %v186_v44 = vsub.f32 %v3040_v0, %v154_v42  ;;  %v187_v45 = vsub.f32 %v3045_v1, %v155_v43 }
  0x93   :  { %v153_v46 = vpop.xlane.xlu0 %152  ;;  %v95_v47 = vpop.xlane.xlu1 %94 }
  0x94   :  { %v185_v48 = vmul.f32 0.03125, %v153_v46  ;;  %v156_v49 = vmul.f32 0.03125, %v95_v47  ;;  %v3257_v50 = vsel %vm220_vm0, %v186_v44, 0.0  ;;  %v3261_v51 = vsel %vm220_vm0, %v187_v45, 0.0 }
  0x95   :  { %v255_v52 = vmul.f32 %v3257_v50, %v3257_v50  ;;  %v256_v57 = vmul.f32 %v3261_v51, %v3261_v51 }
  0x96   :  { %v217_v53 = vsub.f32 %v3052_v2, %v185_v48  ;;  %v188_v54 = vsub.f32 %v3057_v3, %v156_v49 }
  0x97   :  { %287 = vadd.xlane.f32.xlu0 %v255_v52  ;;  %v97_v55 = vpop.xlane.xlu0 %96  ;;  %v99_v56 = vpop.xlane.xlu1 %98 }
  0x98   :  { %v157_v58 = vmul.f32 0.03125, %v97_v55  ;;  %v158_v59 = vmul.f32 0.03125, %v99_v56  ;;  %v3271_v60 = vsel %vm220_vm0, %v217_v53, 0.0  ;;  %v3275_v61 = vsel %vm220_vm0, %v188_v54, 0.0 }
  0x99   :  { %v286_v62 = vmul.f32 %v3271_v60, %v3271_v60  ;;  %v257_v3 = vmul.f32 %v3275_v61, %v3275_v61 }
  0x9a   :  { %v189_v63 = vsub.f32 %v3064_v4, %v157_v58  ;;  %v190_v0 = vsub.f32 %v3069_v5, %v158_v59 }
  0x9b   :  { %289 = vadd.xlane.f32.xlu0 %v256_v57  ;;  %349 = vadd.xlane.f32.xlu1 %v286_v62  ;;  %v101_v1 = vpop.xlane.xlu0 %100  ;;  %v103_v2 = vpop.xlane.xlu1 %102 }
  0x9c   :  { %v159_v12 = vmul.f32 0.03125, %v101_v1  ;;  %v160_v40 = vmul.f32 0.03125, %v103_v2  ;;  %v3285_v41 = vsel %vm220_vm0, %v189_v63, 0.0  ;;  %v3289_v42 = vsel %vm220_vm0, %v190_v0, 0.0 }
  0x9d   :  { %v258_v4 = vmul.f32 %v3285_v41, %v3285_v41  ;;  %v259_v46 = vmul.f32 %v3289_v42, %v3289_v42 }
  0x9e   :  { %v191_v5 = vsub.f32 %v3076_v6, %v159_v12  ;;  %v192_v43 = vsub.f32 %v3081_v7, %v160_v40 }
  0x9f   :  { %291 = vadd.xlane.f32.xlu1 %v257_v3  ;;  %293 = vadd.xlane.f32.xlu0 %v258_v4  ;;  %v105_v44 = vpop.xlane.xlu0 %104  ;;  %v107_v45 = vpop.xlane.xlu1 %106 }
  0xa0   :  { %v161_v47 = vmul.f32 0.03125, %v105_v44  ;;  %v162_v48 = vmul.f32 0.03125, %v107_v45  ;;  %v3299_v49 = vsel %vm220_vm0, %v191_v5, 0.0  ;;  %v3303_v52 = vsel %vm220_vm0, %v192_v43, 0.0  ;;  %v2786_v43 = vld [vmem:[%s4616_s3] sm:$0xff]  }
  0xa1   :  { %v260_v6 = vmul.f32 %v3299_v49, %v3299_v49  ;;  %v261_v56 = vmul.f32 %v3303_v52, %v3303_v52  ;;  %2626 = vmatprep.subr.bf16.mxu0 %v2786_v43  ;;  %2770 = vmatprep.subr.bf16.mxu1 %v2786_v43 }
  0xa2   :  { %v193_v7 = vsub.f32 %v3088_v8, %v161_v47  ;;  %v194_v53 = vsub.f32 %v3093_v9, %v162_v48  ;;  %2627 = vmatpush3.bf16.msra.mxu0 %v2786_v43  ;;  %2778 = vmatpush3.bf16.msra.mxu1 %v2786_v43 }
  0xa3   :  { %295 = vadd.xlane.f32.xlu1 %v259_v46  ;;  %297 = vadd.xlane.f32.xlu0 %v260_v6  ;;  %v109_v54 = vpop.xlane.xlu0 %108  ;;  %v111_v55 = vpop.xlane.xlu1 %110 }
  0xa4   :  { %v163_v57 = vmul.f32 0.03125, %v109_v54  ;;  %v164_v58 = vmul.f32 0.03125, %v111_v55  ;;  %v3313_v59 = vsel %vm220_vm0, %v193_v7, 0.0  ;;  %v3317_v62 = vsel %vm220_vm0, %v194_v53, 0.0  ;;  %v2787_v54 = vld [vmem:[%s4616_s3 + $0x8] sm:$0xff]  }
  0xa5   :  { %v262_v8 = vmul.f32 %v3313_v59, %v3313_v59  ;;  %v263_v2 = vmul.f32 %v3317_v62, %v3317_v62  ;;  %2628 = vmatprep.subr.bf16.mxu0 %v2787_v54  ;;  %2771 = vmatprep.subr.bf16.mxu1 %v2787_v54 }
  0xa6   :  { %v195_v9 = vsub.f32 %v3100_v10, %v163_v57  ;;  %v196_v63 = vsub.f32 %v3105_v11, %v164_v58  ;;  %2629 = vmatpush3.bf16.msra.mxu0 %v2787_v54  ;;  %2779 = vmatpush3.bf16.msra.mxu1 %v2787_v54 }
  0xa7   :  { %299 = vadd.xlane.f32.xlu1 %v261_v56  ;;  %301 = vadd.xlane.f32.xlu0 %v262_v8  ;;  %v113_v0 = vpop.xlane.xlu0 %112  ;;  %v115_v1 = vpop.xlane.xlu1 %114 }
  0xa8   :  { %v165_v3 = vmul.f32 0.03125, %v113_v0  ;;  %v166_v12 = vmul.f32 0.03125, %v115_v1  ;;  %v3327_v40 = vsel %vm220_vm0, %v195_v9, 0.0  ;;  %v3331_v4 = vsel %vm220_vm0, %v196_v63, 0.0  ;;  %v2788_v1 = vld [vmem:[%s4616_s3 + $0x10] sm:$0xff]  }
  0xa9   :  { %v264_v10 = vmul.f32 %v3327_v40, %v3327_v40  ;;  %v265_v46 = vmul.f32 %v3331_v4, %v3331_v4  ;;  %2630 = vmatprep.subr.bf16.mxu0 %v2788_v1  ;;  %2772 = vmatprep.subr.bf16.mxu1 %v2788_v1 }
  0xaa   :  { %v197_v11 = vsub.f32 %v3112_v13, %v165_v3  ;;  %v198_v5 = vsub.f32 %v3117_v14, %v166_v12  ;;  %2631 = vmatpush3.bf16.msra.mxu0 %v2788_v1  ;;  %2780 = vmatpush3.bf16.msra.mxu1 %v2788_v1 }
  0xab   :  { %303 = vadd.xlane.f32.xlu1 %v263_v2  ;;  %305 = vadd.xlane.f32.xlu0 %v264_v10  ;;  %v117_v44 = vpop.xlane.xlu0 %116  ;;  %v119_v45 = vpop.xlane.xlu1 %118 }
  0xac   :  { %v167_v47 = vmul.f32 0.03125, %v117_v44  ;;  %v168_v48 = vmul.f32 0.03125, %v119_v45  ;;  %v3344_v6 = vsel %vm220_vm0, %v197_v11, 0.0  ;;  %v3348_v13 = vsel %vm220_vm0, %v198_v5, 0.0  ;;  %v2789_v45 = vld [vmem:[%s4616_s3 + $0x18] sm:$0xff]  }
  0xad   :  { %v266_v14 = vmul.f32 %v3344_v6, %v3344_v6  ;;  %v267_v57 = vmul.f32 %v3348_v13, %v3348_v13  ;;  %2632 = vmatprep.subr.bf16.mxu0 %v2789_v45  ;;  %2773 = vmatprep.subr.bf16.mxu1 %v2789_v45 }
  0xae   :  { %v199_v7 = vsub.f32 %v3137_v19, %v167_v47  ;;  %v200_v53 = vsub.f32 %v3142_v20, %v168_v48  ;;  %2633 = vmatpush3.bf16.msra.mxu0 %v2789_v45  ;;  %2781 = vmatpush3.bf16.msra.mxu1 %v2789_v45 }
  0xaf   :  { %307 = vadd.xlane.f32.xlu1 %v265_v46  ;;  %309 = vadd.xlane.f32.xlu0 %v266_v14  ;;  %v121_v55 = vpop.xlane.xlu0 %120  ;;  %v123_v56 = vpop.xlane.xlu1 %122 }
  0xb0   :  { %v169_v58 = vmul.f32 0.03125, %v121_v55  ;;  %v170_v8 = vmul.f32 0.03125, %v123_v56  ;;  %v3361_v9 = vsel %vm220_vm0, %v199_v7, 0.0  ;;  %v3365_v19 = vsel %vm220_vm0, %v200_v53, 0.0  ;;  %v2790_v56 = vld [vmem:[%s4616_s3 + $0x20] sm:$0xff]  }
  0xb1   :  { %v268_v20 = vmul.f32 %v3361_v9, %v3361_v9  ;;  %v269_v12 = vmul.f32 %v3365_v19, %v3365_v19  ;;  %2634 = vmatprep.subr.bf16.mxu0 %v2790_v56  ;;  %2774 = vmatprep.subr.bf16.mxu1 %v2790_v56 }
  0xb2   :  { %v201_v63 = vsub.f32 %v3157_v23, %v169_v58  ;;  %v202_v0 = vsub.f32 %v3162_v24, %v170_v8  ;;  %2635 = vmatpush3.bf16.msra.mxu0 %v2790_v56  ;;  %2782 = vmatpush3.bf16.msra.mxu1 %v2790_v56 }
  0xb3   :  { %311 = vadd.xlane.f32.xlu1 %v267_v57  ;;  %313 = vadd.xlane.f32.xlu0 %v268_v20  ;;  %v125_v2 = vpop.xlane.xlu0 %124  ;;  %v127_v3 = vpop.xlane.xlu1 %126 }
  0xb4   :  { %v171_v10 = vmul.f32 0.03125, %v125_v2  ;;  %v172_v11 = vmul.f32 0.03125, %v127_v3  ;;  %v3378_v5 = vsel %vm220_vm0, %v201_v63, 0.0  ;;  %v3382_v23 = vsel %vm220_vm0, %v202_v0, 0.0  ;;  %v2791_v3 = vld [vmem:[%s4616_s3 + $0x28] sm:$0xff]  }
  0xb5   :  { %v270_v24 = vmul.f32 %v3378_v5, %v3378_v5  ;;  %v271_v48 = vmul.f32 %v3382_v23, %v3382_v23  ;;  %2636 = vmatprep.subr.bf16.mxu0 %v2791_v3  ;;  %2775 = vmatprep.subr.bf16.mxu1 %v2791_v3 }
  0xb6   :  { %v203_v43 = vsub.f32 %v3169_v25, %v171_v10  ;;  %v204_v44 = vsub.f32 %v3174_v26, %v172_v11  ;;  %2637 = vmatpush3.bf16.msra.mxu0 %v2791_v3  ;;  %2783 = vmatpush3.bf16.msra.mxu1 %v2791_v3 }
  0xb7   :  { %315 = vadd.xlane.f32.xlu1 %v269_v12  ;;  %317 = vadd.xlane.f32.xlu0 %v270_v24  ;;  %v129_v46 = vpop.xlane.xlu0 %128  ;;  %v131_v47 = vpop.xlane.xlu1 %130 }
  0xb8   :  { %v173_v14 = vmul.f32 0.03125, %v129_v46  ;;  %v174_v7 = vmul.f32 0.03125, %v131_v47  ;;  %v3395_v53 = vsel %vm220_vm0, %v203_v43, 0.0  ;;  %v3399_v25 = vsel %vm220_vm0, %v204_v44, 0.0  ;;  %v2792_v47 = vld [vmem:[%s4616_s3 + $0x30] sm:$0xff]  }
  0xb9   :  { %v272_v26 = vmul.f32 %v3395_v53, %v3395_v53  ;;  %v273_v8 = vmul.f32 %v3399_v25, %v3399_v25  ;;  %2638 = vmatprep.subr.bf16.mxu0 %v2792_v47  ;;  %2776 = vmatprep.subr.bf16.mxu1 %v2792_v47 }
  0xba   :  { %v205_v54 = vsub.f32 %v3181_v27, %v173_v14  ;;  %v206_v55 = vsub.f32 %v3186_v28, %v174_v7  ;;  %2639 = vmatpush3.bf16.msra.mxu0 %v2792_v47  ;;  %2784 = vmatpush3.bf16.msra.mxu1 %v2792_v47 }
  0xbb   :  { %319 = vadd.xlane.f32.xlu1 %v271_v48  ;;  %321 = vadd.xlane.f32.xlu0 %v272_v26  ;;  %v133_v57 = vpop.xlane.xlu0 %132  ;;  %v135_v58 = vpop.xlane.xlu1 %134 }
  0xbc   :  { %v175_v20 = vmul.f32 0.03125, %v133_v57  ;;  %v176_v63 = vmul.f32 0.03125, %v135_v58  ;;  %v3412_v0 = vsel %vm220_vm0, %v205_v54, 0.0  ;;  %v3416_v27 = vsel %vm220_vm0, %v206_v55, 0.0  ;;  %v2793_v58 = vld [vmem:[%s4616_s3 + $0x38] sm:$0xff]  }
  0xbd   :  { %v274_v28 = vmul.f32 %v3412_v0, %v3412_v0  ;;  %v275_v11 = vmul.f32 %v3416_v27, %v3416_v27  ;;  %2640 = vmatprep.subr.bf16.mxu0 %v2793_v58  ;;  %2777 = vmatprep.subr.bf16.mxu1 %v2793_v58 }
  0xbe   :  { %v207_v1 = vsub.f32 %v3193_v29, %v175_v20  ;;  %v208_v2 = vsub.f32 %v3198_v30, %v176_v63  ;;  %2641 = vmatpush3.bf16.msra.mxu0 %v2793_v58  ;;  %2785 = vmatpush3.bf16.msra.mxu1 %v2793_v58 }
  0xbf   :  { %323 = vadd.xlane.f32.xlu1 %v273_v8  ;;  %325 = vadd.xlane.f32.xlu0 %v274_v28  ;;  %v137_v12 = vpop.xlane.xlu0 %136  ;;  %v139_v10 = vpop.xlane.xlu1 %138 }
  0xc0   :  { %v177_v24 = vmul.f32 0.03125, %v137_v12  ;;  %v178_v43 = vmul.f32 0.03125, %v139_v10  ;;  %v3429_v44 = vsel %vm220_vm0, %v207_v1, 0.0  ;;  %v3433_v29 = vsel %vm220_vm0, %v208_v2, 0.0  ;;  %2674 = vmatprep.subr.bf16.mxu1 %v3510_v39 }
  0xc1   :  { %v276_v30 = vmul.f32 %v3429_v44, %v3429_v44  ;;  %v277_v7 = vmul.f32 %v3433_v29, %v3433_v29 }
  0xc2   :  { %v209_v45 = vsub.f32 %v3205_v31, %v177_v24  ;;  %v210_v46 = vsub.f32 %v3210_v32, %v178_v43 }
  0xc3   :  { %327 = vadd.xlane.f32.xlu1 %v275_v11  ;;  %329 = vadd.xlane.f32.xlu0 %v276_v30  ;;  %v141_v48 = vpop.xlane.xlu0 %140  ;;  %v143_v14 = vpop.xlane.xlu1 %142 }
  0xc4   :  { %v179_v26 = vmul.f32 0.03125, %v141_v48  ;;  %v180_v54 = vmul.f32 0.03125, %v143_v14  ;;  %v3446_v55 = vsel %vm220_vm0, %v209_v45, 0.0  ;;  %v3450_v31 = vsel %vm220_vm0, %v210_v46, 0.0 }
  0xc5   :  { %v278_v32 = vmul.f32 %v3446_v55, %v3446_v55  ;;  %v279_v63 = vmul.f32 %v3450_v31, %v3450_v31 }
  0xc6   :  { %v211_v56 = vsub.f32 %v3217_v33, %v179_v26  ;;  %v212_v57 = vsub.f32 %v3222_v34, %v180_v54 }
  0xc7   :  { %331 = vadd.xlane.f32.xlu1 %v277_v7  ;;  %333 = vadd.xlane.f32.xlu0 %v278_v32  ;;  %v145_v8 = vpop.xlane.xlu0 %144  ;;  %v147_v20 = vpop.xlane.xlu1 %146 }
  0xc8   :  { %v181_v28 = vmul.f32 0.03125, %v145_v8  ;;  %v182_v1 = vmul.f32 0.03125, %v147_v20  ;;  %v3463_v2 = vsel %vm220_vm0, %v211_v56, 0.0  ;;  %v3467_v33 = vsel %vm220_vm0, %v212_v57, 0.0 }
  0xc9   :  { %v280_v34 = vmul.f32 %v3463_v2, %v3463_v2  ;;  %v281_v24 = vmul.f32 %v3467_v33, %v3467_v33 }
  0xca   :  { %v213_v3 = vsub.f32 %v3229_v35, %v181_v28  ;;  %v214_v12 = vsub.f32 %v3234_v36, %v182_v1 }
  0xcb   :  { %335 = vadd.xlane.f32.xlu1 %v279_v63  ;;  %337 = vadd.xlane.f32.xlu0 %v280_v34  ;;  %v149_v10 = vpop.xlane.xlu0 %148  ;;  %v151_v11 = vpop.xlane.xlu1 %150 }
  0xcc   :  { %v183_v43 = vmul.f32 0.03125, %v149_v10  ;;  %v184_v30 = vmul.f32 0.03125, %v151_v11  ;;  %v3477_v45 = vsel %vm220_vm0, %v213_v3, 0.0  ;;  %v3481_v46 = vsel %vm220_vm0, %v214_v12, 0.0  ;;  %v57_v11 = vld [vmem:[%s4617_s1] sm:$0x3] }
  0xcd   :  { %v282_v35 = vmul.f32 %v3477_v45, %v3477_v45  ;;  %v283_v48 = vmul.f32 %v3481_v46, %v3481_v46  ;;  %v481_v10 = vsub.s32 0, %v3119_v15 }
  0xce   :  { %v215_v36 = vsub.f32 %v3241_v37, %v183_v43  ;;  %v216_v47 = vsub.f32 %v3246_v38, %v184_v30  ;;  %v3504_v38 = vld [vmem:[%s4616_s3 + $0x80] sm:$0xff]  }
  0xcf   :  { %339 = vadd.xlane.f32.xlu1 %v281_v24  ;;  %341 = vadd.xlane.f32.xlu0 %v282_v35 }
  0xd0   :  { %v3491_v14 = vsel %vm220_vm0, %v215_v36, 0.0  ;;  %v3495_v7 = vsel %vm220_vm0, %v216_v47, 0.0  ;;  %2722 = vmatprep.subr.bf16.mxu0 %v3504_v38 }
  0xd1   :  { %4690 = vst [vmem:[#allocation5_spill] sm:$0xff] %v3495_v7  ;;  %v284_v26 = vmul.f32 %v3491_v14, %v3491_v14  ;;  %v285_v37 = vmul.f32 %v3495_v7, %v3495_v7 }
  0xd3   :  { %343 = vadd.xlane.f32.xlu1 %v283_v48  ;;  %345 = vadd.xlane.f32.xlu0 %v284_v26  ;;  %v3517_v48 = vrot.slane %v57_v11, %v481_v10 }
  0xd7   :  { %347 = vadd.xlane.f32.xlu1 %v285_v37 }
 0x124   :  { %v288_v54 = vpop.xlane.xlu0 %287 }
 0x125   :  { %v351_v32 = vmul.f32 0.03125, %v288_v54 }
 0x127   :  { %v383_v56 = vadd.f32 1e-05, %v351_v32  ;;  %v3520_v32 = vrot.slane %v57_v11, %v3130_v18  ;;  %v3530_v11 = vrot.slane %v3127_v17, %v481_v10 }
 0x128   :  { %v350_v57 = vpop.xlane.xlu1 %349  ;;  %v290_v58 = vpop.xlane.xlu0 %289 }
 0x129   :  { %2810 = vrsqrt.f32 %v383_v56  ;;  %v382_v8 = vmul.f32 0.03125, %v350_v57  ;;  %v352_v20 = vmul.f32 0.03125, %v290_v58  ;;  %v1052_v56 = vsub.s32 2, %v3119_v15 }
 0x12b   :  { %v414_v63 = vadd.f32 1e-05, %v382_v8  ;;  %v384_v28 = vadd.f32 1e-05, %v352_v20 }
 0x12c   :  { %v292_v1 = vpop.xlane.xlu1 %291  ;;  %v294_v34 = vpop.xlane.xlu0 %293 }
 0x12d   :  { %2812 = vrsqrt.f32 %v414_v63  ;;  %v353_v3 = vmul.f32 0.03125, %v292_v1  ;;  %v354_v12 = vmul.f32 0.03125, %v294_v34  ;;  %v3527_v34 = vrot.slane %v3124_v16, %v481_v10 }
 0x12e   :  { %2814 = vrsqrt.f32 %v384_v28 }
 0x12f   :  { %v385_v24 = vadd.f32 1e-05, %v353_v3  ;;  %v386_v43 = vadd.f32 1e-05, %v354_v12 }
 0x130   :  { %v296_v30 = vpop.xlane.xlu1 %295  ;;  %v298_v35 = vpop.xlane.xlu0 %297 }
 0x131   :  { %2816 = vrsqrt.f32 %v385_v24  ;;  %v355_v36 = vmul.f32 0.03125, %v296_v30  ;;  %v356_v47 = vmul.f32 0.03125, %v298_v35 }
 0x132   :  { %2818 = vrsqrt.f32 %v386_v43 }
 0x133   :  { %v2811_v26 = vpop.eup %2810  ;;  %v387_v37 = vadd.f32 1e-05, %v355_v36  ;;  %v388_v54 = vadd.f32 1e-05, %v356_v47 }
 0x134   :  { %v447_v57 = vmul.f32 %v2811_v26, %v3257_v50  ;;  %v300_v58 = vpop.xlane.xlu1 %299  ;;  %v302_v8 = vpop.xlane.xlu0 %301  ;;  %v3533_v50 = vrot.slane %v3124_v16, %v1052_v56 }
 0x135   :  { %2820 = vrsqrt.f32 %v387_v37  ;;  %v357_v20 = vmul.f32 0.03125, %v300_v58  ;;  %v358_v63 = vmul.f32 0.03125, %v302_v8  ;;  %v3539_v37 = vrot.slane %v3127_v17, %v1052_v56 }
 0x136   :  { %2822 = vrsqrt.f32 %v388_v54  ;;  %v483_v28 = vmul.f32 %v3517_v48, %v447_v57 }
 0x137   :  { %v2813_v1 = vpop.eup %2812  ;;  %v389_v18 = vadd.f32 1e-05, %v357_v20  ;;  %v390_v3 = vadd.f32 1e-05, %v358_v63 }
 0x138   :  { %v2815_v12 = vpop.eup %2814  ;;  %v478_v24 = vmul.f32 %v2813_v1, %v3271_v60  ;;  %v304_v43 = vpop.xlane.xlu1 %303  ;;  %v519_v35 = vadd.f32 %v3520_v32, %v483_v28 }
 0x139   :  { %v306_v30 = vpop.xlane.xlu0 %305  ;;  %v448_v36 = vmul.f32 %v2815_v12, %v3261_v51  ;;  %2824 = vrsqrt.f32 %v389_v18  ;;  %v359_v47 = vmul.f32 0.03125, %v304_v43 }
 0x13a   :  { %v360_v26 = vmul.f32 0.03125, %v306_v30  ;;  %v514_v10 = vmul.f32 %v3517_v48, %v478_v24  ;;  %2826 = vrsqrt.f32 %v390_v3  ;;  %v584_v54 = vrot.slane %v519_v35, 6 }
 0x13b   :  { %v2817_v16 = vpop.eup %2816  ;;  %v391_v57 = vadd.f32 1e-05, %v359_v47  ;;  %v484_v60 = vmul.f32 %v3517_v48, %v448_v36  ;;  %v845_v8 = vmul.f32 %v3527_v34, %v519_v35  ;;  %v3549_v56 = vmul.f32 %v3533_v50, %v519_v35 }
 0x13c   :  { %v392_v58 = vadd.f32 1e-05, %v360_v26  ;;  %v2819_v20 = vpop.eup %2818  ;;  %v3545_v51 = vadd.f32 %v3520_v32, %v514_v10  ;;  %v449_v63 = vmul.f32 %v2817_v16, %v3275_v61  ;;  %v308_v28 = vpop.xlane.xlu1 %307  ;;  %v3552_v1 = vmul.f32 %v3146_v21, %v519_v35 }
 0x13d   :  { %v310_v17 = vpop.xlane.xlu0 %309  ;;  %v450_v18 = vmul.f32 %v2819_v20, %v3285_v41  ;;  %2828 = vrsqrt.f32 %v391_v57  ;;  %v361_v3 = vmul.f32 0.03125, %v308_v28  ;;  %v3557_v43 = vadd.f32 %v3520_v32, %v484_v60 }
 0x13e   :  { %4692 = vst [vmem:[#allocation7_spill] sm:$0xff] %v3545_v51  ;;  %4693 = vst [vmem:[#allocation8_spill] sm:$0xff] %v3552_v1  ;;  %v362_v12 = vmul.f32 0.03125, %v310_v17  ;;  %v485_v24 = vmul.f32 %v3517_v48, %v449_v63  ;;  %2830 = vrsqrt.f32 %v392_v58  ;;  %v4621_v61 = vrot.slane %v3545_v51, 6 }
 0x13f   :  { %4694 = vst [vmem:[#allocation9_spill] sm:$0xff] %v3557_v43  ;;  %v2821_v30 = vpop.eup %2820  ;;  %v486_v36 = vmul.f32 %v3517_v48, %v450_v18  ;;  %v393_v47 = vadd.f32 1e-05, %v361_v3  ;;  %v3563_v35 = vmul.f32 %v3527_v34, %v3545_v51  ;;  %v585_v58 = vrot.slane %v3557_v43, 6 }
 0x140   :  { %v394_v26 = vadd.f32 1e-05, %v362_v12  ;;  %v2823_v41 = vpop.eup %2822  ;;  %v451_v10 = vmul.f32 %v2821_v30, %v3289_v42  ;;  %v312_v16 = vpop.xlane.xlu1 %311  ;;  %v648_v60 = vsel %vm616_vm1, %v4621_v61, %v584_v54  ;;  %v846_v20 = vmul.f32 %v3527_v34, %v3557_v43 }
 0x141   :  { %4695 = vst [vmem:[#allocation10_spill] sm:$0xff] %v3563_v35  ;;  %v314_v57 = vpop.xlane.xlu0 %313  ;;  %v452_v63 = vmul.f32 %v2823_v41, %v3299_v49  ;;  %2832 = vrsqrt.f32 %v393_v47  ;;  %v363_v28 = vmul.f32 0.03125, %v312_v16  ;;  %v3579_v42 = vsel %vm616_vm1, %v584_v54, %v585_v58 }
 0x142   :  { %v364_v17 = vmul.f32 0.03125, %v314_v57  ;;  %v3575_v18 = vmul.f32 %v3517_v48, %v451_v10  ;;  %2834 = vrsqrt.f32 %v394_v26  ;;  %4696 = vst [vmem:[#allocation11_spill] sm:$0xff] %v3579_v42  ;;  %v3583_v3 = vsel %vm616_vm1, 0.0, %v648_v60 }
 0x143   :  { %4697 = vst [vmem:[#allocation12_spill] sm:$0xff] %v3583_v3  ;;  %v2825_v12 = vpop.eup %2824  ;;  %v3586_v30 = vmul.f32 %v3517_v48, %v452_v63  ;;  %v395_v49 = vadd.f32 1e-05, %v363_v28  ;;  %v882_v41 = vmul.f32 %v3530_v11, %v3583_v3  ;;  %v883_v54 = vmul.f32 %v3530_v11, %v3579_v42 }
 0x144   :  { %v396_v47 = vadd.f32 1e-05, %v364_v17  ;;  %v2827_v10 = vpop.eup %2826  ;;  %v453_v26 = vmul.f32 %v2825_v12, %v3303_v52  ;;  %v316_v16 = vpop.xlane.xlu1 %315  ;;  %v3594_v60 = vadd.f32 %v3520_v32, %v485_v24  ;;  %v3597_v61 = vadd.f32 %v3520_v32, %v486_v36 }
 0x145   :  { %v318_v57 = vpop.xlane.xlu0 %317  ;;  %v454_v63 = vmul.f32 %v2827_v10, %v3313_v59  ;;  %2836 = vrsqrt.f32 %v395_v49  ;;  %v365_v28 = vmul.f32 0.03125, %v316_v16  ;;  %v914_v52 = vadd.f32 %v882_v41, %v845_v8 }
 0x146   :  { %v366_v17 = vmul.f32 0.03125, %v318_v57  ;;  %v3601_v1 = vmul.f32 %v3517_v48, %v453_v26  ;;  %2838 = vrsqrt.f32 %v396_v47  ;;  %v915_v12 = vadd.f32 %v883_v54, %v846_v20 }
 0x147   :  { %v2829_v21 = vpop.eup %2828  ;;  %v3604_v35 = vmul.f32 %v3517_v48, %v454_v63  ;;  %v397_v24 = vadd.f32 1e-05, %v365_v28  ;;  %v586_v36 = vrot.slane %v3594_v60, 6  ;;  %v4627_v26 = vrot.slane %v3597_v61, 6 }
 0x148   :  { %v398_v51 = vadd.f32 1e-05, %v366_v17  ;;  %v2831_v39 = vpop.eup %2830  ;;  %v455_v59 = vmul.f32 %v2829_v21, %v3317_v62  ;;  %v320_v49 = vpop.xlane.xlu1 %319  ;;  %v1154_v10 = vpack.c.bf16 %v915_v12, %v914_v52  ;;  %v847_v8 = vmul.f32 %v3527_v34, %v3594_v60 }
 0x149   :  { %v322_v16 = vpop.xlane.xlu0 %321  ;;  %v456_v20 = vmul.f32 %v2831_v39, %v3327_v40  ;;  %2840 = vrsqrt.f32 %v397_v24  ;;  %v367_v47 = vmul.f32 0.03125, %v320_v49  ;;  %v645_v21 = vsel %vm616_vm1, %v586_v36, %v4627_v26 }
 0x14a   :  { %v368_v41 = vmul.f32 0.03125, %v322_v16  ;;  %v3613_v57 = vmul.f32 %v3517_v48, %v455_v59  ;;  %2842 = vrsqrt.f32 %v398_v51  ;;  %2642 = vmatprep.mubr.bf16.mxu0 %v1154_v10  ;;  %v646_v62 = vsel %vm616_vm1, %v585_v58, %v586_v36 }
 0x14b   :  { %v2833_v54 = vpop.eup %2832  ;;  %v3622_v63 = vmul.f32 %v3517_v48, %v456_v20  ;;  %v399_v40 = vadd.f32 1e-05, %v367_v47  ;;  %v848_v28 = vmul.f32 %v3527_v34, %v3597_v61  ;;  %v884_v52 = vmul.f32 %v3530_v11, %v646_v62 }
 0x14c   :  { %v400_v39 = vadd.f32 1e-05, %v368_v41  ;;  %v2835_v17 = vpop.eup %2834  ;;  %v457_v51 = vmul.f32 %v2833_v54, %v3331_v4  ;;  %v885_v12 = vmul.f32 %v3530_v11, %v645_v21  ;;  %v3630_v24 = vmul.f32 %v3150_v22, %v646_v62  ;;  %v324_v58 = vpop.xlane.xlu1 %323 }
 0x14d   :  { %v326_v36 = vpop.xlane.xlu0 %325  ;;  %v458_v59 = vmul.f32 %v2835_v17, %v3344_v6  ;;  %2844 = vrsqrt.f32 %v399_v40  ;;  %v3634_v49 = vmul.f32 %v3150_v22, %v645_v21  ;;  %v3637_v10 = vmul.f32 %v3539_v37, %v646_v62 }
 0x14e   :  { %4698 = vst [vmem:[#allocation13_spill] sm:$0xff] %v3630_v24  ;;  %v3640_v4 = vmul.f32 %v3517_v48, %v457_v51  ;;  %2846 = vrsqrt.f32 %v400_v39  ;;  %v916_v16 = vadd.f32 %v884_v52, %v847_v8  ;;  %v917_v20 = vadd.f32 %v885_v12, %v848_v28  ;;  %v2795_v39 = vld [vmem:[%s4616_s3 + $0x88] sm:$0xff]  }
 0x14f   :  { %4699 = vst [vmem:[#allocation14_spill] sm:$0xff] %v3634_v49  ;;  %v2837_v47 = vpop.eup %2836  ;;  %v3643_v41 = vmul.f32 %v3517_v48, %v458_v59  ;;  %v3646_v54 = vmul.f32 %v3539_v37, %v645_v21  ;;  %v369_v6 = vmul.f32 0.03125, %v324_v58  ;;  %v370_v40 = vmul.f32 0.03125, %v326_v36 }
 0x150   :  { %v2839_v17 = vpop.eup %2838  ;;  %v459_v26 = vmul.f32 %v2837_v47, %v3348_v13  ;;  %v1155_v62 = vpack.c.bf16 %v917_v20, %v916_v16  ;;  %v3651_v51 = vadd.f32 %v3520_v32, %v3575_v18  ;;  %v3655_v8 = vadd.f32 %v3520_v32, %v3586_v30  ;;  %v328_v21 = vpop.xlane.xlu1 %327 }
 0x151   :  { %v330_v28 = vpop.xlane.xlu0 %329  ;;  %v460_v52 = vmul.f32 %v2839_v17, %v3361_v9  ;;  %v401_v12 = vadd.f32 1e-05, %v369_v6  ;;  %v402_v58 = vadd.f32 1e-05, %v370_v40  ;;  %v371_v13 = vmul.f32 0.03125, %v328_v21 }
 0x152   :  { %v3662_v36 = vmul.f32 %v3517_v48, %v459_v26  ;;  %2643 = vmatmul.mubr.bf16.vlgmr.msra.gmra.mrb[0].mxu0 %v1155_v62  ;;  %v588_v18 = vrot.slane %v3651_v51, 6  ;;  %v589_v30 = vrot.slane %v3655_v8, 6  ;;  %v849_v59 = vmul.f32 %v3527_v34, %v3651_v51 }
 0x153   :  { %v2841_v16 = vpop.eup %2840  ;;  %v3669_v20 = vmul.f32 %v3517_v48, %v460_v52  ;;  %2848 = vrsqrt.f32 %v401_v12  ;;  %2723 = vmatpush3.bf16.msra.mxu0 %v3504_v38  ;;  %v850_v9 = vmul.f32 %v3527_v34, %v3655_v8  ;;  %v403_v26 = vadd.f32 1e-05, %v371_v13  ;;  %v2796_v38 = vld [vmem:[%s4616_s3 + $0x90] sm:$0xff]  }
 0x154   :  { %v2843_v47 = vpop.eup %2842  ;;  %v461_v6 = vmul.f32 %v2841_v16, %v3365_v19  ;;  %2850 = vrsqrt.f32 %v402_v58  ;;  %v3677_v40 = vsel %vm616_vm1, %v588_v18, %v589_v30  ;;  %v4700_v17 = vrot.slane %v3597_v61, 6  ;;  %2724 = vmatprep.subr.bf16.mxu0 %v2795_v39  ;;  %v332_v21 = vpop.xlane.xlu1 %331 }
 0x155   :  { %v334_v52 = vpop.xlane.xlu0 %333  ;;  %v462_v19 = vmul.f32 %v2843_v47, %v3378_v5  ;;  %v887_v58 = vmul.f32 %v3530_v11, %v3677_v40  ;;  %2852 = vrsqrt.f32 %v403_v26  ;;  %v3698_v16 = vadd.f32 %v3520_v32, %v3601_v1 }
 0x156   :  { %v3683_v62 = vsel %vm616_vm1, %v4700_v17, %v588_v18  ;;  %v3694_v13 = vmul.f32 %v3517_v48, %v461_v6  ;;  %v372_v18 = vmul.f32 0.03125, %v330_v28  ;;  %v3702_v17 = vadd.f32 %v3520_v32, %v3604_v35  ;;  %v2797_v35 = vld [vmem:[%s4616_s3 + $0x98] sm:$0xff]  }
 0x157   :  { %v886_v12 = vmul.f32 %v3530_v11, %v3683_v62  ;;  %4701 = vst [vmem:[#allocation15_spill] sm:$0xff] %v3698_v16  ;;  %v2845_v5 = vpop.eup %2844  ;;  %v3705_v47 = vmul.f32 %v3517_v48, %v462_v19  ;;  %v919_v24 = vadd.f32 %v887_v58, %v850_v9  ;;  %2725 = vmatpush3.bf16.msra.mxu0 %v2795_v39  ;;  %v373_v26 = vmul.f32 0.03125, %v332_v21 }
 0x158   :  { %4702 = vst [vmem:[#allocation16_spill] sm:$0xff] %v3702_v17  ;;  %v2847_v22 = vpop.eup %2846  ;;  %v3708_v6 = vmul.f32 %v2845_v5, %v3382_v23  ;;  %v404_v28 = vadd.f32 1e-05, %v372_v18  ;;  %v590_v1 = vrot.slane %v3698_v16, 6  ;;  %v591_v7 = vrot.slane %v3702_v17, 6  ;;  %2726 = vmatprep.subr.bf16.mxu0 %v2796_v38  ;;  %v336_v9 = vpop.xlane.xlu1 %335 }
 0x159   :  { %v918_v49 = vadd.f32 %v886_v12, %v849_v59  ;;  %v3716_v19 = vmul.f32 %v2847_v22, %v3395_v53  ;;  %v851_v39 = vmul.f32 %v3527_v34, %v3698_v16  ;;  %v852_v23 = vmul.f32 %v3527_v34, %v3702_v17  ;;  %v338_v21 = vpop.xlane.xlu0 %337 }
 0x15a   :  { %2854 = vrsqrt.f32 %v404_v28  ;;  %v3724_v12 = vsel %vm616_vm1, %v590_v1, %v591_v7  ;;  %v3728_v58 = vsel %vm616_vm1, %v589_v30, %v590_v1  ;;  %v405_v22 = vadd.f32 1e-05, %v373_v26  ;;  %v2798_v28 = vld [vmem:[%s4616_s3 + $0xa0] sm:$0xff]  }
 0x15b   :  { %v1156_v59 = vpack.c.bf16 %v919_v24, %v918_v49  ;;  %4703 = vst [vmem:[#allocation17_spill] sm:$0xff] %v3724_v12  ;;  %4704 = vst [vmem:[#allocation18_spill] sm:$0xff] %v3728_v58  ;;  %v888_v53 = vmul.f32 %v3530_v11, %v3728_v58  ;;  %v889_v24 = vmul.f32 %v3530_v11, %v3724_v12  ;;  %2727 = vmatpush3.bf16.msra.mxu0 %v2796_v38 }
 0x15c   :  { %v374_v49 = vmul.f32 0.03125, %v334_v52  ;;  %v3736_v18 = vadd.f32 %v3520_v32, %v3613_v57  ;;  %2856 = vrsqrt.f32 %v405_v22  ;;  %v3740_v5 = vadd.f32 %v3520_v32, %v3622_v63  ;;  %2728 = vmatprep.subr.bf16.mxu0 %v2797_v35 }
 0x15d   :  { %2646 = vmatprep.mubr.bf16.mxu0 %v1156_v59  ;;  %v375_v30 = vmul.f32 0.03125, %v336_v9  ;;  %v376_v26 = vmul.f32 0.03125, %v338_v21  ;;  %v2849_v1 = vpop.eup %2848  ;;  %v920_v59 = vadd.f32 %v888_v53, %v851_v39  ;;  %v921_v38 = vadd.f32 %v889_v24, %v852_v23 }
 0x15e   :  { %v406_v52 = vadd.f32 1e-05, %v374_v49  ;;  %v592_v12 = vrot.slane %v3736_v18, 6  ;;  %v2851_v57 = vpop.eup %2850  ;;  %v465_v22 = vmul.f32 %v2849_v1, %v3399_v25  ;;  %v593_v58 = vrot.slane %v3740_v5, 6  ;;  %v342_v49 = vpop.xlane.xlu0 %341 }
 0x15f   :  { %v853_v63 = vmul.f32 %v3527_v34, %v3736_v18  ;;  %v854_v9 = vmul.f32 %v3527_v34, %v3740_v5  ;;  %v2853_v21 = vpop.eup %2852  ;;  %v466_v17 = vmul.f32 %v2851_v57, %v3412_v0  ;;  %v1157_v16 = vpack.c.bf16 %v921_v38, %v920_v59  ;;  %2729 = vmatpush3.bf16.msra.mxu0 %v2797_v35  ;;  %v340_v0 = vpop.xlane.xlu1 %339 }
 0x160   :  { %2858 = vrsqrt.f32 %v406_v52  ;;  %v3755_v39 = vsel %vm616_vm1, %v591_v7, %v592_v12  ;;  %v3758_v25 = vmul.f32 %v3517_v48, %v465_v22  ;;  %v467_v23 = vmul.f32 %v2853_v21, %v3416_v27  ;;  %2730 = vmatprep.subr.bf16.mxu0 %v2798_v28  ;;  %v2799_v7 = vld [vmem:[%s4616_s3 + $0xa8] sm:$0xff]  }
 0x161   :  { %v3763_v53 = vsel %vm616_vm1, %v592_v12, %v593_v58  ;;  %v890_v24 = vmul.f32 %v3530_v11, %v3755_v39  ;;  %v3771_v35 = vmul.f32 %v3517_v48, %v466_v17  ;;  %2647 = vmatmul.mubr.bf16.gmra.mrb[4].mxu0 %v1157_v16  ;;  %v407_v1 = vadd.f32 1e-05, %v375_v30 }
 0x162   :  { %v891_v27 = vmul.f32 %v3530_v11, %v3763_v53  ;;  %v408_v12 = vadd.f32 1e-05, %v376_v26  ;;  %v3776_v59 = vmul.f32 %v3517_v48, %v467_v23  ;;  %v3780_v52 = vadd.f32 %v3520_v32, %v3640_v4 }
 0x163   :  { %v922_v38 = vadd.f32 %v890_v24, %v853_v63  ;;  %v3784_v57 = vadd.f32 %v3520_v32, %v3643_v41  ;;  %2860 = vrsqrt.f32 %v407_v1  ;;  %v377_v16 = vmul.f32 0.03125, %v340_v0  ;;  %2731 = vmatpush3.bf16.msra.mxu0 %v2798_v28  ;;  %v2800_v28 = vld [vmem:[%s4616_s3 + $0xb0] sm:$0xff]  }
 0x164   :  { %4705 = vst [vmem:[#allocation19_spill] sm:$0xff] %v3780_v52  ;;  %v923_v17 = vadd.f32 %v891_v27, %v854_v9  ;;  %v378_v22 = vmul.f32 0.03125, %v342_v49  ;;  %v2855_v21 = vpop.eup %2854  ;;  %2862 = vrsqrt.f32 %v408_v12  ;;  %v594_v30 = vrot.slane %v3780_v52, 6  ;;  %2732 = vmatprep.subr.bf16.mxu0 %v2799_v7 }
 0x165   :  { %4706 = vst [vmem:[#allocation20_spill] sm:$0xff] %v3784_v57  ;;  %v595_v26 = vrot.slane %v3784_v57, 6  ;;  %v855_v63 = vmul.f32 %v3527_v34, %v3780_v52  ;;  %v468_v4 = vmul.f32 %v2855_v21, %v3429_v44  ;;  %v856_v41 = vmul.f32 %v3527_v34, %v3784_v57 }
 0x166   :  { %v1158_v23 = vpack.c.bf16 %v923_v17, %v922_v38  ;;  %v409_v9 = vadd.f32 1e-05, %v377_v16  ;;  %v2857_v24 = vpop.eup %2856  ;;  %v3802_v49 = vsel %vm616_vm1, %v593_v58, %v594_v30  ;;  %v410_v27 = vadd.f32 1e-05, %v378_v22  ;;  %v344_v22 = vpop.xlane.xlu1 %343 }
 0x167   :  { %v3798_v0 = vsel %vm616_vm1, %v594_v30, %v595_v26  ;;  %4707 = vst [vmem:[#allocation21_spill] sm:$0xff] %v3802_v49  ;;  %v3806_v44 = vadd.f32 %v3520_v32, %v3662_v36  ;;  %v3809_v1 = vmul.f32 %v3517_v48, %v468_v4  ;;  %v469_v12 = vmul.f32 %v2857_v24, %v3433_v29  ;;  %v346_v29 = vpop.xlane.xlu0 %345 }
 0x168   :  { %2650 = vmatprep.mubr.bf16.mxu0 %v1158_v23  ;;  %v892_v38 = vmul.f32 %v3530_v11, %v3802_v49  ;;  %v893_v17 = vmul.f32 %v3530_v11, %v3798_v0  ;;  %2864 = vrsqrt.f32 %v409_v9  ;;  %v3818_v58 = vadd.f32 %v3520_v32, %v3669_v20  ;;  %2733 = vmatpush3.bf16.msra.mxu0 %v2799_v7  ;;  %v2801_v20 = vld [vmem:[%s4616_s3 + $0xb8] sm:$0xff]  }
 0x169   :  { %4708 = vst [vmem:[#allocation22_spill] sm:$0xff] %v3806_v44  ;;  %v596_v36 = vrot.slane %v3806_v44, 6  ;;  %v857_v16 = vmul.f32 %v3527_v34, %v3806_v44  ;;  %v3824_v30 = vmul.f32 %v3517_v48, %v469_v12  ;;  %2866 = vrsqrt.f32 %v410_v27  ;;  %2734 = vmatprep.subr.bf16.mxu0 %v2800_v28 }
 0x16a   :  { %v2859_v21 = vpop.eup %2858  ;;  %v924_v4 = vadd.f32 %v892_v38, %v855_v63  ;;  %v925_v23 = vadd.f32 %v893_v17, %v856_v41  ;;  %v597_v24 = vrot.slane %v3818_v58, 6  ;;  %v858_v12 = vmul.f32 %v3527_v34, %v3818_v58 }
 0x16b   :  { %v470_v9 = vmul.f32 %v2859_v21, %v3446_v55  ;;  %v3833_v7 = vsel %vm616_vm1, %v595_v26, %v596_v36  ;;  %v379_v41 = vmul.f32 0.03125, %v344_v22  ;;  %v380_v27 = vmul.f32 0.03125, %v346_v29 }
 0x16c   :  { %4709 = vst [vmem:[#allocation23_spill] sm:$0xff] %v3833_v7  ;;  %v1159_v44 = vpack.c.bf16 %v925_v23, %v924_v4  ;;  %v894_v63 = vmul.f32 %v3530_v11, %v3833_v7  ;;  %v3844_v55 = vsel %vm616_vm1, %v596_v36, %v597_v24  ;;  %v3848_v26 = vadd.f32 %v3520_v32, %v3694_v13 }
 0x16d   :  { %v3840_v38 = vmul.f32 %v3517_v48, %v470_v9  ;;  %v3852_v17 = vadd.f32 %v3520_v32, %v3705_v47  ;;  %2735 = vmatpush3.bf16.msra.mxu0 %v2800_v28  ;;  %v2861_v21 = vpop.eup %2860  ;;  %v895_v22 = vmul.f32 %v3530_v11, %v3844_v55  ;;  %v411_v4 = vadd.f32 1e-05, %v379_v41 }
 0x16e   :  { %4710 = vst [vmem:[#allocation24_spill] sm:$0xff] %v3848_v26  ;;  %2651 = vmatmul.mubr.bf16.gmra.mrb[8].mxu0 %v1159_v44  ;;  %v926_v29 = vadd.f32 %v894_v63, %v857_v16  ;;  %v412_v23 = vadd.f32 1e-05, %v380_v27  ;;  %2736 = vmatprep.subr.bf16.mxu0 %v2801_v20  ;;  %v2863_v36 = vpop.eup %2862  ;;  %v471_v9 = vmul.f32 %v2861_v21, %v3450_v31  ;;  %v598_v13 = vrot.slane %v3848_v26, 6  ;;  %v348_v63 = vpop.xlane.xlu1 %347 }
 0x16f   :  { %4711 = vst [vmem:[#allocation25_spill] sm:$0xff] %v3852_v17  ;;  %v599_v7 = vrot.slane %v3852_v17, 6  ;;  %v859_v47 = vmul.f32 %v3527_v34, %v3848_v26  ;;  %v472_v28 = vmul.f32 %v2863_v36, %v3463_v2  ;;  %v927_v44 = vadd.f32 %v895_v22, %v858_v12 }
 0x170   :  { %2868 = vrsqrt.f32 %v411_v4  ;;  %v860_v16 = vmul.f32 %v3527_v34, %v3852_v17  ;;  %v3865_v41 = vmul.f32 %v3517_v48, %v471_v9  ;;  %v3873_v27 = vsel %vm616_vm1, %v597_v24, %v598_v13 }
 0x171   :  { %2870 = vrsqrt.f32 %v412_v23  ;;  %v3869_v31 = vsel %vm616_vm1, %v598_v13, %v599_v7  ;;  %4713 = vst [vmem:[#allocation27_spill] sm:$0xff] %v3873_v27  ;;  %2737 = vmatpush3.bf16.msra.mxu0 %v2801_v20  ;;  %v3876_v2 = vmul.f32 %v3517_v48, %v472_v28  ;;  %v1160_v12 = vpack.c.bf16 %v927_v44, %v926_v29 }
 0x172   :  { %4712 = vst [vmem:[#allocation26_spill] sm:$0xff] %v3869_v31  ;;  %v896_v21 = vmul.f32 %v3530_v11, %v3873_v27  ;;  %v897_v22 = vmul.f32 %v3530_v11, %v3869_v31  ;;  %v2865_v4 = vpop.eup %2864  ;;  %v381_v23 = vmul.f32 0.03125, %v348_v63  ;;  %v1055_v36 = vmul.f32 %v3533_v50, %v3557_v43 }
 0x173   :  { %v1090_v24 = vmul.f32 %v3539_v37, %v3583_v3  ;;  %v1091_v20 = vmul.f32 %v3539_v37, %v3579_v42  ;;  %v2867_v9 = vpop.eup %2866  ;;  %v473_v29 = vmul.f32 %v2865_v4, %v3467_v33  ;;  %2654 = vmatprep.mubr.bf16.mxu0 %v1160_v12  ;;  %v499_v44 = vmul.f32 %v3517_v48, %v3708_v6 }
 0x174   :  { %v928_v13 = vadd.f32 %v896_v21, %v859_v47  ;;  %v929_v28 = vadd.f32 %v897_v22, %v860_v16  ;;  %v474_v63 = vmul.f32 %v2867_v9, %v3477_v45  ;;  %v413_v31 = vadd.f32 1e-05, %v381_v23 }
 0x175   :  { %v1122_v43 = vadd.f32 %v1090_v24, %v3549_v56  ;;  %v1123_v27 = vadd.f32 %v1091_v20, %v1055_v36  ;;  %v3894_v3 = vmul.f32 %v3517_v48, %v473_v29  ;;  %v500_v42 = vmul.f32 %v3517_v48, %v3716_v19 }
 0x176   :  { %v1161_v17 = vpack.c.bf16 %v929_v28, %v928_v13  ;;  %v3899_v33 = vadd.f32 %v3520_v32, %v499_v44  ;;  %v3902_v47 = vmul.f32 %v3517_v48, %v474_v63  ;;  %2872 = vrsqrt.f32 %v413_v31 }
 0x177   :  { %v1701_v6 = vpack.c.bf16 %v1123_v27, %v1122_v43  ;;  %v3906_v45 = vadd.f32 %v3520_v32, %v3758_v25  ;;  %v3909_v56 = vadd.f32 %v3520_v32, %v500_v42  ;;  %v3916_v12 = vadd.f32 %v3520_v32, %v3771_v35 }
 0x178   :  { %2655 = vmatmul.mubr.bf16.gmra.mrb[12].mxu0 %v1161_v17  ;;  %v600_v16 = vrot.slane %v3899_v33, 6  ;;  %v861_v19 = vmul.f32 %v3527_v34, %v3899_v33  ;;  %v1056_v17 = vmul.f32 %v3533_v50, %v3594_v60  ;;  %v1057_v42 = vmul.f32 %v3533_v50, %v3597_v61 }
 0x179   :  { %2738 = vmatprep.mubr.bf16.mxu0 %v1701_v6  ;;  %v602_v43 = vrot.slane %v3906_v45, 6  ;;  %v863_v25 = vmul.f32 %v3527_v34, %v3906_v45  ;;  %v601_v27 = vrot.slane %v3909_v56, 6  ;;  %v862_v35 = vmul.f32 %v3527_v34, %v3909_v56 }
 0x17a   :  { %v2869_v31 = vpop.eup %2868  ;;  %v3928_v21 = vsel %vm616_vm1, %v599_v7, %v600_v16  ;;  %v603_v22 = vrot.slane %v3916_v12, 6  ;;  %v864_v24 = vmul.f32 %v3527_v34, %v3916_v12  ;;  %v1124_v20 = vadd.f32 %v3637_v10, %v1056_v17 }
 0x17b   :  { %v2871_v4 = vpop.eup %2870  ;;  %v475_v23 = vmul.f32 %v2869_v31, %v3481_v46  ;;  %v898_v36 = vmul.f32 %v3530_v11, %v3928_v21  ;;  %v3942_v7 = vsel %vm616_vm1, %v600_v16, %v601_v27  ;;  %v3950_v46 = vsel %vm616_vm1, %v601_v27, %v602_v43 }
 0x17c   :  { %v476_v9 = vmul.f32 %v2871_v4, %v3491_v14  ;;  %v3946_v29 = vsel %vm616_vm1, %v602_v43, %v603_v22  ;;  %v899_v10 = vmul.f32 %v3530_v11, %v3942_v7  ;;  %v900_v14 = vmul.f32 %v3530_v11, %v3950_v46 }
 0x17d   :  { %v3953_v13 = vmul.f32 %v3517_v48, %v475_v23  ;;  %v930_v28 = vadd.f32 %v898_v36, %v861_v19  ;;  %v901_v63 = vmul.f32 %v3530_v11, %v3946_v29  ;;  %v1125_v6 = vadd.f32 %v3646_v54, %v1057_v42 }
 0x17e   :  { %v512_v44 = vmul.f32 %v3517_v48, %v476_v9  ;;  %v1058_v16 = vmul.f32 %v3533_v50, %v3651_v51  ;;  %v931_v43 = vadd.f32 %v899_v10, %v862_v35  ;;  %v932_v17 = vadd.f32 %v900_v14, %v863_v25  ;;  %v4715_v10 = vld [vmem:[#allocation5_spill] sm:$0xff] }
 0x17f   :  { %v1059_v31 = vmul.f32 %v3533_v50, %v3655_v8  ;;  %v1094_v19 = vmul.f32 %v3539_v37, %v3683_v62  ;;  %v933_v4 = vadd.f32 %v901_v63, %v864_v24  ;;  %v1702_v23 = vpack.c.bf16 %v1125_v6, %v1124_v20  ;;  %v2803_v20 = vld [vmem:[%s4616_s3 + $0x48] sm:$0xff]  }
 0x180   :  { %v3970_v27 = vadd.f32 %v3520_v32, %v512_v44  ;;  %v1095_v36 = vmul.f32 %v3539_v37, %v3677_v40  ;;  %v2873_v54 = vpop.eup %2872  ;;  %v1162_v42 = vpack.c.bf16 %v931_v43, %v930_v28  ;;  %v3976_v25 = vadd.f32 %v3520_v32, %v3776_v59 }
 0x181   :  { %v1126_v9 = vadd.f32 %v1094_v19, %v1058_v16  ;;  %v3980_v35 = vadd.f32 %v3520_v32, %v3809_v1  ;;  %v477_v14 = vmul.f32 %v2873_v54, %v4715_v10  ;;  %v1163_v44 = vpack.c.bf16 %v933_v4, %v932_v17  ;;  %2739 = vmatmul.mubr.bf16.vlgmr.msra.gmra.mrb[16].mxu0 %v1702_v23  ;;  %v4720_v23 = vld [vmem:[#allocation15_spill] sm:$0xff] }
 0x182   :  { %4714 = vst [vmem:[#allocation28_spill] sm:$0xff] %v3970_v27  ;;  %v1127_v24 = vadd.f32 %v1095_v36, %v1059_v31  ;;  %v3988_v28 = vadd.f32 %v3520_v32, %v3824_v30  ;;  %2658 = vmatprep.mubr.bf16.mxu1 %v1162_v42  ;;  %v604_v59 = vrot.slane %v3976_v25, 6  ;;  %v865_v1 = vmul.f32 %v3527_v34, %v3976_v25  ;;  %v4718_v31 = vld [vmem:[#allocation6_spill] sm:$0xff] }
 0x183   :  { %v605_v63 = vrot.slane %v3980_v35, 6  ;;  %v866_v6 = vmul.f32 %v3527_v34, %v3980_v35  ;;  %v513_v16 = vmul.f32 %v3517_v48, %v477_v14  ;;  %2659 = vmatmul.mubr.bf16.vlgmr.msra.gmra.mrb[0].mxu1 %v1163_v44  ;;  %v3999_v17 = vadd.f32 %v3520_v32, %v3840_v38  ;;  %v4722_v44 = vld [vmem:[#allocation16_spill] sm:$0xff] }
 0x184   :  { %4716 = vst [vmem:[#allocation5_spill] sm:$0xff] %v3988_v28  ;;  %v1703_v43 = vpack.c.bf16 %v1127_v24, %v1126_v9  ;;  %v606_v30 = vrot.slane %v3988_v28, 6  ;;  %2675 = vmatpush3.bf16.msra.mxu1 %v4718_v31  ;;  %v4009_v4 = vsel %vm616_vm1, %v603_v22, %v604_v59  ;;  %v867_v48 = vmul.f32 %v3527_v34, %v3988_v28  ;;  %v2804_v22 = vld [vmem:[%s4616_s3 + $0x50] sm:$0xff]  }
 0x185   :  { %4717 = vst [vmem:[#allocation29_spill] sm:$0xff] %v3999_v17  ;;  %v4005_v19 = vsel %vm616_vm1, %v604_v59, %v605_v63  ;;  %v1060_v36 = vmul.f32 %v3533_v50, %v4720_v23  ;;  %v4016_v38 = vadd.f32 %v3520_v32, %v513_v16  ;;  %2676 = vmatprep.subr.bf16.mxu1 %v2803_v20  ;;  %v607_v9 = vrot.slane %v3999_v17, 6  ;;  %v4723_v59 = vld [vmem:[#allocation18_spill] sm:$0xff] }
 0x186   :  { %4719 = vst [vmem:[#allocation6_spill] sm:$0xff] %v4005_v19  ;;  %2742 = vmatprep.mubr.bf16.mxu0 %v1703_v43  ;;  %v902_v54 = vmul.f32 %v3530_v11, %v4009_v4  ;;  %v903_v42 = vmul.f32 %v3530_v11, %v4005_v19  ;;  %v4028_v10 = vsel %vm616_vm1, %v605_v63, %v606_v30 }
 0x187   :  { %4721 = vst [vmem:[#allocation30_spill] sm:$0xff] %v4016_v38  ;;  %v868_v14 = vmul.f32 %v3527_v34, %v3999_v17  ;;  %v1061_v24 = vmul.f32 %v3533_v50, %v4722_v44  ;;  %v1096_v16 = vmul.f32 %v3539_v37, %v4723_v59  ;;  %v4038_v28 = vsel %vm616_vm1, %v606_v30, %v607_v9  ;;  %v4725_v17 = vld [vmem:[#allocation17_spill] sm:$0xff] }
 0x188   :  { %v934_v43 = vadd.f32 %v902_v54, %v865_v1  ;;  %v935_v31 = vadd.f32 %v903_v42, %v866_v6  ;;  %4724 = vst [vmem:[#allocation31_spill] sm:$0xff] %v4038_v28  ;;  %v904_v23 = vmul.f32 %v3530_v11, %v4028_v10  ;;  %2677 = vmatpush3.bf16.msra.mxu1 %v2803_v20  ;;  %v2805_v20 = vld [vmem:[%s4616_s3 + $0x58] sm:$0xff]  }
 0x189   :  { %v905_v63 = vmul.f32 %v3530_v11, %v4038_v28  ;;  %v1097_v19 = vmul.f32 %v3539_v37, %v4725_v17  ;;  %v1128_v44 = vadd.f32 %v1096_v16, %v1060_v36  ;;  %v1062_v59 = vmul.f32 %v3533_v50, %v3736_v18  ;;  %2678 = vmatprep.subr.bf16.mxu1 %v2804_v22 }
 0x18a   :  { %v1164_v1 = vpack.c.bf16 %v935_v31, %v934_v43  ;;  %v936_v6 = vadd.f32 %v904_v23, %v867_v48  ;;  %v1063_v30 = vmul.f32 %v3533_v50, %v3740_v5  ;;  %v1098_v54 = vmul.f32 %v3539_v37, %v3755_v39 }
 0x18b   :  { %v937_v42 = vadd.f32 %v905_v63, %v868_v14  ;;  %v1129_v28 = vadd.f32 %v1097_v19, %v1061_v24  ;;  %v1099_v36 = vmul.f32 %v3539_v37, %v3763_v53  ;;  %v4059_v16 = vadd.f32 %v3520_v32, %v3865_v41 }
 0x18c   :  { %2662 = vmatprep.mubr.bf16.mxu1 %v1164_v1  ;;  %v1130_v48 = vadd.f32 %v1098_v54, %v1062_v59  ;;  %v4063_v23 = vadd.f32 %v3520_v32, %v3876_v2  ;;  %v4067_v43 = vadd.f32 %v3520_v32, %v3894_v3  ;;  %v4071_v19 = vadd.f32 %v3520_v32, %v3902_v47  ;;  %v2806_v47 = vld [vmem:[%s4616_s3 + $0x60] sm:$0xff]  }
 0x18d   :  { %v1165_v14 = vpack.c.bf16 %v937_v42, %v936_v6  ;;  %2679 = vmatpush3.bf16.msra.mxu1 %v2804_v22  ;;  %v1704_v24 = vpack.c.bf16 %v1129_v28, %v1128_v44  ;;  %v1131_v31 = vadd.f32 %v1099_v36, %v1063_v30  ;;  %v608_v41 = vrot.slane %v4059_v16, 6 }
 0x18e   :  { %4726 = vst [vmem:[#allocation17_spill] sm:$0xff] %v4067_v43  ;;  %4727 = vst [vmem:[#allocation32_spill] sm:$0xff] %v4071_v19  ;;  %2680 = vmatprep.subr.bf16.mxu1 %v2805_v20  ;;  %v609_v59 = vrot.slane %v4063_v23, 6  ;;  %v869_v2 = vmul.f32 %v3527_v34, %v4059_v16  ;;  %v870_v3 = vmul.f32 %v3527_v34, %v4063_v23  ;;  %v610_v63 = vrot.slane %v4067_v43, 6 }
 0x18f   :  { %2663 = vmatmul.mubr.bf16.gmra.mrb[4].mxu1 %v1165_v14  ;;  %2743 = vmatmul.mubr.bf16.gmra.mrb[20].mxu0 %v1704_v24  ;;  %v1705_v28 = vpack.c.bf16 %v1131_v31, %v1130_v48  ;;  %v4085_v22 = vsel %vm616_vm1, %v607_v9, %v608_v41  ;;  %v611_v44 = vrot.slane %v4071_v19, 6  ;;  %v871_v1 = vmul.f32 %v3527_v34, %v4067_v43 }
 0x190   :  { %v4092_v6 = vsel %vm616_vm1, %v608_v41, %v609_v59  ;;  %v906_v30 = vmul.f32 %v3530_v11, %v4085_v22  ;;  %v4098_v54 = vsel %vm616_vm1, %v609_v59, %v610_v63  ;;  %v872_v9 = vmul.f32 %v3527_v34, %v4071_v19  ;;  %v2807_v59 = vld [vmem:[%s4616_s3 + $0x68] sm:$0xff]  }
 0x191   :  { %4728 = vst [vmem:[#allocation33_spill] sm:$0xff] %v4092_v6  ;;  %4729 = vst [vmem:[#allocation34_spill] sm:$0xff] %v4098_v54  ;;  %2746 = vmatprep.mubr.bf16.mxu0 %v1705_v28  ;;  %v907_v42 = vmul.f32 %v3530_v11, %v4092_v6  ;;  %2681 = vmatpush3.bf16.msra.mxu1 %v2805_v20  ;;  %v4106_v36 = vsel %vm616_vm1, %v610_v63, %v611_v44  ;;  %v613_v14 = vrot.slane %v3970_v27, 6 }
 0x192   :  { %4730 = vst [vmem:[#allocation35_spill] sm:$0xff] %v4106_v36  ;;  %v908_v48 = vmul.f32 %v3530_v11, %v4098_v54  ;;  %v938_v24 = vadd.f32 %v906_v30, %v869_v2  ;;  %2682 = vmatprep.subr.bf16.mxu1 %v2806_v47  ;;  %v909_v31 = vmul.f32 %v3530_v11, %v4106_v36  ;;  %v4731_v36 = vld [vmem:[#allocation22_spill] sm:$0xff] }
 0x193   :  { %v1064_v41 = vmul.f32 %v3533_v50, %v3780_v52  ;;  %v1065_v20 = vmul.f32 %v3533_v50, %v3784_v57  ;;  %v939_v63 = vadd.f32 %v907_v42, %v870_v3  ;;  %v1100_v54 = vmul.f32 %v3539_v37, %v3802_v49  ;;  %v4732_v57 = vld [vmem:[#allocation23_spill] sm:$0xff] }
 0x194   :  { %v940_v28 = vadd.f32 %v908_v48, %v871_v1  ;;  %v1101_v2 = vmul.f32 %v3539_v37, %v3798_v0  ;;  %v941_v30 = vadd.f32 %v909_v31, %v872_v9  ;;  %v1066_v19 = vmul.f32 %v3533_v50, %v4731_v36 }
 0x195   :  { %v1067_v43 = vmul.f32 %v3533_v50, %v3818_v58  ;;  %v1102_v52 = vmul.f32 %v3539_v37, %v4732_v57  ;;  %v1166_v6 = vpack.c.bf16 %v939_v63, %v938_v24  ;;  %2683 = vmatpush3.bf16.msra.mxu1 %v2806_v47  ;;  %v1132_v3 = vadd.f32 %v1100_v54, %v1064_v41  ;;  %v2808_v24 = vld [vmem:[%s4616_s3 + $0x70] sm:$0xff]  }
 0x196   :  { %v1133_v1 = vadd.f32 %v1101_v2, %v1065_v20  ;;  %v1103_v42 = vmul.f32 %v3539_v37, %v3844_v55  ;;  %v1167_v48 = vpack.c.bf16 %v941_v30, %v940_v28  ;;  %2684 = vmatprep.subr.bf16.mxu1 %v2807_v59  ;;  %v4134_v9 = vadd.f32 %v3520_v32, %v3953_v13  ;;  %v4734_v20 = vld [vmem:[#allocation25_spill] sm:$0xff] }
 0x197   :  { %v1134_v49 = vadd.f32 %v1102_v52, %v1066_v19  ;;  %v874_v31 = vmul.f32 %v3527_v34, %v3970_v27  ;;  %2666 = vmatprep.mubr.bf16.mxu1 %v1166_v6  ;;  %v614_v41 = vrot.slane %v4016_v38, 6  ;;  %v875_v52 = vmul.f32 %v3527_v34, %v4016_v38  ;;  %v4748_v27 = vld [vmem:[#allocation11_spill] sm:$0xff] }
 0x198   :  { %4733 = vst [vmem:[#allocation22_spill] sm:$0xff] %v4134_v9  ;;  %v1706_v47 = vpack.c.bf16 %v1133_v1, %v1132_v3  ;;  %v1135_v54 = vadd.f32 %v1103_v42, %v1067_v43  ;;  %2667 = vmatmul.mubr.bf16.gmra.mrb[8].mxu1 %v1167_v48  ;;  %v612_v19 = vrot.slane %v4134_v9, 6  ;;  %v873_v32 = vmul.f32 %v3527_v34, %v4134_v9  ;;  %v4735_v43 = vld [vmem:[#allocation7_spill] sm:$0xff]  ;;  %v2809_v1 = vld [vmem:[%s4616_s3 + $0x78] sm:$0xff]   ;;  %v4749_v9 = vld [vmem:[#allocation8_spill] sm:$0xff] }
 0x199   :  { %v1068_v13 = vmul.f32 %v3533_v50, %v3848_v26  ;;  %v1069_v63 = vmul.f32 %v3533_v50, %v4734_v20  ;;  %2685 = vmatpush3.bf16.msra.mxu1 %v2807_v59  ;;  %v4736_v28 = vrot.slane %v4735_v43, 6  ;;  %v4159_v30 = vsel %vm616_vm1, %v613_v14, %v614_v41  ;;  %v4742_v48 = vld [vmem:[#allocation26_spill] sm:$0xff]  ;;  %v4746_v43 = vld [vmem:[#allocation12_spill] sm:$0xff] }
 0x19a   :  { %2747 = vmatmul.mubr.bf16.gmra.mrb[24].mxu0 %v1706_v47  ;;  %v1707_v6 = vpack.c.bf16 %v1135_v54, %v1134_v49  ;;  %4738 = vst [vmem:[#allocation36_spill] sm:$0xff] %v4159_v30  ;;  %v4163_v34 = vsel %vm616_vm1, %v612_v19, %v613_v14  ;;  %v4167_v3 = vsel %vm616_vm1, %v611_v44, %v612_v19  ;;  %v4741_v44 = vld [vmem:[#allocation27_spill] sm:$0xff] }
 0x19b   :  { %v4155_v2 = vsel %vm616_vm1, %v614_v41, %v4736_v28  ;;  %4739 = vst [vmem:[#allocation37_spill] sm:$0xff] %v4163_v34  ;;  %4740 = vst [vmem:[#allocation38_spill] sm:$0xff] %v4167_v3  ;;  %2686 = vmatprep.subr.bf16.mxu1 %v2808_v24  ;;  %v912_v49 = vmul.f32 %v3530_v11, %v4159_v30  ;;  %v910_v14 = vmul.f32 %v3530_v11, %v4167_v3  ;;  %v4743_v41 = vld [vmem:[#allocation10_spill] sm:$0xff]  ;;  %v4744_v28 = vld [vmem:[#allocation9_spill] sm:$0xff] }
 0x19c   :  { %4737 = vst [vmem:[#allocation23_spill] sm:$0xff] %v4155_v2  ;;  %v913_v59 = vmul.f32 %v3530_v11, %v4155_v2  ;;  %2750 = vmatprep.mubr.bf16.mxu0 %v1707_v6  ;;  %v911_v15 = vmul.f32 %v3530_v11, %v4163_v34  ;;  %v1104_v42 = vmul.f32 %v3539_v37, %v4741_v44  ;;  %v4745_v2 = vld [vmem:[#allocation3_spill] sm:$0xff]  ;;  %v4747_v6 = vld [vmem:[#allocation4_spill] sm:$0xff] }
 0x19d   :  { %v1105_v47 = vmul.f32 %v3539_v37, %v4742_v48  ;;  %v944_v54 = vadd.f32 %v912_v49, %v875_v52  ;;  %v951_v30 = vmul.f32 %v4745_v2, %v4744_v28  ;;  %v986_v38 = vmul.f32 %v4747_v6, %v4746_v43  ;;  %2687 = vmatpush3.bf16.msra.mxu1 %v2808_v24 }
 0x19e   :  { %v945_v19 = vadd.f32 %v913_v59, %v4743_v41  ;;  %v942_v20 = vadd.f32 %v910_v14, %v873_v32  ;;  %v943_v26 = vadd.f32 %v911_v15, %v874_v31  ;;  %v1136_v3 = vadd.f32 %v1104_v42, %v1068_v13  ;;  %2688 = vmatprep.subr.bf16.mxu1 %v2809_v1  ;;  %v4751_v14 = vld [vmem:[#allocation14_spill] sm:$0xff] }
 0x19f   :  { %v1137_v11 = vadd.f32 %v1105_v47, %v1069_v63  ;;  %v987_v44 = vmul.f32 %v4747_v6, %v4748_v27  ;;  %v1018_v48 = vadd.f32 %v986_v38, %v4749_v9  ;;  %v1070_v52 = vmul.f32 %v3533_v50, %v3899_v33 }
 0x1a0   :  { %v1169_v34 = vpack.c.bf16 %v945_v19, %v944_v54  ;;  %v1168_v49 = vpack.c.bf16 %v943_v26, %v942_v20  ;;  %v1071_v43 = vmul.f32 %v3533_v50, %v3909_v56  ;;  %v1106_v31 = vmul.f32 %v3539_v37, %v3928_v21 }
 0x1a1   :  { %v1708_v59 = vpack.c.bf16 %v1137_v11, %v1136_v3  ;;  %v1019_v24 = vadd.f32 %v987_v44, %v951_v30  ;;  %v1107_v32 = vmul.f32 %v3539_v37, %v3942_v7  ;;  %v952_v27 = vmul.f32 %v4745_v2, %v3594_v60  ;;  %v4750_v30 = vld [vmem:[#allocation13_spill] sm:$0xff]  ;;  %2689 = vmatpush3.bf16.msra.mxu1 %v2809_v1 }
 0x1a2   :  { %v953_v38 = vmul.f32 %v4745_v2, %v3597_v61  ;;  %2670 = vmatprep.mubr.bf16.mxu1 %v1168_v49  ;;  %v1138_v26 = vadd.f32 %v1106_v31, %v1070_v52  ;;  %v1072_v9 = vmul.f32 %v3533_v50, %v3906_v45  ;;  %v1073_v13 = vmul.f32 %v3533_v50, %v3916_v12  ;;  %v4752_v52 = vld [vmem:[#allocation6_spill] sm:$0xff] }
 0x1a3   :  { %2751 = vmatmul.mubr.bf16.gmra.mrb[28].mxu0 %v1708_v59  ;;  %2671 = vmatmul.mubr.bf16.gmra.mrb[12].mxu1 %v1169_v34  ;;  %v1427_v20 = vpack.c.bf16 %v1019_v24, %v1018_v48  ;;  %v1139_v63 = vadd.f32 %v1107_v32, %v1071_v43  ;;  %v1020_v3 = vadd.f32 %v4750_v30, %v952_v27  ;;  %v4753_v59 = vld [vmem:[#allocation15_spill] sm:$0xff]  ;;  %v4754_v43 = vld [vmem:[#allocation16_spill] sm:$0xff]  ;;  %v4755_v24 = vld [vmem:[#allocation18_spill] sm:$0xff] }
 0x1a4   :  { %v1021_v15 = vadd.f32 %v4751_v14, %v953_v38  ;;  %v1108_v61 = vmul.f32 %v3539_v37, %v3950_v46  ;;  %v1109_v60 = vmul.f32 %v3539_v37, %v3946_v29  ;;  %v954_v44 = vmul.f32 %v4745_v2, %v3651_v51  ;;  %v4757_v30 = vld [vmem:[#allocation29_spill] sm:$0xff] }
 0x1a5   :  { %v955_v42 = vmul.f32 %v4745_v2, %v3655_v8  ;;  %2690 = vmatprep.mubr.bf16.mxu1 %v1427_v20  ;;  %v1709_v34 = vpack.c.bf16 %v1139_v63, %v1138_v26  ;;  %v990_v47 = vmul.f32 %v4747_v6, %v3683_v62  ;;  %v991_v1 = vmul.f32 %v4747_v6, %v3677_v40  ;;  %v4756_v20 = vld [vmem:[#allocation5_spill] sm:$0xff] }
 0x1a6   :  { %v1428_v48 = vpack.c.bf16 %v1021_v15, %v1020_v3  ;;  %v1140_v54 = vadd.f32 %v1108_v61, %v1072_v9  ;;  %v1141_v41 = vadd.f32 %v1109_v60, %v1073_v13  ;;  %v1074_v19 = vmul.f32 %v3533_v50, %v3976_v25  ;;  %v4758_v60 = vld [vmem:[#allocation31_spill] sm:$0xff] }
 0x1a7   :  { %v1075_v51 = vmul.f32 %v3533_v50, %v3980_v35  ;;  %2754 = vmatprep.mubr.bf16.mxu0 %v1709_v34  ;;  %v1022_v28 = vadd.f32 %v990_v47, %v954_v44  ;;  %v1023_v8 = vadd.f32 %v991_v1, %v955_v42  ;;  %v1110_v11 = vmul.f32 %v3539_v37, %v4009_v4 }
 0x1a8   :  { %v1111_v62 = vmul.f32 %v3539_v37, %v4752_v52  ;;  %v1710_v49 = vpack.c.bf16 %v1141_v41, %v1140_v54  ;;  %v956_v40 = vmul.f32 %v4745_v2, %v4753_v59  ;;  %v957_v31 = vmul.f32 %v4745_v2, %v4754_v43  ;;  %v4762_v59 = vld [vmem:[#allocation21_spill] sm:$0xff] }
 0x1a9   :  { %v992_v32 = vmul.f32 %v4747_v6, %v4755_v24  ;;  %v1429_v27 = vpack.c.bf16 %v1023_v8, %v1022_v28  ;;  %v1142_v38 = vadd.f32 %v1110_v11, %v1074_v19  ;;  %v993_v9 = vmul.f32 %v4747_v6, %v4725_v17  ;;  %v4759_v28 = vld [vmem:[#allocation33_spill] sm:$0xff]  ;;  %v4760_v11 = vld [vmem:[#allocation19_spill] sm:$0xff] }
 0x1aa   :  { %v1143_v26 = vadd.f32 %v1111_v62, %v1075_v51  ;;  %v1076_v63 = vmul.f32 %v3533_v50, %v4756_v20  ;;  %v1077_v3 = vmul.f32 %v3533_v50, %v4757_v30  ;;  %v1112_v14 = vmul.f32 %v3539_v37, %v4028_v10  ;;  %v4761_v62 = vld [vmem:[#allocation20_spill] sm:$0xff] }
 0x1ab   :  { %2755 = vmatmul.mubr.bf16.gmra.mrb[32].mxu0 %v1710_v49  ;;  %v1024_v13 = vadd.f32 %v992_v32, %v956_v40  ;;  %2691 = vmatmul.mubr.bf16.vlgmr.msra.gmra.mrb[16].mxu1 %v1428_v48  ;;  %v1025_v61 = vadd.f32 %v993_v9, %v957_v31  ;;  %v1113_v44 = vmul.f32 %v3539_v37, %v4758_v60  ;;  %v4764_v9 = vld [vmem:[#allocation32_spill] sm:$0xff] }
 0x1ac   :  { %v1711_v15 = vpack.c.bf16 %v1143_v26, %v1142_v38  ;;  %v958_v17 = vmul.f32 %v4745_v2, %v3736_v18  ;;  %2694 = vmatprep.mubr.bf16.mxu1 %v1429_v27  ;;  %v1144_v42 = vadd.f32 %v1112_v14, %v1076_v63  ;;  %v959_v34 = vmul.f32 %v4745_v2, %v3740_v5  ;;  %v4763_v38 = vld [vmem:[#allocation17_spill] sm:$0xff]  ;;  %v4765_v63 = vld [vmem:[#allocation34_spill] sm:$0xff] }
 0x1ad   :  { %v994_v47 = vmul.f32 %v4747_v6, %v3755_v39  ;;  %v995_v1 = vmul.f32 %v4747_v6, %v3763_v53  ;;  %v1430_v48 = vpack.c.bf16 %v1025_v61, %v1024_v13  ;;  %v1145_v54 = vadd.f32 %v1113_v44, %v1077_v3  ;;  %v4766_v61 = vld [vmem:[#allocation35_spill] sm:$0xff] }
 0x1ae   :  { %2758 = vmatprep.mubr.bf16.mxu0 %v1711_v15  ;;  %v1078_v41 = vmul.f32 %v3533_v50, %v4059_v16  ;;  %v1079_v18 = vmul.f32 %v3533_v50, %v4063_v23  ;;  %v1114_v5 = vmul.f32 %v3539_v37, %v4085_v22  ;;  %v1115_v39 = vmul.f32 %v3539_v37, %v4759_v28 }
 0x1af   :  { %v1026_v19 = vadd.f32 %v994_v47, %v958_v17  ;;  %v1027_v51 = vadd.f32 %v995_v1, %v959_v34  ;;  %v1712_v8 = vpack.c.bf16 %v1145_v54, %v1144_v42  ;;  %v960_v53 = vmul.f32 %v4745_v2, %v4760_v11 }
 0x1b0   :  { %v961_v49 = vmul.f32 %v4745_v2, %v4761_v62  ;;  %v996_v40 = vmul.f32 %v4747_v6, %v4762_v59  ;;  %v1146_v31 = vadd.f32 %v1114_v5, %v1078_v41  ;;  %v1147_v24 = vadd.f32 %v1115_v39, %v1079_v18  ;;  %v4767_v41 = vld [vmem:[#allocation22_spill] sm:$0xff] }
 0x1b1   :  { %v1431_v43 = vpack.c.bf16 %v1027_v51, %v1026_v19  ;;  %v997_v32 = vmul.f32 %v4747_v6, %v3798_v0  ;;  %v1080_v26 = vmul.f32 %v3533_v50, %v4763_v38  ;;  %v1081_v13 = vmul.f32 %v3533_v50, %v4764_v9  ;;  %v4769_v5 = vld [vmem:[#allocation38_spill] sm:$0xff] }
 0x1b2   :  { %v1028_v27 = vadd.f32 %v996_v40, %v960_v53  ;;  %v1116_v3 = vmul.f32 %v3539_v37, %v4765_v63  ;;  %v1713_v14 = vpack.c.bf16 %v1147_v24, %v1146_v31  ;;  %v1117_v44 = vmul.f32 %v3539_v37, %v4766_v61  ;;  %v4772_v53 = vld [vmem:[#allocation25_spill] sm:$0xff]  ;;  %v4773_v40 = vld [vmem:[#allocation27_spill] sm:$0xff]  ;;  %v4774_v31 = vld [vmem:[#allocation26_spill] sm:$0xff] }
 0x1b3   :  { %2759 = vmatmul.mubr.bf16.gmra.mrb[36].mxu0 %v1712_v8  ;;  %v1029_v15 = vadd.f32 %v997_v32, %v961_v49  ;;  %v962_v17 = vmul.f32 %v4745_v2, %v4731_v36  ;;  %2695 = vmatmul.mubr.bf16.gmra.mrb[20].mxu1 %v1430_v48  ;;  %v963_v42 = vmul.f32 %v4745_v2, %v3818_v58  ;;  %v4768_v48 = vld [vmem:[#allocation28_spill] sm:$0xff] }
 0x1b4   :  { %v1148_v0 = vadd.f32 %v1116_v3, %v1080_v26  ;;  %v998_v34 = vmul.f32 %v4747_v6, %v4732_v57  ;;  %v999_v47 = vmul.f32 %v4747_v6, %v3844_v55  ;;  %2698 = vmatprep.mubr.bf16.mxu1 %v1431_v43  ;;  %2762 = vmatprep.mubr.bf16.mxu0 %v1713_v14  ;;  %v4770_v57 = vld [vmem:[#allocation37_spill] sm:$0xff]  ;;  %v4771_v55 = vld [vmem:[#allocation24_spill] sm:$0xff] }
 0x1b5   :  { %v1432_v1 = vpack.c.bf16 %v1029_v15, %v1028_v27  ;;  %v1149_v54 = vadd.f32 %v1117_v44, %v1081_v13  ;;  %v1082_v18 = vmul.f32 %v3533_v50, %v4767_v41  ;;  %v1083_v51 = vmul.f32 %v3533_v50, %v4768_v48  ;;  %v4775_v27 = vld [vmem:[#allocation30_spill] sm:$0xff]  ;;  %v4776_v13 = vld [vmem:[#allocation7_spill] sm:$0xff]  ;;  %v4777_v14 = vld [vmem:[#allocation36_spill] sm:$0xff] }
 0x1b6   :  { %v1030_v19 = vadd.f32 %v998_v34, %v962_v17  ;;  %v1031_v36 = vadd.f32 %v999_v47, %v963_v42  ;;  %v1118_v58 = vmul.f32 %v3539_v37, %v4769_v5  ;;  %v1119_v8 = vmul.f32 %v3539_v37, %v4770_v57 }
 0x1b7   :  { %v1714_v39 = vpack.c.bf16 %v1149_v54, %v1148_v0  ;;  %v964_v11 = vmul.f32 %v4745_v2, %v4771_v55  ;;  %v965_v62 = vmul.f32 %v4745_v2, %v4772_v53  ;;  %v1000_v43 = vmul.f32 %v4747_v6, %v4773_v40  ;;  %v4778_v0 = vld [vmem:[#allocation23_spill] sm:$0xff] }
 0x1b8   :  { %v1433_v49 = vpack.c.bf16 %v1031_v36, %v1030_v19  ;;  %v1150_v59 = vadd.f32 %v1118_v58, %v1082_v18  ;;  %v1001_v24 = vmul.f32 %v4747_v6, %v4774_v31  ;;  %v1151_v32 = vadd.f32 %v1119_v8, %v1083_v51 }
 0x1b9   :  { %v1084_v26 = vmul.f32 %v3533_v50, %v4775_v27  ;;  %v1085_v3 = vmul.f32 %v3533_v50, %v4776_v13  ;;  %v1120_v15 = vmul.f32 %v3539_v37, %v4777_v14  ;;  %v1032_v44 = vadd.f32 %v1000_v43, %v964_v11 }
 0x1ba   :  { %v1033_v17 = vadd.f32 %v1001_v24, %v965_v62  ;;  %v1121_v42 = vmul.f32 %v3539_v37, %v4778_v0  ;;  %v966_v34 = vmul.f32 %v4745_v2, %v3899_v33  ;;  %v1715_v47 = vpack.c.bf16 %v1151_v32, %v1150_v59 }
 0x1bb   :  { %2763 = vmatmul.mubr.bf16.gmra.mrb[40].mxu0 %v1714_v39  ;;  %v1152_v54 = vadd.f32 %v1120_v15, %v1084_v26  ;;  %v967_v18 = vmul.f32 %v4745_v2, %v3909_v56  ;;  %v1002_v50 = vmul.f32 %v4747_v6, %v3928_v21  ;;  %2699 = vmatmul.mubr.bf16.gmra.mrb[24].mxu1 %v1432_v1 }
 0x1bc   :  { %v1434_v19 = vpack.c.bf16 %v1033_v17, %v1032_v44  ;;  %v1153_v36 = vadd.f32 %v1121_v42, %v1085_v3  ;;  %v1003_v51 = vmul.f32 %v4747_v6, %v3942_v7  ;;  %v968_v37 = vmul.f32 %v4745_v2, %v3906_v45  ;;  %2702 = vmatprep.mubr.bf16.mxu1 %v1433_v49 }
 0x1bd   :  { %2766 = vmatprep.mubr.bf16.mxu0 %v1715_v47  ;;  %v1034_v33 = vadd.f32 %v1002_v50, %v966_v34  ;;  %v969_v58 = vmul.f32 %v4745_v2, %v3916_v12  ;;  %v1004_v56 = vmul.f32 %v4747_v6, %v3950_v46  ;;  %v1005_v1 = vmul.f32 %v4747_v6, %v3946_v29 }
 0x1be   :  { %v1716_v39 = vpack.c.bf16 %v1153_v36, %v1152_v54  ;;  %v1035_v21 = vadd.f32 %v1003_v51, %v967_v18  ;;  %v970_v7 = vmul.f32 %v4745_v2, %v3976_v25  ;;  %v971_v45 = vmul.f32 %v4745_v2, %v3980_v35 }
 0x1bf   :  { %v1036_v8 = vadd.f32 %v1004_v56, %v968_v37  ;;  %v1006_v55 = vmul.f32 %v4747_v6, %v4009_v4  ;;  %v1007_v12 = vmul.f32 %v4747_v6, %v4752_v52  ;;  %v1037_v46 = vadd.f32 %v1005_v1, %v969_v58 }
 0x1c0   :  { %v1435_v11 = vpack.c.bf16 %v1035_v21, %v1034_v33  ;;  %v972_v53 = vmul.f32 %v4745_v2, %v4756_v20  ;;  %v973_v29 = vmul.f32 %v4745_v2, %v4757_v30  ;;  %v1008_v49 = vmul.f32 %v4747_v6, %v4028_v10 }
 0x1c1   :  { %v1038_v62 = vadd.f32 %v1006_v55, %v970_v7  ;;  %v1039_v25 = vadd.f32 %v1007_v12, %v971_v45  ;;  %v1009_v35 = vmul.f32 %v4747_v6, %v4758_v60  ;;  %v1436_v4 = vpack.c.bf16 %v1037_v46, %v1036_v8 }
 0x1c2   :  { %v974_v52 = vmul.f32 %v4745_v2, %v4059_v16  ;;  %v975_v59 = vmul.f32 %v4745_v2, %v4063_v23  ;;  %v1010_v20 = vmul.f32 %v4747_v6, %v4085_v22  ;;  %v1040_v40 = vadd.f32 %v1008_v49, %v972_v53 }
 0x1c3   :  { %2767 = vmatmul.mubr.bf16.gmra.mrb[44].mxu0 %v1716_v39  ;;  %v1437_v30 = vpack.c.bf16 %v1039_v25, %v1038_v62  ;;  %v1041_v43 = vadd.f32 %v1009_v35, %v973_v29  ;;  %v1011_v10 = vmul.f32 %v4747_v6, %v4759_v28  ;;  %2703 = vmatmul.mubr.bf16.gmra.mrb[28].mxu1 %v1434_v19 }
 0x1c4   :  { %v1042_v31 = vadd.f32 %v1010_v20, %v974_v52  ;;  %v976_v60 = vmul.f32 %v4745_v2, %v4763_v38  ;;  %v977_v16 = vmul.f32 %v4745_v2, %v4764_v9  ;;  %v1012_v23 = vmul.f32 %v4747_v6, %v4765_v63  ;;  %2706 = vmatprep.mubr.bf16.mxu1 %v1435_v11 }
 0x1c5   :  { %v1438_v22 = vpack.c.bf16 %v1041_v43, %v1040_v40  ;;  %v1043_v24 = vadd.f32 %v1011_v10, %v975_v59  ;;  %v1013_v32 = vmul.f32 %v4747_v6, %v4766_v61  ;;  %v978_v28 = vmul.f32 %v4745_v2, %v4767_v41 }
 0x1c6   :  { %v1044_v26 = vadd.f32 %v1012_v23, %v976_v60  ;;  %v979_v3 = vmul.f32 %v4745_v2, %v4768_v48  ;;  %v1014_v38 = vmul.f32 %v4747_v6, %v4769_v5  ;;  %v1015_v9 = vmul.f32 %v4747_v6, %v4770_v57 }
 0x1c7   :  { %v1439_v63 = vpack.c.bf16 %v1043_v24, %v1042_v31  ;;  %v1045_v15 = vadd.f32 %v1013_v32, %v977_v16  ;;  %v980_v44 = vmul.f32 %v4745_v2, %v4775_v27  ;;  %v981_v61 = vmul.f32 %v4745_v2, %v4776_v13 }
 0x1c8   :  { %v1046_v17 = vadd.f32 %v1014_v38, %v978_v28  ;;  %v1047_v41 = vadd.f32 %v1015_v9, %v979_v3  ;;  %v1016_v42 = vmul.f32 %v4747_v6, %v4777_v14  ;;  %v1017_v48 = vmul.f32 %v4747_v6, %v4778_v0 }
 0x1c9   :  { %v1440_v5 = vpack.c.bf16 %v1045_v15, %v1044_v26 }
 0x1ca   :  { %v1441_v34 = vpack.c.bf16 %v1047_v41, %v1046_v17  ;;  %v1048_v47 = vadd.f32 %v1016_v42, %v980_v44  ;;  %v1049_v57 = vadd.f32 %v1017_v48, %v981_v61 }
 0x1cb   :  { %2707 = vmatmul.mubr.bf16.gmra.mrb[32].mxu1 %v1436_v4 }
 0x1cc   :  { %v1442_v54 = vpack.c.bf16 %v1049_v57, %v1048_v47  ;;  %2710 = vmatprep.mubr.bf16.mxu1 %v1437_v30 }
 0x1d3   :  { %2711 = vmatmul.mubr.bf16.gmra.mrb[36].mxu1 %v1438_v22 }
 0x1d4   :  { %2714 = vmatprep.mubr.bf16.mxu1 %v1439_v63 }
 0x1db   :  { %2715 = vmatmul.mubr.bf16.gmra.mrb[40].mxu1 %v1440_v5 }
 0x1dc   :  { %2718 = vmatprep.mubr.bf16.mxu1 %v1441_v34 }
 0x1e3   :  { %2719 = vmatmul.mubr.bf16.gmra.mrb[44].mxu1 %v1442_v54 }
 0x225   :  { %v2644_v2 = vpop.f32.mrb[0].mxu0 }
 0x226   :  { %1397 = vst [vmem:[%s4618_s4 + $0x10] sm:$0xff] %v2644_v2  ;;  %v1268_v27 = vpop.f32.mrb[1].mxu0 }
 0x227   :  { %1395 = vst [vmem:[%s4618_s4] sm:$0xff] %v1268_v27  ;;  %v2645_v6 = vpop.f32.mrb[2].mxu0 }
 0x228   :  { %1398 = vst [vmem:[%s4618_s4 + $0x18] sm:$0xff] %v2645_v6  ;;  %v1271_v13 = vpop.f32.mrb[3].mxu0 }
 0x229   :  { %1396 = vst [vmem:[%s4618_s4 + $0x8] sm:$0xff] %v1271_v13 }
 0x234   :  { %v2648_v14 = vpop.f32.mrb[4].mxu0 }
 0x235   :  { %1401 = vst [vmem:[%s4618_s4 + $0x30] sm:$0xff] %v2648_v14  ;;  %v1284_v0 = vpop.f32.mrb[5].mxu0 }
 0x236   :  { %1399 = vst [vmem:[%s4618_s4 + $0x20] sm:$0xff] %v1284_v0  ;;  %v2649_v18 = vpop.f32.mrb[6].mxu0 }
 0x237   :  { %1402 = vst [vmem:[%s4618_s4 + $0x38] sm:$0xff] %v2649_v18  ;;  %v1287_v50 = vpop.f32.mrb[7].mxu0 }
 0x238   :  { %1400 = vst [vmem:[%s4618_s4 + $0x28] sm:$0xff] %v1287_v50 }
 0x241   :  { %v2652_v19 = vpop.f32.mrb[8].mxu0 }
 0x242   :  { %1405 = vst [vmem:[%s4618_s4 + $0x50] sm:$0xff] %v2652_v19  ;;  %v1300_v36 = vpop.f32.mrb[9].mxu0 }
 0x243   :  { %1403 = vst [vmem:[%s4618_s4 + $0x40] sm:$0xff] %v1300_v36  ;;  %v2653_v51 = vpop.f32.mrb[10].mxu0 }
 0x244   :  { %1406 = vst [vmem:[%s4618_s4 + $0x58] sm:$0xff] %v2653_v51  ;;  %v1303_v37 = vpop.f32.mrb[11].mxu0 }
 0x245   :  { %1404 = vst [vmem:[%s4618_s4 + $0x48] sm:$0xff] %v1303_v37 }
 0x24b   :  { %v2656_v33 = vpop.f32.mrb[12].mxu0 }
 0x24c   :  { %1409 = vst [vmem:[%s4618_s4 + $0x70] sm:$0xff] %v2656_v33  ;;  %v1316_v58 = vpop.f32.mrb[13].mxu0 }
 0x24d   :  { %1407 = vst [vmem:[%s4618_s4 + $0x60] sm:$0xff] %v1316_v58  ;;  %v2657_v56 = vpop.f32.mrb[14].mxu0 }
 0x24e   :  { %1410 = vst [vmem:[%s4618_s4 + $0x78] sm:$0xff] %v2657_v56  ;;  %v1319_v39 = vpop.f32.mrb[15].mxu0 }
 0x24f   :  { %1408 = vst [vmem:[%s4618_s4 + $0x68] sm:$0xff] %v1319_v39 }
 0x254   :  { %v2740_v21 = vpop.f32.mrb[16].mxu0 }
 0x255   :  { %v2365_v1 = vmul.f32 -1.442695, %v2740_v21  ;;  %v1816_v7 = vpop.f32.mrb[17].mxu0 }
 0x256   :  { %v2660_v8 = vpop.f32.mrb[0].mxu1  ;;  %v2363_v45 = vmul.f32 -1.442695, %v1816_v7  ;;  %v2741_v55 = vpop.f32.mrb[18].mxu0 }
 0x257   :  { %1413 = vst [vmem:[%s4618_s4 + $0x90] sm:$0xff] %v2660_v8  ;;  %2874 = vpow2.f32 %v2365_v1  ;;  %v1332_v12 = vpop.f32.mrb[1].mxu1  ;;  %v2366_v11 = vmul.f32 -1.442695, %v2741_v55  ;;  %v1819_v46 = vpop.f32.mrb[19].mxu0 }
 0x258   :  { %1411 = vst [vmem:[%s4618_s4 + $0x80] sm:$0xff] %v1332_v12  ;;  %2876 = vpow2.f32 %v2363_v45  ;;  %v2661_v53 = vpop.f32.mrb[2].mxu1  ;;  %v2364_v29 = vmul.f32 -1.442695, %v1819_v46 }
 0x259   :  { %1414 = vst [vmem:[%s4618_s4 + $0x98] sm:$0xff] %v2661_v53  ;;  %2878 = vpow2.f32 %v2366_v11  ;;  %v1335_v62 = vpop.f32.mrb[3].mxu1 }
 0x25a   :  { %1412 = vst [vmem:[%s4618_s4 + $0x88] sm:$0xff] %v1335_v62  ;;  %2880 = vpow2.f32 %v2364_v29 }
 0x261   :  { %v2875_v25 = vpop.eup %2874 }
 0x262   :  { %v2664_v49 = vpop.f32.mrb[4].mxu1  ;;  %v2744_v35 = vpop.f32.mrb[20].mxu0  ;;  %v2041_v52 = vadd.f32 1.0, %v2875_v25 }
 0x263   :  { %v2877_v4 = vpop.eup %2876  ;;  %1417 = vst [vmem:[%s4618_s4 + $0xb0] sm:$0xff] %v2664_v49  ;;  %v1348_v59 = vpop.f32.mrb[5].mxu1  ;;  %v2369_v16 = vmul.f32 -1.442695, %v2744_v35 }
 0x264   :  { %v1832_v20 = vpop.f32.mrb[21].mxu0  ;;  %v2879_v30 = vpop.eup %2878  ;;  %v2039_v40 = vadd.f32 1.0, %v2877_v4  ;;  %1415 = vst [vmem:[%s4618_s4 + $0xa0] sm:$0xff] %v1348_v59  ;;  %2882 = vrcp.f32 %v2041_v52 }
 0x265   :  { %v2665_v43 = vpop.f32.mrb[6].mxu1  ;;  %v2745_v10 = vpop.f32.mrb[22].mxu0  ;;  %v2042_v60 = vadd.f32 1.0, %v2879_v30  ;;  %v2367_v32 = vmul.f32 -1.442695, %v1832_v20 }
 0x266   :  { %v2881_v31 = vpop.eup %2880  ;;  %1418 = vst [vmem:[%s4618_s4 + $0xb8] sm:$0xff] %v2665_v43  ;;  %v1351_v23 = vpop.f32.mrb[7].mxu1  ;;  %2884 = vrcp.f32 %v2039_v40  ;;  %v2370_v28 = vmul.f32 -1.442695, %v2745_v10 }
 0x267   :  { %v1835_v22 = vpop.f32.mrb[23].mxu0  ;;  %v2040_v24 = vadd.f32 1.0, %v2881_v31  ;;  %1416 = vst [vmem:[%s4618_s4 + $0xa8] sm:$0xff] %v1351_v23  ;;  %2886 = vrcp.f32 %v2042_v60 }
 0x268   :  { %v2368_v26 = vmul.f32 -1.442695, %v1835_v22 }
 0x269   :  { %2888 = vrcp.f32 %v2040_v24 }
 0x26a   :  { %2890 = vpow2.f32 %v2369_v16 }
 0x26b   :  { %2892 = vpow2.f32 %v2367_v32  ;;  %v2668_v3 = vpop.f32.mrb[8].mxu1 }
 0x26c   :  { %2894 = vpow2.f32 %v2370_v28  ;;  %1421 = vst [vmem:[%s4618_s4 + $0xd0] sm:$0xff] %v2668_v3  ;;  %v1364_v9 = vpop.f32.mrb[9].mxu1 }
 0x26d   :  { %2896 = vpow2.f32 %v2368_v26  ;;  %v2748_v38 = vpop.f32.mrb[24].mxu0  ;;  %1419 = vst [vmem:[%s4618_s4 + $0xc0] sm:$0xff] %v1364_v9  ;;  %v2669_v44 = vpop.f32.mrb[10].mxu1 }
 0x26e   :  { %v2373_v63 = vmul.f32 -1.442695, %v2748_v38  ;;  %v1848_v15 = vpop.f32.mrb[25].mxu0  ;;  %1422 = vst [vmem:[%s4618_s4 + $0xd8] sm:$0xff] %v2669_v44  ;;  %v1367_v41 = vpop.f32.mrb[11].mxu1 }
 0x26f   :  { %v2371_v61 = vmul.f32 -1.442695, %v1848_v15  ;;  %v2749_v17 = vpop.f32.mrb[26].mxu0  ;;  %v2883_v42 = vpop.eup %2882  ;;  %1420 = vst [vmem:[%s4618_s4 + $0xc8] sm:$0xff] %v1367_v41 }
 0x270   :  { %2898 = vpow2.f32 %v2373_v63  ;;  %v2374_v48 = vmul.f32 -1.442695, %v2749_v17  ;;  %v1851_v5 = vpop.f32.mrb[27].mxu0  ;;  %v2885_v34 = vpop.eup %2884 }
 0x271   :  { %2900 = vpow2.f32 %v2371_v61  ;;  %v2372_v47 = vmul.f32 -1.442695, %v1851_v5  ;;  %v2887_v57 = vpop.eup %2886 }
 0x272   :  { %2902 = vpow2.f32 %v2374_v48  ;;  %v2467_v2 = vpack.c.bf16 %v2887_v57, %v2883_v42 }
 0x273   :  { %v2889_v54 = vpop.eup %2888  ;;  %2904 = vpow2.f32 %v2372_v47 }
 0x274   :  { %v2891_v27 = vpop.eup %2890  ;;  %v2462_v6 = vpack.c.bf16 %v2889_v54, %v2885_v34  ;;  %2539 = vst [vmem:[%s4619_s6 + $0x8] sm:$0xff] %v2467_v2  }
 0x275   :  { %v2893_v13 = vpop.eup %2892  ;;  %v2045_v14 = vadd.f32 1.0, %v2891_v27 }
 0x276   :  { %v2752_v0 = vpop.f32.mrb[28].mxu0  ;;  %v2895_v18 = vpop.eup %2894  ;;  %2463 = vst [vmem:[%s4619_s6] sm:$0xff] %v2462_v6   ;;  %v2043_v50 = vadd.f32 1.0, %v2893_v13 }
 0x277   :  { %v2672_v19 = vpop.f32.mrb[12].mxu1  ;;  %v1864_v36 = vpop.f32.mrb[29].mxu0  ;;  %2906 = vrcp.f32 %v2045_v14  ;;  %v2046_v37 = vadd.f32 1.0, %v2895_v18  ;;  %v2377_v33 = vmul.f32 -1.442695, %v2752_v0 }
 0x278   :  { %v2897_v51 = vpop.eup %2896  ;;  %1425 = vst [vmem:[%s4618_s4 + $0xf0] sm:$0xff] %v2672_v19  ;;  %v1380_v58 = vpop.f32.mrb[13].mxu1  ;;  %2908 = vrcp.f32 %v2043_v50  ;;  %v2375_v21 = vmul.f32 -1.442695, %v1864_v36 }
 0x279   :  { %v2753_v56 = vpop.f32.mrb[30].mxu0  ;;  %v2044_v39 = vadd.f32 1.0, %v2897_v51  ;;  %1423 = vst [vmem:[%s4618_s4 + $0xe0] sm:$0xff] %v1380_v58  ;;  %v2673_v1 = vpop.f32.mrb[14].mxu1  ;;  %2910 = vrcp.f32 %v2046_v37 }
 0x27a   :  { %v1867_v7 = vpop.f32.mrb[31].mxu0  ;;  %1426 = vst [vmem:[%s4618_s4 + $0xf8] sm:$0xff] %v2673_v1  ;;  %v1383_v8 = vpop.f32.mrb[15].mxu1  ;;  %v2378_v62 = vmul.f32 -1.442695, %v2753_v56 }
 0x27b   :  { %v2899_v45 = vpop.eup %2898  ;;  %2912 = vrcp.f32 %v2044_v39  ;;  %1424 = vst [vmem:[%s4618_s4 + $0xe8] sm:$0xff] %v1383_v8  ;;  %v2376_v35 = vmul.f32 -1.442695, %v1867_v7 }
 0x27c   :  { %v2901_v55 = vpop.eup %2900  ;;  %v2049_v12 = vadd.f32 1.0, %v2899_v45  ;;  %2914 = vpow2.f32 %v2377_v33 }
 0x27d   :  { %v2903_v11 = vpop.eup %2902  ;;  %v2047_v46 = vadd.f32 1.0, %v2901_v55  ;;  %2916 = vpow2.f32 %v2375_v21 }
 0x27e   :  { %v2905_v53 = vpop.eup %2904  ;;  %2918 = vrcp.f32 %v2049_v12  ;;  %v2050_v29 = vadd.f32 1.0, %v2903_v11  ;;  %v2756_v25 = vpop.f32.mrb[32].mxu0 }
 0x27f   :  { %2920 = vrcp.f32 %v2047_v46  ;;  %v2048_v49 = vadd.f32 1.0, %v2905_v53  ;;  %v2692_v4 = vpop.f32.mrb[16].mxu1  ;;  %v1880_v52 = vpop.f32.mrb[33].mxu0  ;;  %v2381_v59 = vmul.f32 -1.442695, %v2756_v25 }
 0x280   :  { %2922 = vrcp.f32 %v2050_v29  ;;  %1671 = vst [vmem:[%s4620_s5 + $0x10] sm:$0xff] %v2692_v4  ;;  %v1542_v20 = vpop.f32.mrb[17].mxu1  ;;  %v2757_v30 = vpop.f32.mrb[34].mxu0  ;;  %v2379_v40 = vmul.f32 -1.442695, %v1880_v52 }
 0x281   :  { %2924 = vrcp.f32 %v2048_v49  ;;  %1669 = vst [vmem:[%s4620_s5] sm:$0xff] %v1542_v20  ;;  %v2693_v43 = vpop.f32.mrb[18].mxu1  ;;  %v1883_v10 = vpop.f32.mrb[35].mxu0  ;;  %v2382_v60 = vmul.f32 -1.442695, %v2757_v30 }
 0x282   :  { %v2907_v31 = vpop.eup %2906  ;;  %2926 = vpow2.f32 %v2378_v62  ;;  %1672 = vst [vmem:[%s4620_s5 + $0x18] sm:$0xff] %v2693_v43  ;;  %v1545_v16 = vpop.f32.mrb[19].mxu1  ;;  %v2380_v22 = vmul.f32 -1.442695, %v1883_v10 }
 0x283   :  { %v2909_v23 = vpop.eup %2908  ;;  %2928 = vpow2.f32 %v2376_v35  ;;  %1670 = vst [vmem:[%s4620_s5 + $0x8] sm:$0xff] %v1545_v16 }
 0x284   :  { %v2911_v24 = vpop.eup %2910  ;;  %2930 = vpow2.f32 %v2381_v59 }
 0x285   :  { %v2913_v32 = vpop.eup %2912  ;;  %v2477_v28 = vpack.c.bf16 %v2911_v24, %v2907_v31  ;;  %2932 = vpow2.f32 %v2379_v40 }
 0x286   :  { %v2915_v26 = vpop.eup %2914  ;;  %v2472_v3 = vpack.c.bf16 %v2913_v32, %v2909_v23  ;;  %2934 = vpow2.f32 %v2382_v60  ;;  %v2760_v38 = vpop.f32.mrb[36].mxu0 }
 0x287   :  { %v2917_v9 = vpop.eup %2916  ;;  %2541 = vst [vmem:[%s4619_s6 + $0x18] sm:$0xff] %v2477_v28   ;;  %v2053_v63 = vadd.f32 1.0, %v2915_v26  ;;  %2936 = vpow2.f32 %v2380_v22  ;;  %v2696_v15 = vpop.f32.mrb[20].mxu1  ;;  %v2385_v44 = vmul.f32 -1.442695, %v2760_v38 }
 0x288   :  { %v1896_v61 = vpop.f32.mrb[37].mxu0  ;;  %v2919_v17 = vpop.eup %2918  ;;  %2540 = vst [vmem:[%s4619_s6 + $0x10] sm:$0xff] %v2472_v3   ;;  %v2051_v41 = vadd.f32 1.0, %v2917_v9  ;;  %1675 = vst [vmem:[%s4620_s5 + $0x30] sm:$0xff] %v2696_v15 }
 0x289   :  { %v1558_v42 = vpop.f32.mrb[21].mxu1  ;;  %v2383_v48 = vmul.f32 -1.442695, %v1896_v61  ;;  %v2761_v5 = vpop.f32.mrb[38].mxu0  ;;  %2938 = vrcp.f32 %v2053_v63 }
 0x28a   :  { %v2921_v34 = vpop.eup %2920  ;;  %1673 = vst [vmem:[%s4620_s5 + $0x20] sm:$0xff] %v1558_v42  ;;  %v2697_v47 = vpop.f32.mrb[22].mxu1  ;;  %v2386_v57 = vmul.f32 -1.442695, %v2761_v5  ;;  %2940 = vrcp.f32 %v2051_v41 }
 0x28b   :  { %v1899_v54 = vpop.f32.mrb[39].mxu0  ;;  %v2923_v2 = vpop.eup %2922  ;;  %1676 = vst [vmem:[%s4620_s5 + $0x38] sm:$0xff] %v2697_v47  ;;  %2942 = vpow2.f32 %v2385_v44 }
 0x28c   :  { %v1561_v27 = vpop.f32.mrb[23].mxu1  ;;  %v2384_v6 = vmul.f32 -1.442695, %v1899_v54  ;;  %v2925_v13 = vpop.eup %2924  ;;  %v2487_v14 = vpack.c.bf16 %v2923_v2, %v2919_v17  ;;  %2944 = vpow2.f32 %v2383_v48 }
 0x28d   :  { %1674 = vst [vmem:[%s4620_s5 + $0x28] sm:$0xff] %v1561_v27  ;;  %v2927_v0 = vpop.eup %2926  ;;  %v2482_v18 = vpack.c.bf16 %v2925_v13, %v2921_v34  ;;  %2946 = vpow2.f32 %v2386_v57 }
 0x28e   :  { %v2929_v50 = vpop.eup %2928  ;;  %2543 = vst [vmem:[%s4619_s6 + $0x28] sm:$0xff] %v2487_v14   ;;  %v2054_v19 = vadd.f32 1.0, %v2927_v0  ;;  %2948 = vpow2.f32 %v2384_v6  ;;  %v2764_v37 = vpop.f32.mrb[40].mxu0 }
 0x28f   :  { %v2931_v36 = vpop.eup %2930  ;;  %2542 = vst [vmem:[%s4619_s6 + $0x20] sm:$0xff] %v2482_v18   ;;  %v2052_v51 = vadd.f32 1.0, %v2929_v50  ;;  %v2700_v56 = vpop.f32.mrb[24].mxu1  ;;  %v2389_v12 = vmul.f32 -1.442695, %v2764_v37 }
 0x290   :  { %v2933_v33 = vpop.eup %2932  ;;  %2950 = vrcp.f32 %v2054_v19  ;;  %v2057_v58 = vadd.f32 1.0, %v2931_v36  ;;  %v1912_v39 = vpop.f32.mrb[41].mxu0  ;;  %1679 = vst [vmem:[%s4620_s5 + $0x50] sm:$0xff] %v2700_v56 }
 0x291   :  { %v2935_v21 = vpop.eup %2934  ;;  %2952 = vrcp.f32 %v2052_v51  ;;  %v2055_v1 = vadd.f32 1.0, %v2933_v33  ;;  %v1574_v7 = vpop.f32.mrb[25].mxu1  ;;  %v2387_v29 = vmul.f32 -1.442695, %v1912_v39 }
 0x292   :  { %v2765_v8 = vpop.f32.mrb[42].mxu0  ;;  %v2937_v45 = vpop.eup %2936  ;;  %2954 = vrcp.f32 %v2057_v58  ;;  %v2058_v55 = vadd.f32 1.0, %v2935_v21  ;;  %1677 = vst [vmem:[%s4620_s5 + $0x40] sm:$0xff] %v1574_v7 }
 0x293   :  { %v2701_v11 = vpop.f32.mrb[26].mxu1  ;;  %v1915_v46 = vpop.f32.mrb[43].mxu0  ;;  %2956 = vrcp.f32 %v2055_v1  ;;  %v2056_v53 = vadd.f32 1.0, %v2937_v45  ;;  %v2390_v49 = vmul.f32 -1.442695, %v2765_v8 }
 0x294   :  { %1680 = vst [vmem:[%s4620_s5 + $0x58] sm:$0xff] %v2701_v11  ;;  %v1577_v62 = vpop.f32.mrb[27].mxu1  ;;  %v2939_v25 = vpop.eup %2938  ;;  %2958 = vrcp.f32 %v2058_v55  ;;  %v2388_v16 = vmul.f32 -1.442695, %v1915_v46 }
 0x295   :  { %1678 = vst [vmem:[%s4620_s5 + $0x48] sm:$0xff] %v1577_v62  ;;  %v2941_v35 = vpop.eup %2940  ;;  %2960 = vrcp.f32 %v2056_v53 }
 0x296   :  { %v2943_v4 = vpop.eup %2942  ;;  %2962 = vpow2.f32 %v2389_v12  ;;  %v2768_v20 = vpop.f32.mrb[44].mxu0 }
 0x297   :  { %v2945_v52 = vpop.eup %2944  ;;  %v2061_v59 = vadd.f32 1.0, %v2943_v4  ;;  %2964 = vpow2.f32 %v2387_v29  ;;  %v2704_v43 = vpop.f32.mrb[28].mxu1  ;;  %v2393_v28 = vmul.f32 -1.442695, %v2768_v20 }
 0x298   :  { %v2947_v30 = vpop.eup %2946  ;;  %v2059_v40 = vadd.f32 1.0, %v2945_v52  ;;  %2966 = vpow2.f32 %v2390_v49  ;;  %v1928_v10 = vpop.f32.mrb[45].mxu0  ;;  %1683 = vst [vmem:[%s4620_s5 + $0x70] sm:$0xff] %v2704_v43 }
 0x299   :  { %v2949_v31 = vpop.eup %2948  ;;  %2968 = vrcp.f32 %v2061_v59  ;;  %v2062_v60 = vadd.f32 1.0, %v2947_v30  ;;  %v1590_v23 = vpop.f32.mrb[29].mxu1  ;;  %v2391_v63 = vmul.f32 -1.442695, %v1928_v10 }
 0x29a   :  { %v2769_v22 = vpop.f32.mrb[46].mxu0  ;;  %v2951_v24 = vpop.eup %2950  ;;  %2970 = vrcp.f32 %v2059_v40  ;;  %v2060_v32 = vadd.f32 1.0, %v2949_v31  ;;  %1681 = vst [vmem:[%s4620_s5 + $0x60] sm:$0xff] %v1590_v23 }
 0x29b   :  { %v2705_v26 = vpop.f32.mrb[30].mxu1  ;;  %v1931_v3 = vpop.f32.mrb[47].mxu0  ;;  %v2497_v9 = vpack.c.bf16 %v2951_v24, %v2939_v25  ;;  %2972 = vrcp.f32 %v2062_v60  ;;  %v2394_v17 = vmul.f32 -1.442695, %v2769_v22 }
 0x29c   :  { %v2953_v38 = vpop.eup %2952  ;;  %1684 = vst [vmem:[%s4620_s5 + $0x78] sm:$0xff] %v2705_v26  ;;  %v1593_v15 = vpop.f32.mrb[31].mxu1  ;;  %2974 = vrcp.f32 %v2060_v32  ;;  %v2392_v42 = vmul.f32 -1.442695, %v1931_v3 }
 0x29d   :  { %v2955_v44 = vpop.eup %2954  ;;  %v2492_v61 = vpack.c.bf16 %v2953_v38, %v2941_v35  ;;  %1682 = vst [vmem:[%s4620_s5 + $0x68] sm:$0xff] %v1593_v15  ;;  %2545 = vst [vmem:[%s4619_s6 + $0x38] sm:$0xff] %v2497_v9   ;;  %2976 = vpow2.f32 %v2388_v16 }
 0x29e   :  { %v2957_v41 = vpop.eup %2956  ;;  %2978 = vpow2.f32 %v2393_v28  ;;  %v2708_v54 = vpop.f32.mrb[32].mxu1 }
 0x29f   :  { %v2959_v48 = vpop.eup %2958  ;;  %2544 = vst [vmem:[%s4619_s6 + $0x30] sm:$0xff] %v2492_v61   ;;  %2980 = vpow2.f32 %v2391_v63  ;;  %1687 = vst [vmem:[%s4620_s5 + $0x90] sm:$0xff] %v2708_v54  ;;  %v1606_v6 = vpop.f32.mrb[33].mxu1 }
 0x2a0   :  { %v2961_v5 = vpop.eup %2960  ;;  %v2507_v34 = vpack.c.bf16 %v2959_v48, %v2955_v44  ;;  %2982 = vpow2.f32 %v2394_v17  ;;  %1685 = vst [vmem:[%s4620_s5 + $0x80] sm:$0xff] %v1606_v6  ;;  %v2709_v14 = vpop.f32.mrb[34].mxu1 }
 0x2a1   :  { %v2963_v47 = vpop.eup %2962  ;;  %v2502_v57 = vpack.c.bf16 %v2961_v5, %v2957_v41  ;;  %2984 = vpow2.f32 %v2392_v42  ;;  %1688 = vst [vmem:[%s4620_s5 + $0x98] sm:$0xff] %v2709_v14  ;;  %v1609_v50 = vpop.f32.mrb[35].mxu1 }
 0x2a2   :  { %v2965_v2 = vpop.eup %2964  ;;  %2547 = vst [vmem:[%s4619_s6 + $0x48] sm:$0xff] %v2507_v34   ;;  %v2065_v27 = vadd.f32 1.0, %v2963_v47  ;;  %1686 = vst [vmem:[%s4620_s5 + $0x88] sm:$0xff] %v1609_v50 }
 0x2a3   :  { %v2967_v13 = vpop.eup %2966  ;;  %2546 = vst [vmem:[%s4619_s6 + $0x40] sm:$0xff] %v2502_v57   ;;  %v2063_v51 = vadd.f32 1.0, %v2965_v2 }
 0x2a4   :  { %v2969_v0 = vpop.eup %2968  ;;  %v2066_v18 = vadd.f32 1.0, %v2967_v13  ;;  %2986 = vrcp.f32 %v2065_v27 }
 0x2a5   :  { %v2971_v19 = vpop.eup %2970 }
 0x2a6   :  { %v2973_v36 = vpop.eup %2972  ;;  %2988 = vrcp.f32 %v2066_v18  ;;  %v2712_v1 = vpop.f32.mrb[36].mxu1 }
 0x2a7   :  { %v2975_v37 = vpop.eup %2974  ;;  %v2517_v33 = vpack.c.bf16 %v2973_v36, %v2969_v0  ;;  %2990 = vrcp.f32 %v2063_v51  ;;  %1691 = vst [vmem:[%s4620_s5 + $0xb0] sm:$0xff] %v2712_v1  ;;  %v1622_v45 = vpop.f32.mrb[37].mxu1 }
 0x2a8   :  { %v2977_v58 = vpop.eup %2976  ;;  %v2512_v56 = vpack.c.bf16 %v2975_v37, %v2971_v19  ;;  %1689 = vst [vmem:[%s4620_s5 + $0xa0] sm:$0xff] %v1622_v45  ;;  %v2713_v11 = vpop.f32.mrb[38].mxu1 }
 0x2a9   :  { %v2979_v39 = vpop.eup %2978  ;;  %2549 = vst [vmem:[%s4619_s6 + $0x58] sm:$0xff] %v2517_v33   ;;  %v2064_v21 = vadd.f32 1.0, %v2977_v58  ;;  %1692 = vst [vmem:[%s4620_s5 + $0xb8] sm:$0xff] %v2713_v11  ;;  %v1625_v29 = vpop.f32.mrb[39].mxu1 }
 0x2aa   :  { %v2981_v7 = vpop.eup %2980  ;;  %2548 = vst [vmem:[%s4619_s6 + $0x50] sm:$0xff] %v2512_v56   ;;  %v2069_v8 = vadd.f32 1.0, %v2979_v39  ;;  %1690 = vst [vmem:[%s4620_s5 + $0xa8] sm:$0xff] %v1625_v29 }
 0x2ab   :  { %v2983_v55 = vpop.eup %2982  ;;  %2992 = vrcp.f32 %v2064_v21  ;;  %v2067_v12 = vadd.f32 1.0, %v2981_v7 }
 0x2ac   :  { %v2985_v46 = vpop.eup %2984  ;;  %2994 = vrcp.f32 %v2069_v8  ;;  %v2070_v53 = vadd.f32 1.0, %v2983_v55 }
 0x2ad   :  { %2996 = vrcp.f32 %v2067_v12  ;;  %v2068_v62 = vadd.f32 1.0, %v2985_v46 }
 0x2ae   :  { %2998 = vrcp.f32 %v2070_v53  ;;  %v2987_v25 = vpop.eup %2986  ;;  %v2716_v4 = vpop.f32.mrb[40].mxu1 }
 0x2af   :  { %3000 = vrcp.f32 %v2068_v62  ;;  %1695 = vst [vmem:[%s4620_s5 + $0xd0] sm:$0xff] %v2716_v4  ;;  %v1638_v52 = vpop.f32.mrb[41].mxu1 }
 0x2b0   :  { %v2989_v49 = vpop.eup %2988  ;;  %1693 = vst [vmem:[%s4620_s5 + $0xc0] sm:$0xff] %v1638_v52  ;;  %v2717_v59 = vpop.f32.mrb[42].mxu1 }
 0x2b1   :  { %v2527_v35 = vpack.c.bf16 %v2989_v49, %v2987_v25  ;;  %v2991_v20 = vpop.eup %2990  ;;  %1696 = vst [vmem:[%s4620_s5 + $0xd8] sm:$0xff] %v2717_v59  ;;  %v1641_v30 = vpop.f32.mrb[43].mxu1 }
 0x2b2   :  { %1694 = vst [vmem:[%s4620_s5 + $0xc8] sm:$0xff] %v1641_v30 }
 0x2b3   :  { %2551 = vst [vmem:[%s4619_s6 + $0x68] sm:$0xff] %v2527_v35  }
 0x2b5   :  { %v2993_v40 = vpop.eup %2992 }
 0x2b6   :  { %v2995_v43 = vpop.eup %2994  ;;  %v2522_v10 = vpack.c.bf16 %v2993_v40, %v2991_v20  ;;  %v2720_v22 = vpop.f32.mrb[44].mxu1 }
 0x2b7   :  { %v2997_v31 = vpop.eup %2996  ;;  %1699 = vst [vmem:[%s4620_s5 + $0xf0] sm:$0xff] %v2720_v22  ;;  %v1654_v32 = vpop.f32.mrb[45].mxu1 }
 0x2b8   :  { %v2999_v60 = vpop.eup %2998  ;;  %2550 = vst [vmem:[%s4619_s6 + $0x60] sm:$0xff] %v2522_v10   ;;  %1697 = vst [vmem:[%s4620_s5 + $0xe0] sm:$0xff] %v1654_v32  ;;  %v2721_v28 = vpop.f32.mrb[46].mxu1 }
 0x2b9   :  { %v3001_v16 = vpop.eup %3000  ;;  %v2537_v23 = vpack.c.bf16 %v2999_v60, %v2995_v43  ;;  %1700 = vst [vmem:[%s4620_s5 + $0xf8] sm:$0xff] %v2721_v28  ;;  %v1657_v26 = vpop.f32.mrb[47].mxu1 }
 0x2ba   :  { %v2532_v24 = vpack.c.bf16 %v3001_v16, %v2997_v31  ;;  %1698 = vst [vmem:[%s4620_s5 + $0xe8] sm:$0xff] %v1657_v26 }
 0x2bb   :  { %2553 = vst [vmem:[%s4619_s6 + $0x78] sm:$0xff] %v2537_v23  }
 0x2bc   :  { %2552 = vst [vmem:[%s4619_s6 + $0x70] sm:$0xff] %v2532_v24  }

// kernel: rwkv_encoder_forward.19
= control target key start
LH: loop header
LB: loop body
LE: loop exit
PB: predicated region body
PF: predicated region fallthrough
CT: control target
= control target key end

     0   :  { %s1119_s3 = inlined_call_operand.vmem [shape: bf16[128,128], index: 3, kind: input, shape index: {}]   ;;  %s1120_s0 = inlined_call_operand.vmem [shape: bf16[256,128], index: 0, kind: input, shape index: {}]   ;;  %s1121_s1 = inlined_call_operand.vmem [shape: bf16[256,128], index: 1, kind: input, shape index: {}]   ;;  %s1122_s2 = inlined_call_operand.vmem [shape: f32[256,128], index: 2, kind: input, shape index: {}]   ;;  %s1123_s4 = inlined_call_operand.vmem [shape: f32[256,128], index: 4, kind: output, shape index: {}]  }
   0x1   :  { %v758_v0 = vld [vmem:[%s1119_s3] sm:$0xff]   ;;  %v759_v1 = vld [vmem:[%s1119_s3 + $0x8] sm:$0xff]   ;;  %v760_v2 = vld [vmem:[%s1119_s3 + $0x10] sm:$0xff]  }
   0x2   :  { %694 = vmatprep.subr.bf16.mxu0 %v758_v0  ;;  %742 = vmatprep.subr.bf16.mxu1 %v758_v0  ;;  %v761_v3 = vld [vmem:[%s1119_s3 + $0x18] sm:$0xff]   ;;  %v766_v4 = vld [vmem:[%s1120_s0] sm:$0xff]   ;;  %v763_v7 = vld [vmem:[%s1119_s3 + $0x28] sm:$0xff]  }
   0x3   :  { %695 = vmatpush3.bf16.msra.mxu0 %v758_v0  ;;  %750 = vmatpush3.bf16.msra.mxu1 %v758_v0  ;;  %v767_v5 = vld [vmem:[%s1120_s0 + $0x40] sm:$0xff]   ;;  %v764_v8 = vld [vmem:[%s1119_s3 + $0x30] sm:$0xff]   ;;  %v765_v9 = vld [vmem:[%s1119_s3 + $0x38] sm:$0xff]  }
   0x4   :  { %696 = vmatprep.subr.bf16.mxu0 %v759_v1  ;;  %743 = vmatprep.subr.bf16.mxu1 %v759_v1  ;;  %v762_v6 = vld [vmem:[%s1119_s3 + $0x20] sm:$0xff]   ;;  %v768_v10 = vld [vmem:[%s1120_s0 + $0x8] sm:$0xff]   ;;  %v770_v12 = vld [vmem:[%s1120_s0 + $0x10] sm:$0xff]  }
   0x5   :  { %710 = vmatprep.mubr.bf16.mxu0 %v766_v4  ;;  %726 = vmatprep.mubr.bf16.mxu1 %v767_v5  ;;  %v769_v11 = vld [vmem:[%s1120_s0 + $0x48] sm:$0xff]   ;;  %v771_v13 = vld [vmem:[%s1120_s0 + $0x50] sm:$0xff]   ;;  %v772_v14 = vld [vmem:[%s1120_s0 + $0x18] sm:$0xff]  }
   0x6   :  { %v773_v15 = vld [vmem:[%s1120_s0 + $0x58] sm:$0xff]   ;;  %v774_v16 = vld [vmem:[%s1120_s0 + $0x20] sm:$0xff]   ;;  %v776_v18 = vld [vmem:[%s1120_s0 + $0x28] sm:$0xff]  }
   0x7   :  { %697 = vmatpush3.bf16.msra.mxu0 %v759_v1  ;;  %751 = vmatpush3.bf16.msra.mxu1 %v759_v1  ;;  %v775_v17 = vld [vmem:[%s1120_s0 + $0x60] sm:$0xff]   ;;  %v777_v19 = vld [vmem:[%s1120_s0 + $0x68] sm:$0xff]   ;;  %v778_v20 = vld [vmem:[%s1120_s0 + $0x30] sm:$0xff]  }
   0x8   :  { %698 = vmatprep.subr.bf16.mxu0 %v760_v2  ;;  %744 = vmatprep.subr.bf16.mxu1 %v760_v2  ;;  %v779_v21 = vld [vmem:[%s1120_s0 + $0x70] sm:$0xff]   ;;  %v780_v22 = vld [vmem:[%s1120_s0 + $0x38] sm:$0xff]   ;;  %v655_v24 = vld [vmem:[%s1121_s1 + $0x8] sm:$0xff]  }
   0x9   :  { %v781_v23 = vld [vmem:[%s1120_s0 + $0x78] sm:$0xff]   ;;  %v663_v25 = vld [vmem:[%s1121_s1 + $0x48] sm:$0xff]   ;;  %v592_v26 = vld [vmem:[%s1121_s1] sm:$0xff]   ;;  %v597_v28 = vunpack.c.l.bf16 %v655_v24  ;;  %v598_v32 = vunpack.c.h.bf16 %v655_v24 }
   0xa   :  { %v662_v27 = vld [vmem:[%s1121_s1 + $0x40] sm:$0xff]   ;;  %v629_v29 = vunpack.c.l.bf16 %v663_v25  ;;  %v593_v30 = vunpack.c.l.bf16 %v592_v26  ;;  %v630_v33 = vunpack.c.h.bf16 %v663_v25  ;;  %v373_v35 = vld [vmem:[%s1122_s2 + $0x10] sm:$0xff]  ;;  %v594_v39 = vunpack.c.h.bf16 %v592_v26  ;;  %v374_v46 = vld [vmem:[%s1122_s2 + $0x18] sm:$0xff] }
   0xb   :  { %699 = vmatpush3.bf16.msra.mxu0 %v760_v2  ;;  %752 = vmatpush3.bf16.msra.mxu1 %v760_v2  ;;  %v625_v31 = vunpack.c.l.bf16 %v662_v27  ;;  %v389_v37 = vld [vmem:[%s1122_s2 + $0x90] sm:$0xff]  ;;  %v371_v38 = vld [vmem:[%s1122_s2] sm:$0xff]  ;;  %v626_v40 = vunpack.c.h.bf16 %v662_v27  ;;  %v390_v47 = vld [vmem:[%s1122_s2 + $0x98] sm:$0xff] }
   0xc   :  { %700 = vmatprep.subr.bf16.mxu0 %v761_v3  ;;  %745 = vmatprep.subr.bf16.mxu1 %v761_v3  ;;  %v387_v45 = vld [vmem:[%s1122_s2 + $0x80] sm:$0xff]  ;;  %v372_v52 = vld [vmem:[%s1122_s2 + $0x8] sm:$0xff]  ;;  %v657_v53 = vld [vmem:[%s1121_s1 + $0x18] sm:$0xff]  }
   0xd   :  { %v665_v54 = vld [vmem:[%s1121_s1 + $0x58] sm:$0xff]   ;;  %v388_v61 = vld [vmem:[%s1122_s2 + $0x88] sm:$0xff]  ;;  %v656_v62 = vld [vmem:[%s1121_s1 + $0x10] sm:$0xff]  }
   0xe   :  { %v664_v63 = vld [vmem:[%s1121_s1 + $0x50] sm:$0xff]   ;;  %v391_v25 = vld [vmem:[%s1122_s2 + $0xa0] sm:$0xff]  ;;  %v378_v26 = vld [vmem:[%s1122_s2 + $0x38] sm:$0xff] }
   0xf   :  { %701 = vmatpush3.bf16.msra.mxu0 %v761_v3  ;;  %753 = vmatpush3.bf16.msra.mxu1 %v761_v3  ;;  %v394_v27 = vld [vmem:[%s1122_s2 + $0xb8] sm:$0xff] }
  0x10   :  { %702 = vmatprep.subr.bf16.mxu0 %v762_v6  ;;  %746 = vmatprep.subr.bf16.mxu1 %v762_v6 }
  0x13   :  { %703 = vmatpush3.bf16.msra.mxu0 %v762_v6  ;;  %754 = vmatpush3.bf16.msra.mxu1 %v762_v6  ;;  %v605_v6 = vunpack.c.l.bf16 %v657_v53 }
  0x14   :  { %704 = vmatprep.subr.bf16.mxu0 %v763_v7  ;;  %747 = vmatprep.subr.bf16.mxu1 %v763_v7 }
  0x17   :  { %705 = vmatpush3.bf16.msra.mxu0 %v763_v7  ;;  %755 = vmatpush3.bf16.msra.mxu1 %v763_v7  ;;  %v637_v7 = vunpack.c.l.bf16 %v665_v54 }
  0x18   :  { %706 = vmatprep.subr.bf16.mxu0 %v764_v8  ;;  %748 = vmatprep.subr.bf16.mxu1 %v764_v8 }
  0x1b   :  { %707 = vmatpush3.bf16.msra.mxu0 %v764_v8  ;;  %756 = vmatpush3.bf16.msra.mxu1 %v764_v8 }
  0x1c   :  { %708 = vmatprep.subr.bf16.mxu0 %v765_v9  ;;  %749 = vmatprep.subr.bf16.mxu1 %v765_v9 }
  0x1f   :  { %709 = vmatpush3.bf16.msra.mxu0 %v765_v9  ;;  %757 = vmatpush3.bf16.msra.mxu1 %v765_v9 }
  0x22   :  { %711 = vmatmul.mubr.bf16.vlgmr.msra.gmra.mrb[0].mxu0 %v768_v10  ;;  %727 = vmatmul.mubr.bf16.vlgmr.msra.gmra.mrb[0].mxu1 %v769_v11  ;;  %v601_v10 = vunpack.c.l.bf16 %v656_v62  ;;  %v633_v11 = vunpack.c.l.bf16 %v664_v63 }
  0x23   :  { %714 = vmatprep.mubr.bf16.mxu0 %v770_v12  ;;  %730 = vmatprep.mubr.bf16.mxu1 %v771_v13  ;;  %v606_v12 = vunpack.c.h.bf16 %v657_v53  ;;  %v638_v13 = vunpack.c.h.bf16 %v665_v54 }
  0x2a   :  { %715 = vmatmul.mubr.bf16.gmra.mrb[4].mxu0 %v772_v14  ;;  %731 = vmatmul.mubr.bf16.gmra.mrb[4].mxu1 %v773_v15  ;;  %v377_v15 = vld [vmem:[%s1122_s2 + $0x30] sm:$0xff] }
  0x2b   :  { %718 = vmatprep.mubr.bf16.mxu0 %v774_v16  ;;  %734 = vmatprep.mubr.bf16.mxu1 %v775_v17  ;;  %v393_v17 = vld [vmem:[%s1122_s2 + $0xb0] sm:$0xff] }
  0x32   :  { %719 = vmatmul.mubr.bf16.gmra.mrb[8].mxu0 %v776_v18  ;;  %735 = vmatmul.mubr.bf16.gmra.mrb[8].mxu1 %v777_v19  ;;  %v375_v18 = vld [vmem:[%s1122_s2 + $0x20] sm:$0xff]  ;;  %v602_v19 = vunpack.c.h.bf16 %v656_v62 }
  0x33   :  { %722 = vmatprep.mubr.bf16.mxu0 %v778_v20  ;;  %738 = vmatprep.mubr.bf16.mxu1 %v779_v21  ;;  %v634_v20 = vunpack.c.h.bf16 %v664_v63  ;;  %v379_v62 = vld [vmem:[%s1122_s2 + $0x40] sm:$0xff] }
  0x3a   :  { %723 = vmatmul.mubr.bf16.gmra.mrb[12].mxu0 %v780_v22  ;;  %739 = vmatmul.mubr.bf16.gmra.mrb[12].mxu1 %v781_v23 }
  0xf5   :  { %v712_v34 = vpop.f32.mrb[0].mxu0  ;;  %v728_v36 = vpop.f32.mrb[0].mxu1 }
  0xf6   :  { %v469_v41 = vmul.f32 %v712_v34, %v597_v28  ;;  %v485_v42 = vmul.f32 %v728_v36, %v629_v29  ;;  %v244_v43 = vpop.f32.mrb[1].mxu0  ;;  %v308_v44 = vpop.f32.mrb[1].mxu1  ;;  %v667_v34 = vld [vmem:[%s1121_s1 + $0x68] sm:$0xff]  }
  0xf7   :  { %v467_v48 = vmul.f32 %v593_v30, %v244_v43  ;;  %v483_v49 = vmul.f32 %v625_v31, %v308_v44  ;;  %v713_v50 = vpop.f32.mrb[2].mxu0  ;;  %v729_v51 = vpop.f32.mrb[2].mxu1  ;;  %v666_v43 = vld [vmem:[%s1121_s1 + $0x60] sm:$0xff]  }
  0xf8   :  { %v501_v55 = vadd.f32 %v469_v41, %v373_v35  ;;  %v517_v56 = vadd.f32 %v485_v42, %v389_v37  ;;  %v470_v57 = vmul.f32 %v713_v50, %v598_v32  ;;  %v486_v58 = vmul.f32 %v729_v51, %v630_v33  ;;  %v247_v59 = vpop.f32.mrb[3].mxu0  ;;  %v311_v60 = vpop.f32.mrb[3].mxu1  ;;  %v376_v32 = vld [vmem:[%s1122_s2 + $0x28] sm:$0xff]  ;;  %v658_v42 = vld [vmem:[%s1121_s1 + $0x20] sm:$0xff]  }
  0xf9   :  { %v499_v0 = vadd.f32 %v467_v48, %v371_v38  ;;  %v515_v1 = vadd.f32 %v483_v49, %v387_v45  ;;  %v468_v2 = vmul.f32 %v594_v39, %v247_v59  ;;  %v484_v3 = vmul.f32 %v626_v40, %v311_v60  ;;  %v659_v33 = vld [vmem:[%s1121_s1 + $0x28] sm:$0xff]   ;;  %v381_v59 = vld [vmem:[%s1122_s2 + $0x50] sm:$0xff] }
  0xfa   :  { %533 = vst [vmem:[%s1123_s4 + $0x10] sm:$0xff] %v501_v55  ;;  %549 = vst [vmem:[%s1123_s4 + $0x90] sm:$0xff] %v517_v56  ;;  %v502_v4 = vadd.f32 %v470_v57, %v374_v46  ;;  %v518_v5 = vadd.f32 %v486_v58, %v390_v47  ;;  %v392_v41 = vld [vmem:[%s1122_s2 + $0xa8] sm:$0xff]  ;;  %v613_v50 = vunpack.c.l.bf16 %v659_v33  ;;  %v645_v51 = vunpack.c.l.bf16 %v667_v34 }
  0xfb   :  { %531 = vst [vmem:[%s1123_s4] sm:$0xff] %v499_v0  ;;  %547 = vst [vmem:[%s1123_s4 + $0x80] sm:$0xff] %v515_v1  ;;  %v500_v8 = vadd.f32 %v468_v2, %v372_v52  ;;  %v516_v9 = vadd.f32 %v484_v3, %v388_v61  ;;  %v609_v54 = vunpack.c.l.bf16 %v658_v42  ;;  %v641_v55 = vunpack.c.l.bf16 %v666_v43  ;;  %v397_v61 = vld [vmem:[%s1122_s2 + $0xd0] sm:$0xff] }
  0xfc   :  { %534 = vst [vmem:[%s1123_s4 + $0x18] sm:$0xff] %v502_v4  ;;  %550 = vst [vmem:[%s1123_s4 + $0x98] sm:$0xff] %v518_v5  ;;  %v614_v56 = vunpack.c.h.bf16 %v659_v33  ;;  %v646_v57 = vunpack.c.h.bf16 %v667_v34  ;;  %v610_v63 = vunpack.c.h.bf16 %v658_v42  ;;  %v642_v0 = vunpack.c.h.bf16 %v666_v43  ;;  %v395_v5 = vld [vmem:[%s1122_s2 + $0xc0] sm:$0xff] }
  0xfd   :  { %532 = vst [vmem:[%s1123_s4 + $0x8] sm:$0xff] %v500_v8  ;;  %548 = vst [vmem:[%s1123_s4 + $0x88] sm:$0xff] %v516_v9  ;;  %v716_v14 = vpop.f32.mrb[4].mxu0  ;;  %v732_v16 = vpop.f32.mrb[4].mxu1 }
  0xfe   :  { %v473_v21 = vmul.f32 %v716_v14, %v605_v6  ;;  %v489_v22 = vmul.f32 %v732_v16, %v637_v7  ;;  %v260_v23 = vpop.f32.mrb[5].mxu0  ;;  %v324_v24 = vpop.f32.mrb[5].mxu1  ;;  %v382_v6 = vld [vmem:[%s1122_s2 + $0x58] sm:$0xff] }
  0xff   :  { %v471_v28 = vmul.f32 %v601_v10, %v260_v23  ;;  %v487_v29 = vmul.f32 %v633_v11, %v324_v24  ;;  %v717_v30 = vpop.f32.mrb[6].mxu0  ;;  %v733_v31 = vpop.f32.mrb[6].mxu1  ;;  %v398_v7 = vld [vmem:[%s1122_s2 + $0xd8] sm:$0xff]  ;;  %v668_v23 = vld [vmem:[%s1121_s1 + $0x70] sm:$0xff]  }
 0x100   :  { %v505_v35 = vadd.f32 %v473_v21, %v377_v15  ;;  %v521_v36 = vadd.f32 %v489_v22, %v393_v17  ;;  %v474_v37 = vmul.f32 %v717_v30, %v606_v12  ;;  %v490_v38 = vmul.f32 %v733_v31, %v638_v13  ;;  %v263_v39 = vpop.f32.mrb[7].mxu0  ;;  %v327_v40 = vpop.f32.mrb[7].mxu1  ;;  %v380_v12 = vld [vmem:[%s1122_s2 + $0x48] sm:$0xff]  ;;  %v661_v13 = vld [vmem:[%s1121_s1 + $0x38] sm:$0xff]   ;;  %v660_v22 = vld [vmem:[%s1121_s1 + $0x30] sm:$0xff]  }
 0x101   :  { %v503_v44 = vadd.f32 %v471_v28, %v375_v18  ;;  %v519_v45 = vadd.f32 %v487_v29, %v391_v25  ;;  %v472_v46 = vmul.f32 %v602_v19, %v263_v39  ;;  %v488_v47 = vmul.f32 %v634_v20, %v327_v40  ;;  %v669_v14 = vld [vmem:[%s1121_s1 + $0x78] sm:$0xff]   ;;  %v396_v21 = vld [vmem:[%s1122_s2 + $0xc8] sm:$0xff]  ;;  %v385_v39 = vld [vmem:[%s1122_s2 + $0x70] sm:$0xff] }
 0x102   :  { %537 = vst [vmem:[%s1123_s4 + $0x30] sm:$0xff] %v505_v35  ;;  %553 = vst [vmem:[%s1123_s4 + $0xb0] sm:$0xff] %v521_v36  ;;  %v506_v48 = vadd.f32 %v474_v37, %v378_v26  ;;  %v522_v49 = vadd.f32 %v490_v38, %v394_v27  ;;  %v621_v30 = vunpack.c.l.bf16 %v661_v13  ;;  %v653_v31 = vunpack.c.l.bf16 %v669_v14 }
 0x103   :  { %535 = vst [vmem:[%s1123_s4 + $0x20] sm:$0xff] %v503_v44  ;;  %551 = vst [vmem:[%s1123_s4 + $0xa0] sm:$0xff] %v519_v45  ;;  %v504_v52 = vadd.f32 %v472_v46, %v376_v32  ;;  %v520_v53 = vadd.f32 %v488_v47, %v392_v41  ;;  %v617_v34 = vunpack.c.l.bf16 %v660_v22  ;;  %v649_v35 = vunpack.c.l.bf16 %v668_v23  ;;  %v401_v41 = vld [vmem:[%s1122_s2 + $0xf0] sm:$0xff]  ;;  %v383_v47 = vld [vmem:[%s1122_s2 + $0x60] sm:$0xff] }
 0x104   :  { %538 = vst [vmem:[%s1123_s4 + $0x38] sm:$0xff] %v506_v48  ;;  %554 = vst [vmem:[%s1123_s4 + $0xb8] sm:$0xff] %v522_v49  ;;  %v622_v36 = vunpack.c.h.bf16 %v661_v13  ;;  %v654_v37 = vunpack.c.h.bf16 %v669_v14  ;;  %v618_v42 = vunpack.c.h.bf16 %v660_v22  ;;  %v650_v43 = vunpack.c.h.bf16 %v668_v23  ;;  %v399_v49 = vld [vmem:[%s1122_s2 + $0xe0] sm:$0xff] }
 0x105   :  { %536 = vst [vmem:[%s1123_s4 + $0x28] sm:$0xff] %v504_v52  ;;  %552 = vst [vmem:[%s1123_s4 + $0xa8] sm:$0xff] %v520_v53  ;;  %v720_v58 = vpop.f32.mrb[8].mxu0  ;;  %v736_v60 = vpop.f32.mrb[8].mxu1  ;;  %v386_v53 = vld [vmem:[%s1122_s2 + $0x78] sm:$0xff] }
 0x106   :  { %v477_v1 = vmul.f32 %v720_v58, %v613_v50  ;;  %v493_v2 = vmul.f32 %v736_v60, %v645_v51  ;;  %v276_v3 = vpop.f32.mrb[9].mxu0  ;;  %v340_v4 = vpop.f32.mrb[9].mxu1 }
 0x107   :  { %v475_v8 = vmul.f32 %v609_v54, %v276_v3  ;;  %v491_v9 = vmul.f32 %v641_v55, %v340_v4  ;;  %v721_v10 = vpop.f32.mrb[10].mxu0  ;;  %v737_v11 = vpop.f32.mrb[10].mxu1  ;;  %v402_v55 = vld [vmem:[%s1122_s2 + $0xf8] sm:$0xff] }
 0x108   :  { %v509_v15 = vadd.f32 %v477_v1, %v381_v59  ;;  %v525_v16 = vadd.f32 %v493_v2, %v397_v61  ;;  %v478_v17 = vmul.f32 %v721_v10, %v614_v56  ;;  %v494_v18 = vmul.f32 %v737_v11, %v646_v57  ;;  %v279_v19 = vpop.f32.mrb[11].mxu0  ;;  %v343_v20 = vpop.f32.mrb[11].mxu1  ;;  %v384_v61 = vld [vmem:[%s1122_s2 + $0x68] sm:$0xff] }
 0x109   :  { %v507_v24 = vadd.f32 %v475_v8, %v379_v62  ;;  %v523_v25 = vadd.f32 %v491_v9, %v395_v5  ;;  %v476_v26 = vmul.f32 %v610_v63, %v279_v19  ;;  %v492_v27 = vmul.f32 %v642_v0, %v343_v20  ;;  %v400_v63 = vld [vmem:[%s1122_s2 + $0xe8] sm:$0xff] }
 0x10a   :  { %541 = vst [vmem:[%s1123_s4 + $0x50] sm:$0xff] %v509_v15  ;;  %557 = vst [vmem:[%s1123_s4 + $0xd0] sm:$0xff] %v525_v16  ;;  %v510_v28 = vadd.f32 %v478_v17, %v382_v6  ;;  %v526_v29 = vadd.f32 %v494_v18, %v398_v7 }
 0x10b   :  { %539 = vst [vmem:[%s1123_s4 + $0x40] sm:$0xff] %v507_v24  ;;  %555 = vst [vmem:[%s1123_s4 + $0xc0] sm:$0xff] %v523_v25  ;;  %v508_v32 = vadd.f32 %v476_v26, %v380_v12  ;;  %v524_v33 = vadd.f32 %v492_v27, %v396_v21 }
 0x10c   :  { %542 = vst [vmem:[%s1123_s4 + $0x58] sm:$0xff] %v510_v28  ;;  %558 = vst [vmem:[%s1123_s4 + $0xd8] sm:$0xff] %v526_v29 }
 0x10d   :  { %540 = vst [vmem:[%s1123_s4 + $0x48] sm:$0xff] %v508_v32  ;;  %556 = vst [vmem:[%s1123_s4 + $0xc8] sm:$0xff] %v524_v33  ;;  %v724_v38 = vpop.f32.mrb[12].mxu0  ;;  %v740_v40 = vpop.f32.mrb[12].mxu1 }
 0x10e   :  { %v481_v44 = vmul.f32 %v724_v38, %v621_v30  ;;  %v497_v45 = vmul.f32 %v740_v40, %v653_v31  ;;  %v292_v46 = vpop.f32.mrb[13].mxu0  ;;  %v356_v48 = vpop.f32.mrb[13].mxu1 }
 0x10f   :  { %v479_v50 = vmul.f32 %v617_v34, %v292_v46  ;;  %v495_v51 = vmul.f32 %v649_v35, %v356_v48  ;;  %v725_v52 = vpop.f32.mrb[14].mxu0  ;;  %v741_v54 = vpop.f32.mrb[14].mxu1 }
 0x110   :  { %v513_v56 = vadd.f32 %v481_v44, %v385_v39  ;;  %v529_v57 = vadd.f32 %v497_v45, %v401_v41  ;;  %v482_v58 = vmul.f32 %v725_v52, %v622_v36  ;;  %v498_v59 = vmul.f32 %v741_v54, %v654_v37  ;;  %v295_v60 = vpop.f32.mrb[15].mxu0  ;;  %v359_v62 = vpop.f32.mrb[15].mxu1 }
 0x111   :  { %v511_v0 = vadd.f32 %v479_v50, %v383_v47  ;;  %v527_v1 = vadd.f32 %v495_v51, %v399_v49  ;;  %v480_v2 = vmul.f32 %v618_v42, %v295_v60  ;;  %v496_v3 = vmul.f32 %v650_v43, %v359_v62 }
 0x112   :  { %545 = vst [vmem:[%s1123_s4 + $0x70] sm:$0xff] %v513_v56  ;;  %561 = vst [vmem:[%s1123_s4 + $0xf0] sm:$0xff] %v529_v57  ;;  %v514_v4 = vadd.f32 %v482_v58, %v386_v53  ;;  %v530_v5 = vadd.f32 %v498_v59, %v402_v55 }
 0x113   :  { %543 = vst [vmem:[%s1123_s4 + $0x60] sm:$0xff] %v511_v0  ;;  %559 = vst [vmem:[%s1123_s4 + $0xe0] sm:$0xff] %v527_v1  ;;  %v512_v6 = vadd.f32 %v480_v2, %v384_v61  ;;  %v528_v7 = vadd.f32 %v496_v3, %v400_v63 }
 0x114   :  { %546 = vst [vmem:[%s1123_s4 + $0x78] sm:$0xff] %v514_v4  ;;  %562 = vst [vmem:[%s1123_s4 + $0xf8] sm:$0xff] %v530_v5 }
 0x115   :  { %544 = vst [vmem:[%s1123_s4 + $0x68] sm:$0xff] %v512_v6  ;;  %560 = vst [vmem:[%s1123_s4 + $0xe8] sm:$0xff] %v528_v7 }

// kernel: rwkv_encoder_forward.18
= control target key start
LH: loop header
LB: loop body
LE: loop exit
PB: predicated region body
PF: predicated region fallthrough
CT: control target
= control target key end

     0   :  { %v220_v32 = vlaneseq  ;;  %s3859_s0 = inlined_call_operand.vmem [shape: f32[256,128], index: 0, kind: input, shape index: {}]   ;;  %s3860_s3 = inlined_call_operand.vmem [shape: bf16[128,128], index: 3, kind: input, shape index: {}]   ;;  %s3861_s4 = inlined_call_operand.vmem [shape: bf16[128,128], index: 4, kind: input, shape index: {}]   ;;  %s3862_s1 = inlined_call_operand.vmem [shape: f32[2,128], index: 1, kind: input, shape index: {}]   ;;  %s3863_s2 = inlined_call_operand.vmem [shape: f32[2,128], index: 2, kind: input, shape index: {}]   ;;  %s3864_s5 = inlined_call_operand.vmem [shape: bf16[256,128], index: 5, kind: output, shape index: {0}]   ;;  %s3865_s6 = inlined_call_operand.vmem [shape: bf16[256,128], index: 6, kind: output, shape index: {1}]  }
   0x1   :  { %v2874_v0 = vld [vmem:[%s3859_s0] sm:$0xff]  ;;  %v2879_v1 = vld [vmem:[%s3859_s0 + $0x8] sm:$0xff]  ;;  %v2886_v2 = vld [vmem:[%s3859_s0 + $0xf8] sm:$0xff] }
   0x2   :  { %92 = vadd.xlane.f32.xlu0 %v2874_v0  ;;  %94 = vadd.xlane.f32.xlu1 %v2879_v1  ;;  %v2891_v3 = vld [vmem:[%s3859_s0 + $0x10] sm:$0xff]  ;;  %v2898_v4 = vld [vmem:[%s3859_s0 + $0x18] sm:$0xff]  ;;  %v2903_v5 = vld [vmem:[%s3859_s0 + $0x20] sm:$0xff]  ;;  %v3064_v33 = vand.u32 127, %v220_v32 }
   0x3   :  { %v2910_v6 = vld [vmem:[%s3859_s0 + $0x28] sm:$0xff]  ;;  %v2915_v7 = vld [vmem:[%s3859_s0 + $0x30] sm:$0xff]  ;;  %v2922_v8 = vld [vmem:[%s3859_s0 + $0x38] sm:$0xff] }
   0x4   :  { %v2927_v9 = vld [vmem:[%s3859_s0 + $0x40] sm:$0xff]  ;;  %v2934_v10 = vld [vmem:[%s3859_s0 + $0x48] sm:$0xff]  ;;  %v2939_v11 = vld [vmem:[%s3859_s0 + $0x50] sm:$0xff]  ;;  %vm222_vm0 = vcmp.lt.s32.totalorder %v3064_v33, 32  ;;  %v3340_v33 = vshrl.u32 %v220_v32, 7 }
   0x5   :  { %v2946_v12 = vld [vmem:[%s3859_s0 + $0x58] sm:$0xff]  ;;  %v2951_v13 = vld [vmem:[%s3859_s0 + $0x60] sm:$0xff]  ;;  %v2958_v14 = vld [vmem:[%s3859_s0 + $0x68] sm:$0xff] }
   0x6   :  { %154 = vadd.xlane.f32.xlu0 %v2886_v2  ;;  %96 = vadd.xlane.f32.xlu1 %v2891_v3  ;;  %v2963_v15 = vld [vmem:[%s3859_s0 + $0x70] sm:$0xff]  ;;  %v2970_v16 = vld [vmem:[%s3859_s0 + $0x78] sm:$0xff]  ;;  %v2975_v17 = vld [vmem:[%s3859_s0 + $0x80] sm:$0xff]  ;;  %vm618_vm1 = vcmp.lt.s32.totalorder %v3340_v33, 2 }
   0x7   :  { %v2982_v18 = vld [vmem:[%s3859_s0 + $0x88] sm:$0xff]  ;;  %v2987_v19 = vld [vmem:[%s3859_s0 + $0x90] sm:$0xff]  ;;  %v2994_v20 = vld [vmem:[%s3859_s0 + $0x98] sm:$0xff] }
   0x8   :  { %v2999_v21 = vld [vmem:[%s3859_s0 + $0xa0] sm:$0xff]  ;;  %v3006_v22 = vld [vmem:[%s3859_s0 + $0xa8] sm:$0xff]  ;;  %v3011_v23 = vld [vmem:[%s3859_s0 + $0xb0] sm:$0xff] }
   0x9   :  { %v3018_v24 = vld [vmem:[%s3859_s0 + $0xb8] sm:$0xff]  ;;  %v3023_v25 = vld [vmem:[%s3859_s0 + $0xc0] sm:$0xff]  ;;  %v3030_v26 = vld [vmem:[%s3859_s0 + $0xc8] sm:$0xff] }
   0xa   :  { %98 = vadd.xlane.f32.xlu0 %v2898_v4  ;;  %100 = vadd.xlane.f32.xlu1 %v2903_v5  ;;  %v3035_v27 = vld [vmem:[%s3859_s0 + $0xd0] sm:$0xff]  ;;  %v3042_v28 = vld [vmem:[%s3859_s0 + $0xd8] sm:$0xff]  ;;  %v3047_v29 = vld [vmem:[%s3859_s0 + $0xe0] sm:$0xff] }
   0xb   :  { %v3054_v30 = vld [vmem:[%s3859_s0 + $0xe8] sm:$0xff]  ;;  %v3059_v31 = vld [vmem:[%s3859_s0 + $0xf0] sm:$0xff] }
   0xe   :  { %102 = vadd.xlane.f32.xlu0 %v2910_v6  ;;  %104 = vadd.xlane.f32.xlu1 %v2915_v7 }
  0x12   :  { %106 = vadd.xlane.f32.xlu0 %v2922_v8  ;;  %108 = vadd.xlane.f32.xlu1 %v2927_v9 }
  0x16   :  { %110 = vadd.xlane.f32.xlu0 %v2934_v10  ;;  %112 = vadd.xlane.f32.xlu1 %v2939_v11 }
  0x1a   :  { %114 = vadd.xlane.f32.xlu0 %v2946_v12  ;;  %116 = vadd.xlane.f32.xlu1 %v2951_v13 }
  0x1e   :  { %118 = vadd.xlane.f32.xlu0 %v2958_v14  ;;  %120 = vadd.xlane.f32.xlu1 %v2963_v15 }
  0x22   :  { %122 = vadd.xlane.f32.xlu0 %v2970_v16  ;;  %124 = vadd.xlane.f32.xlu1 %v2975_v17 }
  0x26   :  { %126 = vadd.xlane.f32.xlu0 %v2982_v18  ;;  %128 = vadd.xlane.f32.xlu1 %v2987_v19 }
  0x2a   :  { %130 = vadd.xlane.f32.xlu0 %v2994_v20  ;;  %132 = vadd.xlane.f32.xlu1 %v2999_v21 }
  0x2e   :  { %134 = vadd.xlane.f32.xlu0 %v3006_v22  ;;  %136 = vadd.xlane.f32.xlu1 %v3011_v23 }
  0x32   :  { %138 = vadd.xlane.f32.xlu0 %v3018_v24  ;;  %140 = vadd.xlane.f32.xlu1 %v3023_v25 }
  0x36   :  { %142 = vadd.xlane.f32.xlu0 %v3030_v26  ;;  %144 = vadd.xlane.f32.xlu1 %v3035_v27 }
  0x3a   :  { %146 = vadd.xlane.f32.xlu0 %v3042_v28  ;;  %148 = vadd.xlane.f32.xlu1 %v3047_v29 }
  0x3e   :  { %150 = vadd.xlane.f32.xlu0 %v3054_v30  ;;  %152 = vadd.xlane.f32.xlu1 %v3059_v31 }
  0x8f   :  { %v93_v34 = vpop.xlane.xlu0 %92  ;;  %v95_v35 = vpop.xlane.xlu1 %94 }
  0x90   :  { %v156_v36 = vmul.f32 0.03125, %v93_v34  ;;  %v157_v37 = vmul.f32 0.03125, %v95_v35 }
  0x92   :  { %v188_v38 = vsub.f32 %v2874_v0, %v156_v36  ;;  %v189_v39 = vsub.f32 %v2879_v1, %v157_v37 }
  0x93   :  { %v155_v40 = vpop.xlane.xlu0 %154  ;;  %v97_v41 = vpop.xlane.xlu1 %96 }
  0x94   :  { %v187_v42 = vmul.f32 0.03125, %v155_v40  ;;  %v158_v43 = vmul.f32 0.03125, %v97_v41  ;;  %v3071_v44 = vsel %vm222_vm0, %v188_v38, 0.0  ;;  %v3075_v45 = vsel %vm222_vm0, %v189_v39, 0.0 }
  0x95   :  { %v257_v46 = vmul.f32 %v3071_v44, %v3071_v44  ;;  %v258_v51 = vmul.f32 %v3075_v45, %v3075_v45 }
  0x96   :  { %v219_v47 = vsub.f32 %v2886_v2, %v187_v42  ;;  %v190_v48 = vsub.f32 %v2891_v3, %v158_v43 }
  0x97   :  { %289 = vadd.xlane.f32.xlu0 %v257_v46  ;;  %v99_v49 = vpop.xlane.xlu0 %98  ;;  %v101_v50 = vpop.xlane.xlu1 %100 }
  0x98   :  { %v159_v52 = vmul.f32 0.03125, %v99_v49  ;;  %v160_v53 = vmul.f32 0.03125, %v101_v50  ;;  %v3085_v54 = vsel %vm222_vm0, %v219_v47, 0.0  ;;  %v3089_v55 = vsel %vm222_vm0, %v190_v48, 0.0 }
  0x99   :  { %v288_v56 = vmul.f32 %v3085_v54, %v3085_v54  ;;  %v259_v61 = vmul.f32 %v3089_v55, %v3089_v55 }
  0x9a   :  { %v191_v57 = vsub.f32 %v2898_v4, %v159_v52  ;;  %v192_v58 = vsub.f32 %v2903_v5, %v160_v53 }
  0x9b   :  { %291 = vadd.xlane.f32.xlu0 %v258_v51  ;;  %351 = vadd.xlane.f32.xlu1 %v288_v56  ;;  %v103_v59 = vpop.xlane.xlu0 %102  ;;  %v105_v60 = vpop.xlane.xlu1 %104 }
  0x9c   :  { %v161_v62 = vmul.f32 0.03125, %v103_v59  ;;  %v162_v63 = vmul.f32 0.03125, %v105_v60  ;;  %v3099_v0 = vsel %vm222_vm0, %v191_v57, 0.0  ;;  %v3103_v1 = vsel %vm222_vm0, %v192_v58, 0.0 }
  0x9d   :  { %v260_v2 = vmul.f32 %v3099_v0, %v3099_v0  ;;  %v261_v35 = vmul.f32 %v3103_v1, %v3103_v1 }
  0x9e   :  { %v193_v3 = vsub.f32 %v2910_v6, %v161_v62  ;;  %v194_v4 = vsub.f32 %v2915_v7, %v162_v63 }
  0x9f   :  { %293 = vadd.xlane.f32.xlu1 %v259_v61  ;;  %295 = vadd.xlane.f32.xlu0 %v260_v2  ;;  %v107_v5 = vpop.xlane.xlu0 %106  ;;  %v109_v34 = vpop.xlane.xlu1 %108  ;;  %v2628_v61 = vld [vmem:[%s3860_s3] sm:$0xff]  }
  0xa0   :  { %v163_v36 = vmul.f32 0.03125, %v107_v5  ;;  %v164_v37 = vmul.f32 0.03125, %v109_v34  ;;  %v3113_v38 = vsel %vm222_vm0, %v193_v3, 0.0  ;;  %v3117_v39 = vsel %vm222_vm0, %v194_v4, 0.0  ;;  %v2629_v3 = vld [vmem:[%s3861_s4] sm:$0xff]   ;;  %2532 = vmatprep.subr.bf16.mxu0 %v2628_v61 }
  0xa1   :  { %v262_v6 = vmul.f32 %v3113_v38, %v3113_v38  ;;  %v263_v43 = vmul.f32 %v3117_v39, %v3117_v39  ;;  %2580 = vmatprep.subr.bf16.mxu1 %v2629_v3  ;;  %2533 = vmatpush3.bf16.msra.mxu0 %v2628_v61  ;;  %v2634_v61 = vld [vmem:[%s3860_s3 + $0x18] sm:$0xff]  }
  0xa2   :  { %v195_v7 = vsub.f32 %v2922_v8, %v163_v36  ;;  %v196_v40 = vsub.f32 %v2927_v9, %v164_v37  ;;  %2581 = vmatpush3.bf16.msra.mxu1 %v2629_v3  ;;  %v2630_v37 = vld [vmem:[%s3860_s3 + $0x8] sm:$0xff]  }
  0xa3   :  { %297 = vadd.xlane.f32.xlu1 %v261_v35  ;;  %299 = vadd.xlane.f32.xlu0 %v262_v6  ;;  %v111_v41 = vpop.xlane.xlu0 %110  ;;  %v113_v42 = vpop.xlane.xlu1 %112  ;;  %v2631_v6 = vld [vmem:[%s3861_s4 + $0x8] sm:$0xff]  }
  0xa4   :  { %v165_v46 = vmul.f32 0.03125, %v111_v41  ;;  %v166_v47 = vmul.f32 0.03125, %v113_v42  ;;  %v3127_v48 = vsel %vm222_vm0, %v195_v7, 0.0  ;;  %v3131_v49 = vsel %vm222_vm0, %v196_v40, 0.0  ;;  %2534 = vmatprep.subr.bf16.mxu0 %v2630_v37  ;;  %2582 = vmatprep.subr.bf16.mxu1 %v2631_v6 }
  0xa5   :  { %v264_v8 = vmul.f32 %v3127_v48, %v3127_v48  ;;  %v265_v53 = vmul.f32 %v3131_v49, %v3131_v49  ;;  %2535 = vmatpush3.bf16.msra.mxu0 %v2630_v37  ;;  %v2636_v37 = vld [vmem:[%s3860_s3 + $0x20] sm:$0xff]  }
  0xa6   :  { %v197_v9 = vsub.f32 %v2934_v10, %v165_v46  ;;  %v198_v50 = vsub.f32 %v2939_v11, %v166_v47  ;;  %2583 = vmatpush3.bf16.msra.mxu1 %v2631_v6  ;;  %v2637_v6 = vld [vmem:[%s3861_s4 + $0x20] sm:$0xff]  }
  0xa7   :  { %301 = vadd.xlane.f32.xlu1 %v263_v43  ;;  %303 = vadd.xlane.f32.xlu0 %v264_v8  ;;  %v115_v51 = vpop.xlane.xlu0 %114  ;;  %v117_v52 = vpop.xlane.xlu1 %116 }
  0xa8   :  { %v167_v56 = vmul.f32 0.03125, %v115_v51  ;;  %v168_v57 = vmul.f32 0.03125, %v117_v52  ;;  %v3141_v58 = vsel %vm222_vm0, %v197_v9, 0.0  ;;  %v3145_v59 = vsel %vm222_vm0, %v198_v50, 0.0  ;;  %v2632_v9 = vld [vmem:[%s3860_s3 + $0x10] sm:$0xff]  }
  0xa9   :  { %v266_v10 = vmul.f32 %v3141_v58, %v3141_v58  ;;  %v267_v2 = vmul.f32 %v3145_v59, %v3145_v59  ;;  %v2633_v50 = vld [vmem:[%s3861_s4 + $0x10] sm:$0xff]   ;;  %2536 = vmatprep.subr.bf16.mxu0 %v2632_v9 }
  0xaa   :  { %v199_v11 = vsub.f32 %v2946_v12, %v167_v56  ;;  %v200_v60 = vsub.f32 %v2951_v13, %v168_v57  ;;  %2584 = vmatprep.subr.bf16.mxu1 %v2633_v50  ;;  %2537 = vmatpush3.bf16.msra.mxu0 %v2632_v9  ;;  %v2638_v9 = vld [vmem:[%s3860_s3 + $0x28] sm:$0xff]  }
  0xab   :  { %305 = vadd.xlane.f32.xlu1 %v265_v53  ;;  %307 = vadd.xlane.f32.xlu0 %v266_v10  ;;  %v119_v62 = vpop.xlane.xlu0 %118  ;;  %v121_v63 = vpop.xlane.xlu1 %120 }
  0xac   :  { %v169_v4 = vmul.f32 0.03125, %v119_v62  ;;  %v170_v5 = vmul.f32 0.03125, %v121_v63  ;;  %v3161_v12 = vsel %vm222_vm0, %v199_v11, 0.0  ;;  %v3165_v13 = vsel %vm222_vm0, %v200_v60, 0.0  ;;  %2585 = vmatpush3.bf16.msra.mxu1 %v2633_v50  ;;  %v2635_v62 = vld [vmem:[%s3861_s4 + $0x18] sm:$0xff]   ;;  %2538 = vmatprep.subr.bf16.mxu0 %v2634_v61  ;;  %v2639_v50 = vld [vmem:[%s3861_s4 + $0x28] sm:$0xff]  }
  0xad   :  { %v268_v34 = vmul.f32 %v3161_v12, %v3161_v12  ;;  %v269_v41 = vmul.f32 %v3165_v13, %v3165_v13  ;;  %2586 = vmatprep.subr.bf16.mxu1 %v2635_v62 }
  0xae   :  { %v201_v35 = vsub.f32 %v2958_v14, %v169_v4  ;;  %v202_v36 = vsub.f32 %v2963_v15, %v170_v5  ;;  %2539 = vmatpush3.bf16.msra.mxu0 %v2634_v61  ;;  %v2640_v61 = vld [vmem:[%s3860_s3 + $0x30] sm:$0xff]  }
  0xaf   :  { %309 = vadd.xlane.f32.xlu1 %v267_v2  ;;  %311 = vadd.xlane.f32.xlu0 %v268_v34  ;;  %v123_v7 = vpop.xlane.xlu0 %122  ;;  %v125_v40 = vpop.xlane.xlu1 %124 }
  0xb0   :  { %v171_v42 = vmul.f32 0.03125, %v123_v7  ;;  %v172_v14 = vmul.f32 0.03125, %v125_v40  ;;  %v3181_v15 = vsel %vm222_vm0, %v201_v35, 0.0  ;;  %v3185_v43 = vsel %vm222_vm0, %v202_v36, 0.0  ;;  %2587 = vmatpush3.bf16.msra.mxu1 %v2635_v62  ;;  %2540 = vmatprep.subr.bf16.mxu0 %v2636_v37  ;;  %v2641_v62 = vld [vmem:[%s3861_s4 + $0x30] sm:$0xff]  }
  0xb1   :  { %v270_v46 = vmul.f32 %v3181_v15, %v3181_v15  ;;  %v271_v53 = vmul.f32 %v3185_v43, %v3185_v43  ;;  %2588 = vmatprep.subr.bf16.mxu1 %v2637_v6 }
  0xb2   :  { %v203_v47 = vsub.f32 %v2970_v16, %v171_v42  ;;  %v204_v8 = vsub.f32 %v2975_v17, %v172_v14  ;;  %2541 = vmatpush3.bf16.msra.mxu0 %v2636_v37  ;;  %v2642_v37 = vld [vmem:[%s3860_s3 + $0x38] sm:$0xff]  }
  0xb3   :  { %313 = vadd.xlane.f32.xlu1 %v269_v41  ;;  %315 = vadd.xlane.f32.xlu0 %v270_v46  ;;  %v127_v51 = vpop.xlane.xlu0 %126  ;;  %v129_v52 = vpop.xlane.xlu1 %128 }
  0xb4   :  { %v173_v56 = vmul.f32 0.03125, %v127_v51  ;;  %v174_v16 = vmul.f32 0.03125, %v129_v52  ;;  %v3201_v17 = vsel %vm222_vm0, %v203_v47, 0.0  ;;  %v3205_v57 = vsel %vm222_vm0, %v204_v8, 0.0  ;;  %2589 = vmatpush3.bf16.msra.mxu1 %v2637_v6  ;;  %2542 = vmatprep.subr.bf16.mxu0 %v2638_v9  ;;  %v2643_v6 = vld [vmem:[%s3861_s4 + $0x38] sm:$0xff]  }
  0xb5   :  { %v272_v10 = vmul.f32 %v3201_v17, %v3201_v17  ;;  %v273_v3 = vmul.f32 %v3205_v57, %v3205_v57  ;;  %2590 = vmatprep.subr.bf16.mxu1 %v2639_v50 }
  0xb6   :  { %v205_v11 = vsub.f32 %v2982_v18, %v173_v56  ;;  %v206_v60 = vsub.f32 %v2987_v19, %v174_v16  ;;  %2543 = vmatpush3.bf16.msra.mxu0 %v2638_v9 }
  0xb7   :  { %317 = vadd.xlane.f32.xlu1 %v271_v53  ;;  %319 = vadd.xlane.f32.xlu0 %v272_v10  ;;  %v131_v63 = vpop.xlane.xlu0 %130  ;;  %v133_v2 = vpop.xlane.xlu1 %132 }
  0xb8   :  { %v175_v4 = vmul.f32 0.03125, %v131_v63  ;;  %v176_v18 = vmul.f32 0.03125, %v133_v2  ;;  %v3221_v19 = vsel %vm222_vm0, %v205_v11, 0.0  ;;  %v3225_v5 = vsel %vm222_vm0, %v206_v60, 0.0  ;;  %2591 = vmatpush3.bf16.msra.mxu1 %v2639_v50  ;;  %2544 = vmatprep.subr.bf16.mxu0 %v2640_v61 }
  0xb9   :  { %v274_v34 = vmul.f32 %v3221_v19, %v3221_v19  ;;  %v275_v41 = vmul.f32 %v3225_v5, %v3225_v5  ;;  %2592 = vmatprep.subr.bf16.mxu1 %v2641_v62 }
  0xba   :  { %v207_v35 = vsub.f32 %v2994_v20, %v175_v4  ;;  %v208_v36 = vsub.f32 %v2999_v21, %v176_v18  ;;  %2545 = vmatpush3.bf16.msra.mxu0 %v2640_v61 }
  0xbb   :  { %321 = vadd.xlane.f32.xlu1 %v273_v3  ;;  %323 = vadd.xlane.f32.xlu0 %v274_v34  ;;  %v135_v7 = vpop.xlane.xlu0 %134  ;;  %v137_v40 = vpop.xlane.xlu1 %136 }
  0xbc   :  { %v177_v42 = vmul.f32 0.03125, %v135_v7  ;;  %v178_v20 = vmul.f32 0.03125, %v137_v40  ;;  %v3241_v21 = vsel %vm222_vm0, %v207_v35, 0.0  ;;  %v3245_v14 = vsel %vm222_vm0, %v208_v36, 0.0  ;;  %2593 = vmatpush3.bf16.msra.mxu1 %v2641_v62  ;;  %2546 = vmatprep.subr.bf16.mxu0 %v2642_v37 }
  0xbd   :  { %v276_v46 = vmul.f32 %v3241_v21, %v3241_v21  ;;  %v277_v53 = vmul.f32 %v3245_v14, %v3245_v14  ;;  %2594 = vmatprep.subr.bf16.mxu1 %v2643_v6 }
  0xbe   :  { %v209_v47 = vsub.f32 %v3006_v22, %v177_v42  ;;  %v210_v8 = vsub.f32 %v3011_v23, %v178_v20  ;;  %2547 = vmatpush3.bf16.msra.mxu0 %v2642_v37 }
  0xbf   :  { %325 = vadd.xlane.f32.xlu1 %v275_v41  ;;  %327 = vadd.xlane.f32.xlu0 %v276_v46  ;;  %v139_v51 = vpop.xlane.xlu0 %138  ;;  %v141_v52 = vpop.xlane.xlu1 %140 }
  0xc0   :  { %v179_v56 = vmul.f32 0.03125, %v139_v51  ;;  %v180_v22 = vmul.f32 0.03125, %v141_v52  ;;  %v3261_v23 = vsel %vm222_vm0, %v209_v47, 0.0  ;;  %v3265_v16 = vsel %vm222_vm0, %v210_v8, 0.0  ;;  %2595 = vmatpush3.bf16.msra.mxu1 %v2643_v6 }
  0xc1   :  { %v278_v10 = vmul.f32 %v3261_v23, %v3261_v23  ;;  %v279_v3 = vmul.f32 %v3265_v16, %v3265_v16 }
  0xc2   :  { %v211_v11 = vsub.f32 %v3018_v24, %v179_v56  ;;  %v212_v60 = vsub.f32 %v3023_v25, %v180_v22 }
  0xc3   :  { %329 = vadd.xlane.f32.xlu1 %v277_v53  ;;  %331 = vadd.xlane.f32.xlu0 %v278_v10  ;;  %v143_v63 = vpop.xlane.xlu0 %142  ;;  %v145_v2 = vpop.xlane.xlu1 %144 }
  0xc4   :  { %v181_v4 = vmul.f32 0.03125, %v143_v63  ;;  %v182_v24 = vmul.f32 0.03125, %v145_v2  ;;  %v3281_v25 = vsel %vm222_vm0, %v211_v11, 0.0  ;;  %v3285_v18 = vsel %vm222_vm0, %v212_v60, 0.0 }
  0xc5   :  { %v280_v34 = vmul.f32 %v3281_v25, %v3281_v25  ;;  %v281_v41 = vmul.f32 %v3285_v18, %v3285_v18 }
  0xc6   :  { %v213_v35 = vsub.f32 %v3030_v26, %v181_v4  ;;  %v214_v36 = vsub.f32 %v3035_v27, %v182_v24 }
  0xc7   :  { %333 = vadd.xlane.f32.xlu1 %v279_v3  ;;  %335 = vadd.xlane.f32.xlu0 %v280_v34  ;;  %v147_v7 = vpop.xlane.xlu0 %146  ;;  %v149_v40 = vpop.xlane.xlu1 %148 }
  0xc8   :  { %v183_v42 = vmul.f32 0.03125, %v147_v7  ;;  %v184_v26 = vmul.f32 0.03125, %v149_v40  ;;  %v3301_v27 = vsel %vm222_vm0, %v213_v35, 0.0  ;;  %v3305_v20 = vsel %vm222_vm0, %v214_v36, 0.0 }
  0xc9   :  { %v282_v46 = vmul.f32 %v3301_v27, %v3301_v27  ;;  %v283_v51 = vmul.f32 %v3305_v20, %v3305_v20 }
  0xca   :  { %v215_v47 = vsub.f32 %v3042_v28, %v183_v42  ;;  %v216_v8 = vsub.f32 %v3047_v29, %v184_v26  ;;  %v59_v42 = vld [vmem:[%s3862_s1] sm:$0x3] }
  0xcb   :  { %337 = vadd.xlane.f32.xlu1 %v281_v41  ;;  %339 = vadd.xlane.f32.xlu0 %v282_v46  ;;  %v151_v9 = vpop.xlane.xlu0 %150  ;;  %v153_v50 = vpop.xlane.xlu1 %152  ;;  %v483_v41 = vsub.s32 0, %v3340_v33 }
  0xcc   :  { %v185_v52 = vmul.f32 0.03125, %v151_v9  ;;  %v186_v53 = vmul.f32 0.03125, %v153_v50  ;;  %v3315_v56 = vsel %vm222_vm0, %v215_v47, 0.0  ;;  %v3319_v22 = vsel %vm222_vm0, %v216_v8, 0.0 }
  0xcd   :  { %v284_v28 = vmul.f32 %v3315_v56, %v3315_v56  ;;  %v285_v11 = vmul.f32 %v3319_v22, %v3319_v22  ;;  %v519_v47 = vsub.s32 1, %v3340_v33 }
  0xce   :  { %v217_v29 = vsub.f32 %v3054_v30, %v185_v52  ;;  %v218_v10 = vsub.f32 %v3059_v31, %v186_v53 }
  0xcf   :  { %341 = vadd.xlane.f32.xlu1 %v283_v51  ;;  %343 = vadd.xlane.f32.xlu0 %v284_v28  ;;  %v3347_v51 = vrot.slane %v59_v42, %v483_v41 }
  0xd0   :  { %v3329_v60 = vsel %vm222_vm0, %v217_v29, 0.0  ;;  %v3333_v61 = vsel %vm222_vm0, %v218_v10, 0.0  ;;  %v3349_v29 = vrot.slane %v59_v42, %v519_v47 }
  0xd1   :  { %v286_v62 = vmul.f32 %v3329_v60, %v3329_v60  ;;  %v287_v30 = vmul.f32 %v3333_v61, %v3333_v61 }
  0xd3   :  { %345 = vadd.xlane.f32.xlu1 %v285_v11  ;;  %347 = vadd.xlane.f32.xlu0 %v286_v62 }
  0xd7   :  { %349 = vadd.xlane.f32.xlu1 %v287_v30  ;;  %v842_v30 = vld [vmem:[%s3863_s2] sm:$0x3] }
 0x124   :  { %v290_v31 = vpop.xlane.xlu0 %289 }
 0x125   :  { %v353_v63 = vmul.f32 0.03125, %v290_v31 }
 0x127   :  { %v385_v2 = vadd.f32 1e-05, %v353_v63 }
 0x128   :  { %v352_v3 = vpop.xlane.xlu1 %351  ;;  %v292_v4 = vpop.xlane.xlu0 %291 }
 0x129   :  { %2644 = vrsqrt.f32 %v385_v2  ;;  %v384_v24 = vmul.f32 0.03125, %v352_v3  ;;  %v354_v34 = vmul.f32 0.03125, %v292_v4  ;;  %v879_v2 = vsub.f32 1.0, %v842_v30 }
 0x12b   :  { %v416_v35 = vadd.f32 1e-05, %v384_v24  ;;  %v386_v36 = vadd.f32 1e-05, %v354_v34 }
 0x12c   :  { %v294_v37 = vpop.xlane.xlu1 %293  ;;  %v296_v6 = vpop.xlane.xlu0 %295 }
 0x12d   :  { %2646 = vrsqrt.f32 %v416_v35  ;;  %v355_v7 = vmul.f32 0.03125, %v294_v37  ;;  %v356_v40 = vmul.f32 0.03125, %v296_v6 }
 0x12e   :  { %2648 = vrsqrt.f32 %v386_v36  ;;  %v3357_v36 = vrot.slane %v842_v30, %v483_v41 }
 0x12f   :  { %v387_v26 = vadd.f32 1e-05, %v355_v7  ;;  %v388_v46 = vadd.f32 1e-05, %v356_v40 }
 0x130   :  { %v298_v32 = vpop.xlane.xlu1 %297  ;;  %v300_v8 = vpop.xlane.xlu0 %299 }
 0x131   :  { %2650 = vrsqrt.f32 %v387_v26  ;;  %v357_v9 = vmul.f32 0.03125, %v298_v32  ;;  %v358_v50 = vmul.f32 0.03125, %v300_v8  ;;  %v3364_v32 = vrot.slane %v842_v30, %v519_v47 }
 0x132   :  { %2652 = vrsqrt.f32 %v388_v46  ;;  %v3362_v46 = vrot.slane %v879_v2, %v483_v41 }
 0x133   :  { %v2645_v52 = vpop.eup %2644  ;;  %v389_v53 = vadd.f32 1e-05, %v357_v9  ;;  %v390_v28 = vadd.f32 1e-05, %v358_v50  ;;  %v3367_v50 = vrot.slane %v879_v2, %v519_v47 }
 0x134   :  { %v302_v10 = vpop.xlane.xlu1 %301  ;;  %v304_v11 = vpop.xlane.xlu0 %303  ;;  %v449_v62 = vmul.f32 %v2645_v52, %v3071_v44 }
 0x135   :  { %2654 = vrsqrt.f32 %v389_v53  ;;  %v359_v31 = vmul.f32 0.03125, %v302_v10  ;;  %v360_v63 = vmul.f32 0.03125, %v304_v11 }
 0x136   :  { %2656 = vrsqrt.f32 %v390_v28  ;;  %v485_v3 = vmul.f32 %v3347_v51, %v449_v62 }
 0x137   :  { %v2647_v4 = vpop.eup %2646  ;;  %v391_v24 = vadd.f32 1e-05, %v359_v31  ;;  %v392_v34 = vadd.f32 1e-05, %v360_v63 }
 0x138   :  { %v2649_v35 = vpop.eup %2648  ;;  %v480_v44 = vmul.f32 %v2647_v4, %v3085_v54  ;;  %v306_v37 = vpop.xlane.xlu1 %305  ;;  %v521_v7 = vadd.f32 %v3349_v29, %v485_v3 }
 0x139   :  { %v308_v6 = vpop.xlane.xlu0 %307  ;;  %2658 = vrsqrt.f32 %v391_v24  ;;  %v361_v40 = vmul.f32 0.03125, %v306_v37  ;;  %v450_v26 = vmul.f32 %v2649_v35, %v3075_v45 }
 0x13a   :  { %v362_v42 = vmul.f32 0.03125, %v308_v6  ;;  %v516_v8 = vmul.f32 %v3347_v51, %v480_v44  ;;  %2660 = vrsqrt.f32 %v392_v34  ;;  %v586_v41 = vrot.slane %v521_v7, 6 }
 0x13b   :  { %v2651_v9 = vpop.eup %2650  ;;  %v393_v54 = vadd.f32 1e-05, %v361_v40  ;;  %v486_v53 = vmul.f32 %v3347_v51, %v450_v26  ;;  %v847_v30 = vmul.f32 %v3357_v36, %v521_v7 }
 0x13c   :  { %v394_v52 = vadd.f32 1e-05, %v362_v42  ;;  %v2653_v28 = vpop.eup %2652  ;;  %v451_v10 = vmul.f32 %v2651_v9, %v3089_v55  ;;  %v310_v11 = vpop.xlane.xlu1 %309  ;;  %v3372_v45 = vadd.f32 %v3349_v29, %v516_v8  ;;  %v952_v55 = vmul.f32 %v3364_v32, %v521_v7 }
 0x13d   :  { %v312_v62 = vpop.xlane.xlu0 %311  ;;  %v452_v31 = vmul.f32 %v2653_v28, %v3099_v0  ;;  %2662 = vrsqrt.f32 %v393_v54  ;;  %v363_v47 = vmul.f32 0.03125, %v310_v11  ;;  %v3377_v2 = vadd.f32 %v3349_v29, %v486_v53 }
 0x13e   :  { %v364_v63 = vmul.f32 0.03125, %v312_v62  ;;  %2664 = vrsqrt.f32 %v394_v52  ;;  %v3866_v3 = vrot.slane %v3372_v45, 6  ;;  %v487_v35 = vmul.f32 %v3347_v51, %v451_v10 }
 0x13f   :  { %v2655_v4 = vpop.eup %2654  ;;  %v395_v24 = vadd.f32 1e-05, %v363_v47  ;;  %v488_v44 = vmul.f32 %v3347_v51, %v452_v31  ;;  %v587_v42 = vrot.slane %v3377_v2, 6  ;;  %v848_v26 = vmul.f32 %v3357_v36, %v3377_v2 }
 0x140   :  { %v396_v34 = vadd.f32 1e-05, %v364_v63  ;;  %v2657_v37 = vpop.eup %2656  ;;  %v3384_v0 = vmul.f32 %v2655_v4, %v3103_v1  ;;  %v314_v6 = vpop.xlane.xlu1 %313  ;;  %v650_v7 = vsel %vm618_vm1, %v3866_v3, %v586_v41  ;;  %v953_v53 = vmul.f32 %v3364_v32, %v3377_v2 }
 0x141   :  { %v316_v40 = vpop.xlane.xlu0 %315  ;;  %v3394_v8 = vmul.f32 %v2657_v37, %v3113_v38  ;;  %2666 = vrsqrt.f32 %v395_v24  ;;  %v365_v9 = vmul.f32 0.03125, %v314_v6  ;;  %v649_v1 = vsel %vm618_vm1, %v586_v41, %v587_v42 }
 0x142   :  { %v366_v54 = vmul.f32 0.03125, %v316_v40  ;;  %2668 = vrsqrt.f32 %v396_v34  ;;  %v778_v52 = vsel %vm618_vm1, 0.0, %v650_v7  ;;  %v885_v38 = vmul.f32 %v3362_v46, %v649_v1 }
 0x143   :  { %v2659_v28 = vpop.eup %2658  ;;  %v397_v10 = vadd.f32 1e-05, %v365_v9  ;;  %v884_v62 = vmul.f32 %v3362_v46, %v778_v52  ;;  %v988_v41 = vmul.f32 %v3367_v50, %v778_v52  ;;  %v989_v24 = vmul.f32 %v3367_v50, %v649_v1 }
 0x144   :  { %v398_v11 = vadd.f32 1e-05, %v366_v54  ;;  %v2661_v31 = vpop.eup %2660  ;;  %v3405_v47 = vmul.f32 %v2659_v28, %v3117_v39  ;;  %v318_v63 = vpop.xlane.xlu1 %317  ;;  %v523_v34 = vadd.f32 %v3349_v29, %v487_v35  ;;  %v917_v7 = vadd.f32 %v885_v38, %v848_v26 }
 0x145   :  { %v320_v4 = vpop.xlane.xlu0 %319  ;;  %v3411_v2 = vmul.f32 %v2661_v31, %v3127_v48  ;;  %2670 = vrsqrt.f32 %v397_v10  ;;  %v367_v37 = vmul.f32 0.03125, %v318_v63  ;;  %v916_v40 = vadd.f32 %v884_v62, %v847_v30 }
 0x146   :  { %v368_v6 = vmul.f32 0.03125, %v320_v4  ;;  %2672 = vrsqrt.f32 %v398_v11  ;;  %v1020_v9 = vadd.f32 %v988_v41, %v952_v55  ;;  %v1021_v3 = vadd.f32 %v989_v24, %v953_v53 }
 0x147   :  { %v2663_v39 = vpop.eup %2662  ;;  %v399_v54 = vadd.f32 1e-05, %v367_v37  ;;  %v3414_v52 = vadd.f32 %v3349_v29, %v488_v44  ;;  %v1052_v31 = vpack.c.bf16 %v917_v7, %v916_v40  ;;  %v588_v63 = vrot.slane %v523_v34, 6 }
 0x148   :  { %v400_v28 = vadd.f32 1e-05, %v368_v6  ;;  %v2665_v1 = vpop.eup %2664  ;;  %v3417_v35 = vmul.f32 %v2663_v39, %v3131_v49  ;;  %v322_v48 = vpop.xlane.xlu1 %321  ;;  %v849_v11 = vmul.f32 %v3357_v36, %v523_v34  ;;  %v1517_v26 = vpack.c.bf16 %v1021_v3, %v1020_v9 }
 0x149   :  { %v324_v10 = vpop.xlane.xlu0 %323  ;;  %v3421_v30 = vmul.f32 %v2665_v1, %v3141_v58  ;;  %2674 = vrsqrt.f32 %v399_v54  ;;  %v369_v55 = vmul.f32 0.03125, %v322_v48  ;;  %2548 = vmatprep.mubr.bf16.mxu0 %v1052_v31  ;;  %v589_v53 = vrot.slane %v3414_v52, 6 }
 0x14a   :  { %2676 = vrsqrt.f32 %v400_v28  ;;  %v370_v44 = vmul.f32 0.03125, %v324_v10  ;;  %v648_v49 = vsel %vm618_vm1, %v587_v42, %v588_v63  ;;  %2596 = vmatprep.mubr.bf16.mxu1 %v1517_v26  ;;  %v850_v4 = vmul.f32 %v3357_v36, %v3414_v52 }
 0x14b   :  { %v2667_v62 = vpop.eup %2666  ;;  %v401_v38 = vadd.f32 1e-05, %v369_v55  ;;  %v886_v58 = vmul.f32 %v3362_v46, %v648_v49  ;;  %v954_v41 = vmul.f32 %v3364_v32, %v523_v34  ;;  %v647_v6 = vsel %vm618_vm1, %v588_v63, %v589_v53 }
 0x14c   :  { %v2669_v24 = vpop.eup %2668  ;;  %v3431_v3 = vmul.f32 %v2667_v62, %v3145_v59  ;;  %v402_v37 = vadd.f32 1e-05, %v370_v44  ;;  %v955_v42 = vmul.f32 %v3364_v32, %v3414_v52  ;;  %v326_v40 = vpop.xlane.xlu1 %325  ;;  %v887_v39 = vmul.f32 %v3362_v46, %v647_v6 }
 0x14d   :  { %v328_v7 = vpop.xlane.xlu0 %327  ;;  %v3438_v9 = vmul.f32 %v2669_v24, %v3161_v12  ;;  %2678 = vrsqrt.f32 %v401_v38  ;;  %v918_v34 = vadd.f32 %v886_v58, %v849_v11  ;;  %v990_v59 = vmul.f32 %v3367_v50, %v648_v49 }
 0x14e   :  { %2680 = vrsqrt.f32 %v402_v37  ;;  %v991_v54 = vmul.f32 %v3367_v50, %v647_v6  ;;  %v371_v28 = vmul.f32 0.03125, %v326_v40  ;;  %v919_v48 = vadd.f32 %v887_v39, %v850_v4 }
 0x14f   :  { %v2671_v1 = vpop.eup %2670  ;;  %v372_v31 = vmul.f32 0.03125, %v328_v7  ;;  %v489_v52 = vmul.f32 %v3347_v51, %v3384_v0  ;;  %v490_v12 = vmul.f32 %v3347_v51, %v3394_v8  ;;  %v1022_v11 = vadd.f32 %v990_v59, %v954_v41 }
 0x150   :  { %v2673_v10 = vpop.eup %2672  ;;  %v3448_v63 = vmul.f32 %v2671_v1, %v3165_v13  ;;  %v1023_v55 = vadd.f32 %v991_v54, %v955_v42  ;;  %v403_v26 = vadd.f32 1e-05, %v371_v28  ;;  %v330_v44 = vpop.xlane.xlu1 %329  ;;  %v1053_v62 = vpack.c.bf16 %v919_v48, %v918_v34 }
 0x151   :  { %v3451_v49 = vmul.f32 %v2673_v10, %v3181_v15  ;;  %v404_v38 = vadd.f32 1e-05, %v372_v31  ;;  %v525_v4 = vadd.f32 %v3349_v29, %v489_v52  ;;  %v332_v58 = vpop.xlane.xlu0 %331  ;;  %v3455_v8 = vadd.f32 %v3349_v29, %v490_v12 }
 0x152   :  { %v1518_v0 = vpack.c.bf16 %v1023_v55, %v1022_v11  ;;  %2682 = vrsqrt.f32 %v403_v26  ;;  %v373_v24 = vmul.f32 0.03125, %v330_v44  ;;  %2549 = vmatmul.mubr.bf16.vlgmr.msra.gmra.mrb[0].mxu0 %v1053_v62  ;;  %v374_v28 = vmul.f32 0.03125, %v332_v58 }
 0x153   :  { %v2675_v13 = vpop.eup %2674  ;;  %2684 = vrsqrt.f32 %v404_v38  ;;  %v590_v41 = vrot.slane %v525_v4, 6  ;;  %v851_v37 = vmul.f32 %v3357_v36, %v525_v4  ;;  %v956_v15 = vmul.f32 %v3364_v32, %v525_v4 }
 0x154   :  { %v2677_v6 = vpop.eup %2676  ;;  %v3460_v42 = vmul.f32 %v2675_v13, %v3185_v43  ;;  %2597 = vmatmul.mubr.bf16.vlgmr.msra.gmra.mrb[0].mxu1 %v1518_v0  ;;  %v591_v40 = vrot.slane %v3455_v8, 6  ;;  %v852_v7 = vmul.f32 %v3357_v36, %v3455_v8  ;;  %v957_v39 = vmul.f32 %v3364_v32, %v3455_v8 }
 0x155   :  { %v3468_v34 = vmul.f32 %v2677_v6, %v3201_v17  ;;  %v646_v59 = vsel %vm618_vm1, %v589_v53, %v590_v41  ;;  %v405_v54 = vadd.f32 1e-05, %v373_v24  ;;  %v491_v31 = vmul.f32 %v3347_v51, %v3405_v47  ;;  %v334_v53 = vpop.xlane.xlu1 %333  ;;  %v336_v11 = vpop.xlane.xlu0 %335 }
 0x156   :  { %v645_v43 = vsel %vm618_vm1, %v590_v41, %v591_v40  ;;  %v888_v1 = vmul.f32 %v3362_v46, %v646_v59  ;;  %v992_v48 = vmul.f32 %v3367_v50, %v646_v59  ;;  %v406_v10 = vadd.f32 1e-05, %v374_v28 }
 0x157   :  { %v2679_v52 = vpop.eup %2678  ;;  %v889_v12 = vmul.f32 %v3362_v46, %v645_v43  ;;  %v993_v17 = vmul.f32 %v3367_v50, %v645_v43  ;;  %2686 = vrsqrt.f32 %v405_v54  ;;  %v492_v38 = vmul.f32 %v3347_v51, %v3411_v2 }
 0x158   :  { %v2681_v55 = vpop.eup %2680  ;;  %v3481_v26 = vmul.f32 %v2679_v52, %v3205_v57  ;;  %v920_v44 = vadd.f32 %v888_v1, %v851_v37  ;;  %v1024_v62 = vadd.f32 %v992_v48, %v956_v15  ;;  %2688 = vrsqrt.f32 %v406_v10 }
 0x159   :  { %v3486_v47 = vmul.f32 %v2681_v55, %v3221_v19  ;;  %v921_v4 = vadd.f32 %v889_v12, %v852_v7  ;;  %v1025_v58 = vadd.f32 %v993_v17, %v957_v39  ;;  %v527_v0 = vadd.f32 %v3349_v29, %v491_v31  ;;  %v338_v1 = vpop.xlane.xlu1 %337  ;;  %v340_v55 = vpop.xlane.xlu0 %339 }
 0x15a   :  { %v528_v8 = vadd.f32 %v3349_v29, %v492_v38  ;;  %v375_v24 = vmul.f32 0.03125, %v334_v53  ;;  %v376_v13 = vmul.f32 0.03125, %v336_v11  ;;  %v493_v37 = vmul.f32 %v3347_v51, %v3417_v35 }
 0x15b   :  { %v1054_v41 = vpack.c.bf16 %v921_v4, %v920_v44  ;;  %v1519_v57 = vpack.c.bf16 %v1025_v58, %v1024_v62  ;;  %v494_v2 = vmul.f32 %v3347_v51, %v3421_v30  ;;  %v592_v19 = vrot.slane %v527_v0, 6 }
 0x15c   :  { %v2683_v15 = vpop.eup %2682  ;;  %v593_v6 = vrot.slane %v528_v8, 6  ;;  %v853_v7 = vmul.f32 %v3357_v36, %v527_v0  ;;  %v854_v39 = vmul.f32 %v3357_v36, %v528_v8  ;;  %v958_v28 = vmul.f32 %v3364_v32, %v527_v0 }
 0x15d   :  { %v2685_v59 = vpop.eup %2684  ;;  %v3497_v54 = vmul.f32 %v2683_v15, %v3225_v5  ;;  %2552 = vmatprep.mubr.bf16.mxu0 %v1054_v41  ;;  %2600 = vmatprep.mubr.bf16.mxu1 %v1519_v57  ;;  %v959_v35 = vmul.f32 %v3364_v32, %v528_v8  ;;  %v407_v43 = vadd.f32 1e-05, %v375_v24  ;;  %v644_v31 = vsel %vm618_vm1, %v591_v40, %v592_v19 }
 0x15e   :  { %v3502_v30 = vmul.f32 %v2685_v59, %v3241_v21  ;;  %v643_v48 = vsel %vm618_vm1, %v592_v19, %v593_v6  ;;  %v408_v52 = vadd.f32 1e-05, %v376_v13  ;;  %v890_v5 = vmul.f32 %v3362_v46, %v644_v31 }
 0x15f   :  { %v891_v12 = vmul.f32 %v3362_v46, %v643_v48  ;;  %v994_v17 = vmul.f32 %v3367_v50, %v644_v31  ;;  %v995_v10 = vmul.f32 %v3367_v50, %v643_v48  ;;  %2690 = vrsqrt.f32 %v407_v43  ;;  %v344_v48 = vpop.xlane.xlu0 %343 }
 0x160   :  { %v529_v53 = vadd.f32 %v3349_v29, %v493_v37  ;;  %v530_v21 = vadd.f32 %v3349_v29, %v494_v2  ;;  %v377_v11 = vmul.f32 0.03125, %v338_v1  ;;  %v922_v62 = vadd.f32 %v890_v5, %v853_v7 }
 0x161   :  { %v2687_v44 = vpop.eup %2686  ;;  %v923_v38 = vadd.f32 %v891_v12, %v854_v39  ;;  %v1026_v40 = vadd.f32 %v994_v17, %v958_v28  ;;  %v1027_v4 = vadd.f32 %v995_v10, %v959_v35  ;;  %2692 = vrsqrt.f32 %v408_v52 }
 0x162   :  { %v3515_v58 = vmul.f32 %v2687_v44, %v3245_v14  ;;  %v594_v0 = vrot.slane %v529_v53, 6  ;;  %v595_v8 = vrot.slane %v530_v21, 6  ;;  %v2689_v24 = vpop.eup %2688  ;;  %v855_v57 = vmul.f32 %v3357_v36, %v529_v53 }
 0x163   :  { %v1055_v13 = vpack.c.bf16 %v923_v38, %v922_v62  ;;  %v1520_v41 = vpack.c.bf16 %v1027_v4, %v1026_v40  ;;  %v856_v37 = vmul.f32 %v3357_v36, %v530_v21  ;;  %v3520_v2 = vmul.f32 %v2689_v24, %v3261_v23 }
 0x164   :  { %v641_v15 = vsel %vm618_vm1, %v594_v0, %v595_v8  ;;  %v642_v14 = vsel %vm618_vm1, %v593_v6, %v594_v0  ;;  %v960_v19 = vmul.f32 %v3364_v32, %v529_v53  ;;  %v961_v59 = vmul.f32 %v3364_v32, %v530_v21  ;;  %v342_v6 = vpop.xlane.xlu1 %341 }
 0x165   :  { %2553 = vmatmul.mubr.bf16.gmra.mrb[4].mxu0 %v1055_v13  ;;  %2601 = vmatmul.mubr.bf16.gmra.mrb[4].mxu1 %v1520_v41  ;;  %v892_v7 = vmul.f32 %v3362_v46, %v642_v14  ;;  %v893_v39 = vmul.f32 %v3362_v46, %v641_v15  ;;  %v409_v28 = vadd.f32 1e-05, %v377_v11  ;;  %v996_v23 = vmul.f32 %v3367_v50, %v642_v14 }
 0x166   :  { %v997_v35 = vmul.f32 %v3367_v50, %v641_v15  ;;  %v378_v43 = vmul.f32 0.03125, %v340_v55  ;;  %v495_v1 = vmul.f32 %v3347_v51, %v3431_v3  ;;  %v496_v5 = vmul.f32 %v3347_v51, %v3438_v9 }
 0x167   :  { %v924_v31 = vadd.f32 %v892_v7, %v855_v57  ;;  %v925_v52 = vadd.f32 %v893_v39, %v856_v37  ;;  %2694 = vrsqrt.f32 %v409_v28  ;;  %v1028_v12 = vadd.f32 %v996_v23, %v960_v19  ;;  %v348_v23 = vpop.xlane.xlu0 %347 }
 0x168   :  { %v1029_v17 = vadd.f32 %v997_v35, %v961_v59  ;;  %v410_v10 = vadd.f32 1e-05, %v378_v43  ;;  %v531_v53 = vadd.f32 %v3349_v29, %v495_v1  ;;  %v532_v11 = vadd.f32 %v3349_v29, %v496_v5  ;;  %v346_v39 = vpop.xlane.xlu1 %345 }
 0x169   :  { %v1056_v21 = vpack.c.bf16 %v925_v52, %v924_v31  ;;  %v379_v55 = vmul.f32 0.03125, %v342_v6  ;;  %v380_v44 = vmul.f32 0.03125, %v344_v48  ;;  %v2691_v62 = vpop.eup %2690  ;;  %v498_v43 = vmul.f32 %v3347_v51, %v3451_v49 }
 0x16a   :  { %v1521_v3 = vpack.c.bf16 %v1029_v17, %v1028_v12  ;;  %2696 = vrsqrt.f32 %v410_v10  ;;  %v596_v38 = vrot.slane %v531_v53, 6  ;;  %v857_v40 = vmul.f32 %v3357_v36, %v531_v53 }
 0x16b   :  { %v3540_v4 = vmul.f32 %v2691_v62, %v3265_v16  ;;  %2556 = vmatprep.mubr.bf16.mxu0 %v1056_v21  ;;  %v597_v9 = vrot.slane %v532_v11, 6  ;;  %v858_v0 = vmul.f32 %v3357_v36, %v532_v11  ;;  %v962_v24 = vmul.f32 %v3364_v32, %v531_v53  ;;  %v2693_v13 = vpop.eup %2692 }
 0x16c   :  { %2604 = vmatprep.mubr.bf16.mxu1 %v1521_v3  ;;  %v640_v41 = vsel %vm618_vm1, %v595_v8, %v596_v38  ;;  %v963_v57 = vmul.f32 %v3364_v32, %v532_v11  ;;  %v411_v37 = vadd.f32 1e-05, %v379_v55  ;;  %v412_v15 = vadd.f32 1e-05, %v380_v44 }
 0x16d   :  { %v3548_v14 = vmul.f32 %v2693_v13, %v3281_v25  ;;  %v639_v16 = vsel %vm618_vm1, %v596_v38, %v597_v9  ;;  %v894_v19 = vmul.f32 %v3362_v46, %v640_v41  ;;  %v998_v7 = vmul.f32 %v3367_v50, %v640_v41 }
 0x16e   :  { %v895_v59 = vmul.f32 %v3362_v46, %v639_v16  ;;  %v999_v28 = vmul.f32 %v3367_v50, %v639_v16  ;;  %2698 = vrsqrt.f32 %v411_v37  ;;  %v497_v8 = vmul.f32 %v3347_v51, %v3448_v63 }
 0x16f   :  { %v926_v35 = vadd.f32 %v894_v19, %v857_v40  ;;  %v1030_v25 = vadd.f32 %v998_v7, %v962_v24  ;;  %2700 = vrsqrt.f32 %v412_v15  ;;  %v381_v31 = vmul.f32 0.03125, %v346_v39 }
 0x170   :  { %v927_v1 = vadd.f32 %v895_v59, %v858_v0  ;;  %v1031_v6 = vadd.f32 %v999_v28, %v963_v57  ;;  %v533_v48 = vadd.f32 %v3349_v29, %v497_v8  ;;  %v534_v5 = vadd.f32 %v3349_v29, %v498_v43  ;;  %v350_v43 = vpop.xlane.xlu1 %349 }
 0x171   :  { %v2695_v52 = vpop.eup %2694  ;;  %v382_v12 = vmul.f32 0.03125, %v348_v23  ;;  %v499_v17 = vmul.f32 %v3347_v51, %v3460_v42  ;;  %v500_v63 = vmul.f32 %v3347_v51, %v3468_v34 }
 0x172   :  { %v3567_v10 = vmul.f32 %v2695_v52, %v3285_v18  ;;  %v1057_v53 = vpack.c.bf16 %v927_v1, %v926_v35  ;;  %v1522_v49 = vpack.c.bf16 %v1031_v6, %v1030_v25  ;;  %v598_v21 = vrot.slane %v533_v48, 6 }
 0x173   :  { %v599_v11 = vrot.slane %v534_v5, 6  ;;  %v859_v55 = vmul.f32 %v3357_v36, %v533_v48  ;;  %v860_v44 = vmul.f32 %v3357_v36, %v534_v5  ;;  %v964_v62 = vmul.f32 %v3364_v32, %v533_v48 }
 0x174   :  { %v2697_v3 = vpop.eup %2696  ;;  %2557 = vmatmul.mubr.bf16.gmra.mrb[8].mxu0 %v1057_v53  ;;  %2605 = vmatmul.mubr.bf16.gmra.mrb[8].mxu1 %v1522_v49  ;;  %v638_v42 = vsel %vm618_vm1, %v597_v9, %v598_v21  ;;  %v965_v34 = vmul.f32 %v3364_v32, %v534_v5  ;;  %v413_v18 = vadd.f32 1e-05, %v381_v31  ;;  %v414_v38 = vadd.f32 1e-05, %v382_v12 }
 0x175   :  { %v3576_v40 = vmul.f32 %v2697_v3, %v3301_v27  ;;  %v637_v0 = vsel %vm618_vm1, %v598_v21, %v599_v11  ;;  %v896_v24 = vmul.f32 %v3362_v46, %v638_v42  ;;  %v1000_v13 = vmul.f32 %v3367_v50, %v638_v42 }
 0x176   :  { %v897_v41 = vmul.f32 %v3362_v46, %v637_v0  ;;  %v1001_v57 = vmul.f32 %v3367_v50, %v637_v0  ;;  %2702 = vrsqrt.f32 %v413_v18  ;;  %v535_v9 = vadd.f32 %v3349_v29, %v499_v17 }
 0x177   :  { %v928_v37 = vadd.f32 %v896_v24, %v859_v55  ;;  %v1032_v15 = vadd.f32 %v1000_v13, %v964_v62  ;;  %2704 = vrsqrt.f32 %v414_v38  ;;  %v536_v27 = vadd.f32 %v3349_v29, %v500_v63 }
 0x178   :  { %v2699_v16 = vpop.eup %2698  ;;  %v929_v19 = vadd.f32 %v897_v41, %v860_v44  ;;  %v1033_v7 = vadd.f32 %v1001_v57, %v965_v34  ;;  %v600_v39 = vrot.slane %v535_v9, 6  ;;  %v861_v59 = vmul.f32 %v3357_v36, %v535_v9 }
 0x179   :  { %v2701_v28 = vpop.eup %2700  ;;  %v3588_v8 = vmul.f32 %v2699_v16, %v3305_v20  ;;  %v601_v23 = vrot.slane %v536_v27, 6  ;;  %v862_v35 = vmul.f32 %v3357_v36, %v536_v27  ;;  %v966_v25 = vmul.f32 %v3364_v32, %v535_v9 }
 0x17a   :  { %v3593_v1 = vmul.f32 %v2701_v28, %v3315_v56  ;;  %v1058_v6 = vpack.c.bf16 %v929_v19, %v928_v37  ;;  %v1523_v48 = vpack.c.bf16 %v1033_v7, %v1032_v15  ;;  %v636_v31 = vsel %vm618_vm1, %v599_v11, %v600_v39 }
 0x17b   :  { %v635_v52 = vsel %vm618_vm1, %v600_v39, %v601_v23  ;;  %v898_v20 = vmul.f32 %v3362_v46, %v636_v31  ;;  %v967_v5 = vmul.f32 %v3364_v32, %v536_v27  ;;  %v1002_v12 = vmul.f32 %v3367_v50, %v636_v31 }
 0x17c   :  { %2560 = vmatprep.mubr.bf16.mxu0 %v1058_v6  ;;  %2608 = vmatprep.mubr.bf16.mxu1 %v1523_v48  ;;  %v899_v17 = vmul.f32 %v3362_v46, %v635_v52  ;;  %v1003_v56 = vmul.f32 %v3367_v50, %v635_v52  ;;  %v383_v63 = vmul.f32 0.03125, %v350_v43  ;;  %v501_v53 = vmul.f32 %v3347_v51, %v3481_v26 }
 0x17d   :  { %v930_v49 = vadd.f32 %v898_v20, %v861_v59  ;;  %v1034_v21 = vadd.f32 %v1002_v12, %v966_v25  ;;  %v502_v11 = vmul.f32 %v3347_v51, %v3486_v47  ;;  %v503_v55 = vmul.f32 %v3347_v51, %v3497_v54 }
 0x17e   :  { %v931_v44 = vadd.f32 %v899_v17, %v862_v35  ;;  %v1035_v62 = vadd.f32 %v1003_v56, %v967_v5  ;;  %v415_v3 = vadd.f32 1e-05, %v383_v63  ;;  %v537_v42 = vadd.f32 %v3349_v29, %v501_v53 }
 0x17f   :  { %v538_v34 = vadd.f32 %v3349_v29, %v502_v11  ;;  %v504_v18 = vmul.f32 %v3347_v51, %v3502_v30  ;;  %v539_v26 = vadd.f32 %v3349_v29, %v503_v55  ;;  %v505_v38 = vmul.f32 %v3347_v51, %v3515_v58 }
 0x180   :  { %v2703_v0 = vpop.eup %2702  ;;  %v1059_v47 = vpack.c.bf16 %v931_v44, %v930_v49  ;;  %v1524_v24 = vpack.c.bf16 %v1035_v62, %v1034_v21  ;;  %2706 = vrsqrt.f32 %v415_v3  ;;  %v602_v54 = vrot.slane %v537_v42, 6 }
 0x181   :  { %v2705_v13 = vpop.eup %2704  ;;  %v3618_v41 = vmul.f32 %v2703_v0, %v3319_v22  ;;  %v603_v57 = vrot.slane %v538_v34, 6  ;;  %v863_v9 = vmul.f32 %v3357_v36, %v537_v42  ;;  %v864_v37 = vmul.f32 %v3357_v36, %v538_v34 }
 0x182   :  { %v478_v30 = vmul.f32 %v2705_v13, %v3329_v60  ;;  %2561 = vmatmul.mubr.bf16.gmra.mrb[12].mxu0 %v1059_v47  ;;  %2609 = vmatmul.mubr.bf16.gmra.mrb[12].mxu1 %v1524_v24  ;;  %v634_v58 = vsel %vm618_vm1, %v601_v23, %v602_v54  ;;  %v968_v15 = vmul.f32 %v3364_v32, %v537_v42  ;;  %v604_v27 = vrot.slane %v539_v26, 6 }
 0x183   :  { %v633_v16 = vsel %vm618_vm1, %v602_v54, %v603_v57  ;;  %v900_v22 = vmul.f32 %v3362_v46, %v634_v58  ;;  %v969_v19 = vmul.f32 %v3364_v32, %v538_v34  ;;  %v1004_v7 = vmul.f32 %v3367_v50, %v634_v58 }
 0x184   :  { %v3632_v39 = vmul.f32 %v3347_v51, %v478_v30  ;;  %v901_v60 = vmul.f32 %v3362_v46, %v633_v16  ;;  %v1005_v59 = vmul.f32 %v3367_v50, %v633_v16  ;;  %v540_v28 = vadd.f32 %v3349_v29, %v504_v18 }
 0x185   :  { %v932_v23 = vadd.f32 %v900_v22, %v863_v9  ;;  %v1036_v35 = vadd.f32 %v1004_v7, %v968_v15  ;;  %v632_v25 = vsel %vm618_vm1, %v603_v57, %v604_v27  ;;  %v865_v43 = vmul.f32 %v3357_v36, %v539_v26 }
 0x186   :  { %v933_v6 = vadd.f32 %v901_v60, %v864_v37  ;;  %v1037_v48 = vadd.f32 %v1005_v59, %v969_v19  ;;  %v605_v31 = vrot.slane %v540_v28, 6  ;;  %v866_v52 = vmul.f32 %v3357_v36, %v540_v28 }
 0x187   :  { %v902_v20 = vmul.f32 %v3362_v46, %v632_v25  ;;  %v970_v5 = vmul.f32 %v3364_v32, %v539_v26  ;;  %v971_v12 = vmul.f32 %v3364_v32, %v540_v28  ;;  %v1006_v17 = vmul.f32 %v3367_v50, %v632_v25 }
 0x188   :  { %v1060_v56 = vpack.c.bf16 %v933_v6, %v932_v23  ;;  %v1525_v63 = vpack.c.bf16 %v1037_v48, %v1036_v35  ;;  %v631_v53 = vsel %vm618_vm1, %v604_v27, %v605_v31  ;;  %v506_v49 = vmul.f32 %v3347_v51, %v3520_v2 }
 0x189   :  { %v903_v21 = vmul.f32 %v3362_v46, %v631_v53  ;;  %v934_v11 = vadd.f32 %v902_v20, %v865_v43  ;;  %v1007_v55 = vmul.f32 %v3367_v50, %v631_v53  ;;  %v1038_v44 = vadd.f32 %v1006_v17, %v970_v5 }
 0x18a   :  { %v2707_v62 = vpop.eup %2706  ;;  %2564 = vmatprep.mubr.bf16.mxu0 %v1060_v56  ;;  %2612 = vmatprep.mubr.bf16.mxu1 %v1525_v63  ;;  %v541_v3 = vadd.f32 %v3349_v29, %v505_v38  ;;  %v542_v42 = vadd.f32 %v3349_v29, %v506_v49  ;;  %v507_v34 = vmul.f32 %v3347_v51, %v3540_v4 }
 0x18b   :  { %v479_v18 = vmul.f32 %v2707_v62, %v3333_v61  ;;  %v935_v26 = vadd.f32 %v903_v21, %v866_v52  ;;  %v1039_v2 = vadd.f32 %v1007_v55, %v971_v12  ;;  %v508_v0 = vmul.f32 %v3347_v51, %v3548_v14 }
 0x18c   :  { %v606_v47 = vrot.slane %v541_v3, 6  ;;  %v607_v24 = vrot.slane %v542_v42, 6  ;;  %v867_v54 = vmul.f32 %v3357_v36, %v541_v3  ;;  %v868_v13 = vmul.f32 %v3357_v36, %v542_v42 }
 0x18d   :  { %v3661_v38 = vmul.f32 %v3347_v51, %v479_v18  ;;  %v1061_v57 = vpack.c.bf16 %v935_v26, %v934_v11  ;;  %v1526_v9 = vpack.c.bf16 %v1039_v2, %v1038_v44  ;;  %v972_v4 = vmul.f32 %v3364_v32, %v541_v3 }
 0x18e   :  { %v629_v61 = vsel %vm618_vm1, %v606_v47, %v607_v24  ;;  %v630_v37 = vsel %vm618_vm1, %v605_v31, %v606_v47  ;;  %v973_v14 = vmul.f32 %v3364_v32, %v542_v42  ;;  %v543_v30 = vadd.f32 %v3349_v29, %v507_v34 }
 0x18f   :  { %2565 = vmatmul.mubr.bf16.gmra.mrb[16].mxu0 %v1061_v57  ;;  %2613 = vmatmul.mubr.bf16.gmra.mrb[16].mxu1 %v1526_v9  ;;  %v904_v58 = vmul.f32 %v3362_v46, %v630_v37  ;;  %v905_v15 = vmul.f32 %v3362_v46, %v629_v61  ;;  %v1008_v27 = vmul.f32 %v3367_v50, %v630_v37 }
 0x190   :  { %v1009_v16 = vmul.f32 %v3367_v50, %v629_v61  ;;  %v544_v22 = vadd.f32 %v3349_v29, %v508_v0  ;;  %v608_v19 = vrot.slane %v543_v30, 6  ;;  %v869_v7 = vmul.f32 %v3357_v36, %v543_v30 }
 0x191   :  { %v936_v60 = vadd.f32 %v904_v58, %v867_v54  ;;  %v937_v59 = vadd.f32 %v905_v15, %v868_v13  ;;  %v1040_v28 = vadd.f32 %v1008_v27, %v972_v4  ;;  %v974_v23 = vmul.f32 %v3364_v32, %v543_v30 }
 0x192   :  { %v1041_v35 = vadd.f32 %v1009_v16, %v973_v14  ;;  %v609_v25 = vrot.slane %v544_v22, 6  ;;  %v628_v43 = vsel %vm618_vm1, %v607_v24, %v608_v19  ;;  %v870_v6 = vmul.f32 %v3357_v36, %v544_v22 }
 0x193   :  { %v1062_v48 = vpack.c.bf16 %v937_v59, %v936_v60  ;;  %v906_v31 = vmul.f32 %v3362_v46, %v628_v43  ;;  %v975_v52 = vmul.f32 %v3364_v32, %v544_v22  ;;  %v1010_v20 = vmul.f32 %v3367_v50, %v628_v43 }
 0x194   :  { %v1527_v5 = vpack.c.bf16 %v1041_v35, %v1040_v28  ;;  %v627_v12 = vsel %vm618_vm1, %v608_v19, %v609_v25  ;;  %v509_v17 = vmul.f32 %v3347_v51, %v3567_v10  ;;  %v510_v56 = vmul.f32 %v3347_v51, %v3576_v40 }
 0x195   :  { %2568 = vmatprep.mubr.bf16.mxu0 %v1062_v48  ;;  %v907_v63 = vmul.f32 %v3362_v46, %v627_v12  ;;  %v938_v53 = vadd.f32 %v906_v31, %v869_v7  ;;  %v1011_v49 = vmul.f32 %v3367_v50, %v627_v12  ;;  %v1042_v21 = vadd.f32 %v1010_v20, %v974_v23 }
 0x196   :  { %2616 = vmatprep.mubr.bf16.mxu1 %v1527_v5  ;;  %v545_v11 = vadd.f32 %v3349_v29, %v509_v17  ;;  %v546_v55 = vadd.f32 %v3349_v29, %v510_v56  ;;  %v511_v44 = vmul.f32 %v3347_v51, %v3588_v8  ;;  %v512_v10 = vmul.f32 %v3347_v51, %v3593_v1 }
 0x197   :  { %v939_v62 = vadd.f32 %v907_v63, %v870_v6  ;;  %v1043_v40 = vadd.f32 %v1011_v49, %v975_v52  ;;  %v513_v3 = vmul.f32 %v3347_v51, %v3618_v41  ;;  %v3701_v42 = vadd.f32 %v3349_v29, %v3632_v39 }
 0x198   :  { %v610_v34 = vrot.slane %v545_v11, 6  ;;  %v611_v18 = vrot.slane %v546_v55, 6  ;;  %v871_v26 = vmul.f32 %v3357_v36, %v545_v11  ;;  %v872_v2 = vmul.f32 %v3357_v36, %v546_v55 }
 0x199   :  { %v1063_v0 = vpack.c.bf16 %v939_v62, %v938_v53  ;;  %v1528_v8 = vpack.c.bf16 %v1043_v40, %v1042_v21  ;;  %v976_v47 = vmul.f32 %v3364_v32, %v545_v11  ;;  %v977_v1 = vmul.f32 %v3364_v32, %v546_v55 }
 0x19a   :  { %v625_v24 = vsel %vm618_vm1, %v610_v34, %v611_v18  ;;  %v626_v51 = vsel %vm618_vm1, %v609_v25, %v610_v34  ;;  %v547_v41 = vadd.f32 %v3349_v29, %v511_v44  ;;  %v548_v39 = vadd.f32 %v3349_v29, %v512_v10 }
 0x19b   :  { %2569 = vmatmul.mubr.bf16.gmra.mrb[20].mxu0 %v1063_v0  ;;  %2617 = vmatmul.mubr.bf16.gmra.mrb[20].mxu1 %v1528_v8  ;;  %v908_v54 = vmul.f32 %v3362_v46, %v626_v51  ;;  %v909_v13 = vmul.f32 %v3362_v46, %v625_v24  ;;  %v1012_v57 = vmul.f32 %v3367_v50, %v626_v51  ;;  %v615_v9 = vrot.slane %v3701_v42, 6 }
 0x19c   :  { %v1013_v4 = vmul.f32 %v3367_v50, %v625_v24  ;;  %v612_v61 = vrot.slane %v547_v41, 6  ;;  %v613_v37 = vrot.slane %v548_v39, 6  ;;  %v873_v14 = vmul.f32 %v3357_v36, %v547_v41 }
 0x19d   :  { %v940_v30 = vadd.f32 %v908_v54, %v871_v26  ;;  %v941_v58 = vadd.f32 %v909_v13, %v872_v2  ;;  %v1044_v15 = vadd.f32 %v1012_v57, %v976_v47  ;;  %v874_v27 = vmul.f32 %v3357_v36, %v548_v39 }
 0x19e   :  { %v1045_v16 = vadd.f32 %v1013_v4, %v977_v1  ;;  %v623_v22 = vsel %vm618_vm1, %v612_v61, %v613_v37  ;;  %v624_v19 = vsel %vm618_vm1, %v611_v18, %v612_v61  ;;  %v978_v7 = vmul.f32 %v3364_v32, %v547_v41 }
 0x19f   :  { %v1064_v60 = vpack.c.bf16 %v941_v58, %v940_v30  ;;  %v910_v59 = vmul.f32 %v3362_v46, %v624_v19  ;;  %v911_v28 = vmul.f32 %v3362_v46, %v623_v22  ;;  %v979_v23 = vmul.f32 %v3364_v32, %v548_v39 }
 0x1a0   :  { %v1529_v35 = vpack.c.bf16 %v1045_v16, %v1044_v15  ;;  %v1014_v25 = vmul.f32 %v3367_v50, %v624_v19  ;;  %v1015_v43 = vmul.f32 %v3367_v50, %v623_v22  ;;  %v549_v6 = vadd.f32 %v3349_v29, %v513_v3 }
 0x1a1   :  { %2572 = vmatprep.mubr.bf16.mxu0 %v1064_v60  ;;  %v942_v48 = vadd.f32 %v910_v59, %v873_v14  ;;  %v943_v31 = vadd.f32 %v911_v28, %v874_v27  ;;  %v876_v12 = vmul.f32 %v3357_v36, %v3701_v42  ;;  %v981_v63 = vmul.f32 %v3364_v32, %v3701_v42 }
 0x1a2   :  { %2620 = vmatprep.mubr.bf16.mxu1 %v1529_v35  ;;  %v1046_v52 = vadd.f32 %v1014_v25, %v978_v7  ;;  %v1047_v20 = vadd.f32 %v1015_v43, %v979_v23  ;;  %v614_v5 = vrot.slane %v549_v6, 6  ;;  %v875_v56 = vmul.f32 %v3357_v36, %v549_v6 }
 0x1a3   :  { %v1065_v17 = vpack.c.bf16 %v943_v31, %v942_v48  ;;  %v551_v53 = vadd.f32 %v3349_v29, %v3661_v38  ;;  %v980_v55 = vmul.f32 %v3364_v32, %v549_v6  ;;  %v3867_v18 = vrot.slane %v3372_v45, 6 }
 0x1a4   :  { %v1530_v49 = vpack.c.bf16 %v1047_v20, %v1046_v52  ;;  %v621_v21 = vsel %vm618_vm1, %v614_v5, %v615_v9  ;;  %v622_v11 = vsel %vm618_vm1, %v613_v37, %v614_v5  ;;  %v878_v8 = vmul.f32 %v3357_v36, %v3372_v45 }
 0x1a5   :  { %2573 = vmatmul.mubr.bf16.gmra.mrb[24].mxu0 %v1065_v17  ;;  %v912_v44 = vmul.f32 %v3362_v46, %v622_v11  ;;  %v913_v10 = vmul.f32 %v3362_v46, %v621_v21  ;;  %v1016_v62 = vmul.f32 %v3367_v50, %v622_v11  ;;  %v1017_v40 = vmul.f32 %v3367_v50, %v621_v21 }
 0x1a6   :  { %2621 = vmatmul.mubr.bf16.gmra.mrb[24].mxu1 %v1530_v49  ;;  %v616_v29 = vrot.slane %v551_v53, 6  ;;  %v877_v0 = vmul.f32 %v3357_v36, %v551_v53  ;;  %v982_v41 = vmul.f32 %v3364_v32, %v551_v53  ;;  %v983_v39 = vmul.f32 %v3364_v32, %v3372_v45 }
 0x1a7   :  { %v944_v38 = vadd.f32 %v912_v44, %v875_v56  ;;  %v945_v3 = vadd.f32 %v913_v10, %v876_v12  ;;  %v1048_v42 = vadd.f32 %v1016_v62, %v980_v55  ;;  %v1049_v34 = vadd.f32 %v1017_v40, %v981_v63 }
 0x1a8   :  { %v619_v26 = vsel %vm618_vm1, %v616_v29, %v3867_v18  ;;  %v620_v2 = vsel %vm618_vm1, %v615_v9, %v616_v29 }
 0x1a9   :  { %v1066_v47 = vpack.c.bf16 %v945_v3, %v944_v38  ;;  %v1531_v1 = vpack.c.bf16 %v1049_v34, %v1048_v42  ;;  %v914_v24 = vmul.f32 %v3362_v46, %v620_v2  ;;  %v915_v51 = vmul.f32 %v3362_v46, %v619_v26 }
 0x1aa   :  { %v1018_v54 = vmul.f32 %v3367_v50, %v620_v2  ;;  %v1019_v33 = vmul.f32 %v3367_v50, %v619_v26 }
 0x1ab   :  { %2576 = vmatprep.mubr.bf16.mxu0 %v1066_v47  ;;  %2624 = vmatprep.mubr.bf16.mxu1 %v1531_v1  ;;  %v946_v13 = vadd.f32 %v914_v24, %v877_v0  ;;  %v947_v57 = vadd.f32 %v915_v51, %v878_v8 }
 0x1ac   :  { %v1050_v36 = vadd.f32 %v1018_v54, %v982_v41  ;;  %v1051_v9 = vadd.f32 %v1019_v33, %v983_v39 }
 0x1ad   :  { %v1067_v4 = vpack.c.bf16 %v947_v57, %v946_v13 }
 0x1ae   :  { %v1532_v61 = vpack.c.bf16 %v1051_v9, %v1050_v36 }
 0x1af   :  { %2577 = vmatmul.mubr.bf16.gmra.mrb[28].mxu0 %v1067_v4 }
 0x1b0   :  { %2625 = vmatmul.mubr.bf16.gmra.mrb[28].mxu1 %v1532_v61 }
 0x225   :  { %v2550_v46 = vpop.f32.mrb[0].mxu0 }
 0x226   :  { %v1295_v37 = vmax.f32 %v2550_v46, 0.0  ;;  %v1166_v30 = vpop.f32.mrb[1].mxu0 }
 0x227   :  { %v2598_v14 = vpop.f32.mrb[0].mxu1  ;;  %v1293_v32 = vmax.f32 %v1166_v30, 0.0  ;;  %v2551_v15 = vpop.f32.mrb[2].mxu0 }
 0x228   :  { %v2168_v58 = vmul.f32 -1.442695, %v2598_v14  ;;  %v1631_v45 = vpop.f32.mrb[1].mxu1  ;;  %v1296_v50 = vmax.f32 %v2551_v15, 0.0  ;;  %v1169_v22 = vpop.f32.mrb[3].mxu0  ;;  %v1327_v59 = vmul.f32 %v1295_v37, %v1295_v37 }
 0x229   :  { %v2166_v27 = vmul.f32 -1.442695, %v1631_v45  ;;  %v2599_v16 = vpop.f32.mrb[2].mxu1  ;;  %v1294_v7 = vmax.f32 %v1169_v22, 0.0  ;;  %v1325_v35 = vmul.f32 %v1293_v32, %v1293_v32 }
 0x22a   :  { %2708 = vpow2.f32 %v2168_v58  ;;  %v2169_v19 = vmul.f32 -1.442695, %v2599_v16  ;;  %v1634_v60 = vpop.f32.mrb[3].mxu1  ;;  %v1328_v28 = vmul.f32 %v1296_v50, %v1296_v50 }
 0x22b   :  { %2710 = vpow2.f32 %v2166_v27  ;;  %v2167_v23 = vmul.f32 -1.442695, %v1634_v60  ;;  %v1326_v25 = vmul.f32 %v1294_v7, %v1294_v7 }
 0x22c   :  { %2712 = vpow2.f32 %v2169_v19  ;;  %v2302_v43 = vpack.c.bf16 %v1328_v28, %v1327_v59 }
 0x22d   :  { %2714 = vpow2.f32 %v2167_v23  ;;  %v2297_v6 = vpack.c.bf16 %v1326_v25, %v1325_v35 }
 0x22e   :  { %2454 = vst [vmem:[%s3864_s5 + $0x8] sm:$0xff] %v2302_v43  }
 0x22f   :  { %2298 = vst [vmem:[%s3864_s5] sm:$0xff] %v2297_v6  }
 0x234   :  { %v2709_v48 = vpop.eup %2708 }
 0x235   :  { %v2711_v31 = vpop.eup %2710  ;;  %v1856_v52 = vadd.f32 1.0, %v2709_v48 }
 0x236   :  { %v2713_v20 = vpop.eup %2712  ;;  %v1854_v5 = vadd.f32 1.0, %v2711_v31 }
 0x237   :  { %v2715_v12 = vpop.eup %2714  ;;  %2716 = vrcp.f32 %v1856_v52  ;;  %v1857_v17 = vadd.f32 1.0, %v2713_v20 }
 0x238   :  { %2718 = vrcp.f32 %v1854_v5  ;;  %v1855_v56 = vadd.f32 1.0, %v2715_v12  ;;  %v2554_v63 = vpop.f32.mrb[4].mxu0  ;;  %v2602_v53 = vpop.f32.mrb[4].mxu1 }
 0x239   :  { %2720 = vrcp.f32 %v1857_v17  ;;  %v1299_v49 = vmax.f32 %v2554_v63, 0.0  ;;  %v2172_v21 = vmul.f32 -1.442695, %v2602_v53  ;;  %v1182_v11 = vpop.f32.mrb[5].mxu0  ;;  %v1647_v55 = vpop.f32.mrb[5].mxu1 }
 0x23a   :  { %2722 = vrcp.f32 %v1855_v56  ;;  %v1297_v44 = vmax.f32 %v1182_v11, 0.0  ;;  %v2170_v10 = vmul.f32 -1.442695, %v1647_v55  ;;  %v2555_v62 = vpop.f32.mrb[6].mxu0  ;;  %v2603_v40 = vpop.f32.mrb[6].mxu1 }
 0x23b   :  { %2724 = vpow2.f32 %v2172_v21  ;;  %v1300_v29 = vmax.f32 %v2555_v62, 0.0  ;;  %v2173_v38 = vmul.f32 -1.442695, %v2603_v40  ;;  %v1185_v3 = vpop.f32.mrb[7].mxu0  ;;  %v1650_v42 = vpop.f32.mrb[7].mxu1  ;;  %v1331_v26 = vmul.f32 %v1299_v49, %v1299_v49 }
 0x23c   :  { %2726 = vpow2.f32 %v2170_v10  ;;  %v1298_v34 = vmax.f32 %v1185_v3, 0.0  ;;  %v2171_v18 = vmul.f32 -1.442695, %v1650_v42  ;;  %v1329_v0 = vmul.f32 %v1297_v44, %v1297_v44 }
 0x23d   :  { %v1332_v2 = vmul.f32 %v1300_v29, %v1300_v29  ;;  %2728 = vpow2.f32 %v2173_v38 }
 0x23e   :  { %v1330_v8 = vmul.f32 %v1298_v34, %v1298_v34  ;;  %2730 = vpow2.f32 %v2171_v18 }
 0x23f   :  { %v2312_v47 = vpack.c.bf16 %v1332_v2, %v1331_v26 }
 0x240   :  { %v2307_v1 = vpack.c.bf16 %v1330_v8, %v1329_v0 }
 0x241   :  { %v2717_v24 = vpop.eup %2716  ;;  %2456 = vst [vmem:[%s3864_s5 + $0x18] sm:$0xff] %v2312_v47  }
 0x242   :  { %v2719_v51 = vpop.eup %2718  ;;  %2455 = vst [vmem:[%s3864_s5 + $0x10] sm:$0xff] %v2307_v1  }
 0x243   :  { %v2721_v41 = vpop.eup %2720 }
 0x244   :  { %v2723_v39 = vpop.eup %2722  ;;  %v2382_v54 = vpack.c.bf16 %v2721_v41, %v2717_v24 }
 0x245   :  { %v2725_v33 = vpop.eup %2724  ;;  %v2377_v13 = vpack.c.bf16 %v2723_v39, %v2719_v51 }
 0x246   :  { %v2727_v57 = vpop.eup %2726  ;;  %2469 = vst [vmem:[%s3865_s6 + $0x8] sm:$0xff] %v2382_v54   ;;  %v1860_v36 = vadd.f32 1.0, %v2725_v33 }
 0x247   :  { %v2729_v9 = vpop.eup %2728  ;;  %2378 = vst [vmem:[%s3865_s6] sm:$0xff] %v2377_v13   ;;  %v1858_v4 = vadd.f32 1.0, %v2727_v57  ;;  %v2558_v61 = vpop.f32.mrb[8].mxu0 }
 0x248   :  { %v2606_v46 = vpop.f32.mrb[8].mxu1  ;;  %v2731_v37 = vpop.eup %2730  ;;  %2732 = vrcp.f32 %v1860_v36  ;;  %v1861_v14 = vadd.f32 1.0, %v2729_v9  ;;  %v1303_v30 = vmax.f32 %v2558_v61, 0.0 }
 0x249   :  { %v2176_v58 = vmul.f32 -1.442695, %v2606_v46  ;;  %v1198_v32 = vpop.f32.mrb[9].mxu0  ;;  %v1663_v45 = vpop.f32.mrb[9].mxu1  ;;  %2734 = vrcp.f32 %v1858_v4  ;;  %v1859_v15 = vadd.f32 1.0, %v2731_v37 }
 0x24a   :  { %v1301_v27 = vmax.f32 %v1198_v32, 0.0  ;;  %v2174_v50 = vmul.f32 -1.442695, %v1663_v45  ;;  %v2559_v16 = vpop.f32.mrb[10].mxu0  ;;  %v2607_v22 = vpop.f32.mrb[10].mxu1  ;;  %2736 = vrcp.f32 %v1861_v14  ;;  %v1335_v35 = vmul.f32 %v1303_v30, %v1303_v30 }
 0x24b   :  { %v1304_v19 = vmax.f32 %v2559_v16, 0.0  ;;  %v2177_v7 = vmul.f32 -1.442695, %v2607_v22  ;;  %v1201_v60 = vpop.f32.mrb[11].mxu0  ;;  %v1666_v59 = vpop.f32.mrb[11].mxu1  ;;  %2738 = vrcp.f32 %v1859_v15 }
 0x24c   :  { %v1302_v28 = vmax.f32 %v1201_v60, 0.0  ;;  %v2175_v23 = vmul.f32 -1.442695, %v1666_v59  ;;  %2740 = vpow2.f32 %v2176_v58  ;;  %v1333_v43 = vmul.f32 %v1301_v27, %v1301_v27 }
 0x24d   :  { %v1336_v25 = vmul.f32 %v1304_v19, %v1304_v19  ;;  %2742 = vpow2.f32 %v2174_v50 }
 0x24e   :  { %v1334_v6 = vmul.f32 %v1302_v28, %v1302_v28  ;;  %2744 = vpow2.f32 %v2177_v7 }
 0x24f   :  { %v2322_v48 = vpack.c.bf16 %v1336_v25, %v1335_v35  ;;  %2746 = vpow2.f32 %v2175_v23 }
 0x250   :  { %v2317_v31 = vpack.c.bf16 %v1334_v6, %v1333_v43 }
 0x251   :  { %2458 = vst [vmem:[%s3864_s5 + $0x28] sm:$0xff] %v2322_v48  }
 0x252   :  { %2457 = vst [vmem:[%s3864_s5 + $0x20] sm:$0xff] %v2317_v31   ;;  %v2733_v52 = vpop.eup %2732 }
 0x253   :  { %v2735_v20 = vpop.eup %2734 }
 0x254   :  { %v2737_v5 = vpop.eup %2736 }
 0x255   :  { %v2739_v12 = vpop.eup %2738  ;;  %v2392_v17 = vpack.c.bf16 %v2737_v5, %v2733_v52  ;;  %v2562_v56 = vpop.f32.mrb[12].mxu0 }
 0x256   :  { %v2610_v63 = vpop.f32.mrb[12].mxu1  ;;  %v2741_v53 = vpop.eup %2740  ;;  %v2387_v49 = vpack.c.bf16 %v2739_v12, %v2735_v20  ;;  %v1307_v21 = vmax.f32 %v2562_v56, 0.0 }
 0x257   :  { %v2180_v11 = vmul.f32 -1.442695, %v2610_v63  ;;  %v1214_v55 = vpop.f32.mrb[13].mxu0  ;;  %v1679_v44 = vpop.f32.mrb[13].mxu1  ;;  %2471 = vst [vmem:[%s3865_s6 + $0x18] sm:$0xff] %v2392_v17   ;;  %v1864_v62 = vadd.f32 1.0, %v2741_v53 }
 0x258   :  { %v2743_v10 = vpop.eup %2742  ;;  %v1305_v40 = vmax.f32 %v1214_v55, 0.0  ;;  %v2563_v29 = vpop.f32.mrb[14].mxu0  ;;  %2470 = vst [vmem:[%s3865_s6 + $0x10] sm:$0xff] %v2387_v49   ;;  %v2178_v34 = vmul.f32 -1.442695, %v1679_v44  ;;  %v1339_v47 = vmul.f32 %v1307_v21, %v1307_v21 }
 0x259   :  { %v2611_v38 = vpop.f32.mrb[14].mxu1  ;;  %v2745_v3 = vpop.eup %2744  ;;  %v1862_v42 = vadd.f32 1.0, %v2743_v10  ;;  %2748 = vpow2.f32 %v2180_v11  ;;  %v1308_v18 = vmax.f32 %v2563_v29, 0.0 }
 0x25a   :  { %v1217_v26 = vpop.f32.mrb[15].mxu0  ;;  %v1682_v2 = vpop.f32.mrb[15].mxu1  ;;  %2750 = vrcp.f32 %v1864_v62  ;;  %v1865_v8 = vadd.f32 1.0, %v2745_v3  ;;  %v2181_v1 = vmul.f32 -1.442695, %v2611_v38  ;;  %v1337_v54 = vmul.f32 %v1305_v40, %v1305_v40 }
 0x25b   :  { %v2747_v0 = vpop.eup %2746  ;;  %2752 = vrcp.f32 %v1862_v42  ;;  %v1340_v51 = vmul.f32 %v1308_v18, %v1308_v18  ;;  %v1306_v41 = vmax.f32 %v1217_v26, 0.0  ;;  %v2179_v39 = vmul.f32 -1.442695, %v1682_v2 }
 0x25c   :  { %v1863_v24 = vadd.f32 1.0, %v2747_v0  ;;  %2754 = vrcp.f32 %v1865_v8 }
 0x25d   :  { %v2332_v33 = vpack.c.bf16 %v1340_v51, %v1339_v47  ;;  %v1338_v13 = vmul.f32 %v1306_v41, %v1306_v41 }
 0x25e   :  { %2756 = vrcp.f32 %v1863_v24 }
 0x25f   :  { %2758 = vpow2.f32 %v2178_v34  ;;  %2460 = vst [vmem:[%s3864_s5 + $0x38] sm:$0xff] %v2332_v33   ;;  %v2327_v57 = vpack.c.bf16 %v1338_v13, %v1337_v54 }
 0x260   :  { %2760 = vpow2.f32 %v2181_v1 }
 0x261   :  { %2762 = vpow2.f32 %v2179_v39  ;;  %2459 = vst [vmem:[%s3864_s5 + $0x30] sm:$0xff] %v2327_v57  }
 0x262   :  { %v2566_v9 = vpop.f32.mrb[16].mxu0  ;;  %v2614_v4 = vpop.f32.mrb[16].mxu1 }
 0x263   :  { %v2749_v36 = vpop.eup %2748  ;;  %v1311_v37 = vmax.f32 %v2566_v9, 0.0  ;;  %v2184_v14 = vmul.f32 -1.442695, %v2614_v4  ;;  %v1230_v30 = vpop.f32.mrb[17].mxu0 }
 0x264   :  { %v2751_v61 = vpop.eup %2750  ;;  %v1868_v46 = vadd.f32 1.0, %v2749_v36  ;;  %v1695_v58 = vpop.f32.mrb[17].mxu1  ;;  %v1309_v45 = vmax.f32 %v1230_v30, 0.0 }
 0x265   :  { %v2753_v32 = vpop.eup %2752  ;;  %v2182_v15 = vmul.f32 -1.442695, %v1695_v58  ;;  %v2567_v27 = vpop.f32.mrb[18].mxu0  ;;  %v1343_v23 = vmul.f32 %v1311_v37, %v1311_v37 }
 0x266   :  { %v2615_v50 = vpop.f32.mrb[18].mxu1  ;;  %v2755_v16 = vpop.eup %2754  ;;  %2764 = vrcp.f32 %v1868_v46  ;;  %v1312_v22 = vmax.f32 %v2567_v27, 0.0  ;;  %v1341_v20 = vmul.f32 %v1309_v45, %v1309_v45 }
 0x267   :  { %v2185_v19 = vmul.f32 -1.442695, %v2615_v50  ;;  %v1233_v7 = vpop.f32.mrb[19].mxu0  ;;  %v1698_v60 = vpop.f32.mrb[19].mxu1  ;;  %v2402_v28 = vpack.c.bf16 %v2755_v16, %v2751_v61  ;;  %2766 = vpow2.f32 %v2184_v14 }
 0x268   :  { %v2757_v59 = vpop.eup %2756  ;;  %v1310_v35 = vmax.f32 %v1233_v7, 0.0  ;;  %2768 = vpow2.f32 %v2182_v15  ;;  %v1344_v6 = vmul.f32 %v1312_v22, %v1312_v22  ;;  %v2183_v48 = vmul.f32 -1.442695, %v1698_v60 }
 0x269   :  { %v2759_v25 = vpop.eup %2758  ;;  %v2397_v43 = vpack.c.bf16 %v2757_v59, %v2753_v32  ;;  %2473 = vst [vmem:[%s3865_s6 + $0x28] sm:$0xff] %v2402_v28   ;;  %2770 = vpow2.f32 %v2185_v19 }
 0x26a   :  { %v2761_v31 = vpop.eup %2760  ;;  %v1866_v52 = vadd.f32 1.0, %v2759_v25  ;;  %v1342_v5 = vmul.f32 %v1310_v35, %v1310_v35  ;;  %v2342_v56 = vpack.c.bf16 %v1344_v6, %v1343_v23  ;;  %2772 = vpow2.f32 %v2183_v48 }
 0x26b   :  { %v2763_v12 = vpop.eup %2762  ;;  %2472 = vst [vmem:[%s3865_s6 + $0x20] sm:$0xff] %v2397_v43   ;;  %v1869_v17 = vadd.f32 1.0, %v2761_v31 }
 0x26c   :  { %2774 = vrcp.f32 %v1866_v52  ;;  %v1867_v63 = vadd.f32 1.0, %v2763_v12  ;;  %v2337_v53 = vpack.c.bf16 %v1342_v5, %v1341_v20  ;;  %2462 = vst [vmem:[%s3864_s5 + $0x48] sm:$0xff] %v2342_v56  }
 0x26d   :  { %2776 = vrcp.f32 %v1869_v17 }
 0x26e   :  { %2778 = vrcp.f32 %v1867_v63  ;;  %2461 = vst [vmem:[%s3864_s5 + $0x40] sm:$0xff] %v2337_v53   ;;  %v2570_v49 = vpop.f32.mrb[20].mxu0  ;;  %v2618_v21 = vpop.f32.mrb[20].mxu1 }
 0x26f   :  { %v1315_v55 = vmax.f32 %v2570_v49, 0.0  ;;  %v2188_v44 = vmul.f32 -1.442695, %v2618_v21  ;;  %v1246_v10 = vpop.f32.mrb[21].mxu0  ;;  %v1711_v62 = vpop.f32.mrb[21].mxu1 }
 0x270   :  { %v2765_v11 = vpop.eup %2764  ;;  %v2186_v29 = vmul.f32 -1.442695, %v1711_v62  ;;  %v2571_v38 = vpop.f32.mrb[22].mxu0  ;;  %v1313_v18 = vmax.f32 %v1246_v10, 0.0 }
 0x271   :  { %v2767_v40 = vpop.eup %2766  ;;  %v2619_v3 = vpop.f32.mrb[22].mxu1  ;;  %2780 = vpow2.f32 %v2188_v44  ;;  %v1316_v26 = vmax.f32 %v2571_v38, 0.0  ;;  %v1347_v1 = vmul.f32 %v1315_v55, %v1315_v55 }
 0x272   :  { %v2769_v42 = vpop.eup %2768  ;;  %v1872_v34 = vadd.f32 1.0, %v2767_v40  ;;  %v1249_v2 = vpop.f32.mrb[23].mxu0  ;;  %2782 = vpow2.f32 %v2186_v29  ;;  %v2189_v24 = vmul.f32 -1.442695, %v2619_v3  ;;  %v1345_v9 = vmul.f32 %v1313_v18, %v1313_v18 }
 0x273   :  { %v1714_v0 = vpop.f32.mrb[23].mxu1  ;;  %v2771_v8 = vpop.eup %2770  ;;  %v1870_v47 = vadd.f32 1.0, %v2769_v42  ;;  %v1348_v39 = vmul.f32 %v1316_v26, %v1316_v26  ;;  %v1314_v54 = vmax.f32 %v1249_v2, 0.0 }
 0x274   :  { %v2773_v51 = vpop.eup %2772  ;;  %2784 = vrcp.f32 %v1872_v34  ;;  %v1873_v41 = vadd.f32 1.0, %v2771_v8  ;;  %v2187_v57 = vmul.f32 -1.442695, %v1714_v0 }
 0x275   :  { %2786 = vrcp.f32 %v1870_v47  ;;  %v1871_v13 = vadd.f32 1.0, %v2773_v51  ;;  %v2352_v4 = vpack.c.bf16 %v1348_v39, %v1347_v1  ;;  %v1346_v61 = vmul.f32 %v1314_v54, %v1314_v54 }
 0x276   :  { %v2775_v33 = vpop.eup %2774  ;;  %2788 = vrcp.f32 %v1873_v41 }
 0x277   :  { %v2777_v36 = vpop.eup %2776  ;;  %2790 = vrcp.f32 %v1871_v13  ;;  %2464 = vst [vmem:[%s3864_s5 + $0x58] sm:$0xff] %v2352_v4   ;;  %v2347_v30 = vpack.c.bf16 %v1346_v61, %v1345_v9 }
 0x278   :  { %v2779_v46 = vpop.eup %2778  ;;  %v2412_v37 = vpack.c.bf16 %v2777_v36, %v2765_v11  ;;  %2792 = vpow2.f32 %v2189_v24  ;;  %v2574_v58 = vpop.f32.mrb[24].mxu0 }
 0x279   :  { %v2407_v14 = vpack.c.bf16 %v2779_v46, %v2775_v33  ;;  %2794 = vpow2.f32 %v2187_v57  ;;  %2463 = vst [vmem:[%s3864_s5 + $0x50] sm:$0xff] %v2347_v30   ;;  %v1319_v32 = vmax.f32 %v2574_v58, 0.0  ;;  %v2622_v45 = vpop.f32.mrb[24].mxu1  ;;  %v1262_v15 = vpop.f32.mrb[25].mxu0 }
 0x27a   :  { %2475 = vst [vmem:[%s3865_s6 + $0x38] sm:$0xff] %v2412_v37   ;;  %v2192_v27 = vmul.f32 -1.442695, %v2622_v45  ;;  %v1727_v50 = vpop.f32.mrb[25].mxu1  ;;  %v2575_v16 = vpop.f32.mrb[26].mxu0  ;;  %v1317_v19 = vmax.f32 %v1262_v15, 0.0 }
 0x27b   :  { %2474 = vst [vmem:[%s3865_s6 + $0x30] sm:$0xff] %v2407_v14   ;;  %v2781_v22 = vpop.eup %2780  ;;  %v2190_v7 = vmul.f32 -1.442695, %v1727_v50  ;;  %v1320_v60 = vmax.f32 %v2575_v16, 0.0  ;;  %v2623_v59 = vpop.f32.mrb[26].mxu1  ;;  %v1351_v6 = vmul.f32 %v1319_v32, %v1319_v32 }
 0x27c   :  { %v1265_v28 = vpop.f32.mrb[27].mxu0  ;;  %v2783_v23 = vpop.eup %2782  ;;  %2796 = vpow2.f32 %v2192_v27  ;;  %v2193_v35 = vmul.f32 -1.442695, %v2623_v59  ;;  %v1876_v20 = vadd.f32 1.0, %v2781_v22  ;;  %v1349_v56 = vmul.f32 %v1317_v19, %v1317_v19 }
 0x27d   :  { %v1730_v25 = vpop.f32.mrb[27].mxu1  ;;  %2798 = vpow2.f32 %v2190_v7  ;;  %v1352_v48 = vmul.f32 %v1320_v60, %v1320_v60  ;;  %v1318_v31 = vmax.f32 %v1265_v28, 0.0  ;;  %v1874_v17 = vadd.f32 1.0, %v2783_v23 }
 0x27e   :  { %v2785_v43 = vpop.eup %2784  ;;  %v2191_v5 = vmul.f32 -1.442695, %v1730_v25  ;;  %2800 = vpow2.f32 %v2193_v35 }
 0x27f   :  { %v2787_v52 = vpop.eup %2786  ;;  %v2362_v63 = vpack.c.bf16 %v1352_v48, %v1351_v6  ;;  %v1350_v53 = vmul.f32 %v1318_v31, %v1318_v31 }
 0x280   :  { %v2789_v12 = vpop.eup %2788  ;;  %2802 = vpow2.f32 %v2191_v5 }
 0x281   :  { %v2791_v49 = vpop.eup %2790  ;;  %v2422_v21 = vpack.c.bf16 %v2789_v12, %v2785_v43  ;;  %2466 = vst [vmem:[%s3864_s5 + $0x68] sm:$0xff] %v2362_v63   ;;  %v2357_v44 = vpack.c.bf16 %v1350_v53, %v1349_v56  ;;  %2804 = vrcp.f32 %v1876_v20 }
 0x282   :  { %v2793_v11 = vpop.eup %2792  ;;  %v2417_v55 = vpack.c.bf16 %v2791_v49, %v2787_v52  ;;  %v2578_v40 = vpop.f32.mrb[28].mxu0  ;;  %2806 = vrcp.f32 %v1874_v17 }
 0x283   :  { %v2795_v10 = vpop.eup %2794  ;;  %2477 = vst [vmem:[%s3865_s6 + $0x48] sm:$0xff] %v2422_v21   ;;  %v1877_v62 = vadd.f32 1.0, %v2793_v11  ;;  %2465 = vst [vmem:[%s3864_s5 + $0x60] sm:$0xff] %v2357_v44   ;;  %v1323_v38 = vmax.f32 %v2578_v40, 0.0  ;;  %v2626_v3 = vpop.f32.mrb[28].mxu1 }
 0x284   :  { %2476 = vst [vmem:[%s3865_s6 + $0x40] sm:$0xff] %v2417_v55   ;;  %v1875_v29 = vadd.f32 1.0, %v2795_v10  ;;  %v1278_v42 = vpop.f32.mrb[29].mxu0  ;;  %v2196_v34 = vmul.f32 -1.442695, %v2626_v3  ;;  %v1743_v26 = vpop.f32.mrb[29].mxu1 }
 0x285   :  { %2808 = vrcp.f32 %v1877_v62  ;;  %v1321_v18 = vmax.f32 %v1278_v42, 0.0  ;;  %v2579_v2 = vpop.f32.mrb[30].mxu0  ;;  %v2194_v0 = vmul.f32 -1.442695, %v1743_v26  ;;  %v2627_v47 = vpop.f32.mrb[30].mxu1  ;;  %v1355_v51 = vmul.f32 %v1323_v38, %v1323_v38 }
 0x286   :  { %2810 = vrcp.f32 %v1875_v29  ;;  %v1324_v8 = vmax.f32 %v2579_v2, 0.0  ;;  %v1281_v1 = vpop.f32.mrb[31].mxu0  ;;  %v2797_v24 = vpop.eup %2796  ;;  %v2197_v41 = vmul.f32 -1.442695, %v2627_v47 }
 0x287   :  { %2812 = vpow2.f32 %v2196_v34  ;;  %v1322_v39 = vmax.f32 %v1281_v1, 0.0  ;;  %v1746_v54 = vpop.f32.mrb[31].mxu1  ;;  %v2799_v33 = vpop.eup %2798  ;;  %v1880_v13 = vadd.f32 1.0, %v2797_v24  ;;  %v1353_v4 = vmul.f32 %v1321_v18, %v1321_v18 }
 0x288   :  { %2814 = vpow2.f32 %v2194_v0  ;;  %v1356_v57 = vmul.f32 %v1324_v8, %v1324_v8  ;;  %v2195_v36 = vmul.f32 -1.442695, %v1746_v54  ;;  %v1878_v9 = vadd.f32 1.0, %v2799_v33  ;;  %v2801_v37 = vpop.eup %2800 }
 0x289   :  { %2816 = vpow2.f32 %v2197_v41  ;;  %v1354_v61 = vmul.f32 %v1322_v39, %v1322_v39  ;;  %v1881_v58 = vadd.f32 1.0, %v2801_v37 }
 0x28a   :  { %v2372_v46 = vpack.c.bf16 %v1356_v57, %v1355_v51  ;;  %2818 = vrcp.f32 %v1880_v13  ;;  %v2803_v30 = vpop.eup %2802 }
 0x28b   :  { %v2367_v14 = vpack.c.bf16 %v1354_v61, %v1353_v4  ;;  %2820 = vpow2.f32 %v2195_v36  ;;  %v2805_v32 = vpop.eup %2804  ;;  %v1879_v45 = vadd.f32 1.0, %v2803_v30 }
 0x28c   :  { %2468 = vst [vmem:[%s3864_s5 + $0x78] sm:$0xff] %v2372_v46   ;;  %2822 = vrcp.f32 %v1878_v9  ;;  %v2807_v15 = vpop.eup %2806 }
 0x28d   :  { %2467 = vst [vmem:[%s3864_s5 + $0x70] sm:$0xff] %v2367_v14   ;;  %2824 = vrcp.f32 %v1881_v58 }
 0x28e   :  { %2826 = vrcp.f32 %v1879_v45 }
 0x28f   :  { %v2809_v27 = vpop.eup %2808 }
 0x290   :  { %v2811_v50 = vpop.eup %2810  ;;  %v2432_v16 = vpack.c.bf16 %v2809_v27, %v2805_v32 }
 0x291   :  { %v2813_v22 = vpop.eup %2812  ;;  %v2427_v19 = vpack.c.bf16 %v2811_v50, %v2807_v15 }
 0x292   :  { %v2815_v7 = vpop.eup %2814  ;;  %2479 = vst [vmem:[%s3865_s6 + $0x58] sm:$0xff] %v2432_v16   ;;  %v1884_v60 = vadd.f32 1.0, %v2813_v22 }
 0x293   :  { %v2817_v59 = vpop.eup %2816  ;;  %2478 = vst [vmem:[%s3865_s6 + $0x50] sm:$0xff] %v2427_v19   ;;  %v1882_v28 = vadd.f32 1.0, %v2815_v7 }
 0x294   :  { %v1885_v23 = vadd.f32 1.0, %v2817_v59  ;;  %v2819_v35 = vpop.eup %2818  ;;  %2828 = vrcp.f32 %v1884_v60 }
 0x295   :  { %v2821_v25 = vpop.eup %2820 }
 0x296   :  { %2830 = vrcp.f32 %v1885_v23  ;;  %v2823_v43 = vpop.eup %2822  ;;  %v1883_v6 = vadd.f32 1.0, %v2821_v25 }
 0x297   :  { %v2825_v48 = vpop.eup %2824  ;;  %2832 = vrcp.f32 %v1882_v28 }
 0x298   :  { %v2827_v31 = vpop.eup %2826  ;;  %v2442_v52 = vpack.c.bf16 %v2825_v48, %v2819_v35  ;;  %2834 = vrcp.f32 %v1883_v6 }
 0x299   :  { %v2437_v20 = vpack.c.bf16 %v2827_v31, %v2823_v43 }
 0x29a   :  { %2481 = vst [vmem:[%s3865_s6 + $0x68] sm:$0xff] %v2442_v52  }
 0x29b   :  { %2480 = vst [vmem:[%s3865_s6 + $0x60] sm:$0xff] %v2437_v20  }
 0x29e   :  { %v2829_v5 = vpop.eup %2828 }
 0x2a0   :  { %v2831_v12 = vpop.eup %2830 }
 0x2a1   :  { %v2452_v17 = vpack.c.bf16 %v2831_v12, %v2829_v5  ;;  %v2833_v56 = vpop.eup %2832 }
 0x2a2   :  { %v2835_v63 = vpop.eup %2834 }
 0x2a3   :  { %2483 = vst [vmem:[%s3865_s6 + $0x78] sm:$0xff] %v2452_v17   ;;  %v2447_v53 = vpack.c.bf16 %v2835_v63, %v2833_v56 }
 0x2a5   :  { %2482 = vst [vmem:[%s3865_s6 + $0x70] sm:$0xff] %v2447_v53  }

</bundles_post_ra>
